<compile_context>
chip_gen: v7x
topology: tpu7x:2x2x1
jax: 0.10.0
libtpu: 0.0.40
codegen_flags: <defaults>
</compile_context>

<pallas_src>
import functools
import math

import jax
import jax.numpy as jnp
import numpy as np
from jax.experimental import pallas as pl
from jax.experimental.pallas import tpu as pltpu

EPS = 1e-5


def _layernorm(x):
    mean = jnp.mean(x, axis=-1, keepdims=True)
    var = jnp.mean((x - mean) ** 2, axis=-1, keepdims=True)
    return (x - mean) * jax.lax.rsqrt(var + EPS)


def transformer_block_kernel(x_ref, wqkv_ref, bqkv_ref, wo_ref, bo_ref,
                             w1_ref, b1_ref, w2_ref, b2_ref,
                             out_ref, q_scr, k_scr, v_scr, *, heads):
    S, D = x_ref.shape[1], x_ref.shape[2]
    TQ = out_ref.shape[1]
    hd = D // heads
    scale = 1.0 / math.sqrt(hd)
    bf16 = jnp.bfloat16
    qi = pl.program_id(1)

    # ---- Once per batch row: LN1 + fused QKV projection (lane-dense, 3D-wide) -------
    # Head-split via static lane slices into persistent head-major scratch (bf16).
    @pl.when(qi == 0)
    def _():
        xn = _layernorm(x_ref[0])                                       # (S, D) fp32
        qkv = jnp.dot(xn.astype(bf16), wqkv_ref[...],
                      preferred_element_type=jnp.float32) + bqkv_ref[...]  # (S, 3D)
        for h in range(heads):                    # static unroll (once per batch row)
            q_scr[h] = qkv[:, 0 * D + h * hd: 0 * D + (h + 1) * hd].astype(bf16)
            k_scr[h] = qkv[:, 1 * D + h * hd: 1 * D + (h + 1) * hd].astype(bf16)
            v_scr[h] = qkv[:, 2 * D + h * hd: 2 * D + (h + 1) * hd].astype(bf16)

    # ---- Per query tile ---------------------------------------------------------
    start = pl.multiple_of(qi * TQ, TQ)
    x_q = x_ref[0, pl.ds(start, TQ), :]          # (TQ, D) fp32, residual rows
    qh = q_scr[:, pl.ds(start, TQ), :]           # (heads, TQ, hd) bf16
    k = k_scr[...]                               # (heads, S,  hd) bf16
    v = v_scr[...]                               # (heads, S,  hd) bf16

    # Scaled-dot-product attention, batched over heads (fp32 accumulation).
    s = jnp.einsum('hqe,hke->hqk', qh, k,
                   preferred_element_type=jnp.float32) * scale          # (heads, TQ, S)
    s = s - jnp.max(s, axis=-1, keepdims=True)
    p = jnp.exp(s)
    p = p * pl.reciprocal(jnp.sum(p, axis=-1, keepdims=True), approx=True)
    o = jnp.einsum('hqk,hke->hqe', p.astype(bf16), v,
                   preferred_element_type=jnp.float32)                  # (heads, TQ, hd)

    # Output projection: lane-concat heads -> single full-K (TQ,D)x(D,D) matmul.
    o_flat = jnp.concatenate([o[h] for h in range(heads)], axis=-1)     # (TQ, D)
    attn = jnp.dot(o_flat.astype(bf16), wo_ref[...],
                   preferred_element_type=jnp.float32) + bo_ref[...]
    x1 = attn + x_q                                                     # skip 1

    # LayerNorm 2 + FFN + residual.
    xn2 = _layernorm(x1)
    hid = jnp.dot(xn2.astype(bf16), w1_ref[...],
                  preferred_element_type=jnp.float32) + b1_ref[...]
    hid = jnp.maximum(hid, 0.0)                                         # ReLU
    ff = jnp.dot(hid.astype(bf16), w2_ref[...],
                 preferred_element_type=jnp.float32) + b2_ref[...]
    out_ref[0] = ff + x1                                                # skip 2


def transformer_block(x, params, heads, *, tq=None):
    """x: (B, S, D) float32.  S must be a multiple of 8, D a multiple of 128."""
    B, S, D = x.shape
    assert D % heads == 0 and D % 128 == 0 and S % 8 == 0
    hd = D // heads
    H = 2 * D
    bf16 = jnp.bfloat16

    try:
        vmem_cap = int(pltpu.get_tpu_info().vmem_capacity_bytes)
    except Exception:  # pragma: no cover - conservative fallback (v7x per-core size)
        vmem_cap = 64 * 2 ** 20

    if tq is None:
        tq = 256 if vmem_cap >= 96 * 2 ** 20 else 128   # bigger tiles on 128-MiB parts
        tq = min(tq, S)
        while S % tq != 0:
            tq //= 2
    assert S % tq == 0 and tq % 8 == 0

    # ---- weight prep (glue, runs in XLA outside the kernel) ----------------------
    wqkv = params["in_proj_weight"].T.astype(bf16)        # (D, 3D), columns = [q|k|v]
    bqkv = params["in_proj_bias"].reshape(1, 3 * D)
    wo = params["out_proj_weight"].T.astype(bf16)         # (D, D)
    bo = params["out_proj_bias"].reshape(1, D)
    w1 = params["ffn_w1"].T.astype(bf16)                  # (D, 2D)
    b1 = params["ffn_b1"].reshape(1, H)
    w2 = params["ffn_w2"].T.astype(bf16)                  # (2D, D)
    b2 = params["ffn_b2"].reshape(1, D)

    kernel = functools.partial(transformer_block_kernel, heads=heads)
    const = lambda shape: pl.BlockSpec(shape, lambda b, q: (0,) * len(shape))

    # ---- VMEM budget derived from tile sizes --------------------------------------
    F32, BF16 = 4, 2
    lane_hd = ((hd + 127) // 128) * 128                   # lane-padded head dim
    weight_bytes = (3 * D * D + D * D + 2 * D * H) * BF16
    bias_bytes = (3 * D + D + H + D) * F32
    io_bytes = 2 * (S * D + tq * D) * F32                 # x + out blocks (2-buffered)
    scratch_bytes = 3 * heads * S * lane_hd * BF16        # resident Q/K/V scratch
    live_bytes = (4 * S * D * F32                         # LN1 + fused QKV at q==0
                  + 2 * heads * tq * S * F32              # scores + probs
                  + (heads * tq * lane_hd + 2 * tq * D) * F32   # o, o_flat, attn
                  + (tq * H + 3 * tq * D) * F32)          # ffn hidden + misc temps
    est = 2 * (weight_bytes + bias_bytes) + io_bytes + scratch_bytes + live_bytes
    vmem_limit_bytes = int(min(0.75 * vmem_cap, max(32 * 2 ** 20, 2 * est)))

    # ---- advisory cost estimate ----------------------------------------------------
    flops = int(2 * B * S * D * (4 * D + 2 * H) + 4 * B * S * S * D)
    transcendentals = int(B * heads * S * S)
    bytes_accessed = int(2 * B * S * D * F32 + weight_bytes + bias_bytes)

    return pl.pallas_call(
        kernel,
        out_shape=jax.ShapeDtypeStruct((B, S, D), jnp.float32),
        grid=(B, S // tq),
        in_specs=[
            pl.BlockSpec((1, S, D), lambda b, q: (b, 0, 0)),   # x: full-seq view (revisited)
            const((D, 3 * D)), const((1, 3 * D)),              # fused QKV weight / bias
            const((D, D)), const((1, D)),                      # wo, bo
            const((D, H)), const((1, H)),                      # w1, b1
            const((H, D)), const((1, D)),                      # w2, b2
        ],
        out_specs=pl.BlockSpec((1, tq, D), lambda b, q: (b, q, 0)),
        scratch_shapes=[
            pltpu.VMEM((heads, S, hd), jnp.bfloat16),   # Q (all tiles, head-major)
            pltpu.VMEM((heads, S, hd), jnp.bfloat16),   # K
            pltpu.VMEM((heads, S, hd), jnp.bfloat16),   # V
        ],
        compiler_params=pltpu.CompilerParams(
            # q axis must be "arbitrary": Q/K/V scratch carries across query tiles.
            dimension_semantics=("parallel", "arbitrary"),
            vmem_limit_bytes=vmem_limit_bytes),
        cost_estimate=pl.CostEstimate(
            flops=flops, transcendentals=transcendentals,
            bytes_accessed=bytes_accessed),
    )(x, wqkv, bqkv, wo, bo, w1, b1, w2, b2)


# ----------------------------- pure-JAX reference -----------------------------
def reference_block(x, params, heads):
    B, S, D = x.shape
    hd = D // heads

    def ln(y):
        m = jnp.mean(y, axis=-1, keepdims=True)
        v = jnp.mean((y - m) ** 2, axis=-1, keepdims=True)
        return (y - m) / jnp.sqrt(v + EPS)

    skip = x
    xn = ln(x)
    qkv = xn @ params["in_proj_weight"].T + params["in_proj_bias"]
    q, k, v = jnp.split(qkv, 3, axis=-1)

    def split_heads(t):  # (B,S,D) -> (B,H,S,hd)
        return t.reshape(B, S, heads, hd).transpose(0, 2, 1, 3)

    qh, kh, vh = split_heads(q), split_heads(k), split_heads(v)
    s = jnp.einsum("bhqd,bhkd->bhqk", qh, kh) / np.sqrt(hd)
    p = jax.nn.softmax(s, axis=-1)
    o = jnp.einsum("bhqk,bhkd->bhqd", p, vh).transpose(0, 2, 1, 3).reshape(B, S, D)
    attn = o @ params["out_proj_weight"].T + params["out_proj_bias"]

    x1 = attn + skip
    xn2 = ln(x1)
    h = jnp.maximum(xn2 @ params["ffn_w1"].T + params["ffn_b1"], 0.0)
    ff = h @ params["ffn_w2"].T + params["ffn_b2"]
    return ff + x1


if __name__ == "__main__":
    # S multiple of 8, D multiple of 128 so every tile is at least one (8,128) vreg.
    B, S, D, HEADS = 2, 256, 128, 4
    H = 2 * D

    key = jax.random.PRNGKey(0)
    ks = jax.random.split(key, 9)
    sc = 0.05
    params = {
        "in_proj_weight": sc * jax.random.normal(ks[0], (3 * D, D), jnp.float32),
        "in_proj_bias": sc * jax.random.normal(ks[1], (3 * D,), jnp.float32),
        "out_proj_weight": sc * jax.random.normal(ks[2], (D, D), jnp.float32),
        "out_proj_bias": sc * jax.random.normal(ks[3], (D,), jnp.float32),
        "ffn_w1": sc * jax.random.normal(ks[4], (H, D), jnp.float32),
        "ffn_b1": sc * jax.random.normal(ks[5], (H,), jnp.float32),
        "ffn_w2": sc * jax.random.normal(ks[6], (D, H), jnp.float32),
        "ffn_b2": sc * jax.random.normal(ks[7], (D,), jnp.float32),
    }
    x = jax.random.normal(ks[8], (B, S, D), jnp.float32)

    # tq=128 -> 2 query tiles per batch row, exercising the scratch-carry path.
    out = jax.block_until_ready(transformer_block(x, params, HEADS, tq=128))
    ref = reference_block(x, params, HEADS)

    # bf16 matmul operands + approx reciprocal -> looser tolerance than pure fp32.
    np.testing.assert_allclose(np.asarray(out), np.asarray(ref), rtol=3e-2, atol=3e-2)

    print("KERNEL_OK")
</pallas_src>

<mosaic_0001>
module attributes {stable_mosaic.version = 11 : i64} {
  func.func @transformer_block_kernel(%arg0: i32, %arg1: i32, %arg2: memref<1x256x128xf32, #tpu.memory_space<vmem>>, %arg3: memref<128x384xbf16, #tpu.memory_space<vmem>>, %arg4: memref<1x384xf32, #tpu.memory_space<vmem>>, %arg5: memref<128x128xbf16, #tpu.memory_space<vmem>>, %arg6: memref<1x128xf32, #tpu.memory_space<vmem>>, %arg7: memref<128x256xbf16, #tpu.memory_space<vmem>>, %arg8: memref<1x256xf32, #tpu.memory_space<vmem>>, %arg9: memref<256x128xbf16, #tpu.memory_space<vmem>>, %arg10: memref<1x128xf32, #tpu.memory_space<vmem>>, %arg11: memref<1x128x128xf32, #tpu.memory_space<vmem>>, %arg12: memref<4x256x32xbf16, #tpu.memory_space<vmem>>, %arg13: memref<4x256x32xbf16, #tpu.memory_space<vmem>>, %arg14: memref<4x256x32xbf16, #tpu.memory_space<vmem>>) attributes {dimension_semantics = [#tpu.dimension_semantics<parallel>, #tpu.dimension_semantics<arbitrary>], iteration_bounds = array<i64: 2, 2>, scalar_prefetch = 0 : i64, scratch_operands = 3 : i64, tpu.core_type = #tpu.core_type<tc>, window_params = [{transform_indices = @transform_0, window_bounds = array<i64: 1, 256, 128>}, {pipeline_mode = #tpu.pipeline_mode<synchronous>, transform_indices = @transform_1, window_bounds = array<i64: 128, 384>}, {pipeline_mode = #tpu.pipeline_mode<synchronous>, transform_indices = @transform_2, window_bounds = array<i64: 1, 384>}, {pipeline_mode = #tpu.pipeline_mode<synchronous>, transform_indices = @transform_3, window_bounds = array<i64: 128, 128>}, {pipeline_mode = #tpu.pipeline_mode<synchronous>, transform_indices = @transform_4, window_bounds = array<i64: 1, 128>}, {pipeline_mode = #tpu.pipeline_mode<synchronous>, transform_indices = @transform_5, window_bounds = array<i64: 128, 256>}, {pipeline_mode = #tpu.pipeline_mode<synchronous>, transform_indices = @transform_6, window_bounds = array<i64: 1, 256>}, {pipeline_mode = #tpu.pipeline_mode<synchronous>, transform_indices = @transform_7, window_bounds = array<i64: 256, 128>}, {pipeline_mode = #tpu.pipeline_mode<synchronous>, transform_indices = @transform_8, window_bounds = array<i64: 1, 128>}, {transform_indices = @transform_9, window_bounds = array<i64: 1, 128, 128>}]} {
    %c0_i32 = arith.constant 0 : i32
    %0 = arith.cmpi eq, %arg1, %c0_i32 : i32
    %1 = arith.extui %0 : i1 to i32
    %c0_i32_0 = arith.constant 0 : i32
    %2 = arith.cmpi ne, %1, %c0_i32_0 : i32
    scf.if %2 {
      %c0_38 = arith.constant 0 : index
      %c0_39 = arith.constant 0 : index
      %c0_40 = arith.constant 0 : index
      %79 = vector.load %arg2[%c0_38, %c0_39, %c0_40] : memref<1x256x128xf32, #tpu.memory_space<vmem>>, vector<1x256x128xf32>
      %80 = vector.shape_cast %79 : vector<1x256x128xf32> to vector<256x128xf32>
      %cst_41 = arith.constant dense<0.000000e+00> : vector<256xf32>
      %81 = vector.multi_reduction <add>, %80, %cst_41 [1] : vector<256x128xf32> to vector<256xf32>
      %82 = vector.shape_cast %81 : vector<256xf32> to vector<256x1xf32>
      %cst_42 = arith.constant 1.280000e+02 : f32
      %83 = vector.broadcast %cst_42 : f32 to vector<256x1xf32>
      %84 = arith.divf %82, %83 : vector<256x1xf32>
      %85 = vector.broadcast %84 : vector<256x1xf32> to vector<256x128xf32>
      %86 = arith.subf %80, %85 : vector<256x128xf32>
      %87 = arith.mulf %86, %86 : vector<256x128xf32>
      %cst_43 = arith.constant dense<0.000000e+00> : vector<256xf32>
      %88 = vector.multi_reduction <add>, %87, %cst_43 [1] : vector<256x128xf32> to vector<256xf32>
      %89 = vector.shape_cast %88 : vector<256xf32> to vector<256x1xf32>
      %cst_44 = arith.constant 1.280000e+02 : f32
      %90 = vector.broadcast %cst_44 : f32 to vector<256x1xf32>
      %91 = arith.divf %89, %90 : vector<256x1xf32>
      %92 = vector.broadcast %84 : vector<256x1xf32> to vector<256x128xf32>
      %93 = arith.subf %80, %92 : vector<256x128xf32>
      %cst_45 = arith.constant 9.99999974E-6 : f32
      %94 = vector.broadcast %cst_45 : f32 to vector<256x1xf32>
      %95 = arith.addf %91, %94 : vector<256x1xf32>
      %96 = math.rsqrt %95 : vector<256x1xf32>
      %97 = vector.broadcast %96 : vector<256x1xf32> to vector<256x128xf32>
      %98 = arith.mulf %93, %97 : vector<256x128xf32>
      %99 = arith.truncf %98 : vector<256x128xf32> to vector<256x128xbf16>
      %c0_46 = arith.constant 0 : index
      %c0_47 = arith.constant 0 : index
      %100 = vector.load %arg3[%c0_46, %c0_47] : memref<128x384xbf16, #tpu.memory_space<vmem>>, vector<128x384xbf16>
      %cst_48 = arith.constant dense<0.000000e+00> : vector<256x384xf32>
      %101 = tpu.matmul %99, %100, %cst_48 {dimension_numbers = #tpu.dot_dimension_numbers<[1], [0], [0], [1], [0, 0, 1, 1], [], []>} : vector<256x128xbf16>, vector<128x384xbf16>, vector<256x384xf32> -> vector<256x384xf32>
      %c0_49 = arith.constant 0 : index
      %c0_50 = arith.constant 0 : index
      %102 = vector.load %arg4[%c0_49, %c0_50] : memref<1x384xf32, #tpu.memory_space<vmem>>, vector<1x384xf32>
      %103 = vector.broadcast %102 : vector<1x384xf32> to vector<256x384xf32>
      %104 = arith.addf %101, %103 : vector<256x384xf32>
      %105 = vector.extract_strided_slice %104 {offsets = [0, 0], sizes = [256, 32], strides = [1, 1]} : vector<256x384xf32> to vector<256x32xf32>
      %106 = arith.truncf %105 : vector<256x32xf32> to vector<256x32xbf16>
      %c0_51 = arith.constant 0 : index
      %c0_52 = arith.constant 0 : index
      %c0_53 = arith.constant 0 : index
      %107 = vector.load %arg12[%c0_51, %c0_52, %c0_53] : memref<4x256x32xbf16, #tpu.memory_space<vmem>>, vector<1x256x32xbf16>
      %108 = vector.shape_cast %107 : vector<1x256x32xbf16> to vector<256x32xbf16>
      %109 = vector.shape_cast %106 : vector<256x32xbf16> to vector<1x256x32xbf16>
      tpu.vector_store %arg12[%c0_51, %c0_52, %c0_53], %109 {strides = array<i32>} : memref<4x256x32xbf16, #tpu.memory_space<vmem>>, vector<1x256x32xbf16>,
      %110 = vector.extract_strided_slice %104 {offsets = [0, 128], sizes = [256, 32], strides = [1, 1]} : vector<256x384xf32> to vector<256x32xf32>
      %111 = arith.truncf %110 : vector<256x32xf32> to vector<256x32xbf16>
      %c0_54 = arith.constant 0 : index
      %c0_55 = arith.constant 0 : index
      %c0_56 = arith.constant 0 : index
      %112 = vector.load %arg13[%c0_54, %c0_55, %c0_56] : memref<4x256x32xbf16, #tpu.memory_space<vmem>>, vector<1x256x32xbf16>
      %113 = vector.shape_cast %112 : vector<1x256x32xbf16> to vector<256x32xbf16>
      %114 = vector.shape_cast %111 : vector<256x32xbf16> to vector<1x256x32xbf16>
      tpu.vector_store %arg13[%c0_54, %c0_55, %c0_56], %114 {strides = array<i32>} : memref<4x256x32xbf16, #tpu.memory_space<vmem>>, vector<1x256x32xbf16>,
      %115 = vector.extract_strided_slice %104 {offsets = [0, 256], sizes = [256, 32], strides = [1, 1]} : vector<256x384xf32> to vector<256x32xf32>
      %116 = arith.truncf %115 : vector<256x32xf32> to vector<256x32xbf16>
      %c0_57 = arith.constant 0 : index
      %c0_58 = arith.constant 0 : index
      %c0_59 = arith.constant 0 : index
      %117 = vector.load %arg14[%c0_57, %c0_58, %c0_59] : memref<4x256x32xbf16, #tpu.memory_space<vmem>>, vector<1x256x32xbf16>
      %118 = vector.shape_cast %117 : vector<1x256x32xbf16> to vector<256x32xbf16>
      %119 = vector.shape_cast %116 : vector<256x32xbf16> to vector<1x256x32xbf16>
      tpu.vector_store %arg14[%c0_57, %c0_58, %c0_59], %119 {strides = array<i32>} : memref<4x256x32xbf16, #tpu.memory_space<vmem>>, vector<1x256x32xbf16>,
      %120 = vector.extract_strided_slice %104 {offsets = [0, 32], sizes = [256, 32], strides = [1, 1]} : vector<256x384xf32> to vector<256x32xf32>
      %121 = arith.truncf %120 : vector<256x32xf32> to vector<256x32xbf16>
      %c1 = arith.constant 1 : index
      %c0_60 = arith.constant 0 : index
      %c0_61 = arith.constant 0 : index
      %122 = vector.load %arg12[%c1, %c0_60, %c0_61] : memref<4x256x32xbf16, #tpu.memory_space<vmem>>, vector<1x256x32xbf16>
      %123 = vector.shape_cast %122 : vector<1x256x32xbf16> to vector<256x32xbf16>
      %124 = vector.shape_cast %121 : vector<256x32xbf16> to vector<1x256x32xbf16>
      tpu.vector_store %arg12[%c1, %c0_60, %c0_61], %124 {strides = array<i32>} : memref<4x256x32xbf16, #tpu.memory_space<vmem>>, vector<1x256x32xbf16>,
      %125 = vector.extract_strided_slice %104 {offsets = [0, 160], sizes = [256, 32], strides = [1, 1]} : vector<256x384xf32> to vector<256x32xf32>
      %126 = arith.truncf %125 : vector<256x32xf32> to vector<256x32xbf16>
      %c1_62 = arith.constant 1 : index
      %c0_63 = arith.constant 0 : index
      %c0_64 = arith.constant 0 : index
      %127 = vector.load %arg13[%c1_62, %c0_63, %c0_64] : memref<4x256x32xbf16, #tpu.memory_space<vmem>>, vector<1x256x32xbf16>
      %128 = vector.shape_cast %127 : vector<1x256x32xbf16> to vector<256x32xbf16>
      %129 = vector.shape_cast %126 : vector<256x32xbf16> to vector<1x256x32xbf16>
      tpu.vector_store %arg13[%c1_62, %c0_63, %c0_64], %129 {strides = array<i32>} : memref<4x256x32xbf16, #tpu.memory_space<vmem>>, vector<1x256x32xbf16>,
      %130 = vector.extract_strided_slice %104 {offsets = [0, 288], sizes = [256, 32], strides = [1, 1]} : vector<256x384xf32> to vector<256x32xf32>
      %131 = arith.truncf %130 : vector<256x32xf32> to vector<256x32xbf16>
      %c1_65 = arith.constant 1 : index
      %c0_66 = arith.constant 0 : index
      %c0_67 = arith.constant 0 : index
      %132 = vector.load %arg14[%c1_65, %c0_66, %c0_67] : memref<4x256x32xbf16, #tpu.memory_space<vmem>>, vector<1x256x32xbf16>
      %133 = vector.shape_cast %132 : vector<1x256x32xbf16> to vector<256x32xbf16>
      %134 = vector.shape_cast %131 : vector<256x32xbf16> to vector<1x256x32xbf16>
      tpu.vector_store %arg14[%c1_65, %c0_66, %c0_67], %134 {strides = array<i32>} : memref<4x256x32xbf16, #tpu.memory_space<vmem>>, vector<1x256x32xbf16>,
      %135 = vector.extract_strided_slice %104 {offsets = [0, 64], sizes = [256, 32], strides = [1, 1]} : vector<256x384xf32> to vector<256x32xf32>
      %136 = arith.truncf %135 : vector<256x32xf32> to vector<256x32xbf16>
      %c2 = arith.constant 2 : index
      %c0_68 = arith.constant 0 : index
      %c0_69 = arith.constant 0 : index
      %137 = vector.load %arg12[%c2, %c0_68, %c0_69] : memref<4x256x32xbf16, #tpu.memory_space<vmem>>, vector<1x256x32xbf16>
      %138 = vector.shape_cast %137 : vector<1x256x32xbf16> to vector<256x32xbf16>
      %139 = vector.shape_cast %136 : vector<256x32xbf16> to vector<1x256x32xbf16>
      tpu.vector_store %arg12[%c2, %c0_68, %c0_69], %139 {strides = array<i32>} : memref<4x256x32xbf16, #tpu.memory_space<vmem>>, vector<1x256x32xbf16>,
      %140 = vector.extract_strided_slice %104 {offsets = [0, 192], sizes = [256, 32], strides = [1, 1]} : vector<256x384xf32> to vector<256x32xf32>
      %141 = arith.truncf %140 : vector<256x32xf32> to vector<256x32xbf16>
      %c2_70 = arith.constant 2 : index
      %c0_71 = arith.constant 0 : index
      %c0_72 = arith.constant 0 : index
      %142 = vector.load %arg13[%c2_70, %c0_71, %c0_72] : memref<4x256x32xbf16, #tpu.memory_space<vmem>>, vector<1x256x32xbf16>
      %143 = vector.shape_cast %142 : vector<1x256x32xbf16> to vector<256x32xbf16>
      %144 = vector.shape_cast %141 : vector<256x32xbf16> to vector<1x256x32xbf16>
      tpu.vector_store %arg13[%c2_70, %c0_71, %c0_72], %144 {strides = array<i32>} : memref<4x256x32xbf16, #tpu.memory_space<vmem>>, vector<1x256x32xbf16>,
      %145 = vector.extract_strided_slice %104 {offsets = [0, 320], sizes = [256, 32], strides = [1, 1]} : vector<256x384xf32> to vector<256x32xf32>
      %146 = arith.truncf %145 : vector<256x32xf32> to vector<256x32xbf16>
      %c2_73 = arith.constant 2 : index
      %c0_74 = arith.constant 0 : index
      %c0_75 = arith.constant 0 : index
      %147 = vector.load %arg14[%c2_73, %c0_74, %c0_75] : memref<4x256x32xbf16, #tpu.memory_space<vmem>>, vector<1x256x32xbf16>
      %148 = vector.shape_cast %147 : vector<1x256x32xbf16> to vector<256x32xbf16>
      %149 = vector.shape_cast %146 : vector<256x32xbf16> to vector<1x256x32xbf16>
      tpu.vector_store %arg14[%c2_73, %c0_74, %c0_75], %149 {strides = array<i32>} : memref<4x256x32xbf16, #tpu.memory_space<vmem>>, vector<1x256x32xbf16>,
      %150 = vector.extract_strided_slice %104 {offsets = [0, 96], sizes = [256, 32], strides = [1, 1]} : vector<256x384xf32> to vector<256x32xf32>
      %151 = arith.truncf %150 : vector<256x32xf32> to vector<256x32xbf16>
      %c3 = arith.constant 3 : index
      %c0_76 = arith.constant 0 : index
      %c0_77 = arith.constant 0 : index
      %152 = vector.load %arg12[%c3, %c0_76, %c0_77] : memref<4x256x32xbf16, #tpu.memory_space<vmem>>, vector<1x256x32xbf16>
      %153 = vector.shape_cast %152 : vector<1x256x32xbf16> to vector<256x32xbf16>
      %154 = vector.shape_cast %151 : vector<256x32xbf16> to vector<1x256x32xbf16>
      tpu.vector_store %arg12[%c3, %c0_76, %c0_77], %154 {strides = array<i32>} : memref<4x256x32xbf16, #tpu.memory_space<vmem>>, vector<1x256x32xbf16>,
      %155 = vector.extract_strided_slice %104 {offsets = [0, 224], sizes = [256, 32], strides = [1, 1]} : vector<256x384xf32> to vector<256x32xf32>
      %156 = arith.truncf %155 : vector<256x32xf32> to vector<256x32xbf16>
      %c3_78 = arith.constant 3 : index
      %c0_79 = arith.constant 0 : index
      %c0_80 = arith.constant 0 : index
      %157 = vector.load %arg13[%c3_78, %c0_79, %c0_80] : memref<4x256x32xbf16, #tpu.memory_space<vmem>>, vector<1x256x32xbf16>
      %158 = vector.shape_cast %157 : vector<1x256x32xbf16> to vector<256x32xbf16>
      %159 = vector.shape_cast %156 : vector<256x32xbf16> to vector<1x256x32xbf16>
      tpu.vector_store %arg13[%c3_78, %c0_79, %c0_80], %159 {strides = array<i32>} : memref<4x256x32xbf16, #tpu.memory_space<vmem>>, vector<1x256x32xbf16>,
      %160 = vector.extract_strided_slice %104 {offsets = [0, 352], sizes = [256, 32], strides = [1, 1]} : vector<256x384xf32> to vector<256x32xf32>
      %161 = arith.truncf %160 : vector<256x32xf32> to vector<256x32xbf16>
      %c3_81 = arith.constant 3 : index
      %c0_82 = arith.constant 0 : index
      %c0_83 = arith.constant 0 : index
      %162 = vector.load %arg14[%c3_81, %c0_82, %c0_83] : memref<4x256x32xbf16, #tpu.memory_space<vmem>>, vector<1x256x32xbf16>
      %163 = vector.shape_cast %162 : vector<1x256x32xbf16> to vector<256x32xbf16>
      %164 = vector.shape_cast %161 : vector<256x32xbf16> to vector<1x256x32xbf16>
      tpu.vector_store %arg14[%c3_81, %c0_82, %c0_83], %164 {strides = array<i32>} : memref<4x256x32xbf16, #tpu.memory_space<vmem>>, vector<1x256x32xbf16>,
    } else {
    }
    %c128_i32 = arith.constant 128 : i32
    %3 = arith.muli %arg1, %c128_i32 : i32
    %4 = tpu.assume_multiple %3, 128 : i32
    %c0 = arith.constant 0 : index
    %5 = arith.index_cast %4 : i32 to index
    %c0_1 = arith.constant 0 : index
    %6 = vector.load %arg2[%c0, %5, %c0_1] : memref<1x256x128xf32, #tpu.memory_space<vmem>>, vector<1x128x128xf32>
    %7 = vector.shape_cast %6 : vector<1x128x128xf32> to vector<128x128xf32>
    %c0_2 = arith.constant 0 : index
    %8 = arith.index_cast %4 : i32 to index
    %c0_3 = arith.constant 0 : index
    %9 = vector.load %arg12[%c0_2, %8, %c0_3] : memref<4x256x32xbf16, #tpu.memory_space<vmem>>, vector<4x128x32xbf16>
    %c0_4 = arith.constant 0 : index
    %c0_5 = arith.constant 0 : index
    %c0_6 = arith.constant 0 : index
    %10 = vector.load %arg13[%c0_4, %c0_5, %c0_6] : memref<4x256x32xbf16, #tpu.memory_space<vmem>>, vector<4x256x32xbf16>
    %c0_7 = arith.constant 0 : index
    %c0_8 = arith.constant 0 : index
    %c0_9 = arith.constant 0 : index
    %11 = vector.load %arg14[%c0_7, %c0_8, %c0_9] : memref<4x256x32xbf16, #tpu.memory_space<vmem>>, vector<4x256x32xbf16>
    "tpu.trace_start"() <{level = 10 : i32, message = "hqe,hke->hqk"}> : () -> ()
    %cst = arith.constant dense<0.000000e+00> : vector<4x128x256xf32>
    %12 = tpu.matmul %9, %10, %cst {dimension_numbers = #tpu.dot_dimension_numbers<[2], [2], [1], [1], [0, 0, 0, 1, 1, 1], [0], [0]>} : vector<4x128x32xbf16>, vector<4x256x32xbf16>, vector<4x128x256xf32> -> vector<4x128x256xf32>
    "tpu.trace_stop"() : () -> ()
    %cst_10 = arith.constant 0.176776692 : f32
    %13 = vector.broadcast %cst_10 : f32 to vector<4x128x256xf32>
    %14 = arith.mulf %12, %13 : vector<4x128x256xf32>
    %cst_11 = arith.constant dense<0xFF800000> : vector<4x128xf32>
    %15 = vector.multi_reduction <maximumf>, %14, %cst_11 [2] : vector<4x128x256xf32> to vector<4x128xf32>
    %16 = vector.shape_cast %15 : vector<4x128xf32> to vector<4x128x1xf32>
    %17 = vector.broadcast %16 : vector<4x128x1xf32> to vector<4x128x256xf32>
    %18 = arith.subf %14, %17 : vector<4x128x256xf32>
    %19 = math.exp %18 : vector<4x128x256xf32>
    %cst_12 = arith.constant dense<0.000000e+00> : vector<4x128xf32>
    %20 = vector.multi_reduction <add>, %19, %cst_12 [2] : vector<4x128x256xf32> to vector<4x128xf32>
    %21 = vector.shape_cast %20 : vector<4x128xf32> to vector<4x128x1xf32>
    %22 = tpu.reciprocal %21 {approx = true} : vector<4x128x1xf32> -> vector<4x128x1xf32>
    %23 = vector.broadcast %22 : vector<4x128x1xf32> to vector<4x128x256xf32>
    %24 = arith.mulf %19, %23 : vector<4x128x256xf32>
    %25 = arith.truncf %24 : vector<4x128x256xf32> to vector<4x128x256xbf16>
    "tpu.trace_start"() <{level = 10 : i32, message = "hqk,hke->hqe"}> : () -> ()
    %cst_13 = arith.constant dense<0.000000e+00> : vector<4x128x32xf32>
    %26 = tpu.matmul %25, %11, %cst_13 {dimension_numbers = #tpu.dot_dimension_numbers<[2], [1], [1], [2], [0, 0, 0, 1, 1, 2], [0], [0]>} : vector<4x128x256xbf16>, vector<4x256x32xbf16>, vector<4x128x32xf32> -> vector<4x128x32xf32>
    "tpu.trace_stop"() : () -> ()
    %27 = vector.extract_strided_slice %26 {offsets = [0, 0, 0], sizes = [1, 128, 32], strides = [1, 1, 1]} : vector<4x128x32xf32> to vector<1x128x32xf32>
    %28 = vector.shape_cast %27 : vector<1x128x32xf32> to vector<128x32xf32>
    %29 = vector.extract_strided_slice %26 {offsets = [1, 0, 0], sizes = [1, 128, 32], strides = [1, 1, 1]} : vector<4x128x32xf32> to vector<1x128x32xf32>
    %30 = vector.shape_cast %29 : vector<1x128x32xf32> to vector<128x32xf32>
    %31 = vector.extract_strided_slice %26 {offsets = [2, 0, 0], sizes = [1, 128, 32], strides = [1, 1, 1]} : vector<4x128x32xf32> to vector<1x128x32xf32>
    %32 = vector.shape_cast %31 : vector<1x128x32xf32> to vector<128x32xf32>
    %33 = vector.extract_strided_slice %26 {offsets = [3, 0, 0], sizes = [1, 128, 32], strides = [1, 1, 1]} : vector<4x128x32xf32> to vector<1x128x32xf32>
    %34 = vector.shape_cast %33 : vector<1x128x32xf32> to vector<128x32xf32>
    %35 = tpu.concatenate %28, %30, %32, %34 in 1 : vector<128x32xf32>, vector<128x32xf32>, vector<128x32xf32>, vector<128x32xf32> -> vector<128x128xf32>
    %36 = arith.truncf %35 : vector<128x128xf32> to vector<128x128xbf16>
    %c0_14 = arith.constant 0 : index
    %c0_15 = arith.constant 0 : index
    %37 = vector.load %arg5[%c0_14, %c0_15] : memref<128x128xbf16, #tpu.memory_space<vmem>>, vector<128x128xbf16>
    %cst_16 = arith.constant dense<0.000000e+00> : vector<128x128xf32>
    %38 = tpu.matmul %36, %37, %cst_16 {dimension_numbers = #tpu.dot_dimension_numbers<[1], [0], [0], [1], [0, 0, 1, 1], [], []>} : vector<128x128xbf16>, vector<128x128xbf16>, vector<128x128xf32> -> vector<128x128xf32>
    %c0_17 = arith.constant 0 : index
    %c0_18 = arith.constant 0 : index
    %39 = vector.load %arg6[%c0_17, %c0_18] : memref<1x128xf32, #tpu.memory_space<vmem>>, vector<1x128xf32>
    %40 = vector.broadcast %39 : vector<1x128xf32> to vector<128x128xf32>
    %41 = arith.addf %38, %40 : vector<128x128xf32>
    %42 = arith.addf %41, %7 : vector<128x128xf32>
    %cst_19 = arith.constant dense<0.000000e+00> : vector<128xf32>
    %43 = vector.multi_reduction <add>, %42, %cst_19 [1] : vector<128x128xf32> to vector<128xf32>
    %44 = vector.shape_cast %43 : vector<128xf32> to vector<128x1xf32>
    %cst_20 = arith.constant 1.280000e+02 : f32
    %45 = vector.broadcast %cst_20 : f32 to vector<128x1xf32>
    %46 = arith.divf %44, %45 : vector<128x1xf32>
    %47 = vector.broadcast %46 : vector<128x1xf32> to vector<128x128xf32>
    %48 = arith.subf %42, %47 : vector<128x128xf32>
    %49 = arith.mulf %48, %48 : vector<128x128xf32>
    %cst_21 = arith.constant dense<0.000000e+00> : vector<128xf32>
    %50 = vector.multi_reduction <add>, %49, %cst_21 [1] : vector<128x128xf32> to vector<128xf32>
    %51 = vector.shape_cast %50 : vector<128xf32> to vector<128x1xf32>
    %cst_22 = arith.constant 1.280000e+02 : f32
    %52 = vector.broadcast %cst_22 : f32 to vector<128x1xf32>
    %53 = arith.divf %51, %52 : vector<128x1xf32>
    %54 = vector.broadcast %46 : vector<128x1xf32> to vector<128x128xf32>
    %55 = arith.subf %42, %54 : vector<128x128xf32>
    %cst_23 = arith.constant 9.99999974E-6 : f32
    %56 = vector.broadcast %cst_23 : f32 to vector<128x1xf32>
    %57 = arith.addf %53, %56 : vector<128x1xf32>
    %58 = math.rsqrt %57 : vector<128x1xf32>
    %59 = vector.broadcast %58 : vector<128x1xf32> to vector<128x128xf32>
    %60 = arith.mulf %55, %59 : vector<128x128xf32>
    %61 = arith.truncf %60 : vector<128x128xf32> to vector<128x128xbf16>
    %c0_24 = arith.constant 0 : index
    %c0_25 = arith.constant 0 : index
    %62 = vector.load %arg7[%c0_24, %c0_25] : memref<128x256xbf16, #tpu.memory_space<vmem>>, vector<128x256xbf16>
    %cst_26 = arith.constant dense<0.000000e+00> : vector<128x256xf32>
    %63 = tpu.matmul %61, %62, %cst_26 {dimension_numbers = #tpu.dot_dimension_numbers<[1], [0], [0], [1], [0, 0, 1, 1], [], []>} : vector<128x128xbf16>, vector<128x256xbf16>, vector<128x256xf32> -> vector<128x256xf32>
    %c0_27 = arith.constant 0 : index
    %c0_28 = arith.constant 0 : index
    %64 = vector.load %arg8[%c0_27, %c0_28] : memref<1x256xf32, #tpu.memory_space<vmem>>, vector<1x256xf32>
    %65 = vector.broadcast %64 : vector<1x256xf32> to vector<128x256xf32>
    %66 = arith.addf %63, %65 : vector<128x256xf32>
    %cst_29 = arith.constant 0.000000e+00 : f32
    %67 = vector.broadcast %cst_29 : f32 to vector<128x256xf32>
    %68 = arith.maximumf %66, %67 : vector<128x256xf32>
    %69 = arith.truncf %68 : vector<128x256xf32> to vector<128x256xbf16>
    %c0_30 = arith.constant 0 : index
    %c0_31 = arith.constant 0 : index
    %70 = vector.load %arg9[%c0_30, %c0_31] : memref<256x128xbf16, #tpu.memory_space<vmem>>, vector<256x128xbf16>
    %cst_32 = arith.constant dense<0.000000e+00> : vector<128x128xf32>
    %71 = tpu.matmul %69, %70, %cst_32 {dimension_numbers = #tpu.dot_dimension_numbers<[1], [0], [0], [1], [0, 0, 1, 1], [], []>} : vector<128x256xbf16>, vector<256x128xbf16>, vector<128x128xf32> -> vector<128x128xf32>
    %c0_33 = arith.constant 0 : index
    %c0_34 = arith.constant 0 : index
    %72 = vector.load %arg10[%c0_33, %c0_34] : memref<1x128xf32, #tpu.memory_space<vmem>>, vector<1x128xf32>
    %73 = vector.broadcast %72 : vector<1x128xf32> to vector<128x128xf32>
    %74 = arith.addf %71, %73 : vector<128x128xf32>
    %75 = arith.addf %74, %42 : vector<128x128xf32>
    %c0_35 = arith.constant 0 : index
    %c0_36 = arith.constant 0 : index
    %c0_37 = arith.constant 0 : index
    %76 = vector.load %arg11[%c0_35, %c0_36, %c0_37] : memref<1x128x128xf32, #tpu.memory_space<vmem>>, vector<1x128x128xf32>
    %77 = vector.shape_cast %76 : vector<1x128x128xf32> to vector<128x128xf32>
    %78 = vector.shape_cast %75 : vector<128x128xf32> to vector<1x128x128xf32>
    tpu.vector_store %arg11[%c0_35, %c0_36, %c0_37], %78 {strides = array<i32>} : memref<1x128x128xf32, #tpu.memory_space<vmem>>, vector<1x128x128xf32>,
    return
  }
  func.func @transform_0(%arg0: i32, %arg1: i32) -> (i32, i32, i32) {
    %c0_i32 = arith.constant 0 : i32
    %c0_i32_0 = arith.constant 0 : i32
    %c0_i32_1 = arith.constant 0 : i32
    return %arg0, %c0_i32, %c0_i32_0 : i32, i32, i32
  }
  func.func @transform_1(%arg0: i32, %arg1: i32) -> (i32, i32) {
    %c0_i32 = arith.constant 0 : i32
    %c0_i32_0 = arith.constant 0 : i32
    %c0_i32_1 = arith.constant 0 : i32
    return %c0_i32, %c0_i32_0 : i32, i32
  }
  func.func @transform_2(%arg0: i32, %arg1: i32) -> (i32, i32) {
    %c0_i32 = arith.constant 0 : i32
    %c0_i32_0 = arith.constant 0 : i32
    %c0_i32_1 = arith.constant 0 : i32
    return %c0_i32, %c0_i32_0 : i32, i32
  }
  func.func @transform_3(%arg0: i32, %arg1: i32) -> (i32, i32) {
    %c0_i32 = arith.constant 0 : i32
    %c0_i32_0 = arith.constant 0 : i32
    %c0_i32_1 = arith.constant 0 : i32
    return %c0_i32, %c0_i32_0 : i32, i32
  }
  func.func @transform_4(%arg0: i32, %arg1: i32) -> (i32, i32) {
    %c0_i32 = arith.constant 0 : i32
    %c0_i32_0 = arith.constant 0 : i32
    %c0_i32_1 = arith.constant 0 : i32
    return %c0_i32, %c0_i32_0 : i32, i32
  }
  func.func @transform_5(%arg0: i32, %arg1: i32) -> (i32, i32) {
    %c0_i32 = arith.constant 0 : i32
    %c0_i32_0 = arith.constant 0 : i32
    %c0_i32_1 = arith.constant 0 : i32
    return %c0_i32, %c0_i32_0 : i32, i32
  }
  func.func @transform_6(%arg0: i32, %arg1: i32) -> (i32, i32) {
    %c0_i32 = arith.constant 0 : i32
    %c0_i32_0 = arith.constant 0 : i32
    %c0_i32_1 = arith.constant 0 : i32
    return %c0_i32, %c0_i32_0 : i32, i32
  }
  func.func @transform_7(%arg0: i32, %arg1: i32) -> (i32, i32) {
    %c0_i32 = arith.constant 0 : i32
    %c0_i32_0 = arith.constant 0 : i32
    %c0_i32_1 = arith.constant 0 : i32
    return %c0_i32, %c0_i32_0 : i32, i32
  }
  func.func @transform_8(%arg0: i32, %arg1: i32) -> (i32, i32) {
    %c0_i32 = arith.constant 0 : i32
    %c0_i32_0 = arith.constant 0 : i32
    %c0_i32_1 = arith.constant 0 : i32
    return %c0_i32, %c0_i32_0 : i32, i32
  }
  func.func @transform_9(%arg0: i32, %arg1: i32) -> (i32, i32, i32) {
    %c0_i32 = arith.constant 0 : i32
    %c0_i32_0 = arith.constant 0 : i32
    return %arg0, %arg1, %c0_i32 : i32, i32, i32
  }
}

</mosaic_0001>

<bundles_post_ra>
// kernel: tpu_custom_call.1
= control target key start
LH: loop header
LB: loop body
LE: loop exit
PB: predicated region body
PF: predicated region fallthrough
CT: control target
= control target key end

     0   :  { %s10937_s0 = inlined_call_operand.hbm [shape: f32[2,256,128], index: 0, kind: input, shape index: {}]   ;;  %s10938_s1 = inlined_call_operand.hbm [shape: bf16[128,384], index: 1, kind: input, shape index: {}]   ;;  %s10939_s2 = inlined_call_operand.vmem [shape: f32[1,384], index: 2, kind: input, shape index: {}]   ;;  %s10940_s3 = inlined_call_operand.hbm [shape: bf16[128,128], index: 3, kind: input, shape index: {}]   ;;  %s10941_s4 = inlined_call_operand.vmem [shape: f32[1,128], index: 4, kind: input, shape index: {}]   ;;  %s10942_s5 = inlined_call_operand.hbm [shape: bf16[128,256], index: 5, kind: input, shape index: {}]   ;;  %s10943_s6 = inlined_call_operand.vmem [shape: f32[1,256], index: 6, kind: input, shape index: {}]   ;;  %s10944_s7 = inlined_call_operand.hbm [shape: bf16[256,128], index: 7, kind: input, shape index: {}]   ;;  %s10945_s8 = inlined_call_operand.vmem [shape: f32[1,128], index: 8, kind: input, shape index: {}]   ;;  %s10946_s9 = inlined_call_operand.hbm [shape: f32[2,256,128], index: 9, kind: output, shape index: {}]  }
   0x1   :  { %11121 = sst [smem:[#allocation104_spill]] %s10938_s1 }
   0x2   :  { %11122 = sst [smem:[#allocation105_spill]] %s10939_s2 }
   0x3   :  { %11123 = sst [smem:[#allocation106_spill]] %s10940_s3 }
   0x4   :  { %11124 = sst [smem:[#allocation107_spill]] %s10941_s4 }
   0x5   :  { %11125 = sst [smem:[#allocation108_spill]] %s10942_s5 }
   0x6   :  { %11126 = sst [smem:[#allocation109_spill]] %s10943_s6 }
   0x7   :  { %11127 = sst [smem:[#allocation110_spill]] %s10945_s8 }
   0x8   :  { %11128 = sst [smem:[#allocation111_spill]] %s10946_s9 }
   0x9   :  { %14 = vsyncpa [#allocation6], 0 }
   0xa   :  { %16 = vsyncpa [#allocation6 + $0x1], 0 }
   0xb   :  { %17 = vsyncpa [#allocation9], 0 }
   0xc   :  { %18 = vsyncpa [#allocation12], 0 }
   0xd   :  { %19 = vsyncpa [#allocation7], 0 }
   0xe   :  { %21 = vsyncpa [#allocation7 + $0x1], 0  ;;  %s7794_s30 = smov 0   ;;  %s7796_s10 = smov 0  }
   0xf   :  { %s7798_s11 = smov 0   ;;  %s7800_s12 = smov 0  }
  0x10   :  { %s7802_s13 = smov 0   ;;  %s7804_s14 = smov 0  }
  0x11   :  { %s7806_s15 = smov 0   ;;  %s7808_s16 = smov 0  }
  0x12   :  { %s7810_s17 = smov 0   ;;  %s7812_s18 = smov 0  }
  0x13   :  { %s7814_s19 = smov 0  }
  0x14 LB: > { %11129 = sst [smem:[#allocation19_spill]] %s7680_s30  ;;  %s5851_s20 = sadd.s32 4294967295, %s7720_s19   ;;  %s7720_s19 = sphi %s7814_s19, %s27_s19   ;;  %s7716_s18 = sphi %s7812_s18, %s11494_s18   ;;  %s7712_s17 = sphi %s7810_s17, %s11493_s17   ;;  %s7708_s16 = sphi %s7808_s16, %s11492_s16   ;;  %s7704_s15 = sphi %s7806_s15, %s11491_s15   ;;  %s7700_s14 = sphi %s7804_s14, %s11490_s14   ;;  %s7696_s13 = sphi %s7802_s13, %s11489_s13   ;;  %s7692_s12 = sphi %s7800_s12, %s11488_s12   ;;  %s7688_s11 = sphi %s7798_s11, %s11487_s11   ;;  %s7684_s10 = sphi %s7796_s10, %s11486_s10   ;;  %s7680_s30 = sphi %s7794_s30, %s11485_s30  }
  0x15   : > { %11130 = sst [smem:[#allocation20_spill]] %s7708_s16  ;;  %s5852_s21 = sadd.s32 4294967294, %s7720_s19  }
  0x16   : > { %p59_p0 = scmp.ne.s32.totalorder %s7696_s13, %s7692_s12  ;;  %p7850_p1 = scmp.eq.s32.totalorder %s5851_s20, 0 }
  0x17   : > { %p252_p2 = scmp.ne.s32.totalorder %s7688_s11, %s7684_s10  ;;  %p253_p3 = scmp.eq.s32.totalorder %s5851_s20, 3 }
  0x18   : > { %s11131_s22 = scalar_select %p7850_p1, 1, 0 }
  0x19   : > { %p7858_p4 = por %p7850_p1, %p59_p0  ;;  %p258_p5 = scmp.ne.s32.totalorder %s7684_s10, %s7680_s30 }
  0x1a   : > { %p7864_p6 = por %p253_p3, %p252_p2  ;;  %p259_p7 = scmp.eq.s32.totalorder %s5852_s21, 3 }
  0x1b   : > { %s11132_s23 = scalar_select %p7858_p4, 1, 0 }
  0x1c   : > { %s11133_s24 = scalar_select %p7864_p6, 1, 0 }
  0x1d   : > { %p5853_p8 = scmp.ge.s32.totalorder %s7720_s19, 1  ;;  %p266_p9 = scmp.lt.s32.totalorder %s7720_s19, 5 }
  0x1e   : > { %11134 = sst [smem:[#allocation21_spill]] %s11133_s24  ;;  %p7870_p10 = por %p259_p7, %p258_p5 }
  0x1f   : > { %p7874_p11 = pnand %p5853_p8, %p266_p9  ;;  %s7722_s27 = smov [#allocation8]  }
  0x20   : > { %s11135_s25 = scalar_select %p7870_p10, 1, 0 }
  0x21   : > { %s11137_s26 = scalar_select %p7874_p11, 1, 0 }
  0x22   : > { %11136 = sst [smem:[#allocation22_spill]] %s11135_s25  ;;  %s278_s28 = sshll.u32 %s7722_s27, 4  ;;  %s279_s28 = int_to_ptr.vmem [resolvable:$true] %s278_s28 }
  0x23   : > { %p6629_p12 = pneg %p7874_p11  ;;  %s7723_s12 = smov [#allocation11]  }
  0x24   : > { %s310_s20 = sshll.u32 %s7723_s12, 4  ;;  %s11139_s1 = sld [smem:[#allocation104_spill]]  ;;  %s7886_s20 = int_to_ptr.vmem [resolvable:$true] %s310_s20 }
  0x25   : > { %p7882_p13 = pnand %p6629_p12, %p7850_p1 }
  0x27   : > { %p7896_p2 = pneg %p7882_p13 }
  0x2a   : > { %s7448_s30 = scalar_lea.hbm %s11139_s1, 3072 }
  0x2b   : > { %p7449_p0 = scmp.ne.s32.totalorder %s11139_s1, %s7448_s30  ;;  %p7455_p7 = scmp.lt.u32.totalorder %s7448_s30, %s11139_s1 }
  0x2d   : > { %p7451_p3 = pnand %p7896_p2, %p7449_p0 }
  0x2f   : > { %p7452_p5 = pneg %p7451_p3 }
  0x31   : > { %p7457_p8 = pnand %p7455_p7, %p7452_p5 }
  0x33   : > { %7460 = shalt.err (!%p7457_p8)
}
  0x34   : > { %s7461_s25 = scalar_lea.vmem %s279_s28, 3072  ;;  %p7469_p6 = scmp.lt.s32.totalorder %s279_s28, %s279_s28 }
  0x35   : > { %p7462_p9 = scmp.ne.s32.totalorder %s279_s28, %s7461_s25  ;;  %p7470_p1 = scmp.lt.s32.totalorder %s7461_s25, %s7461_s25 }
  0x37   : > { %p7464_p12 = pnand %p7462_p9, %p7896_p2  ;;  %p7471_p4 = por %p7470_p1, %p7469_p6 }
  0x39   : > { %p7465_p10 = pneg %p7464_p12 }
  0x3b   : > { %p7472_p11 = pnand %p7471_p4, %p7465_p10 }
  0x3d   : > { %7475 = shalt.err (!%p7472_p11)
}
  0x3e   : > { %s7724_s9 = smov 192   ;;  %s7725_s24 = smov 12  }
  0x3f   : > { %6632 = dma.hbm_to_vmem [thread:$0]  (!%p7882_p13), %s11139_s1, 3072, %s279_s28, [#allocation9], %s7724_s9, %s7724_s9, %s7725_s24  }
  0x40   : > { %s11141_s5 = sld [smem:[#allocation108_spill]] }
  0x46   : > { %s7476_s8 = scalar_lea.hbm %s11141_s5, 2048 }
  0x47   : > { %p7477_p0 = scmp.ne.s32.totalorder %s11141_s5, %s7476_s8  ;;  %p7483_p6 = scmp.lt.u32.totalorder %s7476_s8, %s11141_s5 }
  0x49   : > { %p7479_p1 = pnand %p7477_p0, %p7896_p2 }
  0x4b   : > { %p7480_p4 = pneg %p7479_p1 }
  0x4d   : > { %p7485_p10 = pnand %p7483_p6, %p7480_p4 }
  0x4f   : > { %7488 = shalt.err (!%p7485_p10)
}
  0x50   : > { %s7489_s28 = scalar_lea.vmem %s7886_s20, 2048  ;;  %p7497_p7 = scmp.lt.s32.totalorder %s7886_s20, %s7886_s20 }
  0x51   : > { %p7490_p11 = scmp.ne.s32.totalorder %s7886_s20, %s7489_s28  ;;  %p7498_p8 = scmp.lt.s32.totalorder %s7489_s28, %s7489_s28 }
  0x53   : > { %p7492_p3 = pnand %p7490_p11, %p7896_p2  ;;  %p7499_p9 = por %p7498_p8, %p7497_p7 }
  0x55   : > { %p7493_p5 = pneg %p7492_p3 }
  0x57   : > { %p7500_p12 = pnand %p7499_p9, %p7493_p5 }
  0x59   : > { %7503 = shalt.err (!%p7500_p12)
}
  0x5a   : > { %s10957_s4 = smov 128   ;;  %s10958_s2 = smov 8  }
  0x5b   : > { %6638 = dma.hbm_to_vmem [thread:$0]  (!%p7882_p13), %s11141_s5, 2048, %s7886_s20, [#allocation12], %s10957_s4, %s10957_s4, %s10958_s2  }
  0x5c   : > { %s7728_s9 = smov [#allocation10]   ;;  %s11142_s3 = sld [smem:[#allocation106_spill]] }
  0x5d   : > { %s294_s24 = sshll.u32 %s7728_s9, 4  ;;  %s295_s24 = int_to_ptr.vmem [resolvable:$true] %s294_s24 }
  0x62   : > { %s7504_s21 = scalar_lea.hbm %s11142_s3, 1024 }
  0x63   : > { %p7505_p0 = scmp.ne.s32.totalorder %s11142_s3, %s7504_s21  ;;  %p7511_p6 = scmp.lt.u32.totalorder %s7504_s21, %s11142_s3 }
  0x65   : > { %p7507_p1 = pnand %p7505_p0, %p7896_p2 }
  0x67   : > { %p7508_p4 = pneg %p7507_p1 }
  0x69   : > { %p7513_p10 = pnand %p7511_p6, %p7508_p4 }
  0x6b   : > { %7516 = shalt.err (!%p7513_p10)
}
  0x6c   : > { %s7517_s20 = scalar_lea.vmem %s295_s24, 1024  ;;  %p7525_p7 = scmp.lt.s32.totalorder %s295_s24, %s295_s24 }
  0x6d   : > { %p7518_p11 = scmp.ne.s32.totalorder %s295_s24, %s7517_s20  ;;  %p7526_p8 = scmp.lt.s32.totalorder %s7517_s20, %s7517_s20 }
  0x6f   : > { %p7520_p3 = pnand %p7518_p11, %p7896_p2  ;;  %p7527_p9 = por %p7526_p8, %p7525_p7 }
  0x71   : > { %p7521_p5 = pneg %p7520_p3 }
  0x73   : > { %p7528_p12 = pnand %p7527_p9, %p7521_p5 }
  0x75   : > { %7531 = shalt.err (!%p7528_p12)
}
  0x76   : > { %s7729_s6 = smov 64   ;;  %s7730_s8 = smov 4  }
  0x77   : > { %6635 = dma.hbm_to_vmem [thread:$0]  (!%p7882_p13), %s11142_s3, 1024, %s295_s24, [#allocation9], %s7729_s6, %s7729_s6, %s7730_s8  }
  0x78   : > { %s7731_s16 = smov [#allocation13]   ;;  %s7532_s25 = scalar_lea.hbm %s10944_s7, 2048 }
  0x79   : > { %s326_s30 = sshll.u32 %s7731_s16, 4  ;;  %p7533_p0 = scmp.ne.s32.totalorder %s10944_s7, %s7532_s25  ;;  %s327_s30 = int_to_ptr.vmem [resolvable:$true] %s326_s30 }
  0x7a   : > { %p7539_p6 = scmp.lt.u32.totalorder %s7532_s25, %s10944_s7 }
  0x7b   : > { %p7535_p1 = pnand %p7533_p0, %p7896_p2 }
  0x7d   : > { %p7536_p4 = pneg %p7535_p1 }
  0x7f   : > { %p7541_p10 = pnand %p7539_p6, %p7536_p4 }
  0x81   : > { %7544 = shalt.err (!%p7541_p10)
}
  0x82   : > { %s7545_s24 = scalar_lea.vmem %s327_s30, 2048  ;;  %p7553_p7 = scmp.lt.s32.totalorder %s327_s30, %s327_s30 }
  0x83   : > { %p7546_p11 = scmp.ne.s32.totalorder %s327_s30, %s7545_s24  ;;  %p7554_p8 = scmp.lt.s32.totalorder %s7545_s24, %s7545_s24 }
  0x85   : > { %p7548_p3 = pnand %p7546_p11, %p7896_p2  ;;  %p7555_p9 = por %p7554_p8, %p7553_p7 }
  0x87   : > { %p7549_p5 = pneg %p7548_p3 }
  0x89   : > { %p7556_p12 = pnand %p7555_p9, %p7549_p5 }
  0x8b   : > { %7559 = shalt.err (!%p7556_p12)
}
  0x8c   : > { %6641 = dma.hbm_to_vmem [thread:$0]  (!%p7882_p13), %s10944_s7, 2048, %s327_s30, [#allocation12], %s7729_s6, %s7729_s6, %s7730_s8  }
  0x8d   : > { %s36_s27 = sadd.s32 1, %s7712_s17  ;;  %s39_s29 = sadd.s32 1, %s7716_s18 }
  0x8e   : > { %p37_p2 = scmp.ge.s32.totalorder %s36_s27, 2  ;;  %s46_s4 = sadd.s32 1, %s7700_s14 }
  0x8f   : > { %p53_p0 = scmp.ne.s32.totalorder %s7700_s14, %s7696_s13  ;;  %p54_p1 = scmp.eq.s32.totalorder %s7720_s19, 0 }
  0x90   : > { %s11496_s27 = smov (%p37_p2, %s36_s27), 0  ;;  %s11498_s29 = smov (!%p37_p2, %s39_s29), %s7716_s18 }
  0x91   : > { %s238_s2 = ssub.s32 %s7712_s17, %s11496_s27  ;;  %p41_p4 = scmp.ge.s32.totalorder %s11498_s29, 2 }
  0x92   : > { %s242_s16 = sadd.s32 1, %s7688_s11  ;;  %p7986_p6 = por %p54_p1, %p53_p0 }
  0x93   : > { %p6654_p13 = scmp.lt.s32.totalorder %s7720_s19, 4  ;;  %s11500_s29 = smov (%p41_p4, %s11498_s29), 0 }
  0x94   : > { %s343_s8 = sand.u32 1, %s7700_s14   ;;  %s5976_s30 = sshll.u32 %s7716_s18, 12 }
  0x95   : > { %s43_s21 = ssub.s32 %s7716_s18, %s11500_s29  ;;  %s5859_s25 = sshll.u32 %s343_s8, 8 }
  0x96   : > { %p44_p10 = scmp.eq.s32.totalorder %s43_s21, 0  ;;  %s239_s12 = sor.u32 %s238_s2, %s43_s21 }
  0x97   : > { %p240_p11 = scmp.eq.s32.totalorder %s239_s12, 0  ;;  %s8006_s9 = scalar_lea.hbm %s10937_s0, %s5976_s30 }
  0x98   : > { %s7998_s28 = scalar_select %p44_p10, %s7700_s14, %s46_s4  }
  0x99   : > { %s8001_s20 = scalar_select %p240_p11, %s7688_s11, %s242_s16  }
  0x9a   : > { %s347_s3 = scalar_lea.vmem [#allocation5], %s5859_s25  ;;  %p8012_p3 = pnand %p6654_p13, %p7986_p6 }
  0x9b   : > { %s354_s5 = sshll.u32 %s347_s3, 4  ;;  %s8018_s4 = scalar_lea.sflag [#allocation6], %s343_s8  ;;  %s8016_s5 = int_to_ptr.vmem [resolvable:$true] %s354_s5 }
  0x9c   : > { %s7560_s16 = scalar_lea.hbm %s8006_s9, 4096  ;;  %p7562_p7 = pneg %p8012_p3 }
  0x9d   : > { %p7561_p5 = scmp.ne.s32.totalorder %s8006_s9, %s7560_s16  ;;  %s7565_s30 = scalar_lea.hbm %s10937_s0, 8192 }
  0x9e   : > { %p7566_p12 = scmp.lt.u32.totalorder %s8006_s9, %s10937_s0  ;;  %p7567_p2 = scmp.lt.u32.totalorder %s7565_s30, %s7560_s16 }
  0x9f   : > { %p7563_p8 = pnand %p7562_p7, %p7561_p5  ;;  %p7569_p1 = scmp.lt.u32.totalorder %s7560_s16, %s8006_s9 }
  0xa0   : > { %p7568_p0 = por %p7567_p2, %p7566_p12 }
  0xa1   : > { %p7564_p9 = pneg %p7563_p8 }
  0xa2   : > { %p7570_p4 = por %p7569_p1, %p7568_p0 }
  0xa4   : > { %p7571_p6 = pnand %p7570_p4, %p7564_p9 }
  0xa6   : > { %7574 = shalt.err (!%p7571_p6)
}
  0xa7   : > { %s7575_s8 = scalar_lea.vmem %s8016_s5, 4096  ;;  %s7732_s25 = smov [#allocation5]  }
  0xa8   : > { %p7576_p13 = scmp.ne.s32.totalorder %s8016_s5, %s7575_s8  ;;  %s7580_s24 = sshll.u32 %s7732_s25, 4  ;;  %s7581_s24 = int_to_ptr.vmem [resolvable:$false] %s7580_s24 }
  0xa9   : > { %s7582_s1 = scalar_lea.vmem %s7581_s24, 8192  ;;  %p7583_p5 = scmp.lt.s32.totalorder %s8016_s5, %s7581_s24 }
  0xaa   : > { %p7578_p10 = pnand %p7576_p13, %p7562_p7  ;;  %p7584_p8 = scmp.lt.s32.totalorder %s7582_s1, %s7575_s8 }
  0xac   : > { %p7579_p11 = pneg %p7578_p10  ;;  %p7585_p12 = por %p7584_p8, %p7583_p5 }
  0xae   : > { %p7586_p2 = pnand %p7585_p12, %p7579_p11 }
  0xb0   : > { %7589 = shalt.err (!%p7586_p2)
}
  0xb1   : > { %s11145_s16 = smov 8   ;;  %s11146_s3 = smov 128  }
  0xb2   : > { %6645 = dma.hbm_to_vmem [thread:$0]  (!%p8012_p3), %s8006_s9, 4096, %s8016_s5, %s8018_s4, %s11146_s3, %s11146_s3, %s11145_s16  }
  0xb3   : > { %p11147_p7 = scmp.ne.s32.totalorder %s11137_s26, 0 }
  0xb5   : > { %366 = sbr.rel (%p11147_p7) target bundleno = 3208 (0xc88), region = 56 }
  0xbc   : > { %s368_s6 = sand.u32 1, %s7696_s13   ;;  %p11148_p9 = scmp.ne.s32.totalorder %s11132_s23, 0 }
  0xbd   : > { %s5863_s30 = sshll.u32 %s368_s6, 8  ;;  %s369_s21 = scalar_lea.sflag [#allocation6], %s368_s6 }
  0xbe   : > { %s8052_s12 = scalar_lea.vmem [#allocation5], %s5863_s30 }
  0xbf   : > { %7663 = dma.done.wait (%p11148_p9), %s369_s21, 4096  }
  0xc0   : > { %7665 = vsyncadd (%p11148_p9), %s369_s21, 4294963200  ;;  %p11149_p0 = scmp.ne.s32.totalorder %s11131_s22, 0 }
  0xc2   : > { %7667 = dma.done.wait (%p11149_p0), [#allocation9], 4096  }
  0xc3   : > { %7669 = vsyncadd (%p11149_p0), [#allocation9], 4294963200 }
  0xc4   : > { %7671 = dma.done.wait (%p11149_p0), [#allocation12], 4096  }
  0xc5   : > { %7673 = vsyncadd (%p11149_p0), [#allocation12], 4294963200  ;;  %s420_s5 = sand.u32 1, %s7684_s10   ;;  %p5869_p3 = scmp.ne.s32.totalorder %s7704_s15, 0 }
  0xc6   : > { %s5868_s26 = sshll.u32 %s420_s5, 7  ;;  %v8073_v0 = vld [vmem:[%s8052_s12] sm:$0xff] (!%p5869_p3)  ;;  %v8081_v2 = vld [vmem:[%s8052_s12 + $0x8] sm:$0xff] (!%p5869_p3)  ;;  %v8089_v4 = vld [vmem:[%s8052_s12 + $0x10] sm:$0xff] (!%p5869_p3)  ;;  %s11150_s2 = sld [smem:[#allocation105_spill]] (!%p5869_p3)  ;;  %vm1377_vm0 = vcmask (!%p5869_p3), 261120  }
  0xc7   : > { %s8069_s9 = scalar_lea.vmem [#allocation14], %s5868_s26  ;;  %428 = sbr.rel (%p5869_p3) target bundleno = 1142 (0x476), region = 80  ;;  %v8076_v1 = vld [vmem:[%s8052_s12 + $0xc0] sm:$0xff] (!%p5869_p3)  ;;  %461 = vadd.xlane.f32.xlu0 (!%p5869_p3), %v8073_v0  ;;  %v8084_v3 = vld [vmem:[%s8052_s12 + $0xc8] sm:$0xff] (!%p5869_p3)  ;;  %v8092_v5 = vld [vmem:[%s8052_s12 + $0x18] sm:$0xff] (!%p5869_p3) }
  0xc8   : > { %509 = vadd.xlane.f32.xlu1 (!%p5869_p3), %v8076_v1  ;;  %v8097_v6 = vld [vmem:[%s8052_s12 + $0xd0] sm:$0xff] (!%p5869_p3)  ;;  %v8100_v7 = vld [vmem:[%s8052_s12 + $0xd8] sm:$0xff] (!%p5869_p3)  ;;  %v8103_v8 = vld [vmem:[%s8052_s12 + $0x20] sm:$0xff] (!%p5869_p3)  ;;  %s7734_s4 = smov (!%p5869_p3), 96   ;;  %s7735_s8 = smov (!%p5869_p3), 64  }
  0xc9   : > { %v8106_v9 = vld [vmem:[%s8052_s12 + $0x28] sm:$0xff] (!%p5869_p3)  ;;  %v8111_v10 = vld [vmem:[%s8052_s12 + $0xe0] sm:$0xff] (!%p5869_p3)  ;;  %v8121_v12 = vld [vmem:[%s8052_s12 + $0x30] sm:$0xff] (!%p5869_p3)  ;;  %s7736_s25 = smov (!%p5869_p3), 32  }
  0xca   : > { %v8114_v11 = vld [vmem:[%s8052_s12 + $0xe8] sm:$0xff] (!%p5869_p3)  ;;  %v8124_v13 = vld [vmem:[%s8052_s12 + $0x38] sm:$0xff] (!%p5869_p3)  ;;  %v8129_v14 = vld [vmem:[%s8052_s12 + $0xf0] sm:$0xff] (!%p5869_p3) }
  0xcb   : > { %463 = vadd.xlane.f32.xlu0 (!%p5869_p3), %v8081_v2  ;;  %v8132_v15 = vld [vmem:[%s8052_s12 + $0xf8] sm:$0xff] (!%p5869_p3)  ;;  %v8137_v16 = vld [vmem:[%s8052_s12 + $0x40] sm:$0xff] (!%p5869_p3)  ;;  %v8140_v17 = vld [vmem:[%s8052_s12 + $0x48] sm:$0xff] (!%p5869_p3) }
  0xcc   : > { %511 = vadd.xlane.f32.xlu1 (!%p5869_p3), %v8084_v3  ;;  %v8145_v18 = vld [vmem:[%s8052_s12 + $0x50] sm:$0xff] (!%p5869_p3)  ;;  %v8148_v19 = vld [vmem:[%s8052_s12 + $0x58] sm:$0xff] (!%p5869_p3)  ;;  %v8153_v20 = vld [vmem:[%s8052_s12 + $0x60] sm:$0xff] (!%p5869_p3) }
  0xcd   : > { %v8156_v21 = vld [vmem:[%s8052_s12 + $0x68] sm:$0xff] (!%p5869_p3)  ;;  %v8161_v22 = vld [vmem:[%s8052_s12 + $0x70] sm:$0xff] (!%p5869_p3)  ;;  %v8164_v23 = vld [vmem:[%s8052_s12 + $0x78] sm:$0xff] (!%p5869_p3) }
  0xce   : > { %v8169_v24 = vld [vmem:[%s8052_s12 + $0x80] sm:$0xff]  ;;  %v8172_v25 = vld [vmem:[%s8052_s12 + $0x88] sm:$0xff]  ;;  %v8177_v26 = vld [vmem:[%s8052_s12 + $0x90] sm:$0xff] }
  0xcf   : > { %465 = vadd.xlane.f32.xlu0 %v8089_v4  ;;  %v8180_v27 = vld [vmem:[%s8052_s12 + $0x98] sm:$0xff]  ;;  %v8185_v28 = vld [vmem:[%s8052_s12 + $0xa0] sm:$0xff]  ;;  %v8188_v29 = vld [vmem:[%s8052_s12 + $0xa8] sm:$0xff] }
  0xd0   : > { %467 = vadd.xlane.f32.xlu1 %v8092_v5  ;;  %v8193_v30 = vld [vmem:[%s8052_s12 + $0xb0] sm:$0xff]  ;;  %v8196_v31 = vld [vmem:[%s8052_s12 + $0xb8] sm:$0xff]  ;;  %v6770_v33 = vld [vmem:[#allocation8] ss:$12 sps:$4 sm:$0xff]  }
  0xd1   : > { %v6768_v32 = vld [vmem:[#allocation8 + $0x4] ss:$12 sps:$4 sm:$0xff]   ;;  %v6771_v34 = vld [vmem:[#allocation8 + $0x1c] ss:$12 sps:$4 sm:$0xff]   ;;  %v6774_v36 = vld [vmem:[#allocation8 + $0x34] ss:$12 sps:$4 sm:$0xff]  }
  0xd2   : > { %1007 = vmatprep.subr.bf16.mxu0 %v6768_v32  ;;  %6545 = vmatprep.subr.bf16.mxu1 %v6768_v32  ;;  %v6773_v35 = vld [vmem:[#allocation8 + $0x18] ss:$12 sps:$4 sm:$0xff]  }
  0xd3   : > { %513 = vadd.xlane.f32.xlu0 %v8097_v6  ;;  %1008 = vmatpush1.bf16.msra.mxu0 %v6770_v33 }
  0xd4   : > { %515 = vadd.xlane.f32.xlu1 %v8100_v7  ;;  %6553 = vmatpush1.bf16.msra.mxu1 %v6770_v33 }
  0xd5   : > { %1009 = vmatprep.subr.bf16.mxu0 %v6771_v34  ;;  %6546 = vmatprep.subr.bf16.mxu1 %v6771_v34 }
  0xd7   : > { %469 = vadd.xlane.f32.xlu0 %v8103_v8  ;;  %1010 = vmatpush1.bf16.msra.mxu0 %v6773_v35 }
  0xd8   : > { %471 = vadd.xlane.f32.xlu1 %v8106_v9  ;;  %6554 = vmatpush1.bf16.msra.mxu1 %v6773_v35 }
  0xd9   : > { %1011 = vmatprep.subr.bf16.mxu0 %v6774_v36  ;;  %6547 = vmatprep.subr.bf16.mxu1 %v6774_v36 }
  0xdb   : > { %517 = vadd.xlane.f32.xlu0 %v8111_v10 }
  0xdc   : > { %519 = vadd.xlane.f32.xlu1 %v8114_v11 }
  0xdf   : > { %473 = vadd.xlane.f32.xlu0 %v8121_v12 }
  0xe0   : > { %475 = vadd.xlane.f32.xlu1 %v8124_v13 }
  0xe3   : > { %521 = vadd.xlane.f32.xlu0 %v8129_v14 }
  0xe4   : > { %523 = vadd.xlane.f32.xlu1 %v8132_v15 }
  0xe7   : > { %477 = vadd.xlane.f32.xlu0 %v8137_v16 }
  0xe8   : > { %479 = vadd.xlane.f32.xlu1 %v8140_v17 }
  0xeb   : > { %481 = vadd.xlane.f32.xlu0 %v8145_v18 }
  0xec   : > { %483 = vadd.xlane.f32.xlu1 %v8148_v19 }
  0xef   : > { %485 = vadd.xlane.f32.xlu0 %v8153_v20 }
  0xf0   : > { %487 = vadd.xlane.f32.xlu1 %v8156_v21 }
  0xf3   : > { %489 = vadd.xlane.f32.xlu0 %v8161_v22 }
  0xf4   : > { %491 = vadd.xlane.f32.xlu1 %v8164_v23 }
  0xf7   : > { %493 = vadd.xlane.f32.xlu0 %v8169_v24 }
  0xf8   : > { %495 = vadd.xlane.f32.xlu1 %v8172_v25 }
  0xfb   : > { %497 = vadd.xlane.f32.xlu0 %v8177_v26 }
  0xfc   : > { %499 = vadd.xlane.f32.xlu1 %v8180_v27 }
  0xff   : > { %501 = vadd.xlane.f32.xlu0 %v8185_v28 }
 0x100   : > { %503 = vadd.xlane.f32.xlu1 %v8188_v29 }
 0x103   : > { %505 = vadd.xlane.f32.xlu0 %v8193_v30 }
 0x104   : > { %507 = vadd.xlane.f32.xlu1 %v8196_v31 }
 0x154   : > { %v462_v37 = vpop.xlane.xlu0 %461 }
 0x155   : > { %v510_v38 = vpop.xlane.xlu1 %509  ;;  %v526_v39 = vmul.f32 0.0078125, %v462_v37 }
 0x156   : > { %v550_v40 = vmul.f32 0.0078125, %v510_v38 }
 0x157   : > { %v8201_v41 = vsub.f32 %v8073_v0, %v526_v39 }
 0x158   : > { %v8204_v42 = vsub.f32 %v8076_v1, %v550_v40  ;;  %v464_v43 = vpop.xlane.xlu0 %463 }
 0x159   : > { %v512_v44 = vpop.xlane.xlu1 %511  ;;  %v527_v45 = vmul.f32 0.0078125, %v464_v43  ;;  %v590_v46 = vmul.f32 %v8201_v41, %v8201_v41  ;;  %v6777_v43 = vld [vmem:[#allocation8 + $0x4c] ss:$12 sps:$4 sm:$0xff]  }
 0x15a   : > { %v551_v47 = vmul.f32 0.0078125, %v512_v44  ;;  %v614_v48 = vmul.f32 %v8204_v42, %v8204_v42 }
 0x15b   : > { %622 = vadd.xlane.f32.xlu0 %v590_v46  ;;  %v8211_v49 = vsub.f32 %v8081_v2, %v527_v45 }
 0x15c   : > { %v8214_v50 = vsub.f32 %v8084_v3, %v551_v47  ;;  %v466_v51 = vpop.xlane.xlu0 %465  ;;  %v6779_v47 = vld [vmem:[#allocation8 + $0x48] ss:$12 sps:$4 sm:$0xff]  }
 0x15d   : > { %v468_v52 = vpop.xlane.xlu1 %467  ;;  %v528_v53 = vmul.f32 0.0078125, %v466_v51  ;;  %v591_v54 = vmul.f32 %v8211_v49, %v8211_v49 }
 0x15e   : > { %v529_v55 = vmul.f32 0.0078125, %v468_v52  ;;  %v615_v56 = vmul.f32 %v8214_v50, %v8214_v50 }
 0x15f   : > { %670 = vadd.xlane.f32.xlu0 %v614_v48  ;;  %624 = vadd.xlane.f32.xlu1 %v591_v54  ;;  %v8221_v57 = vsub.f32 %v8089_v4, %v528_v53  ;;  %v6780_v54 = vld [vmem:[#allocation8 + $0x64] ss:$12 sps:$4 sm:$0xff]  }
 0x160   : > { %v8224_v58 = vsub.f32 %v8092_v5, %v529_v55  ;;  %v514_v59 = vpop.xlane.xlu0 %513 }
 0x161   : > { %v516_v60 = vpop.xlane.xlu1 %515  ;;  %v552_v61 = vmul.f32 0.0078125, %v514_v59  ;;  %v592_v62 = vmul.f32 %v8221_v57, %v8221_v57  ;;  %v6782_v59 = vld [vmem:[#allocation8 + $0x60] ss:$12 sps:$4 sm:$0xff]  }
 0x162   : > { %v553_v63 = vmul.f32 0.0078125, %v516_v60  ;;  %v593_v0 = vmul.f32 %v8224_v58, %v8224_v58 }
 0x163   : > { %672 = vadd.xlane.f32.xlu1 %v615_v56  ;;  %626 = vadd.xlane.f32.xlu0 %v592_v62  ;;  %v8231_v1 = vsub.f32 %v8097_v6, %v552_v61 }
 0x164   : > { %v8234_v2 = vsub.f32 %v8100_v7, %v553_v63  ;;  %v470_v3 = vpop.xlane.xlu0 %469  ;;  %v6776_v7 = vld [vmem:[#allocation8 + $0x30] ss:$12 sps:$4 sm:$0xff]  }
 0x165   : > { %v472_v4 = vpop.xlane.xlu1 %471  ;;  %v530_v5 = vmul.f32 0.0078125, %v470_v3  ;;  %v616_v32 = vmul.f32 %v8231_v1, %v8231_v1  ;;  %1012 = vmatpush1.bf16.msra.mxu0 %v6776_v7  ;;  %6555 = vmatpush1.bf16.msra.mxu1 %v6776_v7 }
 0x166   : > { %v531_v33 = vmul.f32 0.0078125, %v472_v4  ;;  %v617_v34 = vmul.f32 %v8234_v2, %v8234_v2  ;;  %1013 = vmatprep.subr.bf16.mxu0 %v6777_v43  ;;  %6548 = vmatprep.subr.bf16.mxu1 %v6777_v43 }
 0x167   : > { %628 = vadd.xlane.f32.xlu1 %v593_v0  ;;  %674 = vadd.xlane.f32.xlu0 %v616_v32  ;;  %v8241_v35 = vsub.f32 %v8103_v8, %v530_v5  ;;  %v6783_v0 = vld [vmem:[#allocation8 + $0x7c] ss:$12 sps:$4 sm:$0xff]   ;;  %v6785_v5 = vld [vmem:[#allocation8 + $0x78] ss:$12 sps:$4 sm:$0xff]  }
 0x168   : > { %v8244_v6 = vsub.f32 %v8106_v9, %v531_v33  ;;  %v518_v36 = vpop.xlane.xlu0 %517 }
 0x169   : > { %v520_v37 = vpop.xlane.xlu1 %519  ;;  %v554_v38 = vmul.f32 0.0078125, %v518_v36  ;;  %v594_v39 = vmul.f32 %v8241_v35, %v8241_v35  ;;  %1014 = vmatpush1.bf16.msra.mxu0 %v6779_v47  ;;  %6556 = vmatpush1.bf16.msra.mxu1 %v6779_v47  ;;  %v6786_v36 = vld [vmem:[#allocation8 + $0x94] ss:$12 sps:$4 sm:$0xff]  }
 0x16a   : > { %v555_v40 = vmul.f32 0.0078125, %v520_v37  ;;  %v595_v8 = vmul.f32 %v8244_v6, %v8244_v6  ;;  %1015 = vmatprep.subr.bf16.mxu0 %v6780_v54  ;;  %6549 = vmatprep.subr.bf16.mxu1 %v6780_v54 }
 0x16b   : > { %676 = vadd.xlane.f32.xlu1 %v617_v34  ;;  %630 = vadd.xlane.f32.xlu0 %v594_v39  ;;  %v8251_v44 = vsub.f32 %v8111_v10, %v554_v38  ;;  %v6788_v39 = vld [vmem:[#allocation8 + $0x90] ss:$12 sps:$4 sm:$0xff]  }
 0x16c   : > { %v8254_v9 = vsub.f32 %v8114_v11, %v555_v40  ;;  %v474_v45 = vpop.xlane.xlu0 %473 }
 0x16d   : > { %v476_v46 = vpop.xlane.xlu1 %475  ;;  %v532_v48 = vmul.f32 0.0078125, %v474_v45  ;;  %v618_v51 = vmul.f32 %v8251_v44, %v8251_v44  ;;  %1016 = vmatpush1.bf16.msra.mxu0 %v6782_v59  ;;  %6557 = vmatpush1.bf16.msra.mxu1 %v6782_v59 }
 0x16e   : > { %v533_v52 = vmul.f32 0.0078125, %v476_v46  ;;  %v619_v10 = vmul.f32 %v8254_v9, %v8254_v9  ;;  %1017 = vmatprep.subr.bf16.mxu0 %v6783_v0  ;;  %6550 = vmatprep.subr.bf16.mxu1 %v6783_v0  ;;  %v6789_v46 = vld [vmem:[#allocation8 + $0xac] ss:$12 sps:$4 sm:$0xff]  }
 0x16f   : > { %632 = vadd.xlane.f32.xlu1 %v595_v8  ;;  %678 = vadd.xlane.f32.xlu0 %v618_v51  ;;  %v8261_v11 = vsub.f32 %v8121_v12, %v532_v48  ;;  %v6791_v51 = vld [vmem:[#allocation8 + $0xa8] ss:$12 sps:$4 sm:$0xff]  }
 0x170   : > { %v8264_v53 = vsub.f32 %v8124_v13, %v533_v52  ;;  %v522_v55 = vpop.xlane.xlu0 %521 }
 0x171   : > { %v524_v56 = vpop.xlane.xlu1 %523  ;;  %v556_v60 = vmul.f32 0.0078125, %v522_v55  ;;  %v596_v61 = vmul.f32 %v8261_v11, %v8261_v11  ;;  %1018 = vmatpush1.bf16.msra.mxu0 %v6785_v5  ;;  %6558 = vmatpush1.bf16.msra.mxu1 %v6785_v5 }
 0x172   : > { %v557_v62 = vmul.f32 0.0078125, %v524_v56  ;;  %v597_v12 = vmul.f32 %v8264_v53, %v8264_v53  ;;  %1019 = vmatprep.subr.bf16.mxu0 %v6786_v36  ;;  %6551 = vmatprep.subr.bf16.mxu1 %v6786_v36 }
 0x173   : > { %680 = vadd.xlane.f32.xlu1 %v619_v10  ;;  %634 = vadd.xlane.f32.xlu0 %v596_v61  ;;  %v8271_v13 = vsub.f32 %v8129_v14, %v556_v60  ;;  %v7733_v60 = vmov 0  }
 0x174   : > { %v8274_v63 = vsub.f32 %v8132_v15, %v557_v62  ;;  %v478_v3 = vpop.xlane.xlu0 %477  ;;  %1039 = vmatprep.mubr.bf16.mxu0 %v7733_v60  ;;  %1159 = vmatprep.mubr.bf16.mxu1 %v7733_v60 }
 0x175   : > { %v480_v4 = vpop.xlane.xlu1 %479  ;;  %v534_v32 = vmul.f32 0.0078125, %v478_v3  ;;  %v620_v33 = vmul.f32 %v8271_v13, %v8271_v13  ;;  %1020 = vmatpush1.bf16.msra.mxu0 %v6788_v39  ;;  %6559 = vmatpush1.bf16.msra.mxu1 %v6788_v39  ;;  %v8318_v3 = vld [vmem:[#allocation8 + $0x8] ss:$12 sps:$4 sm:$0xff]  }
 0x176   : > { %v535_v34 = vmul.f32 0.0078125, %v480_v4  ;;  %v621_v14 = vmul.f32 %v8274_v63, %v8274_v63  ;;  %1021 = vmatprep.subr.bf16.mxu0 %v6789_v46  ;;  %6552 = vmatprep.subr.bf16.mxu1 %v6789_v46 }
 0x177   : > { %636 = vadd.xlane.f32.xlu1 %v597_v12  ;;  %682 = vadd.xlane.f32.xlu0 %v620_v33  ;;  %v8281_v15 = vsub.f32 %v8137_v16, %v534_v32 }
 0x178   : > { %v8284_v7 = vsub.f32 %v8140_v17, %v535_v34  ;;  %v482_v37 = vpop.xlane.xlu0 %481 }
 0x179   : > { %v484_v38 = vpop.xlane.xlu1 %483  ;;  %v536_v40 = vmul.f32 0.0078125, %v482_v37  ;;  %v598_v43 = vmul.f32 %v8281_v15, %v8281_v15  ;;  %1022 = vmatpush1.bf16.msra.mxu0 %v6791_v51  ;;  %6560 = vmatpush1.bf16.msra.mxu1 %v6791_v51 }
 0x17a   : > { %v537_v8 = vmul.f32 0.0078125, %v484_v38  ;;  %v599_v16 = vmul.f32 %v8284_v7, %v8284_v7  ;;  %6465 = vmatprep.subr.bf16.mxu1 %v8318_v3 }
 0x17b   : > { %684 = vadd.xlane.f32.xlu1 %v621_v14  ;;  %638 = vadd.xlane.f32.xlu0 %v598_v43  ;;  %v8291_v17 = vsub.f32 %v8145_v18, %v536_v40 }
 0x17c   : > { %v8294_v45 = vsub.f32 %v8148_v19, %v537_v8  ;;  %v486_v47 = vpop.xlane.xlu0 %485 }
 0x17d   : > { %v488_v48 = vpop.xlane.xlu1 %487  ;;  %v538_v52 = vmul.f32 0.0078125, %v486_v47  ;;  %v600_v10 = vmul.f32 %v8291_v17, %v8291_v17 }
 0x17e   : > { %v539_v54 = vmul.f32 0.0078125, %v488_v48  ;;  %v601_v18 = vmul.f32 %v8294_v45, %v8294_v45 }
 0x17f   : > { %640 = vadd.xlane.f32.xlu1 %v599_v16  ;;  %642 = vadd.xlane.f32.xlu0 %v600_v10  ;;  %v8301_v19 = vsub.f32 %v8153_v20, %v538_v52 }
 0x180   : > { %v8304_v55 = vsub.f32 %v8156_v21, %v539_v54  ;;  %v490_v56 = vpop.xlane.xlu0 %489 }
 0x181   : > { %v492_v59 = vpop.xlane.xlu1 %491  ;;  %v540_v61 = vmul.f32 0.0078125, %v490_v56  ;;  %v602_v62 = vmul.f32 %v8301_v19, %v8301_v19 }
 0x182   : > { %v541_v12 = vmul.f32 0.0078125, %v492_v59  ;;  %v603_v20 = vmul.f32 %v8304_v55, %v8304_v55 }
 0x183   : > { %644 = vadd.xlane.f32.xlu1 %v601_v18  ;;  %646 = vadd.xlane.f32.xlu0 %v602_v62  ;;  %v8313_v21 = vsub.f32 %v8161_v22, %v540_v61 }
 0x184   : > { %v8316_v0 = vsub.f32 %v8164_v23, %v541_v12  ;;  %v494_v4 = vpop.xlane.xlu0 %493 }
 0x185   : > { %v496_v5 = vpop.xlane.xlu1 %495  ;;  %v542_v32 = vmul.f32 0.0078125, %v494_v4  ;;  %v604_v33 = vmul.f32 %v8313_v21, %v8313_v21 }
 0x186   : > { %v543_v34 = vmul.f32 0.0078125, %v496_v5  ;;  %v605_v22 = vmul.f32 %v8316_v0, %v8316_v0 }
 0x187   : > { %648 = vadd.xlane.f32.xlu1 %v603_v20  ;;  %650 = vadd.xlane.f32.xlu0 %v604_v33  ;;  %v8326_v14 = vsub.f32 %v8169_v24, %v542_v32 }
 0x188   : > { %v8329_v23 = vsub.f32 %v8172_v25, %v543_v34  ;;  %v498_v36 = vpop.xlane.xlu0 %497 }
 0x189   : > { %v500_v37 = vpop.xlane.xlu1 %499  ;;  %v544_v38 = vmul.f32 0.0078125, %v498_v36  ;;  %v606_v39 = vmul.f32 %v8326_v14, %v8326_v14 }
 0x18a   : > { %v545_v40 = vmul.f32 0.0078125, %v500_v37  ;;  %v607_v43 = vmul.f32 %v8329_v23, %v8329_v23 }
 0x18b   : > { %652 = vadd.xlane.f32.xlu1 %v605_v22  ;;  %654 = vadd.xlane.f32.xlu0 %v606_v39  ;;  %v8336_v8 = vsub.f32 %v8177_v26, %v544_v38 }
 0x18c   : > { %v8339_v24 = vsub.f32 %v8180_v27, %v545_v40  ;;  %v502_v25 = vpop.xlane.xlu0 %501 }
 0x18d   : > { %v504_v16 = vpop.xlane.xlu1 %503  ;;  %v546_v46 = vmul.f32 0.0078125, %v502_v25  ;;  %v608_v47 = vmul.f32 %v8336_v8, %v8336_v8 }
 0x18e   : > { %v547_v48 = vmul.f32 0.0078125, %v504_v16  ;;  %v609_v51 = vmul.f32 %v8339_v24, %v8339_v24 }
 0x18f   : > { %656 = vadd.xlane.f32.xlu1 %v607_v43  ;;  %658 = vadd.xlane.f32.xlu0 %v608_v47  ;;  %v8346_v52 = vsub.f32 %v8185_v28, %v546_v46 }
 0x190   : > { %v8349_v26 = vsub.f32 %v8188_v29, %v547_v48  ;;  %v506_v27 = vpop.xlane.xlu0 %505 }
 0x191   : > { %v508_v10 = vpop.xlane.xlu1 %507  ;;  %v548_v54 = vmul.f32 0.0078125, %v506_v27  ;;  %v610_v18 = vmul.f32 %v8346_v52, %v8346_v52 }
 0x192   : > { %v549_v56 = vmul.f32 0.0078125, %v508_v10  ;;  %v611_v59 = vmul.f32 %v8349_v26, %v8349_v26 }
 0x193   : > { %660 = vadd.xlane.f32.xlu1 %v609_v51  ;;  %662 = vadd.xlane.f32.xlu0 %v610_v18  ;;  %v8356_v61 = vsub.f32 %v8193_v30, %v548_v54 }
 0x194   : > { %v8359_v28 = vsub.f32 %v8196_v31, %v549_v56 }
 0x195   : > { %v612_v29 = vmul.f32 %v8356_v61, %v8356_v61 }
 0x196   : > { %v613_v62 = vmul.f32 %v8359_v28, %v8359_v28 }
 0x197   : > { %664 = vadd.xlane.f32.xlu1 %v611_v59  ;;  %666 = vadd.xlane.f32.xlu0 %v612_v29 }
 0x19b   : > { %668 = vadd.xlane.f32.xlu1 %v613_v62 }
 0x1e8   : > { %v623_v12 = vpop.xlane.xlu0 %622 }
 0x1e9   : > { %v686_v20 = vmul.f32 0.0078125, %v623_v12 }
 0x1eb   : > { %v718_v4 = vadd.f32 1e-05, %v686_v20 }
 0x1ec   : > { %v625_v5 = vpop.xlane.xlu1 %624  ;;  %v671_v32 = vpop.xlane.xlu0 %670 }
 0x1ed   : > { %v687_v33 = vmul.f32 0.0078125, %v625_v5  ;;  %v710_v30 = vmul.f32 0.0078125, %v671_v32  ;;  %6800 = vrsqrt.f32 %v718_v4 }
 0x1ef   : > { %v719_v34 = vadd.f32 1e-05, %v687_v33  ;;  %v742_v31 = vadd.f32 1e-05, %v710_v30 }
 0x1f0   : > { %v673_v22 = vpop.xlane.xlu1 %672  ;;  %v627_v36 = vpop.xlane.xlu0 %626 }
 0x1f1   : > { %6802 = vrsqrt.f32 %v719_v34  ;;  %v711_v37 = vmul.f32 0.0078125, %v673_v22  ;;  %v688_v38 = vmul.f32 0.0078125, %v627_v36 }
 0x1f2   : > { %6804 = vrsqrt.f32 %v742_v31 }
 0x1f3   : > { %v743_v39 = vadd.f32 1e-05, %v711_v37  ;;  %v720_v40 = vadd.f32 1e-05, %v688_v38 }
 0x1f4   : > { %v629_v43 = vpop.xlane.xlu1 %628  ;;  %v675_v25 = vpop.xlane.xlu0 %674 }
 0x1f5   : > { %6806 = vrsqrt.f32 %v743_v39  ;;  %v689_v16 = vmul.f32 0.0078125, %v629_v43  ;;  %v712_v46 = vmul.f32 0.0078125, %v675_v25  ;;  %v6793_v25 = vld [vmem:[#allocation8 + $0x20] ss:$12 sps:$4 sm:$0xff]  }
 0x1f6   : > { %6808 = vrsqrt.f32 %v720_v40 }
 0x1f7   : > { %v721_v47 = vadd.f32 1e-05, %v689_v16  ;;  %v744_v48 = vadd.f32 1e-05, %v712_v46  ;;  %v6801_v10 = vpop.eup %6800 }
 0x1f8   : > { %v677_v51 = vpop.xlane.xlu1 %676  ;;  %v631_v27 = vpop.xlane.xlu0 %630  ;;  %v782_v20 = vmul.f32 %v6801_v10, %v8201_v41 }
 0x1f9   : > { %6810 = vrsqrt.f32 %v721_v47  ;;  %v713_v54 = vmul.f32 0.0078125, %v677_v51  ;;  %v690_v18 = vmul.f32 0.0078125, %v631_v27 }
 0x1fa   : > { %6812 = vrsqrt.f32 %v744_v48 }
 0x1fb   : > { %v6803_v56 = vpop.eup %6802  ;;  %v745_v59 = vadd.f32 1e-05, %v713_v54  ;;  %v722_v29 = vadd.f32 1e-05, %v690_v18 }
 0x1fc   : > { %v633_v62 = vpop.xlane.xlu1 %632  ;;  %v679_v12 = vpop.xlane.xlu0 %678  ;;  %v783_v4 = vmul.f32 %v6803_v56, %v8211_v49  ;;  %v6794_v56 = vld [vmem:[#allocation8 + $0x38] ss:$12 sps:$4 sm:$0xff]  }
 0x1fd   : > { %v6805_v5 = vpop.eup %6804  ;;  %6814 = vrsqrt.f32 %v745_v59  ;;  %v691_v32 = vmul.f32 0.0078125, %v633_v62  ;;  %v714_v33 = vmul.f32 0.0078125, %v679_v12 }
 0x1fe   : > { %v8367_v30 = vpack.c.bf16 %v783_v4, %v782_v20  ;;  %6816 = vrsqrt.f32 %v722_v29  ;;  %v806_v38 = vmul.f32 %v6805_v5, %v8204_v42 }
 0x1ff   : > { %v6807_v34 = vpop.eup %6806  ;;  %v723_v31 = vadd.f32 1e-05, %v691_v32  ;;  %v746_v22 = vadd.f32 1e-05, %v714_v33  ;;  %v6795_v33 = vld [vmem:[#allocation8 + $0x50] ss:$12 sps:$4 sm:$0xff]  }
 0x200   : > { %v681_v36 = vpop.xlane.xlu1 %680  ;;  %1040 = vmatmul.mubr.bf16.vlgmr.msra.gmra.mrb[0].mxu0 %v8367_v30  ;;  %v635_v37 = vpop.xlane.xlu0 %634  ;;  %v807_v41 = vmul.f32 %v6807_v34, %v8214_v50 }
 0x201   : > { %v6809_v39 = vpop.eup %6808  ;;  %6818 = vrsqrt.f32 %v723_v31  ;;  %v715_v49 = vmul.f32 0.0078125, %v681_v36  ;;  %v692_v40 = vmul.f32 0.0078125, %v635_v37  ;;  %1049 = vmatprep.mubr.bf16.mxu0 %v7733_v60 }
 0x202   : > { %v8373_v43 = vpack.c.bf16 %v807_v41, %v806_v38  ;;  %6820 = vrsqrt.f32 %v746_v22  ;;  %v784_v42 = vmul.f32 %v6809_v39, %v8221_v57 }
 0x203   : > { %v6811_v16 = vpop.eup %6810  ;;  %v747_v46 = vadd.f32 1e-05, %v715_v49  ;;  %v724_v47 = vadd.f32 1e-05, %v692_v40  ;;  %v6796_v49 = vld [vmem:[#allocation8 + $0x68] ss:$12 sps:$4 sm:$0xff]  }
 0x204   : > { %v637_v48 = vpop.xlane.xlu1 %636  ;;  %1160 = vmatmul.mubr.bf16.vlgmr.msra.gmra.mrb[0].mxu1 %v8373_v43  ;;  %v683_v51 = vpop.xlane.xlu0 %682  ;;  %v785_v50 = vmul.f32 %v6811_v16, %v8224_v58 }
 0x205   : > { %v6813_v27 = vpop.eup %6812  ;;  %6822 = vrsqrt.f32 %v747_v46  ;;  %v693_v10 = vmul.f32 0.0078125, %v637_v48  ;;  %v716_v54 = vmul.f32 0.0078125, %v683_v51  ;;  %6466 = vmatpush3.bf16.msra.mxu1 %v8318_v3  ;;  %1169 = vmatprep.mubr.bf16.mxu1 %v7733_v60 }
 0x206   : > { %v8380_v18 = vpack.c.bf16 %v785_v50, %v784_v42  ;;  %6467 = vmatprep.subr.bf16.mxu1 %v6793_v25  ;;  %6824 = vrsqrt.f32 %v724_v47  ;;  %v808_v58 = vmul.f32 %v6813_v27, %v8231_v1  ;;  %v6797_v50 = vld [vmem:[#allocation8 + $0x80] ss:$12 sps:$4 sm:$0xff]  }
 0x207   : > { %v6815_v59 = vpop.eup %6814  ;;  %v725_v29 = vadd.f32 1e-05, %v693_v10  ;;  %v748_v62 = vadd.f32 1e-05, %v716_v54 }
 0x208   : > { %v685_v12 = vpop.xlane.xlu1 %684  ;;  %1050 = vmatmul.mubr.bf16.gmra.mrb[4].mxu0 %v8380_v18  ;;  %v639_v57 = vpop.xlane.xlu0 %638  ;;  %v809_v20 = vmul.f32 %v6815_v59, %v8234_v2 }
 0x209   : > { %v6817_v4 = vpop.eup %6816  ;;  %6826 = vrsqrt.f32 %v725_v29  ;;  %v717_v3 = vmul.f32 0.0078125, %v685_v12  ;;  %v694_v5 = vmul.f32 0.0078125, %v639_v57  ;;  %6468 = vmatpush3.bf16.msra.mxu1 %v6793_v25  ;;  %1059 = vmatprep.mubr.bf16.mxu0 %v7733_v60  ;;  %v6798_v12 = vld [vmem:[#allocation8 + $0x98] ss:$12 sps:$4 sm:$0xff]  }
 0x20a   : > { %v8386_v32 = vpack.c.bf16 %v809_v20, %v808_v58  ;;  %6469 = vmatprep.subr.bf16.mxu1 %v6794_v56  ;;  %6828 = vrsqrt.f32 %v748_v62  ;;  %v786_v2 = vmul.f32 %v6817_v4, %v8241_v35 }
 0x20b   : > { %v6819_v34 = vpop.eup %6818  ;;  %v749_v31 = vadd.f32 1e-05, %v717_v3  ;;  %v726_v22 = vadd.f32 1e-05, %v694_v5 }
 0x20c   : > { %v641_v36 = vpop.xlane.xlu1 %640  ;;  %1170 = vmatmul.mubr.bf16.gmra.mrb[4].mxu1 %v8386_v32  ;;  %v643_v1 = vpop.xlane.xlu0 %642  ;;  %v787_v37 = vmul.f32 %v6819_v34, %v8244_v6  ;;  %v6799_v34 = vld [vmem:[#allocation8 + $0xb0] ss:$12 sps:$4 sm:$0xff]  }
 0x20d   : > { %v6821_v38 = vpop.eup %6820  ;;  %6830 = vrsqrt.f32 %v749_v31  ;;  %v695_v41 = vmul.f32 0.0078125, %v641_v36  ;;  %6470 = vmatpush3.bf16.msra.mxu1 %v6794_v56  ;;  %1179 = vmatprep.mubr.bf16.mxu1 %v7733_v60  ;;  %v696_v16 = vmul.f32 0.0078125, %v643_v1 }
 0x20e   : > { %v8392_v39 = vpack.c.bf16 %v787_v37, %v786_v2  ;;  %6471 = vmatprep.subr.bf16.mxu1 %v6795_v33  ;;  %6832 = vrsqrt.f32 %v726_v22  ;;  %v810_v35 = vmul.f32 %v6821_v38, %v8251_v44 }
 0x20f   : > { %v6823_v40 = vpop.eup %6822  ;;  %v727_v25 = vadd.f32 1e-05, %v695_v41  ;;  %v728_v10 = vadd.f32 1e-05, %v696_v16 }
 0x210   : > { %v645_v46 = vpop.xlane.xlu1 %644  ;;  %1060 = vmatmul.mubr.bf16.gmra.mrb[8].mxu0 %v8392_v39  ;;  %v811_v6 = vmul.f32 %v6823_v40, %v8254_v9  ;;  %v6825_v47 = vpop.eup %6824 }
 0x211   : > { %6834 = vrsqrt.f32 %v727_v25  ;;  %v697_v48 = vmul.f32 0.0078125, %v645_v46  ;;  %v647_v51 = vpop.xlane.xlu0 %646  ;;  %6472 = vmatpush3.bf16.msra.mxu1 %v6795_v33  ;;  %1069 = vmatprep.mubr.bf16.mxu0 %v7733_v60  ;;  %v788_v44 = vmul.f32 %v6825_v47, %v8261_v11 }
 0x212   : > { %v8398_v42 = vpack.c.bf16 %v811_v6, %v810_v35  ;;  %6473 = vmatprep.subr.bf16.mxu1 %v6796_v49  ;;  %v698_v58 = vmul.f32 0.0078125, %v647_v51 }
 0x213   : > { %v6827_v27 = vpop.eup %6826  ;;  %v729_v54 = vadd.f32 1e-05, %v697_v48 }
 0x214   : > { %v649_v56 = vpop.xlane.xlu1 %648  ;;  %1180 = vmatmul.mubr.bf16.gmra.mrb[8].mxu1 %v8398_v42  ;;  %v789_v9 = vmul.f32 %v6827_v27, %v8264_v53  ;;  %v6829_v59 = vpop.eup %6828  ;;  %v730_v22 = vadd.f32 1e-05, %v698_v58 }
 0x215   : > { %6836 = vrsqrt.f32 %v729_v54  ;;  %v699_v29 = vmul.f32 0.0078125, %v649_v56  ;;  %6474 = vmatpush3.bf16.msra.mxu1 %v6796_v49  ;;  %1189 = vmatprep.mubr.bf16.mxu1 %v7733_v60  ;;  %v651_v20 = vpop.xlane.xlu0 %650  ;;  %v812_v11 = vmul.f32 %v6829_v59, %v8271_v13 }
 0x216   : > { %v8404_v62 = vpack.c.bf16 %v789_v9, %v788_v44  ;;  %6475 = vmatprep.subr.bf16.mxu1 %v6797_v50  ;;  %6838 = vrsqrt.f32 %v728_v10  ;;  %v700_v41 = vmul.f32 0.0078125, %v651_v20 }
 0x217   : > { %v6831_v57 = vpop.eup %6830  ;;  %v731_v5 = vadd.f32 1e-05, %v699_v29 }
 0x218   : > { %v653_v4 = vpop.xlane.xlu1 %652  ;;  %1070 = vmatmul.mubr.bf16.gmra.mrb[12].mxu0 %v8404_v62  ;;  %v813_v53 = vmul.f32 %v6831_v57, %v8274_v63  ;;  %v6833_v3 = vpop.eup %6832  ;;  %v732_v16 = vadd.f32 1e-05, %v700_v41 }
 0x219   : > { %6476 = vmatpush3.bf16.msra.mxu1 %v6797_v50  ;;  %1079 = vmatprep.mubr.bf16.mxu0 %v7733_v60  ;;  %v790_v1 = vmul.f32 %v6833_v3, %v8281_v15  ;;  %6840 = vrsqrt.f32 %v731_v5  ;;  %v701_v63 = vmul.f32 0.0078125, %v653_v4  ;;  %v655_v2 = vpop.xlane.xlu0 %654 }
 0x21a   : > { %v8410_v33 = vpack.c.bf16 %v813_v53, %v812_v11  ;;  %6477 = vmatprep.subr.bf16.mxu1 %v6798_v12  ;;  %6842 = vrsqrt.f32 %v730_v22  ;;  %v702_v35 = vmul.f32 0.0078125, %v655_v2 }
 0x21b   : > { %v6835_v31 = vpop.eup %6834  ;;  %v733_v40 = vadd.f32 1e-05, %v701_v63 }
 0x21c   : > { %v657_v36 = vpop.xlane.xlu1 %656  ;;  %1190 = vmatmul.mubr.bf16.gmra.mrb[12].mxu1 %v8410_v33  ;;  %v791_v13 = vmul.f32 %v6835_v31, %v8284_v7  ;;  %v734_v50 = vadd.f32 1e-05, %v702_v35 }
 0x21d   : > { %6478 = vmatpush3.bf16.msra.mxu1 %v6798_v12  ;;  %6481 = vmatprep.mubr.bf16.mxu1 %v8367_v30  ;;  %v703_v15 = vmul.f32 0.0078125, %v657_v36  ;;  %v659_v46 = vpop.xlane.xlu0 %658  ;;  %6844 = vrsqrt.f32 %v733_v40 }
 0x21e   : > { %v818_v37 = vpack.c.bf16 %v791_v13, %v790_v1  ;;  %6479 = vmatprep.subr.bf16.mxu1 %v6799_v34  ;;  %6846 = vrsqrt.f32 %v732_v16 }
 0x21f   : > { %v6837_v38 = vpop.eup %6836  ;;  %v735_v6 = vadd.f32 1e-05, %v703_v15 }
 0x220   : > { %1080 = vmatmul.mubr.bf16.gmra.mrb[16].mxu0 %v818_v37  ;;  %v6839_v49 = vpop.eup %6838  ;;  %v661_v25 = vpop.xlane.xlu1 %660  ;;  %v793_v7 = vmul.f32 %v6837_v38, %v8294_v45 }
 0x221   : > { %6480 = vmatpush3.bf16.msra.mxu1 %v6799_v34  ;;  %1089 = vmatprep.mubr.bf16.mxu0 %v7733_v60  ;;  %v792_v30 = vmul.f32 %v6839_v49, %v8291_v17  ;;  %v705_v10 = vmul.f32 0.0078125, %v661_v25  ;;  %v663_v45 = vpop.xlane.xlu0 %662  ;;  %6848 = vrsqrt.f32 %v735_v6  ;;  %v704_v17 = vmul.f32 0.0078125, %v659_v46 }
 0x222   : > { %6850 = vrsqrt.f32 %v734_v50  ;;  %v706_v56 = vmul.f32 0.0078125, %v663_v45 }
 0x223   : > { %v819_v47 = vpack.c.bf16 %v793_v7, %v792_v30  ;;  %v6841_v48 = vpop.eup %6840  ;;  %v737_v44 = vadd.f32 1e-05, %v705_v10  ;;  %v736_v57 = vadd.f32 1e-05, %v704_v17 }
 0x224   : > { %6482 = vmatmul.mubr.bf16.vlgmr.msra.gmra.mrb[16].mxu1 %v8380_v18  ;;  %v665_v51 = vpop.xlane.xlu1 %664  ;;  %v6843_v27 = vpop.eup %6842  ;;  %v795_v18 = vmul.f32 %v6841_v48, %v8304_v55  ;;  %v738_v58 = vadd.f32 1e-05, %v706_v56 }
 0x225   : > { %6485 = vmatprep.mubr.bf16.mxu1 %v8392_v39  ;;  %v707_v54 = vmul.f32 0.0078125, %v665_v51  ;;  %v794_v39 = vmul.f32 %v6843_v27, %v8301_v19  ;;  %v667_v20 = vpop.xlane.xlu0 %666  ;;  %6852 = vrsqrt.f32 %v737_v44 }
 0x226   : > { %v708_v19 = vmul.f32 0.0078125, %v667_v20 }
 0x227   : > { %v739_v9 = vadd.f32 1e-05, %v707_v54  ;;  %v820_v29 = vpack.c.bf16 %v795_v18, %v794_v39  ;;  %v6845_v12 = vpop.eup %6844 }
 0x228   : > { %1090 = vmatmul.mubr.bf16.gmra.mrb[20].mxu0 %v819_v47  ;;  %v669_v59 = vpop.xlane.xlu1 %668  ;;  %v6847_v4 = vpop.eup %6846  ;;  %v740_v31 = vadd.f32 1e-05, %v708_v19 }
 0x229   : > { %1099 = vmatprep.mubr.bf16.mxu0 %v7733_v60  ;;  %v709_v55 = vmul.f32 0.0078125, %v669_v59  ;;  %6854 = vrsqrt.f32 %v739_v9  ;;  %v796_v53 = vmul.f32 %v6847_v4, %v8313_v21 }
 0x22a   : > { %6856 = vrsqrt.f32 %v736_v57 }
 0x22b   : > { %v6849_v11 = vpop.eup %6848  ;;  %6858 = vrsqrt.f32 %v738_v58  ;;  %v741_v3 = vadd.f32 1e-05, %v709_v55 }
 0x22c   : > { %6486 = vmatmul.mubr.bf16.gmra.mrb[20].mxu1 %v8404_v62  ;;  %v797_v62 = vmul.f32 %v6845_v12, %v8316_v0  ;;  %v6851_v5 = vpop.eup %6850  ;;  %v799_v22 = vmul.f32 %v6849_v11, %v8329_v23 }
 0x22d   : > { %6489 = vmatprep.mubr.bf16.mxu1 %v818_v37  ;;  %6860 = vrsqrt.f32 %v741_v3  ;;  %v798_v36 = vmul.f32 %v6851_v5, %v8326_v14 }
 0x22e   : > { %v821_v34 = vpack.c.bf16 %v797_v62, %v796_v53  ;;  %6862 = vrsqrt.f32 %v740_v31 }
 0x22f   : > { %v6853_v0 = vpop.eup %6852  ;;  %v822_v1 = vpack.c.bf16 %v799_v22, %v798_v36 }
 0x230   : > { %1100 = vmatmul.mubr.bf16.gmra.mrb[24].mxu0 %v820_v29  ;;  %v801_v2 = vmul.f32 %v6853_v0, %v8339_v24 }
 0x231   : > { %1109 = vmatprep.mubr.bf16.mxu0 %v7733_v60 }
 0x233   : > { %v6855_v13 = vpop.eup %6854 }
 0x234   : > { %6490 = vmatmul.mubr.bf16.gmra.mrb[24].mxu1 %v819_v47  ;;  %v6857_v63 = vpop.eup %6856  ;;  %v803_v37 = vmul.f32 %v6855_v13, %v8349_v26 }
 0x235   : > { %6493 = vmatprep.mubr.bf16.mxu1 %v820_v29  ;;  %v6859_v21 = vpop.eup %6858  ;;  %v800_v23 = vmul.f32 %v6857_v63, %v8336_v8  ;;  %v864_v8 = vlaneseq }
 0x236   : > { %v802_v38 = vmul.f32 %v6859_v21, %v8346_v52 }
 0x237   : > { %v823_v14 = vpack.c.bf16 %v801_v2, %v800_v23  ;;  %v6861_v41 = vpop.eup %6860  ;;  %v8444_v52 = vshrl.u32 %v864_v8, 7 }
 0x238   : > { %1110 = vmatmul.mubr.bf16.gmra.mrb[28].mxu0 %v821_v34  ;;  %v824_v49 = vpack.c.bf16 %v803_v37, %v802_v38  ;;  %v6863_v40 = vpop.eup %6862  ;;  %v805_v25 = vmul.f32 %v6861_v41, %v8359_v28  ;;  %v8450_v28 = vld [vmem:[%s11150_s2] sm:$0x7] }
 0x239   : > { %1119 = vmatprep.mubr.bf16.mxu0 %v7733_v60  ;;  %v804_v24 = vmul.f32 %v6863_v40, %v8356_v61  ;;  %v866_v61 = vsub.s32 0, %v8444_v52 }
 0x23b   : > { %v825_v26 = vpack.c.bf16 %v805_v25, %v804_v24 }
 0x23c   : > { %6494 = vmatmul.mubr.bf16.gmra.mrb[28].mxu1 %v821_v34 }
 0x23d   : > { %6497 = vmatprep.mubr.bf16.mxu1 %v822_v1 }
 0x240   : > { %1120 = vmatmul.mubr.bf16.gmra.mrb[32].mxu0 %v822_v1 }
 0x241   : > { %1129 = vmatprep.mubr.bf16.mxu0 %v7733_v60 }
 0x244   : > { %6498 = vmatmul.mubr.bf16.gmra.mrb[32].mxu1 %v823_v14 }
 0x245   : > { %6501 = vmatprep.mubr.bf16.mxu1 %v824_v49 }
 0x248   : > { %1130 = vmatmul.mubr.bf16.gmra.mrb[36].mxu0 %v823_v14 }
 0x249   : > { %1139 = vmatprep.mubr.bf16.mxu0 %v7733_v60 }
 0x24c   : > { %6502 = vmatmul.mubr.bf16.gmra.mrb[36].mxu1 %v825_v26 }
 0x24d   : > { %6505 = vmatprep.mubr.bf16.mxu1 %v8373_v43  ;;  %v870_v43 = vsub.s32 1, %v8444_v52 }
 0x250   : > { %1140 = vmatmul.mubr.bf16.gmra.mrb[40].mxu0 %v824_v49 }
 0x251   : > { %1149 = vmatprep.mubr.bf16.mxu0 %v7733_v60  ;;  %v8454_v60 = vrot.slane %v8450_v28, %v866_v61 }
 0x254   : > { %6506 = vmatmul.mubr.bf16.gmra.mrb[40].mxu1 %v8386_v32 }
 0x255   : > { %6509 = vmatprep.mubr.bf16.mxu1 %v8398_v42  ;;  %v8457_v42 = vrot.slane %v8450_v28, %v870_v43 }
 0x258   : > { %1150 = vmatmul.mubr.bf16.gmra.mrb[44].mxu0 %v825_v26 }
 0x25c   : > { %6510 = vmatmul.mubr.bf16.gmra.mrb[44].mxu1 %v8410_v33 }
 0x2d3   : > { %v1041_v32 = vpop.f32.mrb[0].mxu0 }
 0x2d4   : > { %v1043_v33 = vpop.f32.mrb[1].mxu0  ;;  %v1042_v7 = vadd.f32 %v1041_v32, %v8454_v60 }
 0x2d5   : > { %v1045_v15 = vpop.f32.mrb[2].mxu0  ;;  %v1044_v35 = vadd.f32 %v1043_v33, %v8457_v42 }
 0x2d6   : > { %v1046_v16 = vadd.f32 %v1045_v15, %v8454_v60  ;;  %v1047_v46 = vpop.f32.mrb[3].mxu0 }
 0x2d7   : > { %v1048_v30 = vadd.f32 %v1047_v46, %v8457_v42  ;;  %v1161_v6 = vpop.f32.mrb[0].mxu1 }
 0x2d8   : > { %v8463_v47 = vpack.c.bf16 %v1046_v16, %v1042_v7  ;;  %v1163_v48 = vpop.f32.mrb[1].mxu1  ;;  %v1162_v27 = vadd.f32 %v1161_v6, %v8454_v60 }
 0x2d9   : > { %v8465_v51 = vpack.c.bf16 %v1048_v30, %v1044_v35  ;;  %v1165_v50 = vpop.f32.mrb[2].mxu1  ;;  %v1164_v54 = vadd.f32 %v1163_v48, %v8457_v42 }
 0x2da   : > { %1378 = vst.msk [vmem:[#allocation2] sm:$0xff] %vm1377_vm0, %v8463_v47  ;;  %v1166_v10 = vadd.f32 %v1165_v50, %v8454_v60  ;;  %1474 = vrot.lane.b32.xlu0 %v8463_v47, %s7734_s4  ;;  %v1167_v45 = vpop.f32.mrb[3].mxu1 }
 0x2db   : > { %1410 = vst.msk [vmem:[#allocation3] sm:$0xff] %vm1377_vm0, %v8465_v51  ;;  %v1168_v18 = vadd.f32 %v1167_v45, %v8457_v42  ;;  %v1051_v17 = vpop.f32.mrb[4].mxu0 }
 0x2dc   : > { %v8477_v56 = vpack.c.bf16 %v1166_v10, %v1162_v27  ;;  %v1053_v39 = vpop.f32.mrb[5].mxu0  ;;  %v1052_v59 = vadd.f32 %v1051_v17, %v8454_v60 }
 0x2dd   : > { %v8479_v44 = vpack.c.bf16 %v1168_v18, %v1164_v54  ;;  %v1055_v9 = vpop.f32.mrb[6].mxu0  ;;  %v1054_v57 = vadd.f32 %v1053_v39, %v8457_v42  ;;  %v874_v18 = vsub.s32 2, %v8444_v52 }
 0x2de   : > { %1390 = vst.msk [vmem:[#allocation2 + $0x60] sm:$0xff] %vm1377_vm0, %v8477_v56  ;;  %v1056_v29 = vadd.f32 %v1055_v9, %v8454_v60  ;;  %1498 = vrot.lane.b32.xlu0 %v8477_v56, %s7734_s4  ;;  %v1057_v12 = vpop.f32.mrb[7].mxu0 }
 0x2df   : > { %1422 = vst.msk [vmem:[#allocation3 + $0x60] sm:$0xff] %vm1377_vm0, %v8479_v44  ;;  %v1058_v58 = vadd.f32 %v1057_v12, %v8457_v42  ;;  %v1171_v20 = vpop.f32.mrb[4].mxu1 }
 0x2e0   : > { %v8491_v4 = vpack.c.bf16 %v1056_v29, %v1052_v59  ;;  %v1173_v55 = vpop.f32.mrb[5].mxu1  ;;  %v1172_v11 = vadd.f32 %v1171_v20, %v8454_v60  ;;  %v8585_v20 = vrot.slane %v8450_v28, %v874_v18 }
 0x2e1   : > { %v8493_v62 = vpack.c.bf16 %v1058_v58, %v1054_v57  ;;  %v1175_v19 = vpop.f32.mrb[6].mxu1  ;;  %v1174_v5 = vadd.f32 %v1173_v55, %v8457_v42 }
 0x2e2   : > { %1379 = vst.msk [vmem:[#allocation2 + $0x8] sm:$0xff] %vm1377_vm0, %v8491_v4  ;;  %v1176_v53 = vadd.f32 %v1175_v19, %v8454_v60  ;;  %1701 = vrot.lane.b32.xlu0 %v8463_v47, %s7735_s8  ;;  %1476 = vrot.lane.b32.xlu1 %v8491_v4, %s7734_s4  ;;  %v1177_v3 = vpop.f32.mrb[7].mxu1 }
 0x2e3   : > { %1411 = vst.msk [vmem:[#allocation3 + $0x8] sm:$0xff] %vm1377_vm0, %v8493_v62  ;;  %v1178_v34 = vadd.f32 %v1177_v3, %v8457_v42  ;;  %v1061_v31 = vpop.f32.mrb[8].mxu0 }
 0x2e4   : > { %v8507_v22 = vpack.c.bf16 %v1176_v53, %v1172_v11  ;;  %v1063_v36 = vpop.f32.mrb[9].mxu0  ;;  %v1062_v13 = vadd.f32 %v1061_v31, %v8454_v60 }
 0x2e5   : > { %v8509_v0 = vpack.c.bf16 %v1178_v34, %v1174_v5  ;;  %v1065_v1 = vpop.f32.mrb[10].mxu0  ;;  %v1064_v2 = vadd.f32 %v1063_v36, %v8457_v42 }
 0x2e6   : > { %1391 = vst.msk [vmem:[#allocation2 + $0x68] sm:$0xff] %vm1377_vm0, %v8507_v22  ;;  %v1066_v63 = vadd.f32 %v1065_v1, %v8454_v60  ;;  %1725 = vrot.lane.b32.xlu0 %v8477_v56, %s7735_s8  ;;  %1500 = vrot.lane.b32.xlu1 %v8507_v22, %s7734_s4  ;;  %v1067_v21 = vpop.f32.mrb[11].mxu0 }
 0x2e7   : > { %1423 = vst.msk [vmem:[#allocation3 + $0x68] sm:$0xff] %vm1377_vm0, %v8509_v0  ;;  %v1068_v37 = vadd.f32 %v1067_v21, %v8457_v42  ;;  %v1181_v23 = vpop.f32.mrb[8].mxu1 }
 0x2e8   : > { %v8523_v38 = vpack.c.bf16 %v1066_v63, %v1062_v13  ;;  %v1183_v14 = vpop.f32.mrb[9].mxu1  ;;  %v1182_v40 = vadd.f32 %v1181_v23, %v8454_v60 }
 0x2e9   : > { %v8525_v41 = vpack.c.bf16 %v1068_v37, %v1064_v2  ;;  %v1185_v49 = vpop.f32.mrb[10].mxu1  ;;  %v1184_v26 = vadd.f32 %v1183_v14, %v8457_v42 }
 0x2ea   : > { %1380 = vst.msk [vmem:[#allocation2 + $0x10] sm:$0xff] %vm1377_vm0, %v8523_v38  ;;  %v1186_v25 = vadd.f32 %v1185_v49, %v8454_v60  ;;  %1896 = vrot.lane.b32.xlu0 %v8463_v47, %s7736_s25  ;;  %1703 = vrot.lane.b32.xlu1 %v8491_v4, %s7735_s8  ;;  %v1187_v24 = vpop.f32.mrb[11].mxu1 }
 0x2eb   : > { %1412 = vst.msk [vmem:[#allocation3 + $0x10] sm:$0xff] %vm1377_vm0, %v8525_v41  ;;  %v1188_v8 = vadd.f32 %v1187_v24, %v8457_v42  ;;  %v1071_v61 = vpop.f32.mrb[12].mxu0 }
 0x2ec   : > { %v8539_v43 = vpack.c.bf16 %v1186_v25, %v1182_v40  ;;  %v1073_v32 = vpop.f32.mrb[13].mxu0  ;;  %v1072_v7 = vadd.f32 %v1071_v61, %v8454_v60 }
 0x2ed   : > { %v8541_v33 = vpack.c.bf16 %v1188_v8, %v1184_v26  ;;  %v1075_v15 = vpop.f32.mrb[14].mxu0  ;;  %v1074_v35 = vadd.f32 %v1073_v32, %v8457_v42 }
 0x2ee   : > { %1392 = vst.msk [vmem:[#allocation2 + $0x70] sm:$0xff] %vm1377_vm0, %v8539_v43  ;;  %v1076_v16 = vadd.f32 %v1075_v15, %v8454_v60  ;;  %1920 = vrot.lane.b32.xlu0 %v8477_v56, %s7736_s25  ;;  %1727 = vrot.lane.b32.xlu1 %v8507_v22, %s7735_s8  ;;  %v1077_v46 = vpop.f32.mrb[15].mxu0 }
 0x2ef   : > { %1424 = vst.msk [vmem:[#allocation3 + $0x70] sm:$0xff] %vm1377_vm0, %v8541_v33  ;;  %v1078_v30 = vadd.f32 %v1077_v46, %v8457_v42  ;;  %v1191_v6 = vpop.f32.mrb[12].mxu1 }
 0x2f0   : > { %v8555_v47 = vpack.c.bf16 %v1076_v16, %v1072_v7  ;;  %v1193_v48 = vpop.f32.mrb[13].mxu1  ;;  %v1192_v10 = vadd.f32 %v1191_v6, %v8454_v60 }
 0x2f1   : > { %v8557_v50 = vpack.c.bf16 %v1078_v30, %v1074_v35  ;;  %v1195_v27 = vpop.f32.mrb[14].mxu1  ;;  %v1194_v17 = vadd.f32 %v1193_v48, %v8457_v42 }
 0x2f2   : > { %1381 = vst.msk [vmem:[#allocation2 + $0x18] sm:$0xff] %vm1377_vm0, %v8555_v47  ;;  %v1196_v45 = vadd.f32 %v1195_v27, %v8454_v60  ;;  %1555 = vrot.lane.b32.xlu0 %v8465_v51, %s7734_s4  ;;  %1898 = vrot.lane.b32.xlu1 %v8491_v4, %s7736_s25  ;;  %v1197_v54 = vpop.f32.mrb[15].mxu1 }
 0x2f3   : > { %1413 = vst.msk [vmem:[#allocation3 + $0x18] sm:$0xff] %vm1377_vm0, %v8557_v50  ;;  %v1198_v56 = vadd.f32 %v1197_v54, %v8457_v42  ;;  %v1081_v39 = vpop.f32.mrb[16].mxu0 }
 0x2f4   : > { %v8572_v9 = vpack.c.bf16 %v1196_v45, %v1192_v10  ;;  %v1083_v59 = vpop.f32.mrb[17].mxu0  ;;  %v1082_v57 = vadd.f32 %v1081_v39, %v8454_v60 }
 0x2f5   : > { %v8574_v29 = vpack.c.bf16 %v1198_v56, %v1194_v17  ;;  %v1085_v12 = vpop.f32.mrb[18].mxu0  ;;  %v1084_v4 = vadd.f32 %v1083_v59, %v8457_v42 }
 0x2f6   : > { %1393 = vst.msk [vmem:[#allocation2 + $0x78] sm:$0xff] %vm1377_vm0, %v8572_v9  ;;  %v1086_v52 = vadd.f32 %v1085_v12, %v8454_v60  ;;  %1579 = vrot.lane.b32.xlu0 %v8479_v44, %s7734_s4  ;;  %1922 = vrot.lane.b32.xlu1 %v8507_v22, %s7736_s25  ;;  %v1087_v58 = vpop.f32.mrb[19].mxu0 }
 0x2f7   : > { %1425 = vst.msk [vmem:[#allocation3 + $0x78] sm:$0xff] %vm1377_vm0, %v8574_v29  ;;  %v1088_v55 = vadd.f32 %v1087_v58, %v8457_v42  ;;  %v6483_v19 = vpop.f32.mrb[16].mxu1 }
 0x2f8   : > { %v8591_v11 = vpack.c.bf16 %v1086_v52, %v1082_v57  ;;  %v1234_v53 = vpop.f32.mrb[17].mxu1  ;;  %v1243_v28 = vadd.f32 %v6483_v19, %v8585_v20 }
 0x2f9   : > { %v8593_v3 = vpack.c.bf16 %v1088_v55, %v1084_v4  ;;  %v6484_v5 = vpop.f32.mrb[18].mxu1  ;;  %v1235_v22 = vadd.f32 %v1234_v53, %v8585_v20 }
 0x2fa   : > { %1382 = vst.msk [vmem:[#allocation2 + $0x20] sm:$0xff] %vm1377_vm0, %v8591_v11  ;;  %v1246_v34 = vadd.f32 %v6484_v5, %v8585_v20  ;;  %1766 = vrot.lane.b32.xlu0 %v8465_v51, %s7735_s8  ;;  %1557 = vrot.lane.b32.xlu1 %v8493_v62, %s7734_s4  ;;  %v1237_v31 = vpop.f32.mrb[19].mxu1 }
 0x2fb   : > { %1414 = vst.msk [vmem:[#allocation3 + $0x20] sm:$0xff] %vm1377_vm0, %v8593_v3  ;;  %v1238_v36 = vadd.f32 %v1237_v31, %v8585_v20  ;;  %v1091_v1 = vpop.f32.mrb[20].mxu0 }
 0x2fc   : > { %v8607_v13 = vpack.c.bf16 %v1246_v34, %v1243_v28  ;;  %v1093_v63 = vpop.f32.mrb[21].mxu0  ;;  %v1092_v37 = vadd.f32 %v1091_v1, %v8454_v60 }
 0x2fd   : > { %v8609_v21 = vpack.c.bf16 %v1238_v36, %v1235_v22  ;;  %v1095_v2 = vpop.f32.mrb[22].mxu0  ;;  %v1094_v49 = vadd.f32 %v1093_v63, %v8457_v42 }
 0x2fe   : > { %1443 = vst.msk [vmem:[#allocation4 + $0x8] sm:$0xff] %vm1377_vm0, %v8607_v13  ;;  %v1096_v23 = vadd.f32 %v1095_v2, %v8454_v60  ;;  %1790 = vrot.lane.b32.xlu0 %v8479_v44, %s7735_s8  ;;  %1581 = vrot.lane.b32.xlu1 %v8509_v0, %s7734_s4  ;;  %v1097_v14 = vpop.f32.mrb[23].mxu0 }
 0x2ff   : > { %1442 = vst.msk [vmem:[#allocation4] sm:$0xff] %vm1377_vm0, %v8609_v21  ;;  %v1098_v40 = vadd.f32 %v1097_v14, %v8457_v42  ;;  %v6487_v25 = vpop.f32.mrb[20].mxu1 }
 0x300   : > { %v8623_v24 = vpack.c.bf16 %v1096_v23, %v1092_v37  ;;  %v1250_v26 = vpop.f32.mrb[21].mxu1  ;;  %v1259_v32 = vadd.f32 %v6487_v25, %v8585_v20 }
 0x301   : > { %v8625_v8 = vpack.c.bf16 %v1098_v40, %v1094_v49  ;;  %v6488_v61 = vpop.f32.mrb[22].mxu1  ;;  %v1251_v16 = vadd.f32 %v1250_v26, %v8585_v20 }
 0x302   : > { %1383 = vst.msk [vmem:[#allocation2 + $0x28] sm:$0xff] %vm1377_vm0, %v8623_v24  ;;  %v1262_v15 = vadd.f32 %v6488_v61, %v8585_v20  ;;  %1961 = vrot.lane.b32.xlu0 %v8465_v51, %s7736_s25  ;;  %1768 = vrot.lane.b32.xlu1 %v8493_v62, %s7735_s8  ;;  %v1253_v7 = vpop.f32.mrb[23].mxu1 }
 0x303   : > { %1415 = vst.msk [vmem:[#allocation3 + $0x28] sm:$0xff] %vm1377_vm0, %v8625_v8  ;;  %v1254_v46 = vadd.f32 %v1253_v7, %v8585_v20  ;;  %v1101_v35 = vpop.f32.mrb[24].mxu0 }
 0x304   : > { %v8639_v30 = vpack.c.bf16 %v1262_v15, %v1259_v32  ;;  %v1103_v6 = vpop.f32.mrb[25].mxu0  ;;  %v1102_v51 = vadd.f32 %v1101_v35, %v8454_v60 }
 0x305   : > { %v8641_v48 = vpack.c.bf16 %v1254_v46, %v1251_v16  ;;  %v1105_v27 = vpop.f32.mrb[26].mxu0  ;;  %v1104_v54 = vadd.f32 %v1103_v6, %v8457_v42 }
 0x306   : > { %1445 = vst.msk [vmem:[#allocation4 + $0x18] sm:$0xff] %vm1377_vm0, %v8639_v30  ;;  %v1106_v10 = vadd.f32 %v1105_v27, %v8454_v60  ;;  %1985 = vrot.lane.b32.xlu0 %v8479_v44, %s7736_s25  ;;  %1792 = vrot.lane.b32.xlu1 %v8509_v0, %s7735_s8  ;;  %v1107_v45 = vpop.f32.mrb[27].mxu0 }
 0x307   : > { %1444 = vst.msk [vmem:[#allocation4 + $0x10] sm:$0xff] %vm1377_vm0, %v8641_v48  ;;  %v1108_v18 = vadd.f32 %v1107_v45, %v8457_v42  ;;  %v6491_v17 = vpop.f32.mrb[24].mxu1 }
 0x308   : > { %v8655_v56 = vpack.c.bf16 %v1106_v10, %v1102_v51  ;;  %v1266_v39 = vpop.f32.mrb[25].mxu1  ;;  %v1275_v44 = vadd.f32 %v6491_v17, %v8585_v20 }
 0x309   : > { %v8657_v59 = vpack.c.bf16 %v1108_v18, %v1104_v54  ;;  %v6492_v12 = vpop.f32.mrb[26].mxu1  ;;  %v1267_v58 = vadd.f32 %v1266_v39, %v8585_v20 }
 0x30a   : > { %1384 = vst.msk [vmem:[#allocation2 + $0x30] sm:$0xff] %vm1377_vm0, %v8655_v56  ;;  %v1278_v57 = vadd.f32 %v6492_v12, %v8585_v20  ;;  %1963 = vrot.lane.b32.xlu1 %v8493_v62, %s7736_s25  ;;  %1502 = vrot.lane.b32.xlu0 %v8539_v43, %s7734_s4  ;;  %v1269_v52 = vpop.f32.mrb[27].mxu1 }
 0x30b   : > { %1416 = vst.msk [vmem:[#allocation3 + $0x30] sm:$0xff] %vm1377_vm0, %v8657_v59  ;;  %v1270_v4 = vadd.f32 %v1269_v52, %v8585_v20  ;;  %v1111_v55 = vpop.f32.mrb[28].mxu0 }
 0x30c   : > { %v8671_v19 = vpack.c.bf16 %v1278_v57, %v1275_v44  ;;  %v1113_v53 = vpop.f32.mrb[29].mxu0  ;;  %v1112_v62 = vadd.f32 %v1111_v55, %v8454_v60 }
 0x30d   : > { %v8673_v5 = vpack.c.bf16 %v1270_v4, %v1267_v58  ;;  %v1115_v28 = vpop.f32.mrb[30].mxu0  ;;  %v1114_v22 = vadd.f32 %v1113_v53, %v8457_v42 }
 0x30e   : > { %1447 = vst.msk [vmem:[#allocation4 + $0x28] sm:$0xff] %vm1377_vm0, %v8671_v19  ;;  %v1116_v34 = vadd.f32 %v1115_v28, %v8454_v60  ;;  %1987 = vrot.lane.b32.xlu1 %v8509_v0, %s7736_s25  ;;  %1705 = vrot.lane.b32.xlu0 %v8523_v38, %s7735_s8  ;;  %v1117_v31 = vpop.f32.mrb[31].mxu0 }
 0x30f   : > { %1446 = vst.msk [vmem:[#allocation4 + $0x20] sm:$0xff] %vm1377_vm0, %v8673_v5  ;;  %v1118_v36 = vadd.f32 %v1117_v31, %v8457_v42  ;;  %v6495_v1 = vpop.f32.mrb[28].mxu1 }
 0x310   : > { %v8687_v63 = vpack.c.bf16 %v1116_v34, %v1112_v62  ;;  %v1282_v2 = vpop.f32.mrb[29].mxu1  ;;  %v1291_v0 = vadd.f32 %v6495_v1, %v8585_v20 }
 0x311   : > { %v8689_v37 = vpack.c.bf16 %v1118_v36, %v1114_v22  ;;  %v6496_v23 = vpop.f32.mrb[30].mxu1  ;;  %v1283_v40 = vadd.f32 %v1282_v2, %v8585_v20 }
 0x312   : > { %1385 = vst.msk [vmem:[#allocation2 + $0x38] sm:$0xff] %vm1377_vm0, %v8687_v63  ;;  %v1294_v14 = vadd.f32 %v6496_v23, %v8585_v20  ;;  %1478 = vrot.lane.b32.xlu1 %v8523_v38, %s7734_s4  ;;  %1729 = vrot.lane.b32.xlu0 %v8539_v43, %s7735_s8  ;;  %v1285_v49 = vpop.f32.mrb[31].mxu1 }
 0x313   : > { %1417 = vst.msk [vmem:[#allocation3 + $0x38] sm:$0xff] %vm1377_vm0, %v8689_v37  ;;  %v1286_v25 = vadd.f32 %v1285_v49, %v8585_v20  ;;  %v1121_v26 = vpop.f32.mrb[32].mxu0 }
 0x314   : > { %v8703_v61 = vpack.c.bf16 %v1294_v14, %v1291_v0  ;;  %v1123_v32 = vpop.f32.mrb[33].mxu0  ;;  %v1122_v16 = vadd.f32 %v1121_v26, %v8454_v60 }
 0x315   : > { %v8705_v15 = vpack.c.bf16 %v1286_v25, %v1283_v40  ;;  %v1125_v7 = vpop.f32.mrb[34].mxu0  ;;  %v1124_v6 = vadd.f32 %v1123_v32, %v8457_v42 }
 0x316   : > { %1449 = vst.msk [vmem:[#allocation4 + $0x38] sm:$0xff] %vm1377_vm0, %v8703_v61  ;;  %v1126_v46 = vadd.f32 %v1125_v7, %v8454_v60  ;;  %1900 = vrot.lane.b32.xlu0 %v8523_v38, %s7736_s25  ;;  %1480 = vrot.lane.b32.xlu1 %v8555_v47, %s7734_s4  ;;  %v1127_v35 = vpop.f32.mrb[35].mxu0 }
 0x317   : > { %1448 = vst.msk [vmem:[#allocation4 + $0x30] sm:$0xff] %vm1377_vm0, %v8705_v15  ;;  %v1128_v27 = vadd.f32 %v1127_v35, %v8457_v42  ;;  %v6499_v51 = vpop.f32.mrb[32].mxu1 }
 0x318   : > { %v8719_v10 = vpack.c.bf16 %v1126_v46, %v1122_v16  ;;  %v1298_v45 = vpop.f32.mrb[33].mxu1  ;;  %v1307_v38 = vadd.f32 %v6499_v51, %v8585_v20 }
 0x319   : > { %v8721_v54 = vpack.c.bf16 %v1128_v27, %v1124_v6  ;;  %v6500_v18 = vpop.f32.mrb[34].mxu1  ;;  %v1299_v12 = vadd.f32 %v1298_v45, %v8585_v20 }
 0x31a   : > { %1386 = vst.msk [vmem:[#allocation2 + $0x40] sm:$0xff] %vm1377_vm0, %v8719_v10  ;;  %v1310_v17 = vadd.f32 %v6500_v18, %v8585_v20  ;;  %1924 = vrot.lane.b32.xlu0 %v8539_v43, %s7736_s25  ;;  %1504 = vrot.lane.b32.xlu1 %v8572_v9, %s7734_s4  ;;  %v1301_v39 = vpop.f32.mrb[35].mxu1 }
 0x31b   : > { %1418 = vst.msk [vmem:[#allocation3 + $0x40] sm:$0xff] %vm1377_vm0, %v8721_v54  ;;  %v1302_v44 = vadd.f32 %v1301_v39, %v8585_v20  ;;  %v1131_v57 = vpop.f32.mrb[36].mxu0 }
 0x31c   : > { %v8735_v52 = vpack.c.bf16 %v1310_v17, %v1307_v38  ;;  %v1133_v58 = vpop.f32.mrb[37].mxu0  ;;  %v1132_v43 = vadd.f32 %v1131_v57, %v8454_v60 }
 0x31d   : > { %v8737_v4 = vpack.c.bf16 %v1302_v44, %v1299_v12  ;;  %v1135_v55 = vpop.f32.mrb[38].mxu0  ;;  %v1134_v62 = vadd.f32 %v1133_v58, %v8457_v42 }
 0x31e   : > { %1451 = vst.msk [vmem:[#allocation4 + $0x48] sm:$0xff] %vm1377_vm0, %v8735_v52  ;;  %v1136_v53 = vadd.f32 %v1135_v55, %v8454_v60  ;;  %1559 = vrot.lane.b32.xlu0 %v8525_v41, %s7734_s4  ;;  %1707 = vrot.lane.b32.xlu1 %v8555_v47, %s7735_s8  ;;  %v1137_v28 = vpop.f32.mrb[39].mxu0 }
 0x31f   : > { %1450 = vst.msk [vmem:[#allocation4 + $0x40] sm:$0xff] %vm1377_vm0, %v8737_v4  ;;  %v1138_v34 = vadd.f32 %v1137_v28, %v8457_v42  ;;  %v6503_v31 = vpop.f32.mrb[36].mxu1 }
 0x320   : > { %v8751_v22 = vpack.c.bf16 %v1136_v53, %v1132_v43  ;;  %v1314_v36 = vpop.f32.mrb[37].mxu1  ;;  %v1323_v23 = vadd.f32 %v6503_v31, %v8585_v20 }
 0x321   : > { %v8753_v1 = vpack.c.bf16 %v1138_v34, %v1134_v62  ;;  %v6504_v2 = vpop.f32.mrb[38].mxu1  ;;  %v1315_v49 = vadd.f32 %v1314_v36, %v8585_v20 }
 0x322   : > { %1387 = vst.msk [vmem:[#allocation2 + $0x48] sm:$0xff] %vm1377_vm0, %v8751_v22  ;;  %v1326_v0 = vadd.f32 %v6504_v2, %v8585_v20  ;;  %1583 = vrot.lane.b32.xlu0 %v8541_v33, %s7734_s4  ;;  %1731 = vrot.lane.b32.xlu1 %v8572_v9, %s7735_s8  ;;  %v1317_v14 = vpop.f32.mrb[39].mxu1 }
 0x323   : > { %1419 = vst.msk [vmem:[#allocation3 + $0x48] sm:$0xff] %vm1377_vm0, %v8753_v1  ;;  %v1318_v40 = vadd.f32 %v1317_v14, %v8585_v20  ;;  %v1141_v25 = vpop.f32.mrb[40].mxu0 }
 0x324   : > { %v8767_v26 = vpack.c.bf16 %v1326_v0, %v1323_v23  ;;  %v1143_v32 = vpop.f32.mrb[41].mxu0  ;;  %v1142_v46 = vadd.f32 %v1141_v25, %v8454_v60 }
 0x325   : > { %v8769_v7 = vpack.c.bf16 %v1318_v40, %v1315_v49  ;;  %v1145_v16 = vpop.f32.mrb[42].mxu0  ;;  %v1144_v27 = vadd.f32 %v1143_v32, %v8457_v42 }
 0x326   : > { %1453 = vst.msk [vmem:[#allocation4 + $0x58] sm:$0xff] %vm1377_vm0, %v8767_v26  ;;  %v1146_v35 = vadd.f32 %v1145_v16, %v8454_v60  ;;  %1770 = vrot.lane.b32.xlu0 %v8525_v41, %s7735_s8  ;;  %1902 = vrot.lane.b32.xlu1 %v8555_v47, %s7736_s25  ;;  %v1147_v6 = vpop.f32.mrb[43].mxu0 }
 0x327   : > { %1452 = vst.msk [vmem:[#allocation4 + $0x50] sm:$0xff] %vm1377_vm0, %v8769_v7  ;;  %v1148_v51 = vadd.f32 %v1147_v6, %v8457_v42  ;;  %v6507_v45 = vpop.f32.mrb[40].mxu1 }
 0x328   : > { %v8783_v18 = vpack.c.bf16 %v1146_v35, %v1142_v46  ;;  %v1330_v38 = vpop.f32.mrb[41].mxu1  ;;  %v1339_v47 = vadd.f32 %v6507_v45, %v8585_v20 }
 0x329   : > { %v8785_v17 = vpack.c.bf16 %v1148_v51, %v1144_v27  ;;  %v6508_v39 = vpop.f32.mrb[42].mxu1  ;;  %v1331_v57 = vadd.f32 %v1330_v38, %v8585_v20 }
 0x32a   : > { %1388 = vst.msk [vmem:[#allocation2 + $0x50] sm:$0xff] %vm1377_vm0, %v8783_v18  ;;  %v1342_v12 = vadd.f32 %v6508_v39, %v8585_v20  ;;  %1794 = vrot.lane.b32.xlu0 %v8541_v33, %s7735_s8  ;;  %1926 = vrot.lane.b32.xlu1 %v8572_v9, %s7736_s25  ;;  %v1333_v44 = vpop.f32.mrb[43].mxu1 }
 0x32b   : > { %1420 = vst.msk [vmem:[#allocation3 + $0x50] sm:$0xff] %vm1377_vm0, %v8785_v17  ;;  %v1334_v58 = vadd.f32 %v1333_v44, %v8585_v20  ;;  %v1151_v55 = vpop.f32.mrb[44].mxu0 }
 0x32c   : > { %v8799_v43 = vpack.c.bf16 %v1342_v12, %v1339_v47  ;;  %v1153_v53 = vpop.f32.mrb[45].mxu0  ;;  %v1152_v9 = vadd.f32 %v1151_v55, %v8454_v60 }
 0x32d   : > { %v8801_v28 = vpack.c.bf16 %v1334_v58, %v1331_v57  ;;  %v1155_v62 = vpop.f32.mrb[46].mxu0  ;;  %v1154_v36 = vadd.f32 %v1153_v53, %v8457_v42 }
 0x32e   : > { %1455 = vst.msk [vmem:[#allocation4 + $0x68] sm:$0xff] %vm1377_vm0, %v8799_v43  ;;  %v1156_v34 = vadd.f32 %v1155_v62, %v8454_v60  ;;  %1965 = vrot.lane.b32.xlu0 %v8525_v41, %s7736_s25  ;;  %1561 = vrot.lane.b32.xlu1 %v8557_v50, %s7734_s4  ;;  %v1157_v31 = vpop.f32.mrb[47].mxu0 }
 0x32f   : > { %1454 = vst.msk [vmem:[#allocation4 + $0x60] sm:$0xff] %vm1377_vm0, %v8801_v28  ;;  %v1158_v2 = vadd.f32 %v1157_v31, %v8457_v42  ;;  %v6511_v23 = vpop.f32.mrb[44].mxu1 }
 0x330   : > { %v8815_v0 = vpack.c.bf16 %v1156_v34, %v1152_v9  ;;  %v1346_v14 = vpop.f32.mrb[45].mxu1  ;;  %v1355_v41 = vadd.f32 %v6511_v23, %v8585_v20 }
 0x331   : > { %v8817_v49 = vpack.c.bf16 %v1158_v2, %v1154_v36  ;;  %v6512_v60 = vpop.f32.mrb[46].mxu1  ;;  %v1347_v25 = vadd.f32 %v1346_v14, %v8585_v20 }
 0x332   : > { %1389 = vst.msk [vmem:[#allocation2 + $0x58] sm:$0xff] %vm1377_vm0, %v8815_v0  ;;  %v1358_v40 = vadd.f32 %v6512_v60, %v8585_v20  ;;  %1989 = vrot.lane.b32.xlu0 %v8541_v33, %s7736_s25  ;;  %1585 = vrot.lane.b32.xlu1 %v8574_v29, %s7734_s4  ;;  %v1349_v42 = vpop.f32.mrb[47].mxu1 }
 0x333   : > { %1421 = vst.msk [vmem:[#allocation3 + $0x58] sm:$0xff] %vm1377_vm0, %v8817_v49  ;;  %v1350_v32 = vadd.f32 %v1349_v42, %v8585_v20 }
 0x334   : > { %v8831_v16 = vpack.c.bf16 %v1358_v40, %v1355_v41 }
 0x335   : > { %v8833_v46 = vpack.c.bf16 %v1350_v32, %v1347_v25 }
 0x336   : > { %1457 = vst.msk [vmem:[#allocation4 + $0x78] sm:$0xff] %vm1377_vm0, %v8831_v16  ;;  %1772 = vrot.lane.b32.xlu1 %v8557_v50, %s7735_s8  ;;  %1482 = vrot.lane.b32.xlu0 %v8591_v11, %s7734_s4 }
 0x337   : > { %1456 = vst.msk [vmem:[#allocation4 + $0x70] sm:$0xff] %vm1377_vm0, %v8833_v46 }
 0x33a   : > { %1796 = vrot.lane.b32.xlu1 %v8574_v29, %s7735_s8  ;;  %1709 = vrot.lane.b32.xlu0 %v8591_v11, %s7735_s8 }
 0x33e   : > { %1967 = vrot.lane.b32.xlu1 %v8557_v50, %s7736_s25  ;;  %1904 = vrot.lane.b32.xlu0 %v8591_v11, %s7736_s25 }
 0x342   : > { %1991 = vrot.lane.b32.xlu1 %v8574_v29, %s7736_s25  ;;  %1563 = vrot.lane.b32.xlu0 %v8593_v3, %s7734_s4 }
 0x346   : > { %1638 = vrot.lane.b32.xlu1 %v8607_v13, %s7734_s4  ;;  %1636 = vrot.lane.b32.xlu0 %v8609_v21, %s7734_s4 }
 0x34a   : > { %1833 = vrot.lane.b32.xlu1 %v8607_v13, %s7735_s8  ;;  %1774 = vrot.lane.b32.xlu0 %v8593_v3, %s7735_s8 }
 0x34c   : > { %v1475_v33 = vpop.permute.xlu0 %1474 }
 0x34d   : > { %1523 = vst.msk [vmem:[#allocation2 + $0x80] sm:$0xff] %vm1377_vm0, %v1475_v33 }
 0x34e   : > { %2028 = vrot.lane.b32.xlu1 %v8607_v13, %s7736_s25  ;;  %1831 = vrot.lane.b32.xlu0 %v8609_v21, %s7735_s8 }
 0x350   : > { %v1499_v50 = vpop.permute.xlu0 %1498 }
 0x351   : > { %1535 = vst.msk [vmem:[#allocation2 + $0xe0] sm:$0xff] %vm1377_vm0, %v1499_v50 }
 0x352   : > { %1969 = vrot.lane.b32.xlu0 %v8593_v3, %s7736_s25  ;;  %1484 = vrot.lane.b32.xlu1 %v8623_v24, %s7734_s4 }
 0x354   : > { %v1477_v29 = vpop.permute.xlu1 %1476  ;;  %v1702_v20 = vpop.permute.xlu0 %1701 }
 0x355   : > { %1524 = vst.msk [vmem:[#allocation2 + $0x88] sm:$0xff] %vm1377_vm0, %v1477_v29  ;;  %1750 = vst.msk [vmem:[#allocation2 + $0x100] sm:$0xff] %vm1377_vm0, %v1702_v20 }
 0x356   : > { %2026 = vrot.lane.b32.xlu0 %v8609_v21, %s7736_s25  ;;  %1642 = vrot.lane.b32.xlu1 %v8639_v30, %s7734_s4 }
 0x358   : > { %v1501_v11 = vpop.permute.xlu1 %1500  ;;  %v1726_v13 = vpop.permute.xlu0 %1725 }
 0x359   : > { %1536 = vst.msk [vmem:[#allocation2 + $0xe8] sm:$0xff] %vm1377_vm0, %v1501_v11  ;;  %1762 = vst.msk [vmem:[#allocation2 + $0x160] sm:$0xff] %vm1377_vm0, %v1726_v13 }
 0x35a   : > { %1640 = vrot.lane.b32.xlu0 %v8641_v48, %s7734_s4  ;;  %1711 = vrot.lane.b32.xlu1 %v8623_v24, %s7735_s8 }
 0x35c   : > { %v1704_v3 = vpop.permute.xlu1 %1703  ;;  %v1897_v35 = vpop.permute.xlu0 %1896 }
 0x35d   : > { %1751 = vst.msk [vmem:[#allocation2 + $0x108] sm:$0xff] %vm1377_vm0, %v1704_v3  ;;  %1945 = vst.msk [vmem:[#allocation2 + $0x180] sm:$0xff] %vm1377_vm0, %v1897_v35 }
 0x35e   : > { %1835 = vrot.lane.b32.xlu0 %v8641_v48, %s7735_s8  ;;  %1837 = vrot.lane.b32.xlu1 %v8639_v30, %s7735_s8 }
 0x360   : > { %v1728_v21 = vpop.permute.xlu1 %1727  ;;  %v1921_v6 = vpop.permute.xlu0 %1920 }
 0x361   : > { %1763 = vst.msk [vmem:[#allocation2 + $0x168] sm:$0xff] %vm1377_vm0, %v1728_v21  ;;  %1957 = vst.msk [vmem:[#allocation2 + $0x1e0] sm:$0xff] %vm1377_vm0, %v1921_v6 }
 0x362   : > { %2030 = vrot.lane.b32.xlu0 %v8641_v48, %s7736_s25  ;;  %1906 = vrot.lane.b32.xlu1 %v8623_v24, %s7736_s25 }
 0x364   : > { %v1899_v27 = vpop.permute.xlu1 %1898  ;;  %v1556_v51 = vpop.permute.xlu0 %1555 }
 0x365   : > { %1946 = vst.msk [vmem:[#allocation2 + $0x188] sm:$0xff] %vm1377_vm0, %v1899_v27  ;;  %1604 = vst.msk [vmem:[#allocation3 + $0x80] sm:$0xff] %vm1377_vm0, %v1556_v51 }
 0x366   : > { %2032 = vrot.lane.b32.xlu1 %v8639_v30, %s7736_s25  ;;  %1486 = vrot.lane.b32.xlu0 %v8655_v56, %s7734_s4 }
 0x368   : > { %v1923_v45 = vpop.permute.xlu1 %1922  ;;  %v1580_v38 = vpop.permute.xlu0 %1579 }
 0x369   : > { %1958 = vst.msk [vmem:[#allocation2 + $0x1e8] sm:$0xff] %vm1377_vm0, %v1923_v45  ;;  %1616 = vst.msk [vmem:[#allocation3 + $0xe0] sm:$0xff] %vm1377_vm0, %v1580_v38 }
 0x36a   : > { %1565 = vrot.lane.b32.xlu1 %v8625_v8, %s7734_s4  ;;  %1713 = vrot.lane.b32.xlu0 %v8655_v56, %s7735_s8 }
 0x36c   : > { %v1558_v24 = vpop.permute.xlu1 %1557  ;;  %v1767_v48 = vpop.permute.xlu0 %1766 }
 0x36d   : > { %1605 = vst.msk [vmem:[#allocation3 + $0x88] sm:$0xff] %vm1377_vm0, %v1558_v24  ;;  %1815 = vst.msk [vmem:[#allocation3 + $0x100] sm:$0xff] %vm1377_vm0, %v1767_v48 }
 0x36e   : > { %1776 = vrot.lane.b32.xlu1 %v8625_v8, %s7735_s8  ;;  %1908 = vrot.lane.b32.xlu0 %v8655_v56, %s7736_s25 }
 0x370   : > { %v1582_v30 = vpop.permute.xlu1 %1581  ;;  %v1791_v39 = vpop.permute.xlu0 %1790 }
 0x371   : > { %1617 = vst.msk [vmem:[#allocation3 + $0xe8] sm:$0xff] %vm1377_vm0, %v1582_v30  ;;  %1827 = vst.msk [vmem:[#allocation3 + $0x160] sm:$0xff] %vm1377_vm0, %v1791_v39 }
 0x372   : > { %1971 = vrot.lane.b32.xlu1 %v8625_v8, %s7736_s25  ;;  %1567 = vrot.lane.b32.xlu0 %v8657_v59, %s7734_s4 }
 0x374   : > { %v1769_v47 = vpop.permute.xlu1 %1768  ;;  %v1962_v12 = vpop.permute.xlu0 %1961 }
 0x375   : > { %1816 = vst.msk [vmem:[#allocation3 + $0x108] sm:$0xff] %vm1377_vm0, %v1769_v47  ;;  %2010 = vst.msk [vmem:[#allocation3 + $0x180] sm:$0xff] %vm1377_vm0, %v1962_v12 }
 0x376   : > { %1646 = vrot.lane.b32.xlu1 %v8671_v19, %s7734_s4  ;;  %1644 = vrot.lane.b32.xlu0 %v8673_v5, %s7734_s4 }
 0x378   : > { %v1793_v56 = vpop.permute.xlu1 %1792  ;;  %v1986_v44 = vpop.permute.xlu0 %1985 }
 0x379   : > { %1828 = vst.msk [vmem:[#allocation3 + $0x168] sm:$0xff] %vm1377_vm0, %v1793_v56  ;;  %2022 = vst.msk [vmem:[#allocation3 + $0x1e0] sm:$0xff] %vm1377_vm0, %v1986_v44 }
 0x37a   : > { %1841 = vrot.lane.b32.xlu1 %v8671_v19, %s7735_s8  ;;  %1778 = vrot.lane.b32.xlu0 %v8657_v59, %s7735_s8 }
 0x37c   : > { %v1964_v8 = vpop.permute.xlu1 %1963  ;;  %v1503_v57 = vpop.permute.xlu0 %1502 }
 0x37d   : > { %2011 = vst.msk [vmem:[#allocation3 + $0x188] sm:$0xff] %vm1377_vm0, %v1964_v8  ;;  %1537 = vst.msk [vmem:[#allocation2 + $0xf0] sm:$0xff] %vm1377_vm0, %v1503_v57 }
 0x37e   : > { %2036 = vrot.lane.b32.xlu1 %v8671_v19, %s7736_s25  ;;  %1839 = vrot.lane.b32.xlu0 %v8673_v5, %s7735_s8 }
 0x380   : > { %v1988_v58 = vpop.permute.xlu1 %1987  ;;  %v1706_v55 = vpop.permute.xlu0 %1705 }
 0x381   : > { %2023 = vst.msk [vmem:[#allocation3 + $0x1e8] sm:$0xff] %vm1377_vm0, %v1988_v58  ;;  %1752 = vst.msk [vmem:[#allocation2 + $0x110] sm:$0xff] %vm1377_vm0, %v1706_v55 }
 0x382   : > { %1973 = vrot.lane.b32.xlu0 %v8657_v59, %s7736_s25  ;;  %1488 = vrot.lane.b32.xlu1 %v8687_v63, %s7734_s4 }
 0x384   : > { %v1479_v53 = vpop.permute.xlu1 %1478  ;;  %v1730_v62 = vpop.permute.xlu0 %1729 }
 0x385   : > { %1525 = vst.msk [vmem:[#allocation2 + $0x90] sm:$0xff] %vm1377_vm0, %v1479_v53  ;;  %1764 = vst.msk [vmem:[#allocation2 + $0x170] sm:$0xff] %vm1377_vm0, %v1730_v62 }
 0x386   : > { %2034 = vrot.lane.b32.xlu0 %v8673_v5, %s7736_s25  ;;  %1650 = vrot.lane.b32.xlu1 %v8703_v61, %s7734_s4 }
 0x388   : > { %v1481_v19 = vpop.permute.xlu1 %1480  ;;  %v1901_v9 = vpop.permute.xlu0 %1900 }
 0x389   : > { %1526 = vst.msk [vmem:[#allocation2 + $0x98] sm:$0xff] %vm1377_vm0, %v1481_v19  ;;  %1947 = vst.msk [vmem:[#allocation2 + $0x190] sm:$0xff] %vm1377_vm0, %v1901_v9 }
 0x38a   : > { %1648 = vrot.lane.b32.xlu0 %v8705_v15, %s7734_s4  ;;  %1715 = vrot.lane.b32.xlu1 %v8687_v63, %s7735_s8 }
 0x38c   : > { %v1505_v59 = vpop.permute.xlu1 %1504  ;;  %v1925_v34 = vpop.permute.xlu0 %1924 }
 0x38d   : > { %1538 = vst.msk [vmem:[#allocation2 + $0xf8] sm:$0xff] %vm1377_vm0, %v1505_v59  ;;  %1959 = vst.msk [vmem:[#allocation2 + $0x1f0] sm:$0xff] %vm1377_vm0, %v1925_v34 }
 0x38e   : > { %1845 = vrot.lane.b32.xlu1 %v8703_v61, %s7735_s8  ;;  %1843 = vrot.lane.b32.xlu0 %v8705_v15, %s7735_s8 }
 0x390   : > { %v1708_v5 = vpop.permute.xlu1 %1707  ;;  %v1560_v31 = vpop.permute.xlu0 %1559 }
 0x391   : > { %1753 = vst.msk [vmem:[#allocation2 + $0x118] sm:$0xff] %vm1377_vm0, %v1708_v5  ;;  %1606 = vst.msk [vmem:[#allocation3 + $0x90] sm:$0xff] %vm1377_vm0, %v1560_v31 }
 0x392   : > { %1910 = vrot.lane.b32.xlu1 %v8687_v63, %s7736_s25  ;;  %2038 = vrot.lane.b32.xlu0 %v8705_v15, %s7736_s25 }
 0x394   : > { %v1732_v36 = vpop.permute.xlu1 %1731  ;;  %v1584_v2 = vpop.permute.xlu0 %1583 }
 0x395   : > { %1765 = vst.msk [vmem:[#allocation2 + $0x178] sm:$0xff] %vm1377_vm0, %v1732_v36  ;;  %1618 = vst.msk [vmem:[#allocation3 + $0xf0] sm:$0xff] %vm1377_vm0, %v1584_v2 }
 0x396   : > { %2040 = vrot.lane.b32.xlu1 %v8703_v61, %s7736_s25  ;;  %1490 = vrot.lane.b32.xlu0 %v8719_v10, %s7734_s4 }
 0x398   : > { %v1903_v23 = vpop.permute.xlu1 %1902  ;;  %v1771_v14 = vpop.permute.xlu0 %1770 }
 0x399   : > { %1948 = vst.msk [vmem:[#allocation2 + $0x198] sm:$0xff] %vm1377_vm0, %v1903_v23  ;;  %1817 = vst.msk [vmem:[#allocation3 + $0x110] sm:$0xff] %vm1377_vm0, %v1771_v14 }
 0x39a   : > { %1569 = vrot.lane.b32.xlu1 %v8689_v37, %s7734_s4  ;;  %1717 = vrot.lane.b32.xlu0 %v8719_v10, %s7735_s8 }
 0x39c   : > { %v1927_v63 = vpop.permute.xlu1 %1926  ;;  %v1795_v15 = vpop.permute.xlu0 %1794 }
 0x39d   : > { %1960 = vst.msk [vmem:[#allocation2 + $0x1f8] sm:$0xff] %vm1377_vm0, %v1927_v63  ;;  %1829 = vst.msk [vmem:[#allocation3 + $0x170] sm:$0xff] %vm1377_vm0, %v1795_v15 }
 0x39e   : > { %1780 = vrot.lane.b32.xlu1 %v8689_v37, %s7735_s8  ;;  %1912 = vrot.lane.b32.xlu0 %v8719_v10, %s7736_s25 }
 0x3a0   : > { %v1562_v61 = vpop.permute.xlu1 %1561  ;;  %v1966_v60 = vpop.permute.xlu0 %1965 }
 0x3a1   : > { %1607 = vst.msk [vmem:[#allocation3 + $0x98] sm:$0xff] %vm1377_vm0, %v1562_v61  ;;  %2012 = vst.msk [vmem:[#allocation3 + $0x190] sm:$0xff] %vm1377_vm0, %v1966_v60 }
 0x3a2   : > { %1975 = vrot.lane.b32.xlu1 %v8689_v37, %s7736_s25  ;;  %1571 = vrot.lane.b32.xlu0 %v8721_v54, %s7734_s4 }
 0x3a4   : > { %v1586_v41 = vpop.permute.xlu1 %1585  ;;  %v1990_v40 = vpop.permute.xlu0 %1989 }
 0x3a5   : > { %1619 = vst.msk [vmem:[#allocation3 + $0xf8] sm:$0xff] %vm1377_vm0, %v1586_v41  ;;  %2024 = vst.msk [vmem:[#allocation3 + $0x1f0] sm:$0xff] %vm1377_vm0, %v1990_v40 }
 0x3a6   : > { %1654 = vrot.lane.b32.xlu1 %v8735_v52, %s7734_s4  ;;  %1652 = vrot.lane.b32.xlu0 %v8737_v4, %s7734_s4 }
 0x3a8   : > { %v1773_v10 = vpop.permute.xlu1 %1772  ;;  %v1483_v42 = vpop.permute.xlu0 %1482 }
 0x3a9   : > { %1818 = vst.msk [vmem:[#allocation3 + $0x118] sm:$0xff] %vm1377_vm0, %v1773_v10  ;;  %1527 = vst.msk [vmem:[#allocation2 + $0xa0] sm:$0xff] %vm1377_vm0, %v1483_v42 }
 0x3aa   : > { %1849 = vrot.lane.b32.xlu1 %v8735_v52, %s7735_s8  ;;  %1782 = vrot.lane.b32.xlu0 %v8721_v54, %s7735_s8 }
 0x3ac   : > { %v1797_v37 = vpop.permute.xlu1 %1796  ;;  %v1710_v25 = vpop.permute.xlu0 %1709 }
 0x3ad   : > { %1830 = vst.msk [vmem:[#allocation3 + $0x178] sm:$0xff] %vm1377_vm0, %v1797_v37  ;;  %1754 = vst.msk [vmem:[#allocation2 + $0x120] sm:$0xff] %vm1377_vm0, %v1710_v25 }
 0x3ae   : > { %2044 = vrot.lane.b32.xlu1 %v8735_v52, %s7736_s25  ;;  %1847 = vrot.lane.b32.xlu0 %v8737_v4, %s7735_s8 }
 0x3b0   : > { %v1968_v32 = vpop.permute.xlu1 %1967  ;;  %v1905_v33 = vpop.permute.xlu0 %1904 }
 0x3b1   : > { %2013 = vst.msk [vmem:[#allocation3 + $0x198] sm:$0xff] %vm1377_vm0, %v1968_v32  ;;  %1949 = vst.msk [vmem:[#allocation2 + $0x1a0] sm:$0xff] %vm1377_vm0, %v1905_v33 }
 0x3b2   : > { %1492 = vrot.lane.b32.xlu1 %v8751_v22, %s7734_s4  ;;  %1977 = vrot.lane.b32.xlu0 %v8721_v54, %s7736_s25 }
 0x3b4   : > { %v1992_v50 = vpop.permute.xlu1 %1991  ;;  %v1564_v29 = vpop.permute.xlu0 %1563 }
 0x3b5   : > { %2025 = vst.msk [vmem:[#allocation3 + $0x1f8] sm:$0xff] %vm1377_vm0, %v1992_v50  ;;  %1608 = vst.msk [vmem:[#allocation3 + $0xa0] sm:$0xff] %vm1377_vm0, %v1564_v29 }
 0x3b6   : > { %1658 = vrot.lane.b32.xlu1 %v8767_v26, %s7734_s4  ;;  %2042 = vrot.lane.b32.xlu0 %v8737_v4, %s7736_s25 }
 0x3b8   : > { %v1639_v52 = vpop.permute.xlu1 %1638  ;;  %v1637_v20 = vpop.permute.xlu0 %1636 }
 0x3b9   : > { %1686 = vst.msk [vmem:[#allocation4 + $0x88] sm:$0xff] %vm1377_vm0, %v1639_v52  ;;  %1685 = vst.msk [vmem:[#allocation4 + $0x80] sm:$0xff] %vm1377_vm0, %v1637_v20 }
 0x3ba   : > { %1719 = vrot.lane.b32.xlu1 %v8751_v22, %s7735_s8  ;;  %1656 = vrot.lane.b32.xlu0 %v8769_v7, %s7734_s4 }
 0x3bc   : > { %v1834_v54 = vpop.permute.xlu1 %1833  ;;  %v1775_v11 = vpop.permute.xlu0 %1774 }
 0x3bd   : > { %1881 = vst.msk [vmem:[#allocation4 + $0x108] sm:$0xff] %vm1377_vm0, %v1834_v54  ;;  %1819 = vst.msk [vmem:[#allocation3 + $0x120] sm:$0xff] %vm1377_vm0, %v1775_v11 }
 0x3be   : > { %1853 = vrot.lane.b32.xlu1 %v8767_v26, %s7735_s8  ;;  %1851 = vrot.lane.b32.xlu0 %v8769_v7, %s7735_s8 }
 0x3c0   : > { %v2029_v4 = vpop.permute.xlu1 %2028  ;;  %v1832_v13 = vpop.permute.xlu0 %1831 }
 0x3c1   : > { %2076 = vst.msk [vmem:[#allocation4 + $0x188] sm:$0xff] %vm1377_vm0, %v2029_v4  ;;  %1880 = vst.msk [vmem:[#allocation4 + $0x100] sm:$0xff] %vm1377_vm0, %v1832_v13 }
 0x3c2   : > { %1914 = vrot.lane.b32.xlu1 %v8751_v22, %s7736_s25  ;;  %2046 = vrot.lane.b32.xlu0 %v8769_v7, %s7736_s25 }
 0x3c4   : > { %v1485_v3 = vpop.permute.xlu1 %1484  ;;  %v1970_v35 = vpop.permute.xlu0 %1969 }
 0x3c5   : > { %1528 = vst.msk [vmem:[#allocation2 + $0xa8] sm:$0xff] %vm1377_vm0, %v1485_v3  ;;  %2014 = vst.msk [vmem:[#allocation3 + $0x1a0] sm:$0xff] %vm1377_vm0, %v1970_v35 }
 0x3c6   : > { %2048 = vrot.lane.b32.xlu1 %v8767_v26, %s7736_s25  ;;  %1494 = vrot.lane.b32.xlu0 %v8783_v18, %s7734_s4 }
 0x3c8   : > { %v1643_v21 = vpop.permute.xlu1 %1642  ;;  %v2027_v6 = vpop.permute.xlu0 %2026 }
 0x3c9   : > { %1688 = vst.msk [vmem:[#allocation4 + $0x98] sm:$0xff] %vm1377_vm0, %v1643_v21  ;;  %2075 = vst.msk [vmem:[#allocation4 + $0x180] sm:$0xff] %vm1377_vm0, %v2027_v6 }
 0x3ca   : > { %1573 = vrot.lane.b32.xlu1 %v8753_v1, %s7734_s4  ;;  %1721 = vrot.lane.b32.xlu0 %v8783_v18, %s7735_s8 }
 0x3cc   : > { %v1712_v22 = vpop.permute.xlu1 %1711  ;;  %v1641_v7 = vpop.permute.xlu0 %1640 }
 0x3cd   : > { %1755 = vst.msk [vmem:[#allocation2 + $0x128] sm:$0xff] %vm1377_vm0, %v1712_v22  ;;  %1687 = vst.msk [vmem:[#allocation4 + $0x90] sm:$0xff] %vm1377_vm0, %v1641_v7 }
 0x3ce   : > { %1784 = vrot.lane.b32.xlu1 %v8753_v1, %s7735_s8  ;;  %1916 = vrot.lane.b32.xlu0 %v8783_v18, %s7736_s25 }
 0x3d0   : > { %v1838_v26 = vpop.permute.xlu1 %1837  ;;  %v1836_v27 = vpop.permute.xlu0 %1835 }
 0x3d1   : > { %1883 = vst.msk [vmem:[#allocation4 + $0x118] sm:$0xff] %vm1377_vm0, %v1838_v26  ;;  %1882 = vst.msk [vmem:[#allocation4 + $0x110] sm:$0xff] %vm1377_vm0, %v1836_v27 }
 0x3d2   : > { %1979 = vrot.lane.b32.xlu1 %v8753_v1, %s7736_s25  ;;  %1575 = vrot.lane.b32.xlu0 %v8785_v17, %s7734_s4 }
 0x3d4   : > { %v1907_v51 = vpop.permute.xlu1 %1906  ;;  %v2031_v45 = vpop.permute.xlu0 %2030 }
 0x3d5   : > { %1950 = vst.msk [vmem:[#allocation2 + $0x1a8] sm:$0xff] %vm1377_vm0, %v1907_v51  ;;  %2077 = vst.msk [vmem:[#allocation4 + $0x190] sm:$0xff] %vm1377_vm0, %v2031_v45 }
 0x3d6   : > { %1662 = vrot.lane.b32.xlu1 %v8799_v43, %s7734_s4  ;;  %1660 = vrot.lane.b32.xlu0 %v8801_v28, %s7734_s4 }
 0x3d8   : > { %v2033_v18 = vpop.permute.xlu1 %2032  ;;  %v1487_v38 = vpop.permute.xlu0 %1486 }
 0x3d9   : > { %2078 = vst.msk [vmem:[#allocation4 + $0x198] sm:$0xff] %vm1377_vm0, %v2033_v18  ;;  %1529 = vst.msk [vmem:[#allocation2 + $0xb0] sm:$0xff] %vm1377_vm0, %v1487_v38 }
 0x3da   : > { %1857 = vrot.lane.b32.xlu1 %v8799_v43, %s7735_s8  ;;  %1786 = vrot.lane.b32.xlu0 %v8785_v17, %s7735_s8 }
 0x3dc   : > { %v1566_v1 = vpop.permute.xlu1 %1565  ;;  %v1714_v24 = vpop.permute.xlu0 %1713 }
 0x3dd   : > { %1609 = vst.msk [vmem:[#allocation3 + $0xa8] sm:$0xff] %vm1377_vm0, %v1566_v1  ;;  %1756 = vst.msk [vmem:[#allocation2 + $0x130] sm:$0xff] %vm1377_vm0, %v1714_v24 }
 0x3de   : > { %2052 = vrot.lane.b32.xlu1 %v8799_v43, %s7736_s25  ;;  %1855 = vrot.lane.b32.xlu0 %v8801_v28, %s7735_s8 }
 0x3e0   : > { %v1777_v48 = vpop.permute.xlu1 %1776  ;;  %v1909_v30 = vpop.permute.xlu0 %1908 }
 0x3e1   : > { %1820 = vst.msk [vmem:[#allocation3 + $0x128] sm:$0xff] %vm1377_vm0, %v1777_v48  ;;  %1951 = vst.msk [vmem:[#allocation2 + $0x1b0] sm:$0xff] %vm1377_vm0, %v1909_v30 }
 0x3e2   : > { %1496 = vrot.lane.b32.xlu1 %v8815_v0, %s7734_s4  ;;  %1981 = vrot.lane.b32.xlu0 %v8785_v17, %s7736_s25 }
 0x3e4   : > { %v1972_v39 = vpop.permute.xlu1 %1971  ;;  %v1568_v47 = vpop.permute.xlu0 %1567 }
 0x3e5   : > { %2015 = vst.msk [vmem:[#allocation3 + $0x1a8] sm:$0xff] %vm1377_vm0, %v1972_v39  ;;  %1610 = vst.msk [vmem:[#allocation3 + $0xb0] sm:$0xff] %vm1377_vm0, %v1568_v47 }
 0x3e6   : > { %1666 = vrot.lane.b32.xlu1 %v8831_v16, %s7734_s4  ;;  %2050 = vrot.lane.b32.xlu0 %v8801_v28, %s7736_s25 }
 0x3e8   : > { %v1647_v43 = vpop.permute.xlu1 %1646  ;;  %v1645_v12 = vpop.permute.xlu0 %1644 }
 0x3e9   : > { %1690 = vst.msk [vmem:[#allocation4 + $0xa8] sm:$0xff] %vm1377_vm0, %v1647_v43  ;;  %1689 = vst.msk [vmem:[#allocation4 + $0xa0] sm:$0xff] %vm1377_vm0, %v1645_v12 }
 0x3ea   : > { %1723 = vrot.lane.b32.xlu1 %v8815_v0, %s7735_s8  ;;  %1664 = vrot.lane.b32.xlu0 %v8833_v46, %s7734_s4 }
 0x3ec   : > { %v1842_v17 = vpop.permute.xlu1 %1841  ;;  %v1779_v56 = vpop.permute.xlu0 %1778 }
 0x3ed   : > { %1885 = vst.msk [vmem:[#allocation4 + $0x128] sm:$0xff] %vm1377_vm0, %v1842_v17  ;;  %1821 = vst.msk [vmem:[#allocation3 + $0x130] sm:$0xff] %vm1377_vm0, %v1779_v56 }
 0x3ee   : > { %1861 = vrot.lane.b32.xlu1 %v8831_v16, %s7735_s8  ;;  %1859 = vrot.lane.b32.xlu0 %v8833_v46, %s7735_s8 }
 0x3f0   : > { %v2037_v28 = vpop.permute.xlu1 %2036  ;;  %v1840_v44 = vpop.permute.xlu0 %1839 }
 0x3f1   : > { %2080 = vst.msk [vmem:[#allocation4 + $0x1a8] sm:$0xff] %vm1377_vm0, %v2037_v28  ;;  %1884 = vst.msk [vmem:[#allocation4 + $0x120] sm:$0xff] %vm1377_vm0, %v1840_v44 }
 0x3f2   : > { %1918 = vrot.lane.b32.xlu1 %v8815_v0, %s7736_s25  ;;  %2054 = vrot.lane.b32.xlu0 %v8833_v46, %s7736_s25 }
 0x3f4   : > { %v1489_v8 = vpop.permute.xlu1 %1488  ;;  %v1974_v57 = vpop.permute.xlu0 %1973 }
 0x3f5   : > { %1530 = vst.msk [vmem:[#allocation2 + $0xb8] sm:$0xff] %vm1377_vm0, %v1489_v8  ;;  %2016 = vst.msk [vmem:[#allocation3 + $0x1b0] sm:$0xff] %vm1377_vm0, %v1974_v57 }
 0x3f6   : > { %1577 = vrot.lane.b32.xlu1 %v8817_v49, %s7734_s4 }
 0x3f8   : > { %v1651_v58 = vpop.permute.xlu1 %1650  ;;  %v2035_v55 = vpop.permute.xlu0 %2034 }
 0x3f9   : > { %1692 = vst.msk [vmem:[#allocation4 + $0xb8] sm:$0xff] %vm1377_vm0, %v1651_v58  ;;  %2079 = vst.msk [vmem:[#allocation4 + $0x1a0] sm:$0xff] %vm1377_vm0, %v2035_v55 }
 0x3fa   : > { %1788 = vrot.lane.b32.xlu1 %v8817_v49, %s7735_s8 }
 0x3fc   : > { %v1716_v0 = vpop.permute.xlu1 %1715  ;;  %v1649_v46 = vpop.permute.xlu0 %1648 }
 0x3fd   : > { %1757 = vst.msk [vmem:[#allocation2 + $0x138] sm:$0xff] %vm1377_vm0, %v1716_v0  ;;  %1691 = vst.msk [vmem:[#allocation4 + $0xb0] sm:$0xff] %vm1377_vm0, %v1649_v46 }
 0x3fe   : > { %1983 = vrot.lane.b32.xlu1 %v8817_v49, %s7736_s25 }
 0x400   : > { %v1846_v53 = vpop.permute.xlu1 %1845  ;;  %v1844_v62 = vpop.permute.xlu0 %1843 }
 0x401   : > { %1887 = vst.msk [vmem:[#allocation4 + $0x138] sm:$0xff] %vm1377_vm0, %v1846_v53  ;;  %1886 = vst.msk [vmem:[#allocation4 + $0x130] sm:$0xff] %vm1377_vm0, %v1844_v62 }
 0x402   : > { %2056 = vrot.lane.b32.xlu1 %v8831_v16, %s7736_s25 }
 0x404   : > { %v1911_v19 = vpop.permute.xlu1 %1910  ;;  %v2039_v9 = vpop.permute.xlu0 %2038 }
 0x405   : > { %1952 = vst.msk [vmem:[#allocation2 + $0x1b8] sm:$0xff] %vm1377_vm0, %v1911_v19  ;;  %2081 = vst.msk [vmem:[#allocation4 + $0x1b0] sm:$0xff] %vm1377_vm0, %v2039_v9 }
 0x408   : > { %v2041_v59 = vpop.permute.xlu1 %2040  ;;  %v1491_v34 = vpop.permute.xlu0 %1490 }
 0x409   : > { %2082 = vst.msk [vmem:[#allocation4 + $0x1b8] sm:$0xff] %vm1377_vm0, %v2041_v59  ;;  %1531 = vst.msk [vmem:[#allocation2 + $0xc0] sm:$0xff] %vm1377_vm0, %v1491_v34 }
 0x40c   : > { %v1570_v49 = vpop.permute.xlu1 %1569  ;;  %v1718_v5 = vpop.permute.xlu0 %1717 }
 0x40d   : > { %1611 = vst.msk [vmem:[#allocation3 + $0xb8] sm:$0xff] %vm1377_vm0, %v1570_v49  ;;  %1758 = vst.msk [vmem:[#allocation2 + $0x140] sm:$0xff] %vm1377_vm0, %v1718_v5 }
 0x410   : > { %v1781_v31 = vpop.permute.xlu1 %1780  ;;  %v1913_v16 = vpop.permute.xlu0 %1912 }
 0x411   : > { %1822 = vst.msk [vmem:[#allocation3 + $0x138] sm:$0xff] %vm1377_vm0, %v1781_v31  ;;  %1953 = vst.msk [vmem:[#allocation2 + $0x1c0] sm:$0xff] %vm1377_vm0, %v1913_v16 }
 0x414   : > { %v1976_v36 = vpop.permute.xlu1 %1975  ;;  %v1572_v2 = vpop.permute.xlu0 %1571 }
 0x415   : > { %2017 = vst.msk [vmem:[#allocation3 + $0x1b8] sm:$0xff] %vm1377_vm0, %v1976_v36  ;;  %1612 = vst.msk [vmem:[#allocation3 + $0xc0] sm:$0xff] %vm1377_vm0, %v1572_v2 }
 0x418   : > { %v1655_v23 = vpop.permute.xlu1 %1654  ;;  %v1653_v14 = vpop.permute.xlu0 %1652 }
 0x419   : > { %1694 = vst.msk [vmem:[#allocation4 + $0xc8] sm:$0xff] %vm1377_vm0, %v1655_v23  ;;  %1693 = vst.msk [vmem:[#allocation4 + $0xc0] sm:$0xff] %vm1377_vm0, %v1653_v14 }
 0x41c   : > { %v1850_v63 = vpop.permute.xlu1 %1849  ;;  %v1783_v15 = vpop.permute.xlu0 %1782 }
 0x41d   : > { %1889 = vst.msk [vmem:[#allocation4 + $0x148] sm:$0xff] %vm1377_vm0, %v1850_v63  ;;  %1823 = vst.msk [vmem:[#allocation3 + $0x140] sm:$0xff] %vm1377_vm0, %v1783_v15 }
 0x420   : > { %v2045_v61 = vpop.permute.xlu1 %2044  ;;  %v1848_v60 = vpop.permute.xlu0 %1847 }
 0x421   : > { %2084 = vst.msk [vmem:[#allocation4 + $0x1c8] sm:$0xff] %vm1377_vm0, %v2045_v61  ;;  %1888 = vst.msk [vmem:[#allocation4 + $0x140] sm:$0xff] %vm1377_vm0, %v1848_v60 }
 0x424   : > { %v1493_v41 = vpop.permute.xlu1 %1492  ;;  %v1978_v40 = vpop.permute.xlu0 %1977 }
 0x425   : > { %1532 = vst.msk [vmem:[#allocation2 + $0xc8] sm:$0xff] %vm1377_vm0, %v1493_v41  ;;  %2018 = vst.msk [vmem:[#allocation3 + $0x1c0] sm:$0xff] %vm1377_vm0, %v1978_v40 }
 0x428   : > { %v1659_v10 = vpop.permute.xlu1 %1658  ;;  %v2043_v42 = vpop.permute.xlu0 %2042 }
 0x429   : > { %1696 = vst.msk [vmem:[#allocation4 + $0xd8] sm:$0xff] %vm1377_vm0, %v1659_v10  ;;  %2083 = vst.msk [vmem:[#allocation4 + $0x1c0] sm:$0xff] %vm1377_vm0, %v2043_v42 }
 0x42c   : > { %v1720_v37 = vpop.permute.xlu1 %1719  ;;  %v1657_v25 = vpop.permute.xlu0 %1656 }
 0x42d   : > { %1759 = vst.msk [vmem:[#allocation2 + $0x148] sm:$0xff] %vm1377_vm0, %v1720_v37  ;;  %1695 = vst.msk [vmem:[#allocation4 + $0xd0] sm:$0xff] %vm1377_vm0, %v1657_v25 }
 0x430   : > { %v1854_v32 = vpop.permute.xlu1 %1853  ;;  %v1852_v33 = vpop.permute.xlu0 %1851 }
 0x431   : > { %1891 = vst.msk [vmem:[#allocation4 + $0x158] sm:$0xff] %vm1377_vm0, %v1854_v32  ;;  %1890 = vst.msk [vmem:[#allocation4 + $0x150] sm:$0xff] %vm1377_vm0, %v1852_v33 }
 0x434   : > { %v1915_v50 = vpop.permute.xlu1 %1914  ;;  %v2047_v29 = vpop.permute.xlu0 %2046 }
 0x435   : > { %1954 = vst.msk [vmem:[#allocation2 + $0x1c8] sm:$0xff] %vm1377_vm0, %v1915_v50  ;;  %2085 = vst.msk [vmem:[#allocation4 + $0x1d0] sm:$0xff] %vm1377_vm0, %v2047_v29 }
 0x438   : > { %v2049_v52 = vpop.permute.xlu1 %2048  ;;  %v1495_v20 = vpop.permute.xlu0 %1494 }
 0x439   : > { %2086 = vst.msk [vmem:[#allocation4 + $0x1d8] sm:$0xff] %vm1377_vm0, %v2049_v52  ;;  %1533 = vst.msk [vmem:[#allocation2 + $0xd0] sm:$0xff] %vm1377_vm0, %v1495_v20 }
 0x43c   : > { %v1574_v54 = vpop.permute.xlu1 %1573  ;;  %v1722_v11 = vpop.permute.xlu0 %1721 }
 0x43d   : > { %1613 = vst.msk [vmem:[#allocation3 + $0xc8] sm:$0xff] %vm1377_vm0, %v1574_v54  ;;  %1760 = vst.msk [vmem:[#allocation2 + $0x150] sm:$0xff] %vm1377_vm0, %v1722_v11 }
 0x440   : > { %v1785_v4 = vpop.permute.xlu1 %1784  ;;  %v1917_v13 = vpop.permute.xlu0 %1916 }
 0x441   : > { %1824 = vst.msk [vmem:[#allocation3 + $0x148] sm:$0xff] %vm1377_vm0, %v1785_v4  ;;  %1955 = vst.msk [vmem:[#allocation2 + $0x1d0] sm:$0xff] %vm1377_vm0, %v1917_v13 }
 0x444   : > { %v1980_v3 = vpop.permute.xlu1 %1979  ;;  %v1576_v35 = vpop.permute.xlu0 %1575 }
 0x445   : > { %2019 = vst.msk [vmem:[#allocation3 + $0x1c8] sm:$0xff] %vm1377_vm0, %v1980_v3  ;;  %1614 = vst.msk [vmem:[#allocation3 + $0xd0] sm:$0xff] %vm1377_vm0, %v1576_v35 }
 0x448   : > { %v1663_v21 = vpop.permute.xlu1 %1662  ;;  %v1661_v6 = vpop.permute.xlu0 %1660 }
 0x449   : > { %1698 = vst.msk [vmem:[#allocation4 + $0xe8] sm:$0xff] %vm1377_vm0, %v1663_v21  ;;  %1697 = vst.msk [vmem:[#allocation4 + $0xe0] sm:$0xff] %vm1377_vm0, %v1661_v6 }
 0x44c   : > { %v1858_v22 = vpop.permute.xlu1 %1857  ;;  %v1787_v7 = vpop.permute.xlu0 %1786 }
 0x44d   : > { %1893 = vst.msk [vmem:[#allocation4 + $0x168] sm:$0xff] %vm1377_vm0, %v1858_v22  ;;  %1825 = vst.msk [vmem:[#allocation3 + $0x150] sm:$0xff] %vm1377_vm0, %v1787_v7 }
 0x450   : > { %v2053_v26 = vpop.permute.xlu1 %2052  ;;  %v1856_v27 = vpop.permute.xlu0 %1855 }
 0x451   : > { %2088 = vst.msk [vmem:[#allocation4 + $0x1e8] sm:$0xff] %vm1377_vm0, %v2053_v26  ;;  %1892 = vst.msk [vmem:[#allocation4 + $0x160] sm:$0xff] %vm1377_vm0, %v1856_v27 }
 0x454   : > { %v1497_v51 = vpop.permute.xlu1 %1496  ;;  %v1982_v45 = vpop.permute.xlu0 %1981 }
 0x455   : > { %1534 = vst.msk [vmem:[#allocation2 + $0xd8] sm:$0xff] %vm1377_vm0, %v1497_v51  ;;  %2020 = vst.msk [vmem:[#allocation3 + $0x1d0] sm:$0xff] %vm1377_vm0, %v1982_v45 }
 0x458   : > { %v1667_v18 = vpop.permute.xlu1 %1666  ;;  %v2051_v38 = vpop.permute.xlu0 %2050 }
 0x459   : > { %1700 = vst.msk [vmem:[#allocation4 + $0xf8] sm:$0xff] %vm1377_vm0, %v1667_v18  ;;  %2087 = vst.msk [vmem:[#allocation4 + $0x1e0] sm:$0xff] %vm1377_vm0, %v2051_v38 }
 0x45c   : > { %v1724_v1 = vpop.permute.xlu1 %1723  ;;  %v1665_v24 = vpop.permute.xlu0 %1664 }
 0x45d   : > { %1761 = vst.msk [vmem:[#allocation2 + $0x158] sm:$0xff] %vm1377_vm0, %v1724_v1  ;;  %1699 = vst.msk [vmem:[#allocation4 + $0xf0] sm:$0xff] %vm1377_vm0, %v1665_v24 }
 0x460   : > { %v1862_v48 = vpop.permute.xlu1 %1861  ;;  %v1860_v30 = vpop.permute.xlu0 %1859 }
 0x461   : > { %1895 = vst.msk [vmem:[#allocation4 + $0x178] sm:$0xff] %vm1377_vm0, %v1862_v48  ;;  %1894 = vst.msk [vmem:[#allocation4 + $0x170] sm:$0xff] %vm1377_vm0, %v1860_v30 }
 0x464   : > { %v1919_v39 = vpop.permute.xlu1 %1918  ;;  %v2055_v47 = vpop.permute.xlu0 %2054 }
 0x465   : > { %1956 = vst.msk [vmem:[#allocation2 + $0x1d8] sm:$0xff] %vm1377_vm0, %v1919_v39  ;;  %2089 = vst.msk [vmem:[#allocation4 + $0x1f0] sm:$0xff] %vm1377_vm0, %v2055_v47 }
 0x468   : > { %v1578_v43 = vpop.permute.xlu1 %1577 }
 0x469   : > { %1615 = vst.msk [vmem:[#allocation3 + $0xd8] sm:$0xff] %vm1377_vm0, %v1578_v43 }
 0x46c   : > { %v1789_v12 = vpop.permute.xlu1 %1788 }
 0x46d   : > { %1826 = vst.msk [vmem:[#allocation3 + $0x158] sm:$0xff] %vm1377_vm0, %v1789_v12 }
 0x470   : > { %v1984_v17 = vpop.permute.xlu1 %1983 }
 0x471   : > { %2021 = vst.msk [vmem:[#allocation3 + $0x1d8] sm:$0xff] %vm1377_vm0, %v1984_v17 }
 0x474   : > { %v2057_v56 = vpop.permute.xlu1 %2056 }
 0x475   : > { %2090 = vst.msk [vmem:[#allocation4 + $0x1f8] sm:$0xff] %vm1377_vm0, %v2057_v56 }
 0x476 PF: > { %v2153_v28 = vld [vmem:[#allocation3 + $0x40] sm:$0xff]  ;;  %vm2273_vm1 = vcmask 261120   ;;  %s5894_s24 = sshll.u32 %s7704_s15, 7  ;;  %v2154_v55 = vld [vmem:[#allocation3 + $0x48] sm:$0xff]  ;;  %v2155_v59 = vld [vmem:[#allocation3 + $0x50] sm:$0xff]  ;;  %s7737_s6 = smov 32  }
 0x477   : > { %v2169_v44 = vld [vmem:[#allocation3 + $0xc0] sm:$0xff]  ;;  %6577 = vmatprep.subr.msk.bf16.mxu0 %vm2273_vm1, %v2153_v28  ;;  %v2170_v0 = vld [vmem:[#allocation3 + $0xc8] sm:$0xff]  ;;  %s2109_s1 = sshra.s32 %s5894_s24, 4  ;;  %v2171_v34 = vld [vmem:[#allocation3 + $0xd0] sm:$0xff]  ;;  %s7738_s30 = smov 64   ;;  %vm4762_vm2 = vcmask 523264  }
 0x478   : > { %v2145_v8 = vld [vmem:[#allocation3] sm:$0xff]  ;;  %6585 = vmatprep.subr.msk.bf16.mxu1 %vm2273_vm1, %v2169_v44  ;;  %v2146_v53 = vld [vmem:[#allocation3 + $0x8] sm:$0xff]  ;;  %s5895_s16 = sshll.u32 %s2109_s1, 3  ;;  %v2147_v31 = vld [vmem:[#allocation3 + $0x10] sm:$0xff]  ;;  %s7739_s21 = smov 96   ;;  %vm4779_vm3 = vcmask 785408  }
 0x479   : > { %v2299_v57 = vsel %vm2273_vm1, %v2145_v8, 0  ;;  %v2161_v58 = vld [vmem:[#allocation3 + $0x80] sm:$0xff]  ;;  %v2162_v62 = vld [vmem:[#allocation3 + $0x88] sm:$0xff]  ;;  %v2302_v19 = vsel %vm2273_vm1, %v2146_v53, 0  ;;  %s9194_s3 = scalar_lea.vmem [#allocation2], %s5895_s16  ;;  %v2163_v16 = vld [vmem:[#allocation3 + $0x90] sm:$0xff]  ;;  %s10557_s26 = scalar_lea.vmem %s8052_s12, %s5894_s24 [#allocation5] }
 0x47a   : > { %6002 = vmatpush3.bf16.xpose.msra.mxu0 %v2299_v57  ;;  %v2484_v46 = vsel %vm2273_vm1, %v2161_v58, 0  ;;  %v2487_v9 = vsel %vm2273_vm1, %v2162_v62, 0  ;;  %v9197_v49 = vld [vmem:[%s9194_s3] sm:$0xff]  ;;  %v2305_v36 = vsel %vm2273_vm1, %v2147_v31, 0  ;;  %v2490_v2 = vsel %vm2273_vm1, %v2163_v16, 0  ;;  %v2156_v23 = vld [vmem:[#allocation3 + $0x58] sm:$0xff] }
 0x47b   : > { %6034 = vmatpush3.bf16.xpose.msra.mxu1 %v2484_v46  ;;  %6578 = vmatprep.subr.msk.bf16.mxu0 %vm2273_vm1, %v2154_v55  ;;  %v9201_v5 = vld [vmem:[%s9194_s3 + $0x80] sm:$0xff]  ;;  %v2172_v14 = vld [vmem:[#allocation3 + $0xd8] sm:$0xff]  ;;  %v2158_v32 = vld [vmem:[#allocation3 + $0x68] sm:$0xff]  ;;  %s11475_s2 = sld [smem:[#allocation107_spill]]  ;;  %s11476_s8 = sld [smem:[#allocation109_spill]] }
 0x47c   : > { %6586 = vmatprep.subr.msk.bf16.mxu1 %vm2273_vm1, %v2170_v0  ;;  %6017 = vmatprep.mubr.msk.bf16.mxu0 %vm2273_vm1, %v9197_v49  ;;  %v2148_v63 = vld [vmem:[#allocation3 + $0x18] sm:$0xff]  ;;  %v2157_v41 = vld [vmem:[#allocation3 + $0x60] sm:$0xff]  ;;  %v2174_v33 = vld [vmem:[#allocation3 + $0xe8] sm:$0xff]  ;;  %s11477_s1 = sld [smem:[#allocation110_spill]]  ;;  %s11478_s16 = sld [smem:[#allocation20_spill]] }
 0x47d   : > { %6049 = vmatprep.mubr.msk.bf16.mxu1 %vm2273_vm1, %v9201_v5  ;;  %v2164_v15 = vld [vmem:[#allocation3 + $0x98] sm:$0xff]  ;;  %v2308_v61 = vsel %vm2273_vm1, %v2148_v63, 0  ;;  %v2173_v40 = vld [vmem:[#allocation3 + $0xe0] sm:$0xff]  ;;  %v2150_v50 = vld [vmem:[#allocation3 + $0x28] sm:$0xff]  ;;  %s10876_s4 = scalar_lea.sflag [#allocation7], %s420_s5  ;;  %s7741_s25 = smov [#allocation14]  }
 0x47e   : > { %v2493_v60 = vsel %vm2273_vm1, %v2164_v15, 0  ;;  %v2149_v10 = vld [vmem:[#allocation3 + $0x20] sm:$0xff]  ;;  %v2166_v29 = vld [vmem:[#allocation3 + $0xa8] sm:$0xff]  ;;  %v2151_v52 = vld [vmem:[#allocation3 + $0x30] sm:$0xff]  ;;  %v2314_v11 = vsel %vm2273_vm1, %v2150_v50, 0  ;;  %s7594_s24 = sshll.u32 %s7741_s25, 4  ;;  %s7595_s24 = int_to_ptr.vmem [resolvable:$false] %s7594_s24 }
 0x47f   : > { %v2165_v42 = vld [vmem:[#allocation3 + $0xa0] sm:$0xff]  ;;  %v2311_v37 = vsel %vm2273_vm1, %v2149_v10, 0  ;;  %v2167_v20 = vld [vmem:[#allocation3 + $0xb0] sm:$0xff]  ;;  %v2499_v4 = vsel %vm2273_vm1, %v2166_v29, 0  ;;  %v2317_v3 = vsel %vm2273_vm1, %v2151_v52, 0  ;;  %v2160_v21 = vld [vmem:[#allocation3 + $0x78] sm:$0xff] }
 0x480   : > { %v2496_v25 = vsel %vm2273_vm1, %v2165_v42, 0  ;;  %v2159_v54 = vld [vmem:[#allocation3 + $0x70] sm:$0xff]  ;;  %v2502_v35 = vsel %vm2273_vm1, %v2167_v20, 0  ;;  %v2176_v6 = vld [vmem:[#allocation3 + $0xf8] sm:$0xff]  ;;  %v2185_v51 = vld [vmem:[#allocation3 + $0x140] sm:$0xff] }
 0x481   : > { %v2175_v13 = vld [vmem:[#allocation3 + $0xf0] sm:$0xff]  ;;  %v2152_v22 = vld [vmem:[#allocation3 + $0x38] sm:$0xff]  ;;  %v2201_v45 = vld [vmem:[#allocation3 + $0x1c0] sm:$0xff] }
 0x482   : > { %6004 = vmatpush3.bf16.xpose.msra.mxu0 %v2302_v19  ;;  %v2168_v7 = vld [vmem:[#allocation3 + $0xb8] sm:$0xff]  ;;  %v2320_v26 = vsel %vm2273_vm1, %v2152_v22, 0  ;;  %v2177_v18 = vld [vmem:[#allocation3 + $0x100] sm:$0xff]  ;;  %v2114_v48 = vld [vmem:[%s9194_s3 + $0x8] sm:$0xff] }
 0x483   : > { %6036 = vmatpush3.bf16.xpose.msra.mxu1 %v2487_v9  ;;  %6579 = vmatprep.subr.msk.bf16.mxu0 %vm2273_vm1, %v2155_v59  ;;  %v2505_v27 = vsel %vm2273_vm1, %v2168_v7, 0  ;;  %v2193_v38 = vld [vmem:[#allocation3 + $0x180] sm:$0xff]  ;;  %v2669_v1 = vsel %vm2273_vm1, %v2177_v18, 0  ;;  %v2186_v30 = vld [vmem:[#allocation3 + $0x148] sm:$0xff]  ;;  %v2115_v28 = vld [vmem:[%s9194_s3 + $0x10] sm:$0xff] }
 0x484   : > { %6587 = vmatprep.subr.msk.bf16.mxu1 %vm2273_vm1, %v2171_v34  ;;  %v2854_v24 = vsel %vm2273_vm1, %v2193_v38, 0  ;;  %v2122_v39 = vld [vmem:[%s9194_s3 + $0x88] sm:$0xff]  ;;  %v2187_v44 = vld [vmem:[#allocation3 + $0x150] sm:$0xff]  ;;  %v2116_v53 = vld [vmem:[%s9194_s3 + $0x18] sm:$0xff] }
 0x485   : > { %v2202_v47 = vld [vmem:[#allocation3 + $0x1c8] sm:$0xff]  ;;  %v2123_v8 = vld [vmem:[%s9194_s3 + $0x90] sm:$0xff]  ;;  %v2188_v62 = vld [vmem:[#allocation3 + $0x158] sm:$0xff] }
 0x486   : > { %v2178_v43 = vld [vmem:[#allocation3 + $0x108] sm:$0xff]  ;;  %v2203_v57 = vld [vmem:[#allocation3 + $0x1d0] sm:$0xff]  ;;  %v2124_v19 = vld [vmem:[%s9194_s3 + $0x98] sm:$0xff] }
 0x487   : > { %v2194_v12 = vld [vmem:[#allocation3 + $0x188] sm:$0xff]  ;;  %v2672_v17 = vsel %vm2273_vm1, %v2178_v43, 0  ;;  %v2179_v58 = vld [vmem:[#allocation3 + $0x110] sm:$0xff]  ;;  %v2204_v9 = vld [vmem:[#allocation3 + $0x1d8] sm:$0xff] }
 0x488   : > { %v2857_v56 = vsel %vm2273_vm1, %v2194_v12, 0  ;;  %v2195_v55 = vld [vmem:[#allocation3 + $0x190] sm:$0xff]  ;;  %v2675_v0 = vsel %vm2273_vm1, %v2179_v58, 0  ;;  %v2180_v59 = vld [vmem:[#allocation3 + $0x118] sm:$0xff]  ;;  %v2117_v31 = vld [vmem:[%s9194_s3 + $0x20] sm:$0xff] }
 0x489   : > { %v2860_v46 = vsel %vm2273_vm1, %v2195_v55, 0  ;;  %v2196_v34 = vld [vmem:[#allocation3 + $0x198] sm:$0xff]  ;;  %v2189_v16 = vld [vmem:[#allocation3 + $0x160] sm:$0xff]  ;;  %v2182_v10 = vld [vmem:[#allocation3 + $0x128] sm:$0xff] }
 0x48a   : > { %6006 = vmatpush3.bf16.xpose.msra.mxu0 %v2305_v36  ;;  %v2125_v36 = vld [vmem:[%s9194_s3 + $0xa0] sm:$0xff]  ;;  %v2198_v42 = vld [vmem:[#allocation3 + $0x1a8] sm:$0xff]  ;;  %v2127_v50 = vld [vmem:[%s9194_s3 + $0xb0] sm:$0xff] }
 0x48b   : > { %6038 = vmatpush3.bf16.xpose.msra.mxu1 %v2490_v2  ;;  %6580 = vmatprep.subr.msk.bf16.mxu0 %vm2273_vm1, %v2156_v23  ;;  %v2205_v2 = vld [vmem:[#allocation3 + $0x1e0] sm:$0xff]  ;;  %v2207_v29 = vld [vmem:[#allocation3 + $0x1f0] sm:$0xff] }
 0x48c   : > { %6588 = vmatprep.subr.msk.bf16.mxu1 %vm2273_vm1, %v2172_v14  ;;  %v2181_v23 = vld [vmem:[#allocation3 + $0x120] sm:$0xff]  ;;  %v2183_v52 = vld [vmem:[#allocation3 + $0x130] sm:$0xff] }
 0x48d   : > { %v2197_v14 = vld [vmem:[#allocation3 + $0x1a0] sm:$0xff]  ;;  %v2681_v63 = vsel %vm2273_vm1, %v2181_v23, 0  ;;  %v2199_v20 = vld [vmem:[#allocation3 + $0x1b0] sm:$0xff] }
 0x48e   : > { %v2866_v15 = vsel %vm2273_vm1, %v2197_v14, 0  ;;  %v2131_v18 = vld [vmem:[%s9194_s3 + $0x110] sm:$0xff] }
 0x48f   : > { %v2139_v38 = vld [vmem:[%s9194_s3 + $0x190] sm:$0xff] }
 0x490   : > { %v2135_v43 = vld [vmem:[%s9194_s3 + $0x130] sm:$0xff] }
 0x491   : > { %v2143_v12 = vld [vmem:[%s9194_s3 + $0x1b0] sm:$0xff] }
 0x492   : > { %6008 = vmatpush3.bf16.xpose.msra.mxu0 %v2308_v61  ;;  %v2118_v61 = vld [vmem:[%s9194_s3 + $0x28] sm:$0xff] }
 0x493   : > { %6040 = vmatpush3.bf16.xpose.msra.mxu1 %v2493_v60  ;;  %6581 = vmatprep.subr.msk.bf16.mxu0 %vm2273_vm1, %v2157_v41  ;;  %v2190_v60 = vld [vmem:[#allocation3 + $0x168] sm:$0xff] }
 0x494   : > { %6589 = vmatprep.subr.msk.bf16.mxu1 %vm2273_vm1, %v2173_v40  ;;  %v2126_v41 = vld [vmem:[%s9194_s3 + $0xa8] sm:$0xff] }
 0x495   : > { %v2206_v40 = vld [vmem:[#allocation3 + $0x1e8] sm:$0xff] }
 0x49a   : > { %6010 = vmatpush3.bf16.xpose.msra.mxu0 %v2311_v37  ;;  %v2684_v37 = vsel %vm2273_vm1, %v2182_v10, 0 }
 0x49b   : > { %6042 = vmatpush3.bf16.xpose.msra.mxu1 %v2496_v25  ;;  %6582 = vmatprep.subr.msk.bf16.mxu0 %vm2273_vm1, %v2158_v32  ;;  %v2869_v25 = vsel %vm2273_vm1, %v2198_v42, 0  ;;  %v2119_v32 = vld [vmem:[%s9194_s3 + $0x30] sm:$0xff] }
 0x49c   : > { %6590 = vmatprep.subr.msk.bf16.mxu1 %vm2273_vm1, %v2174_v33  ;;  %v2191_v33 = vld [vmem:[#allocation3 + $0x170] sm:$0xff] }
 0x4a2   : > { %6012 = vmatpush3.bf16.xpose.msra.mxu0 %v2314_v11  ;;  %v2872_v11 = vsel %vm2273_vm1, %v2199_v20, 0 }
 0x4a3   : > { %6044 = vmatpush3.bf16.xpose.msra.mxu1 %v2499_v4  ;;  %6583 = vmatprep.subr.msk.bf16.mxu0 %vm2273_vm1, %v2159_v54  ;;  %v2687_v54 = vsel %vm2273_vm1, %v2183_v52, 0  ;;  %v2120_v4 = vld [vmem:[%s9194_s3 + $0x38] sm:$0xff] }
 0x4a4   : > { %6591 = vmatprep.subr.msk.bf16.mxu1 %vm2273_vm1, %v2175_v13  ;;  %v2192_v13 = vld [vmem:[#allocation3 + $0x178] sm:$0xff] }
 0x4aa   : > { %6014 = vmatpush3.bf16.xpose.msra.mxu0 %v2317_v3  ;;  %v2128_v3 = vld [vmem:[%s9194_s3 + $0xb8] sm:$0xff] }
 0x4ab   : > { %6046 = vmatpush3.bf16.xpose.msra.mxu1 %v2502_v35  ;;  %6584 = vmatprep.subr.msk.bf16.mxu0 %vm2273_vm1, %v2160_v21  ;;  %v2208_v35 = vld [vmem:[#allocation3 + $0x1f8] sm:$0xff] }
 0x4ac   : > { %6592 = vmatprep.subr.msk.bf16.mxu1 %vm2273_vm1, %v2176_v6  ;;  %v2184_v21 = vld [vmem:[#allocation3 + $0x138] sm:$0xff] }
 0x4ad   : > { %v2200_v6 = vld [vmem:[#allocation3 + $0x1b8] sm:$0xff]  ;;  %v2690_v22 = vsel %vm2273_vm1, %v2184_v21, 0 }
 0x4ae   : > { %v2875_v7 = vsel %vm2273_vm1, %v2200_v6, 0 }
 0x4b2   : > { %6016 = vmatpush3.bf16.xpose.msra.mxu0 %v2320_v26  ;;  %v2129_v26 = vld [vmem:[%s9194_s3 + $0x100] sm:$0xff] }
 0x4b3   : > { %6048 = vmatpush3.bf16.xpose.msra.mxu1 %v2505_v27  ;;  %6593 = vmatprep.subr.msk.bf16.mxu0 %vm2273_vm1, %v2185_v51  ;;  %v2137_v27 = vld [vmem:[%s9194_s3 + $0x180] sm:$0xff]  ;;  %v2130_v51 = vld [vmem:[%s9194_s3 + $0x108] sm:$0xff] }
 0x4b4   : > { %6601 = vmatprep.subr.msk.bf16.mxu1 %vm2273_vm1, %v2201_v45  ;;  %v2138_v45 = vld [vmem:[%s9194_s3 + $0x188] sm:$0xff] }
 0x4b9   : > { %6018 = vmatmul.mubr.msk.bf16.vlgmr.msra.gmra.mrb[0].mxu0 %vm2273_vm1, %v9197_v49  ;;  %v2678_v49 = vsel %vm2273_vm1, %v2180_v59, 0 }
 0x4ba   : > { %6050 = vmatmul.mubr.msk.bf16.vlgmr.msra.gmra.mrb[0].mxu1 %vm2273_vm1, %v9201_v5  ;;  %6066 = vmatpush3.bf16.xpose.msra.mxu0 %v2669_v1  ;;  %v2863_v5 = vsel %vm2273_vm1, %v2196_v34, 0  ;;  %v2132_v1 = vld [vmem:[%s9194_s3 + $0x118] sm:$0xff] }
 0x4bb   : > { %6098 = vmatpush3.bf16.xpose.msra.mxu1 %v2854_v24  ;;  %6019 = vmatprep.mubr.msk.bf16.mxu0 %vm2273_vm1, %v2114_v48  ;;  %v2140_v24 = vld [vmem:[%s9194_s3 + $0x198] sm:$0xff] }
 0x4bc   : > { %6594 = vmatprep.subr.msk.bf16.mxu0 %vm2273_vm1, %v2186_v30  ;;  %6051 = vmatprep.mubr.msk.bf16.mxu1 %vm2273_vm1, %v2122_v39  ;;  %v2141_v30 = vld [vmem:[%s9194_s3 + $0x1a0] sm:$0xff] }
 0x4bd   : > { %6602 = vmatprep.subr.msk.bf16.mxu1 %vm2273_vm1, %v2202_v47  ;;  %v2142_v47 = vld [vmem:[%s9194_s3 + $0x1a8] sm:$0xff] }
 0x4c1   : > { %6020 = vmatmul.mubr.msk.bf16.gmra.mrb[4].mxu0 %vm2273_vm1, %v2114_v48  ;;  %v2133_v48 = vld [vmem:[%s9194_s3 + $0x120] sm:$0xff] }
 0x4c2   : > { %6068 = vmatpush3.bf16.xpose.msra.mxu0 %v2672_v17  ;;  %6052 = vmatmul.mubr.msk.bf16.gmra.mrb[4].mxu1 %vm2273_vm1, %v2122_v39  ;;  %v2134_v39 = vld [vmem:[%s9194_s3 + $0x128] sm:$0xff]  ;;  %v2136_v17 = vld [vmem:[%s9194_s3 + $0x138] sm:$0xff] }
 0x4c3   : > { %6100 = vmatpush3.bf16.xpose.msra.mxu1 %v2857_v56  ;;  %6021 = vmatprep.mubr.msk.bf16.mxu0 %vm2273_vm1, %v2115_v28  ;;  %v2144_v56 = vld [vmem:[%s9194_s3 + $0x1b8] sm:$0xff]  ;;  %s5971_s3 = sshll.u32 %s7704_s15, 4  ;;  %s5722_s15 = sshll.u32 %s8069_s9, 4  ;;  %s10869_s15 = int_to_ptr.vmem [resolvable:$true] %s5722_s15 }
 0x4c4   : > { %6595 = vmatprep.subr.msk.bf16.mxu0 %vm2273_vm1, %v2187_v44  ;;  %6053 = vmatprep.mubr.msk.bf16.mxu1 %vm2273_vm1, %v2123_v8  ;;  %p7597_p10 = scmp.lt.s32.totalorder %s10869_s15, %s7595_s24 }
 0x4c5   : > { %6603 = vmatprep.subr.msk.bf16.mxu1 %vm2273_vm1, %v2203_v57 }
 0x4c9   : > { %6022 = vmatmul.mubr.msk.bf16.gmra.mrb[8].mxu0 %vm2273_vm1, %v2115_v28 }
 0x4ca   : > { %6070 = vmatpush3.bf16.xpose.msra.mxu0 %v2675_v0  ;;  %6054 = vmatmul.mubr.msk.bf16.gmra.mrb[8].mxu1 %vm2273_vm1, %v2123_v8 }
 0x4cb   : > { %6102 = vmatpush3.bf16.xpose.msra.mxu1 %v2860_v46  ;;  %6023 = vmatprep.mubr.msk.bf16.mxu0 %vm2273_vm1, %v2116_v53 }
 0x4cc   : > { %6596 = vmatprep.subr.msk.bf16.mxu0 %vm2273_vm1, %v2188_v62  ;;  %6055 = vmatprep.mubr.msk.bf16.mxu1 %vm2273_vm1, %v2124_v19 }
 0x4cd   : > { %6604 = vmatprep.subr.msk.bf16.mxu1 %vm2273_vm1, %v2204_v9 }
 0x4d1   : > { %6024 = vmatmul.mubr.msk.bf16.gmra.mrb[12].mxu0 %vm2273_vm1, %v2116_v53 }
 0x4d2   : > { %6072 = vmatpush3.bf16.xpose.msra.mxu0 %v2678_v49  ;;  %6056 = vmatmul.mubr.msk.bf16.gmra.mrb[12].mxu1 %vm2273_vm1, %v2124_v19 }
 0x4d3   : > { %6104 = vmatpush3.bf16.xpose.msra.mxu1 %v2863_v5  ;;  %6025 = vmatprep.mubr.msk.bf16.mxu0 %vm2273_vm1, %v2117_v31 }
 0x4d4   : > { %6597 = vmatprep.subr.msk.bf16.mxu0 %vm2273_vm1, %v2189_v16  ;;  %6057 = vmatprep.mubr.msk.bf16.mxu1 %vm2273_vm1, %v2125_v36 }
 0x4d5   : > { %6605 = vmatprep.subr.msk.bf16.mxu1 %vm2273_vm1, %v2205_v2 }
 0x4d9   : > { %6026 = vmatmul.mubr.msk.bf16.gmra.mrb[16].mxu0 %vm2273_vm1, %v2117_v31 }
 0x4da   : > { %6074 = vmatpush3.bf16.xpose.msra.mxu0 %v2681_v63  ;;  %6058 = vmatmul.mubr.msk.bf16.gmra.mrb[16].mxu1 %vm2273_vm1, %v2125_v36 }
 0x4db   : > { %6106 = vmatpush3.bf16.xpose.msra.mxu1 %v2866_v15  ;;  %6027 = vmatprep.mubr.msk.bf16.mxu0 %vm2273_vm1, %v2118_v61 }
 0x4dc   : > { %6598 = vmatprep.subr.msk.bf16.mxu0 %vm2273_vm1, %v2190_v60  ;;  %6059 = vmatprep.mubr.msk.bf16.mxu1 %vm2273_vm1, %v2126_v41 }
 0x4dd   : > { %6606 = vmatprep.subr.msk.bf16.mxu1 %vm2273_vm1, %v2206_v40 }
 0x4e1   : > { %6028 = vmatmul.mubr.msk.bf16.gmra.mrb[20].mxu0 %vm2273_vm1, %v2118_v61 }
 0x4e2   : > { %6076 = vmatpush3.bf16.xpose.msra.mxu0 %v2684_v37  ;;  %6060 = vmatmul.mubr.msk.bf16.gmra.mrb[20].mxu1 %vm2273_vm1, %v2126_v41 }
 0x4e3   : > { %6108 = vmatpush3.bf16.xpose.msra.mxu1 %v2869_v25  ;;  %6029 = vmatprep.mubr.msk.bf16.mxu0 %vm2273_vm1, %v2119_v32 }
 0x4e4   : > { %6599 = vmatprep.subr.msk.bf16.mxu0 %vm2273_vm1, %v2191_v33  ;;  %6061 = vmatprep.mubr.msk.bf16.mxu1 %vm2273_vm1, %v2127_v50 }
 0x4e5   : > { %6607 = vmatprep.subr.msk.bf16.mxu1 %vm2273_vm1, %v2207_v29 }
 0x4e9   : > { %6030 = vmatmul.mubr.msk.bf16.gmra.mrb[24].mxu0 %vm2273_vm1, %v2119_v32 }
 0x4ea   : > { %6078 = vmatpush3.bf16.xpose.msra.mxu0 %v2687_v54  ;;  %6062 = vmatmul.mubr.msk.bf16.gmra.mrb[24].mxu1 %vm2273_vm1, %v2127_v50 }
 0x4eb   : > { %6110 = vmatpush3.bf16.xpose.msra.mxu1 %v2872_v11  ;;  %6031 = vmatprep.mubr.msk.bf16.mxu0 %vm2273_vm1, %v2120_v4 }
 0x4ec   : > { %6600 = vmatprep.subr.msk.bf16.mxu0 %vm2273_vm1, %v2192_v13  ;;  %6063 = vmatprep.mubr.msk.bf16.mxu1 %vm2273_vm1, %v2128_v3 }
 0x4ed   : > { %6608 = vmatprep.subr.msk.bf16.mxu1 %vm2273_vm1, %v2208_v35 }
 0x4f1   : > { %6032 = vmatmul.mubr.msk.bf16.gmra.mrb[28].mxu0 %vm2273_vm1, %v2120_v4 }
 0x4f2   : > { %6080 = vmatpush3.bf16.xpose.msra.mxu0 %v2690_v22  ;;  %6064 = vmatmul.mubr.msk.bf16.gmra.mrb[28].mxu1 %vm2273_vm1, %v2128_v3 }
 0x4f3   : > { %6112 = vmatpush3.bf16.xpose.msra.mxu1 %v2875_v7  ;;  %6081 = vmatprep.mubr.msk.bf16.mxu0 %vm2273_vm1, %v2129_v26 }
 0x4f4   : > { %6113 = vmatprep.mubr.msk.bf16.mxu1 %vm2273_vm1, %v2137_v27 }
 0x4f9   : > { %6082 = vmatmul.mubr.msk.bf16.vlgmr.msra.gmra.mrb[32].mxu0 %vm2273_vm1, %v2129_v26 }
 0x4fa   : > { %6114 = vmatmul.mubr.msk.bf16.vlgmr.msra.gmra.mrb[32].mxu1 %vm2273_vm1, %v2137_v27  ;;  %6083 = vmatprep.mubr.msk.bf16.mxu0 %vm2273_vm1, %v2130_v51 }
 0x4fb   : > { %6115 = vmatprep.mubr.msk.bf16.mxu1 %vm2273_vm1, %v2138_v45 }
 0x501   : > { %6084 = vmatmul.mubr.msk.bf16.gmra.mrb[36].mxu0 %vm2273_vm1, %v2130_v51 }
 0x502   : > { %6116 = vmatmul.mubr.msk.bf16.gmra.mrb[36].mxu1 %vm2273_vm1, %v2138_v45  ;;  %6085 = vmatprep.mubr.msk.bf16.mxu0 %vm2273_vm1, %v2131_v18 }
 0x503   : > { %6117 = vmatprep.mubr.msk.bf16.mxu1 %vm2273_vm1, %v2139_v38 }
 0x509   : > { %6086 = vmatmul.mubr.msk.bf16.gmra.mrb[40].mxu0 %vm2273_vm1, %v2131_v18 }
 0x50a   : > { %6118 = vmatmul.mubr.msk.bf16.gmra.mrb[40].mxu1 %vm2273_vm1, %v2139_v38  ;;  %6087 = vmatprep.mubr.msk.bf16.mxu0 %vm2273_vm1, %v2132_v1 }
 0x50b   : > { %6119 = vmatprep.mubr.msk.bf16.mxu1 %vm2273_vm1, %v2140_v24 }
 0x511   : > { %6088 = vmatmul.mubr.msk.bf16.gmra.mrb[44].mxu0 %vm2273_vm1, %v2132_v1 }
 0x512   : > { %6120 = vmatmul.mubr.msk.bf16.gmra.mrb[44].mxu1 %vm2273_vm1, %v2140_v24  ;;  %6089 = vmatprep.mubr.msk.bf16.mxu0 %vm2273_vm1, %v2133_v48 }
 0x513   : > { %6121 = vmatprep.mubr.msk.bf16.mxu1 %vm2273_vm1, %v2141_v30 }
 0x519   : > { %6090 = vmatmul.mubr.msk.bf16.gmra.mrb[48].mxu0 %vm2273_vm1, %v2133_v48 }
 0x51a   : > { %6122 = vmatmul.mubr.msk.bf16.gmra.mrb[48].mxu1 %vm2273_vm1, %v2141_v30  ;;  %6091 = vmatprep.mubr.msk.bf16.mxu0 %vm2273_vm1, %v2134_v39 }
 0x51b   : > { %6123 = vmatprep.mubr.msk.bf16.mxu1 %vm2273_vm1, %v2142_v47 }
 0x521   : > { %6092 = vmatmul.mubr.msk.bf16.gmra.mrb[52].mxu0 %vm2273_vm1, %v2134_v39 }
 0x522   : > { %6124 = vmatmul.mubr.msk.bf16.gmra.mrb[52].mxu1 %vm2273_vm1, %v2142_v47  ;;  %6093 = vmatprep.mubr.msk.bf16.mxu0 %vm2273_vm1, %v2135_v43 }
 0x523   : > { %6125 = vmatprep.mubr.msk.bf16.mxu1 %vm2273_vm1, %v2143_v12 }
 0x529   : > { %6094 = vmatmul.mubr.msk.bf16.gmra.mrb[56].mxu0 %vm2273_vm1, %v2135_v43 }
 0x52a   : > { %6126 = vmatmul.mubr.msk.bf16.gmra.mrb[56].mxu1 %vm2273_vm1, %v2143_v12  ;;  %6095 = vmatprep.mubr.msk.bf16.mxu0 %vm2273_vm1, %v2136_v17 }
 0x52b   : > { %6127 = vmatprep.mubr.msk.bf16.mxu1 %vm2273_vm1, %v2144_v56 }
 0x531   : > { %6096 = vmatmul.mubr.msk.bf16.gmra.mrb[60].mxu0 %vm2273_vm1, %v2136_v17 }
 0x532   : > { %6128 = vmatmul.mubr.msk.bf16.gmra.mrb[60].mxu1 %vm2273_vm1, %v2144_v56 }
 0x58c   : > { %v2380_v28 = vpop.f32.mrb[0].mxu0 }
 0x58d   : > { %v9356_v44 = vmul.f32 0.17677669, %v2380_v28  ;;  %v2565_v8 = vpop.f32.mrb[0].mxu1  ;;  %v2382_v57 = vpop.f32.mrb[1].mxu0 }
 0x58e   : > { %v9358_v58 = vmul.f32 0.17677669, %v2565_v8  ;;  %v9360_v55 = vmul.f32 0.17677669, %v2382_v57  ;;  %v2567_v0 = vpop.f32.mrb[1].mxu1  ;;  %v2384_v46 = vpop.f32.mrb[2].mxu0 }
 0x58f   : > { %v9362_v53 = vmul.f32 0.17677669, %v2567_v0  ;;  %v9364_v62 = vmul.f32 0.17677669, %v2384_v46  ;;  %v2386_v19 = vpop.f32.mrb[3].mxu0  ;;  %v2569_v9 = vpop.f32.mrb[2].mxu1 }
 0x590   : > { %v9366_v59 = vmul.f32 0.17677669, %v2386_v19  ;;  %v9368_v34 = vmul.f32 0.17677669, %v2569_v9  ;;  %v2571_v49 = vpop.f32.mrb[3].mxu1  ;;  %v3142_v5 = vmax.f32 %v9356_v44, %v9360_v55 }
 0x591   : > { %v9372_v31 = vmul.f32 0.17677669, %v2571_v49  ;;  %v3190_v16 = vmax.f32 %v9358_v58, %v9362_v53 }
 0x592   : > { %3143 = vmax.xlane.f32.xlu0 %v3142_v5  ;;  %v3145_v23 = vmax.f32 %v9364_v62, %v9366_v59 }
 0x593   : > { %3191 = vmax.xlane.f32.xlu1 %v3190_v16  ;;  %v3193_v36 = vmax.f32 %v9368_v34, %v9372_v31 }
 0x594   : > { %v2390_v2 = vpop.f32.mrb[4].mxu0 }
 0x595   : > { %v9380_v14 = vmul.f32 0.17677669, %v2390_v2  ;;  %v2392_v63 = vpop.f32.mrb[5].mxu0  ;;  %v2575_v15 = vpop.f32.mrb[4].mxu1 }
 0x596   : > { %v9382_v61 = vmul.f32 0.17677669, %v2392_v63  ;;  %3146 = vmax.xlane.f32.xlu0 %v3145_v23  ;;  %v2394_v60 = vpop.f32.mrb[6].mxu0  ;;  %v9384_v41 = vmul.f32 0.17677669, %v2575_v15  ;;  %v2577_v40 = vpop.f32.mrb[5].mxu1 }
 0x597   : > { %3194 = vmax.xlane.f32.xlu1 %v3193_v36  ;;  %v9386_v10 = vmul.f32 0.17677669, %v2394_v60  ;;  %v2396_v42 = vpop.f32.mrb[7].mxu0  ;;  %v9388_v37 = vmul.f32 0.17677669, %v2577_v40  ;;  %v2579_v25 = vpop.f32.mrb[6].mxu1 }
 0x598   : > { %v9390_v32 = vmul.f32 0.17677669, %v2396_v42  ;;  %v9392_v33 = vmul.f32 0.17677669, %v2579_v25  ;;  %v2581_v50 = vpop.f32.mrb[7].mxu1  ;;  %v3148_v29 = vmax.f32 %v9380_v14, %v9382_v61 }
 0x599   : > { %v9396_v52 = vmul.f32 0.17677669, %v2581_v50  ;;  %v3196_v54 = vmax.f32 %v9384_v41, %v9388_v37 }
 0x59a   : > { %3149 = vmax.xlane.f32.xlu0 %v3148_v29  ;;  %v3151_v20 = vmax.f32 %v9386_v10, %v9390_v32 }
 0x59b   : > { %v3199_v4 = vmax.f32 %v9392_v33, %v9396_v52 }
 0x59c   : > { %3152 = vmax.xlane.f32.xlu1 %v3151_v20  ;;  %v2400_v11 = vpop.f32.mrb[8].mxu0 }
 0x59d   : > { %v9404_v13 = vmul.f32 0.17677669, %v2400_v11  ;;  %v2402_v3 = vpop.f32.mrb[9].mxu0  ;;  %v2585_v35 = vpop.f32.mrb[8].mxu1 }
 0x59e   : > { %v9406_v21 = vmul.f32 0.17677669, %v2402_v3  ;;  %3197 = vmax.xlane.f32.xlu0 %v3196_v54  ;;  %v2404_v6 = vpop.f32.mrb[10].mxu0  ;;  %v9408_v22 = vmul.f32 0.17677669, %v2585_v35  ;;  %v2587_v7 = vpop.f32.mrb[9].mxu1 }
 0x59f   : > { %v9410_v26 = vmul.f32 0.17677669, %v2404_v6  ;;  %v2406_v27 = vpop.f32.mrb[11].mxu0  ;;  %v9412_v51 = vmul.f32 0.17677669, %v2587_v7  ;;  %v2589_v45 = vpop.f32.mrb[10].mxu1 }
 0x5a0   : > { %v9414_v18 = vmul.f32 0.17677669, %v2406_v27  ;;  %3200 = vmax.xlane.f32.xlu1 %v3199_v4  ;;  %v9416_v38 = vmul.f32 0.17677669, %v2589_v45  ;;  %v2591_v1 = vpop.f32.mrb[11].mxu1  ;;  %v3154_v24 = vmax.f32 %v9404_v13, %v9406_v21 }
 0x5a1   : > { %v9420_v48 = vmul.f32 0.17677669, %v2591_v1  ;;  %v3202_v39 = vmax.f32 %v9408_v22, %v9412_v51 }
 0x5a2   : > { %3155 = vmax.xlane.f32.xlu0 %v3154_v24  ;;  %v3157_v30 = vmax.f32 %v9410_v26, %v9414_v18 }
 0x5a3   : > { %v3205_v43 = vmax.f32 %v9416_v38, %v9420_v48 }
 0x5a4   : > { %3158 = vmax.xlane.f32.xlu1 %v3157_v30  ;;  %v2410_v47 = vpop.f32.mrb[12].mxu0 }
 0x5a5   : > { %v9428_v12 = vmul.f32 0.17677669, %v2410_v47  ;;  %v2412_v17 = vpop.f32.mrb[13].mxu0  ;;  %v2595_v56 = vpop.f32.mrb[12].mxu1 }
 0x5a6   : > { %v9430_v28 = vmul.f32 0.17677669, %v2412_v17  ;;  %3203 = vmax.xlane.f32.xlu0 %v3202_v39  ;;  %v2414_v8 = vpop.f32.mrb[14].mxu0  ;;  %v9432_v57 = vmul.f32 0.17677669, %v2595_v56  ;;  %v2597_v0 = vpop.f32.mrb[13].mxu1 }
 0x5a7   : > { %v9434_v46 = vmul.f32 0.17677669, %v2414_v8  ;;  %v2416_v19 = vpop.f32.mrb[15].mxu0  ;;  %v9436_v9 = vmul.f32 0.17677669, %v2597_v0  ;;  %v2599_v49 = vpop.f32.mrb[14].mxu1 }
 0x5a8   : > { %v9438_v5 = vmul.f32 0.17677669, %v2416_v19  ;;  %3206 = vmax.xlane.f32.xlu1 %v3205_v43  ;;  %v9440_v16 = vmul.f32 0.17677669, %v2599_v49  ;;  %v2601_v36 = vpop.f32.mrb[15].mxu1  ;;  %v3160_v2 = vmax.f32 %v9428_v12, %v9430_v28 }
 0x5a9   : > { %v9444_v23 = vmul.f32 0.17677669, %v2601_v36  ;;  %v3208_v15 = vmax.f32 %v9432_v57, %v9436_v9 }
 0x5aa   : > { %3161 = vmax.xlane.f32.xlu0 %v3160_v2  ;;  %v3163_v63 = vmax.f32 %v9434_v46, %v9438_v5 }
 0x5ab   : > { %v3211_v40 = vmax.f32 %v9440_v16, %v9444_v23 }
 0x5ac   : > { %3164 = vmax.xlane.f32.xlu1 %v3163_v63  ;;  %v2420_v60 = vpop.f32.mrb[16].mxu0 }
 0x5ad   : > { %v9452_v42 = vmul.f32 0.17677669, %v2420_v60  ;;  %v2422_v25 = vpop.f32.mrb[17].mxu0  ;;  %v2605_v50 = vpop.f32.mrb[16].mxu1 }
 0x5ae   : > { %v9454_v29 = vmul.f32 0.17677669, %v2422_v25  ;;  %3209 = vmax.xlane.f32.xlu0 %v3208_v15  ;;  %v2424_v20 = vpop.f32.mrb[18].mxu0  ;;  %v9456_v54 = vmul.f32 0.17677669, %v2605_v50  ;;  %v2607_v11 = vpop.f32.mrb[17].mxu1 }
 0x5af   : > { %v9458_v4 = vmul.f32 0.17677669, %v2424_v20  ;;  %v2426_v3 = vpop.f32.mrb[19].mxu0  ;;  %v9460_v35 = vmul.f32 0.17677669, %v2607_v11  ;;  %v2609_v6 = vpop.f32.mrb[18].mxu1 }
 0x5b0   : > { %v9462_v7 = vmul.f32 0.17677669, %v2426_v3  ;;  %3212 = vmax.xlane.f32.xlu1 %v3211_v40  ;;  %v9464_v27 = vmul.f32 0.17677669, %v2609_v6  ;;  %v2611_v45 = vpop.f32.mrb[19].mxu1  ;;  %v3166_v1 = vmax.f32 %v9452_v42, %v9454_v29 }
 0x5b1   : > { %v9468_v24 = vmul.f32 0.17677669, %v2611_v45  ;;  %v3214_v39 = vmax.f32 %v9456_v54, %v9460_v35 }
 0x5b2   : > { %3167 = vmax.xlane.f32.xlu0 %v3166_v1  ;;  %v3169_v30 = vmax.f32 %v9458_v4, %v9462_v7 }
 0x5b3   : > { %v3217_v43 = vmax.f32 %v9464_v27, %v9468_v24 }
 0x5b4   : > { %3170 = vmax.xlane.f32.xlu1 %v3169_v30  ;;  %v2430_v47 = vpop.f32.mrb[20].mxu0 }
 0x5b5   : > { %v9476_v17 = vmul.f32 0.17677669, %v2430_v47  ;;  %v2432_v56 = vpop.f32.mrb[21].mxu0  ;;  %v2615_v8 = vpop.f32.mrb[20].mxu1 }
 0x5b6   : > { %v9478_v0 = vmul.f32 0.17677669, %v2432_v56  ;;  %3215 = vmax.xlane.f32.xlu0 %v3214_v39  ;;  %v2434_v19 = vpop.f32.mrb[22].mxu0  ;;  %v9480_v49 = vmul.f32 0.17677669, %v2615_v8  ;;  %v2617_v36 = vpop.f32.mrb[21].mxu1 }
 0x5b7   : > { %v9482_v2 = vmul.f32 0.17677669, %v2434_v19  ;;  %v2436_v63 = vpop.f32.mrb[23].mxu0  ;;  %v9484_v15 = vmul.f32 0.17677669, %v2617_v36  ;;  %v2619_v60 = vpop.f32.mrb[22].mxu1 }
 0x5b8   : > { %v9486_v40 = vmul.f32 0.17677669, %v2436_v63  ;;  %3218 = vmax.xlane.f32.xlu1 %v3217_v43  ;;  %v9488_v25 = vmul.f32 0.17677669, %v2619_v60  ;;  %v2621_v50 = vpop.f32.mrb[23].mxu1  ;;  %v3172_v20 = vmax.f32 %v9476_v17, %v9478_v0 }
 0x5b9   : > { %v9492_v11 = vmul.f32 0.17677669, %v2621_v50  ;;  %v3220_v6 = vmax.f32 %v9480_v49, %v9484_v15 }
 0x5ba   : > { %11151 = vst [vmem:[#allocation23_spill] sm:$0xff] %v9488_v25  ;;  %3173 = vmax.xlane.f32.xlu0 %v3172_v20  ;;  %v3175_v3 = vmax.f32 %v9482_v2, %v9486_v40 }
 0x5bb   : > { %11152 = vst [vmem:[#allocation24_spill] sm:$0xff] %v9492_v11  ;;  %v3223_v1 = vmax.f32 %v9488_v25, %v9492_v11 }
 0x5bc   : > { %3176 = vmax.xlane.f32.xlu1 %v3175_v3  ;;  %v2440_v45 = vpop.f32.mrb[24].mxu0 }
 0x5bd   : > { %v9500_v30 = vmul.f32 0.17677669, %v2440_v45  ;;  %v2442_v39 = vpop.f32.mrb[25].mxu0  ;;  %v2625_v47 = vpop.f32.mrb[24].mxu1 }
 0x5be   : > { %v9502_v43 = vmul.f32 0.17677669, %v2442_v39  ;;  %3221 = vmax.xlane.f32.xlu0 %v3220_v6  ;;  %v2444_v56 = vpop.f32.mrb[26].mxu0  ;;  %v9504_v8 = vmul.f32 0.17677669, %v2625_v47  ;;  %v2627_v19 = vpop.f32.mrb[25].mxu1 }
 0x5bf   : > { %11153 = vst [vmem:[#allocation25_spill] sm:$0xff] %v9500_v30  ;;  %v9506_v36 = vmul.f32 0.17677669, %v2444_v56  ;;  %v2446_v63 = vpop.f32.mrb[27].mxu0  ;;  %v9508_v60 = vmul.f32 0.17677669, %v2627_v19 }
 0x5c0   : > { %11154 = vst [vmem:[#allocation26_spill] sm:$0xff] %v9502_v43  ;;  %11155 = vst [vmem:[#allocation27_spill] sm:$0xff] %v9504_v8  ;;  %v2629_v50 = vpop.f32.mrb[26].mxu1  ;;  %v9510_v20 = vmul.f32 0.17677669, %v2446_v63  ;;  %3224 = vmax.xlane.f32.xlu1 %v3223_v1  ;;  %v3178_v39 = vmax.f32 %v9500_v30, %v9502_v43 }
 0x5c1   : > { %11156 = vst [vmem:[#allocation28_spill] sm:$0xff] %v9506_v36  ;;  %11157 = vst [vmem:[#allocation29_spill] sm:$0xff] %v9508_v60  ;;  %v9512_v3 = vmul.f32 0.17677669, %v2629_v50  ;;  %v2631_v45 = vpop.f32.mrb[27].mxu1  ;;  %v3226_v56 = vmax.f32 %v9504_v8, %v9508_v60 }
 0x5c2   : > { %11158 = vst [vmem:[#allocation30_spill] sm:$0xff] %v9510_v20  ;;  %v9516_v6 = vmul.f32 0.17677669, %v2631_v45  ;;  %3179 = vmax.xlane.f32.xlu0 %v3178_v39  ;;  %v3181_v47 = vmax.f32 %v9506_v36, %v9510_v20 }
 0x5c3   : > { %11159 = vst [vmem:[#allocation31_spill] sm:$0xff] %v9512_v3 }
 0x5c4   : > { %11160 = vst [vmem:[#allocation32_spill] sm:$0xff] %v9516_v6  ;;  %3182 = vmax.xlane.f32.xlu1 %v3181_v47  ;;  %v2450_v19 = vpop.f32.mrb[28].mxu0  ;;  %v3229_v1 = vmax.f32 %v9512_v3, %v9516_v6 }
 0x5c5   : > { %v9524_v63 = vmul.f32 0.17677669, %v2450_v19  ;;  %v2452_v50 = vpop.f32.mrb[29].mxu0  ;;  %v2635_v11 = vpop.f32.mrb[28].mxu1 }
 0x5c6   : > { %v9526_v25 = vmul.f32 0.17677669, %v2452_v50  ;;  %3227 = vmax.xlane.f32.xlu0 %v3226_v56  ;;  %v2454_v45 = vpop.f32.mrb[30].mxu0  ;;  %v9528_v39 = vmul.f32 0.17677669, %v2635_v11  ;;  %v2637_v43 = vpop.f32.mrb[29].mxu1 }
 0x5c7   : > { %11161 = vst [vmem:[#allocation33_spill] sm:$0xff] %v9524_v63  ;;  %v9530_v20 = vmul.f32 0.17677669, %v2454_v45  ;;  %v2456_v36 = vpop.f32.mrb[31].mxu0  ;;  %v9532_v60 = vmul.f32 0.17677669, %v2637_v43 }
 0x5c8   : > { %11162 = vst [vmem:[#allocation34_spill] sm:$0xff] %v9526_v25  ;;  %11163 = vst [vmem:[#allocation35_spill] sm:$0xff] %v9528_v39  ;;  %v2639_v47 = vpop.f32.mrb[30].mxu1  ;;  %v9534_v8 = vmul.f32 0.17677669, %v2456_v36  ;;  %3230 = vmax.xlane.f32.xlu1 %v3229_v1  ;;  %v3184_v50 = vmax.f32 %v9524_v63, %v9526_v25 }
 0x5c9   : > { %11164 = vst [vmem:[#allocation36_spill] sm:$0xff] %v9530_v20  ;;  %11165 = vst [vmem:[#allocation37_spill] sm:$0xff] %v9532_v60  ;;  %v9536_v19 = vmul.f32 0.17677669, %v2639_v47  ;;  %v2641_v6 = vpop.f32.mrb[31].mxu1  ;;  %v3232_v43 = vmax.f32 %v9528_v39, %v9532_v60 }
 0x5ca   : > { %11166 = vst [vmem:[#allocation38_spill] sm:$0xff] %v9534_v8  ;;  %v9540_v56 = vmul.f32 0.17677669, %v2641_v6  ;;  %3185 = vmax.xlane.f32.xlu0 %v3184_v50  ;;  %v3187_v11 = vmax.f32 %v9530_v20, %v9534_v8 }
 0x5cb   : > { %11167 = vst [vmem:[#allocation39_spill] sm:$0xff] %v9536_v19 }
 0x5cc   : > { %11168 = vst [vmem:[#allocation40_spill] sm:$0xff] %v9540_v56  ;;  %3188 = vmax.xlane.f32.xlu1 %v3187_v11  ;;  %v2750_v45 = vpop.f32.mrb[32].mxu0  ;;  %v3235_v36 = vmax.f32 %v9536_v19, %v9540_v56 }
 0x5cd   : > { %v9548_v1 = vmul.f32 0.17677669, %v2750_v45  ;;  %v2752_v47 = vpop.f32.mrb[33].mxu0  ;;  %v2935_v3 = vpop.f32.mrb[32].mxu1 }
 0x5ce   : > { %v9550_v30 = vmul.f32 0.17677669, %v2752_v47  ;;  %3233 = vmax.xlane.f32.xlu0 %v3232_v43  ;;  %v2754_v6 = vpop.f32.mrb[34].mxu0  ;;  %v9552_v50 = vmul.f32 0.17677669, %v2935_v3  ;;  %v2937_v25 = vpop.f32.mrb[33].mxu1 }
 0x5cf   : > { %11169 = vst [vmem:[#allocation41_spill] sm:$0xff] %v9548_v1  ;;  %v9554_v8 = vmul.f32 0.17677669, %v2754_v6  ;;  %v2756_v20 = vpop.f32.mrb[35].mxu0  ;;  %v9556_v60 = vmul.f32 0.17677669, %v2937_v25 }
 0x5d0   : > { %11170 = vst [vmem:[#allocation42_spill] sm:$0xff] %v9550_v30  ;;  %11171 = vst [vmem:[#allocation43_spill] sm:$0xff] %v9552_v50  ;;  %v2939_v11 = vpop.f32.mrb[34].mxu1  ;;  %v9558_v39 = vmul.f32 0.17677669, %v2756_v20  ;;  %3236 = vmax.xlane.f32.xlu1 %v3235_v36  ;;  %v3238_v47 = vmax.f32 %v9548_v1, %v9550_v30 }
 0x5d1   : > { %11172 = vst [vmem:[#allocation44_spill] sm:$0xff] %v9554_v8  ;;  %11173 = vst [vmem:[#allocation45_spill] sm:$0xff] %v9556_v60  ;;  %v9560_v45 = vmul.f32 0.17677669, %v2939_v11  ;;  %v2941_v56 = vpop.f32.mrb[35].mxu1  ;;  %v3286_v25 = vmax.f32 %v9552_v50, %v9556_v60 }
 0x5d2   : > { %11174 = vst [vmem:[#allocation46_spill] sm:$0xff] %v9558_v39  ;;  %v9564_v43 = vmul.f32 0.17677669, %v2941_v56  ;;  %3239 = vmax.xlane.f32.xlu0 %v3238_v47  ;;  %v3241_v3 = vmax.f32 %v9554_v8, %v9558_v39 }
 0x5d3   : > { %11175 = vst [vmem:[#allocation47_spill] sm:$0xff] %v9560_v45 }
 0x5d4   : > { %11176 = vst [vmem:[#allocation48_spill] sm:$0xff] %v9564_v43  ;;  %3242 = vmax.xlane.f32.xlu1 %v3241_v3  ;;  %v2760_v6 = vpop.f32.mrb[36].mxu0  ;;  %v3289_v20 = vmax.f32 %v9560_v45, %v9564_v43 }
 0x5d5   : > { %v9572_v36 = vmul.f32 0.17677669, %v2760_v6  ;;  %v2762_v11 = vpop.f32.mrb[37].mxu0  ;;  %v2945_v19 = vpop.f32.mrb[36].mxu1 }
 0x5d6   : > { %v9574_v63 = vmul.f32 0.17677669, %v2762_v11  ;;  %3287 = vmax.xlane.f32.xlu0 %v3286_v25  ;;  %v2764_v56 = vpop.f32.mrb[38].mxu0  ;;  %v9576_v47 = vmul.f32 0.17677669, %v2945_v19  ;;  %v2947_v30 = vpop.f32.mrb[37].mxu1 }
 0x5d7   : > { %11177 = vst [vmem:[#allocation49_spill] sm:$0xff] %v9572_v36  ;;  %v9578_v39 = vmul.f32 0.17677669, %v2764_v56  ;;  %v2766_v8 = vpop.f32.mrb[39].mxu0  ;;  %v9580_v60 = vmul.f32 0.17677669, %v2947_v30 }
 0x5d8   : > { %11178 = vst [vmem:[#allocation50_spill] sm:$0xff] %v9574_v63  ;;  %11179 = vst [vmem:[#allocation51_spill] sm:$0xff] %v9576_v47  ;;  %v2949_v3 = vpop.f32.mrb[38].mxu1  ;;  %v9582_v50 = vmul.f32 0.17677669, %v2766_v8  ;;  %3290 = vmax.xlane.f32.xlu1 %v3289_v20  ;;  %v3244_v11 = vmax.f32 %v9572_v36, %v9574_v63 }
 0x5d9   : > { %11180 = vst [vmem:[#allocation52_spill] sm:$0xff] %v9578_v39  ;;  %11181 = vst [vmem:[#allocation53_spill] sm:$0xff] %v9580_v60  ;;  %v9584_v6 = vmul.f32 0.17677669, %v2949_v3  ;;  %v2951_v43 = vpop.f32.mrb[39].mxu1  ;;  %v3292_v30 = vmax.f32 %v9576_v47, %v9580_v60 }
 0x5da   : > { %11182 = vst [vmem:[#allocation54_spill] sm:$0xff] %v9582_v50  ;;  %v9588_v25 = vmul.f32 0.17677669, %v2951_v43  ;;  %3245 = vmax.xlane.f32.xlu0 %v3244_v11  ;;  %v3247_v19 = vmax.f32 %v9578_v39, %v9582_v50 }
 0x5db   : > { %11183 = vst [vmem:[#allocation55_spill] sm:$0xff] %v9584_v6 }
 0x5dc   : > { %11184 = vst [vmem:[#allocation56_spill] sm:$0xff] %v9588_v25  ;;  %3248 = vmax.xlane.f32.xlu1 %v3247_v19  ;;  %v2770_v56 = vpop.f32.mrb[40].mxu0  ;;  %v3295_v8 = vmax.f32 %v9584_v6, %v9588_v25 }
 0x5dd   : > { %v9596_v20 = vmul.f32 0.17677669, %v2770_v56  ;;  %v2772_v3 = vpop.f32.mrb[41].mxu0  ;;  %v2955_v45 = vpop.f32.mrb[40].mxu1 }
 0x5de   : > { %v9598_v1 = vmul.f32 0.17677669, %v2772_v3  ;;  %3293 = vmax.xlane.f32.xlu0 %v3292_v30  ;;  %v2774_v43 = vpop.f32.mrb[42].mxu0  ;;  %v9600_v11 = vmul.f32 0.17677669, %v2955_v45  ;;  %v2957_v63 = vpop.f32.mrb[41].mxu1 }
 0x5df   : > { %11185 = vst [vmem:[#allocation57_spill] sm:$0xff] %v9596_v20  ;;  %v9602_v50 = vmul.f32 0.17677669, %v2774_v43  ;;  %v2776_v39 = vpop.f32.mrb[43].mxu0  ;;  %v9604_v60 = vmul.f32 0.17677669, %v2957_v63 }
 0x5e0   : > { %11186 = vst [vmem:[#allocation58_spill] sm:$0xff] %v9598_v1  ;;  %11187 = vst [vmem:[#allocation59_spill] sm:$0xff] %v9600_v11  ;;  %v2959_v19 = vpop.f32.mrb[42].mxu1  ;;  %v9606_v47 = vmul.f32 0.17677669, %v2776_v39  ;;  %3296 = vmax.xlane.f32.xlu1 %v3295_v8  ;;  %v3250_v3 = vmax.f32 %v9596_v20, %v9598_v1 }
 0x5e1   : > { %11188 = vst [vmem:[#allocation60_spill] sm:$0xff] %v9602_v50  ;;  %11189 = vst [vmem:[#allocation61_spill] sm:$0xff] %v9604_v60  ;;  %v9608_v56 = vmul.f32 0.17677669, %v2959_v19  ;;  %v2961_v25 = vpop.f32.mrb[43].mxu1  ;;  %v3298_v63 = vmax.f32 %v9600_v11, %v9604_v60 }
 0x5e2   : > { %11190 = vst [vmem:[#allocation62_spill] sm:$0xff] %v9606_v47  ;;  %v9612_v30 = vmul.f32 0.17677669, %v2961_v25  ;;  %3251 = vmax.xlane.f32.xlu0 %v3250_v3  ;;  %v3253_v45 = vmax.f32 %v9602_v50, %v9606_v47 }
 0x5e3   : > { %11191 = vst [vmem:[#allocation63_spill] sm:$0xff] %v9608_v56 }
 0x5e4   : > { %11192 = vst [vmem:[#allocation64_spill] sm:$0xff] %v9612_v30  ;;  %3254 = vmax.xlane.f32.xlu1 %v3253_v45  ;;  %v2780_v43 = vpop.f32.mrb[44].mxu0  ;;  %v3301_v39 = vmax.f32 %v9608_v56, %v9612_v30 }
 0x5e5   : > { %v9620_v8 = vmul.f32 0.17677669, %v2780_v43  ;;  %v2782_v19 = vpop.f32.mrb[45].mxu0  ;;  %v2965_v6 = vpop.f32.mrb[44].mxu1 }
 0x5e6   : > { %v9622_v36 = vmul.f32 0.17677669, %v2782_v19  ;;  %3299 = vmax.xlane.f32.xlu0 %v3298_v63  ;;  %v2784_v25 = vpop.f32.mrb[46].mxu0  ;;  %v9624_v3 = vmul.f32 0.17677669, %v2965_v6  ;;  %v2967_v1 = vpop.f32.mrb[45].mxu1 }
 0x5e7   : > { %11193 = vst [vmem:[#allocation65_spill] sm:$0xff] %v9620_v8  ;;  %v9626_v47 = vmul.f32 0.17677669, %v2784_v25  ;;  %v2786_v50 = vpop.f32.mrb[47].mxu0  ;;  %v9628_v60 = vmul.f32 0.17677669, %v2967_v1 }
 0x5e8   : > { %11194 = vst [vmem:[#allocation66_spill] sm:$0xff] %v9622_v36  ;;  %11195 = vst [vmem:[#allocation67_spill] sm:$0xff] %v9624_v3  ;;  %v2969_v45 = vpop.f32.mrb[46].mxu1  ;;  %v9630_v11 = vmul.f32 0.17677669, %v2786_v50  ;;  %3302 = vmax.xlane.f32.xlu1 %v3301_v39  ;;  %v3256_v19 = vmax.f32 %v9620_v8, %v9622_v36 }
 0x5e9   : > { %11196 = vst [vmem:[#allocation68_spill] sm:$0xff] %v9626_v47  ;;  %11197 = vst [vmem:[#allocation69_spill] sm:$0xff] %v9628_v60  ;;  %v9632_v43 = vmul.f32 0.17677669, %v2969_v45  ;;  %v2971_v30 = vpop.f32.mrb[47].mxu1  ;;  %v3304_v1 = vmax.f32 %v9624_v3, %v9628_v60 }
 0x5ea   : > { %11198 = vst [vmem:[#allocation70_spill] sm:$0xff] %v9630_v11  ;;  %v9636_v63 = vmul.f32 0.17677669, %v2971_v30  ;;  %3257 = vmax.xlane.f32.xlu0 %v3256_v19  ;;  %v3259_v6 = vmax.f32 %v9626_v47, %v9630_v11 }
 0x5eb   : > { %11199 = vst [vmem:[#allocation71_spill] sm:$0xff] %v9632_v43 }
 0x5ec   : > { %11200 = vst [vmem:[#allocation72_spill] sm:$0xff] %v9636_v63  ;;  %3260 = vmax.xlane.f32.xlu1 %v3259_v6  ;;  %v2790_v25 = vpop.f32.mrb[48].mxu0  ;;  %v3307_v50 = vmax.f32 %v9632_v43, %v9636_v63 }
 0x5ed   : > { %v9644_v39 = vmul.f32 0.17677669, %v2790_v25  ;;  %v2792_v45 = vpop.f32.mrb[49].mxu0  ;;  %v2975_v56 = vpop.f32.mrb[48].mxu1 }
 0x5ee   : > { %v9646_v20 = vmul.f32 0.17677669, %v2792_v45  ;;  %3305 = vmax.xlane.f32.xlu0 %v3304_v1  ;;  %v2794_v30 = vpop.f32.mrb[50].mxu0  ;;  %v9648_v19 = vmul.f32 0.17677669, %v2975_v56  ;;  %v2977_v36 = vpop.f32.mrb[49].mxu1 }
 0x5ef   : > { %11201 = vst [vmem:[#allocation73_spill] sm:$0xff] %v9644_v39  ;;  %v9650_v11 = vmul.f32 0.17677669, %v2794_v30  ;;  %v2796_v47 = vpop.f32.mrb[51].mxu0  ;;  %v9652_v60 = vmul.f32 0.17677669, %v2977_v36 }
 0x5f0   : > { %11202 = vst [vmem:[#allocation74_spill] sm:$0xff] %v9646_v20  ;;  %11203 = vst [vmem:[#allocation75_spill] sm:$0xff] %v9648_v19  ;;  %v2979_v6 = vpop.f32.mrb[50].mxu1  ;;  %v9654_v3 = vmul.f32 0.17677669, %v2796_v47  ;;  %3308 = vmax.xlane.f32.xlu1 %v3307_v50  ;;  %v3262_v45 = vmax.f32 %v9644_v39, %v9646_v20 }
 0x5f1   : > { %11204 = vst [vmem:[#allocation76_spill] sm:$0xff] %v9650_v11  ;;  %11205 = vst [vmem:[#allocation77_spill] sm:$0xff] %v9652_v60  ;;  %v9656_v25 = vmul.f32 0.17677669, %v2979_v6  ;;  %v2981_v63 = vpop.f32.mrb[51].mxu1  ;;  %v3310_v36 = vmax.f32 %v9648_v19, %v9652_v60 }
 0x5f2   : > { %11206 = vst [vmem:[#allocation78_spill] sm:$0xff] %v9654_v3  ;;  %v9660_v1 = vmul.f32 0.17677669, %v2981_v63  ;;  %3263 = vmax.xlane.f32.xlu0 %v3262_v45  ;;  %v3265_v56 = vmax.f32 %v9650_v11, %v9654_v3 }
 0x5f3   : > { %11207 = vst [vmem:[#allocation79_spill] sm:$0xff] %v9656_v25 }
 0x5f4   : > { %11208 = vst [vmem:[#allocation80_spill] sm:$0xff] %v9660_v1  ;;  %3266 = vmax.xlane.f32.xlu1 %v3265_v56  ;;  %v2800_v30 = vpop.f32.mrb[52].mxu0  ;;  %v3313_v47 = vmax.f32 %v9656_v25, %v9660_v1 }
 0x5f5   : > { %v9668_v50 = vmul.f32 0.17677669, %v2800_v30  ;;  %v2802_v6 = vpop.f32.mrb[53].mxu0  ;;  %v2985_v43 = vpop.f32.mrb[52].mxu1 }
 0x5f6   : > { %v9670_v8 = vmul.f32 0.17677669, %v2802_v6  ;;  %3311 = vmax.xlane.f32.xlu0 %v3310_v36  ;;  %v2804_v63 = vpop.f32.mrb[54].mxu0  ;;  %v9672_v45 = vmul.f32 0.17677669, %v2985_v43  ;;  %v2987_v20 = vpop.f32.mrb[53].mxu1 }
 0x5f7   : > { %11209 = vst [vmem:[#allocation81_spill] sm:$0xff] %v9668_v50  ;;  %v9674_v3 = vmul.f32 0.17677669, %v2804_v63  ;;  %v2806_v11 = vpop.f32.mrb[55].mxu0  ;;  %v9676_v60 = vmul.f32 0.17677669, %v2987_v20 }
 0x5f8   : > { %11210 = vst [vmem:[#allocation82_spill] sm:$0xff] %v9670_v8  ;;  %11211 = vst [vmem:[#allocation83_spill] sm:$0xff] %v9672_v45  ;;  %v2989_v56 = vpop.f32.mrb[54].mxu1  ;;  %v9678_v19 = vmul.f32 0.17677669, %v2806_v11  ;;  %3314 = vmax.xlane.f32.xlu1 %v3313_v47  ;;  %v3268_v6 = vmax.f32 %v9668_v50, %v9670_v8 }
 0x5f9   : > { %11212 = vst [vmem:[#allocation84_spill] sm:$0xff] %v9674_v3  ;;  %11213 = vst [vmem:[#allocation85_spill] sm:$0xff] %v9676_v60  ;;  %v9680_v30 = vmul.f32 0.17677669, %v2989_v56  ;;  %v2991_v1 = vpop.f32.mrb[55].mxu1  ;;  %v3316_v20 = vmax.f32 %v9672_v45, %v9676_v60 }
 0x5fa   : > { %11214 = vst [vmem:[#allocation86_spill] sm:$0xff] %v9678_v19  ;;  %v9684_v36 = vmul.f32 0.17677669, %v2991_v1  ;;  %3269 = vmax.xlane.f32.xlu0 %v3268_v6  ;;  %v3271_v43 = vmax.f32 %v9674_v3, %v9678_v19 }
 0x5fb   : > { %11215 = vst [vmem:[#allocation87_spill] sm:$0xff] %v9680_v30 }
 0x5fc   : > { %11216 = vst [vmem:[#allocation88_spill] sm:$0xff] %v9684_v36  ;;  %3272 = vmax.xlane.f32.xlu1 %v3271_v43  ;;  %v2810_v63 = vpop.f32.mrb[56].mxu0  ;;  %v3319_v11 = vmax.f32 %v9680_v30, %v9684_v36 }
 0x5fd   : > { %v9692_v47 = vmul.f32 0.17677669, %v2810_v63  ;;  %v2812_v56 = vpop.f32.mrb[57].mxu0  ;;  %v2995_v25 = vpop.f32.mrb[56].mxu1 }
 0x5fe   : > { %v9694_v39 = vmul.f32 0.17677669, %v2812_v56  ;;  %3317 = vmax.xlane.f32.xlu0 %v3316_v20  ;;  %v2814_v1 = vpop.f32.mrb[58].mxu0  ;;  %v9696_v6 = vmul.f32 0.17677669, %v2995_v25  ;;  %v2997_v8 = vpop.f32.mrb[57].mxu1 }
 0x5ff   : > { %v9698_v19 = vmul.f32 0.17677669, %v2814_v1  ;;  %v2816_v3 = vpop.f32.mrb[59].mxu0  ;;  %v9700_v60 = vmul.f32 0.17677669, %v2997_v8  ;;  %v2999_v43 = vpop.f32.mrb[58].mxu1 }
 0x600   : > { %11217 = vst [vmem:[#allocation89_spill] sm:$0xff] %v9694_v39  ;;  %11218 = vst [vmem:[#allocation90_spill] sm:$0xff] %v9696_v6  ;;  %v9702_v45 = vmul.f32 0.17677669, %v2816_v3  ;;  %3320 = vmax.xlane.f32.xlu1 %v3319_v11  ;;  %v9704_v63 = vmul.f32 0.17677669, %v2999_v43  ;;  %v3274_v56 = vmax.f32 %v9692_v47, %v9694_v39 }
 0x601   : > { %11219 = vst [vmem:[#allocation91_spill] sm:$0xff] %v9698_v19  ;;  %11220 = vst [vmem:[#allocation92_spill] sm:$0xff] %v9700_v60  ;;  %v3001_v36 = vpop.f32.mrb[59].mxu1  ;;  %v3322_v8 = vmax.f32 %v9696_v6, %v9700_v60 }
 0x602   : > { %11221 = vst [vmem:[#allocation93_spill] sm:$0xff] %v9702_v45  ;;  %11222 = vst [vmem:[#allocation94_spill] sm:$0xff] %v9704_v63  ;;  %v9708_v20 = vmul.f32 0.17677669, %v3001_v36  ;;  %3275 = vmax.xlane.f32.xlu0 %v3274_v56  ;;  %v3277_v25 = vmax.f32 %v9698_v19, %v9702_v45 }
 0x604   : > { %11223 = vst [vmem:[#allocation95_spill] sm:$0xff] %v9708_v20  ;;  %3278 = vmax.xlane.f32.xlu1 %v3277_v25  ;;  %v2820_v1 = vpop.f32.mrb[60].mxu0  ;;  %v3325_v3 = vmax.f32 %v9704_v63, %v9708_v20 }
 0x605   : > { %v9716_v11 = vmul.f32 0.17677669, %v2820_v1  ;;  %v2822_v43 = vpop.f32.mrb[61].mxu0  ;;  %v3005_v30 = vpop.f32.mrb[60].mxu1 }
 0x606   : > { %v9718_v50 = vmul.f32 0.17677669, %v2822_v43  ;;  %3323 = vmax.xlane.f32.xlu0 %v3322_v8  ;;  %v2824_v36 = vpop.f32.mrb[62].mxu0  ;;  %v9720_v56 = vmul.f32 0.17677669, %v3005_v30  ;;  %v3007_v39 = vpop.f32.mrb[61].mxu1 }
 0x607   : > { %11224 = vst [vmem:[#allocation96_spill] sm:$0xff] %v9716_v11  ;;  %v9722_v45 = vmul.f32 0.17677669, %v2824_v36  ;;  %v2826_v19 = vpop.f32.mrb[63].mxu0  ;;  %v9724_v60 = vmul.f32 0.17677669, %v3007_v39 }
 0x608   : > { %11225 = vst [vmem:[#allocation97_spill] sm:$0xff] %v9718_v50  ;;  %11226 = vst [vmem:[#allocation98_spill] sm:$0xff] %v9720_v56  ;;  %v3009_v25 = vpop.f32.mrb[62].mxu1  ;;  %v9726_v6 = vmul.f32 0.17677669, %v2826_v19  ;;  %3326 = vmax.xlane.f32.xlu1 %v3325_v3  ;;  %v3280_v43 = vmax.f32 %v9716_v11, %v9718_v50  ;;  %v2217_v3 = vld [vmem:[#allocation4 + $0x40] sm:$0xff] }
 0x609   : > { %11227 = vst [vmem:[#allocation99_spill] sm:$0xff] %v9722_v45  ;;  %11228 = vst [vmem:[#allocation100_spill] sm:$0xff] %v9724_v60  ;;  %v9728_v1 = vmul.f32 0.17677669, %v3009_v25  ;;  %v3011_v20 = vpop.f32.mrb[63].mxu1  ;;  %v3328_v39 = vmax.f32 %v9720_v56, %v9724_v60  ;;  %v2209_v36 = vld [vmem:[#allocation4] sm:$0xff]  ;;  %6129 = vmatprep.subr.bf16.mxu0 %v2217_v3 }
 0x60a   : > { %11229 = vst [vmem:[#allocation101_spill] sm:$0xff] %v9726_v6  ;;  %v9732_v8 = vmul.f32 0.17677669, %v3011_v20  ;;  %3281 = vmax.xlane.f32.xlu0 %v3280_v43  ;;  %v3283_v30 = vmax.f32 %v9722_v45, %v9726_v6  ;;  %6130 = vmatpush3.bf16.msra.mxu0 %v2209_v36  ;;  %v2233_v25 = vld [vmem:[#allocation4 + $0xc0] sm:$0xff]  ;;  %v2218_v50 = vld [vmem:[#allocation4 + $0x48] sm:$0xff] }
 0x60b   : > { %11230 = vst [vmem:[#allocation102_spill] sm:$0xff] %v9728_v1  ;;  %v2225_v20 = vld [vmem:[#allocation4 + $0x80] sm:$0xff]  ;;  %6193 = vmatprep.subr.bf16.mxu1 %v2233_v25  ;;  %v2210_v6 = vld [vmem:[#allocation4 + $0x8] sm:$0xff]  ;;  %6131 = vmatprep.subr.bf16.mxu0 %v2218_v50 }
 0x60c   : > { %11231 = vst [vmem:[#allocation103_spill] sm:$0xff] %v9732_v8  ;;  %3284 = vmax.xlane.f32.xlu1 %v3283_v30  ;;  %v3331_v19 = vmax.f32 %v9728_v1, %v9732_v8  ;;  %6194 = vmatpush3.bf16.msra.mxu1 %v2225_v20  ;;  %v2234_v20 = vld [vmem:[#allocation4 + $0xc8] sm:$0xff] }
 0x60d   : > { %v2226_v56 = vld [vmem:[#allocation4 + $0x88] sm:$0xff]  ;;  %6195 = vmatprep.subr.bf16.mxu1 %v2234_v20  ;;  %v2212_v20 = vld [vmem:[#allocation4 + $0x18] sm:$0xff] }
 0x60e   : > { %3329 = vmax.xlane.f32.xlu0 %v3328_v39  ;;  %6132 = vmatpush3.bf16.msra.mxu0 %v2210_v6 }
 0x610   : > { %3332 = vmax.xlane.f32.xlu1 %v3331_v19  ;;  %6196 = vmatpush3.bf16.msra.mxu1 %v2226_v56 }
 0x61f   : > { %v3144_v43 = vpop.xlane.xlu0 %3143 }
 0x620   : > { %v3192_v45 = vpop.xlane.xlu1 %3191  ;;  %v3334_v60 = vsub.f32 %v9356_v44, %v3144_v43  ;;  %v3335_v30 = vsub.f32 %v9360_v55, %v3144_v43 }
 0x621   : > { %v3366_v39 = vsub.f32 %v9358_v58, %v3192_v45  ;;  %v3367_v19 = vsub.f32 %v9362_v53, %v3192_v45  ;;  %v2219_v53 = vld [vmem:[#allocation4 + $0x50] sm:$0xff] }
 0x622   : > { %v3462_v3 = vmul.f32 1.442695, %v3334_v60  ;;  %v3464_v36 = vmul.f32 1.442695, %v3335_v30  ;;  %v2211_v60 = vld [vmem:[#allocation4 + $0x10] sm:$0xff]  ;;  %6133 = vmatprep.subr.bf16.mxu0 %v2219_v53 }
 0x623   : > { %v3526_v8 = vmul.f32 1.442695, %v3366_v39  ;;  %v3528_v1 = vmul.f32 1.442695, %v3367_v19  ;;  %v3147_v25 = vpop.xlane.xlu0 %3146  ;;  %6134 = vmatpush3.bf16.msra.mxu0 %v2211_v60 }
 0x624   : > { %7032 = vpow2.f32 %v3462_v3  ;;  %v3195_v11 = vpop.xlane.xlu1 %3194  ;;  %v3336_v63 = vsub.f32 %v9364_v62, %v3147_v25  ;;  %v3337_v44 = vsub.f32 %v9366_v59, %v3147_v25  ;;  %v2220_v25 = vld [vmem:[#allocation4 + $0x58] sm:$0xff] }
 0x625   : > { %7034 = vpow2.f32 %v3526_v8  ;;  %v3368_v58 = vsub.f32 %v9368_v34, %v3195_v11  ;;  %v3369_v55 = vsub.f32 %v9372_v31, %v3195_v11  ;;  %v2235_v31 = vld [vmem:[#allocation4 + $0xd0] sm:$0xff]  ;;  %6135 = vmatprep.subr.bf16.mxu0 %v2220_v25 }
 0x626   : > { %7036 = vpow2.f32 %v3528_v1  ;;  %v3466_v50 = vmul.f32 1.442695, %v3336_v63  ;;  %v3468_v43 = vmul.f32 1.442695, %v3337_v44  ;;  %v2227_v11 = vld [vmem:[#allocation4 + $0x90] sm:$0xff]  ;;  %6197 = vmatprep.subr.bf16.mxu1 %v2235_v31 }
 0x627   : > { %7038 = vpow2.f32 %v3464_v36  ;;  %v3530_v45 = vmul.f32 1.442695, %v3368_v58  ;;  %v3532_v6 = vmul.f32 1.442695, %v3369_v55  ;;  %v3150_v30 = vpop.xlane.xlu0 %3149  ;;  %6198 = vmatpush3.bf16.msra.mxu1 %v2227_v11  ;;  %6136 = vmatpush3.bf16.msra.mxu0 %v2212_v20 }
 0x628   : > { %7040 = vpow2.f32 %v3466_v50  ;;  %v3338_v62 = vsub.f32 %v9380_v14, %v3150_v30  ;;  %v3339_v59 = vsub.f32 %v9382_v61, %v3150_v30  ;;  %v2236_v30 = vld [vmem:[#allocation4 + $0xd8] sm:$0xff] }
 0x629   : > { %7042 = vpow2.f32 %v3530_v45  ;;  %v3153_v34 = vpop.xlane.xlu1 %3152  ;;  %6199 = vmatprep.subr.bf16.mxu1 %v2236_v30 }
 0x62a   : > { %7044 = vpow2.f32 %v3532_v6  ;;  %v3470_v56 = vmul.f32 1.442695, %v3338_v62  ;;  %v3472_v1 = vmul.f32 1.442695, %v3339_v59  ;;  %v3340_v63 = vsub.f32 %v9386_v10, %v3153_v34  ;;  %v2228_v62 = vld [vmem:[#allocation4 + $0x98] sm:$0xff] }
 0x62b   : > { %7046 = vpow2.f32 %v3468_v43  ;;  %v3341_v8 = vsub.f32 %v9390_v32, %v3153_v34  ;;  %v3198_v39 = vpop.xlane.xlu0 %3197  ;;  %6200 = vmatpush3.bf16.msra.mxu1 %v2228_v62 }
 0x62c   : > { %7048 = vpow2.f32 %v3470_v56  ;;  %v3474_v19 = vmul.f32 1.442695, %v3340_v63  ;;  %v3370_v14 = vsub.f32 %v9384_v41, %v3198_v39  ;;  %v3371_v61 = vsub.f32 %v9388_v37, %v3198_v39 }
 0x62d   : > { %7050 = vpow2.f32 %v3472_v1  ;;  %v3476_v3 = vmul.f32 1.442695, %v3341_v8  ;;  %v3201_v36 = vpop.xlane.xlu1 %3200 }
 0x62e   : > { %v9754_v44 = vpop.eup %7032  ;;  %7052 = vpow2.f32 %v3474_v19  ;;  %v3534_v10 = vmul.f32 1.442695, %v3370_v14  ;;  %v3536_v58 = vmul.f32 1.442695, %v3371_v61  ;;  %v3372_v32 = vsub.f32 %v9392_v33, %v3201_v36  ;;  %v2213_v61 = vld [vmem:[#allocation4 + $0x20] sm:$0xff] }
 0x62f   : > { %v9757_v55 = vpop.eup %7034  ;;  %7054 = vpow2.f32 %v3476_v3  ;;  %v3373_v41 = vsub.f32 %v9396_v52, %v3201_v36  ;;  %v3156_v53 = vpop.xlane.xlu0 %3155  ;;  %v2237_v3 = vld [vmem:[#allocation4 + $0xe0] sm:$0xff] }
 0x630   : > { %v9760_v37 = vpop.eup %7036  ;;  %7056 = vpow2.f32 %v3534_v10  ;;  %v3538_v60 = vmul.f32 1.442695, %v3372_v32  ;;  %v3342_v50 = vsub.f32 %v9404_v13, %v3156_v53  ;;  %v3343_v45 = vsub.f32 %v9406_v21, %v3156_v53  ;;  %6201 = vmatprep.subr.bf16.mxu1 %v2237_v3 }
 0x631   : > { %v9764_v6 = vpop.eup %7038  ;;  %7058 = vpow2.f32 %v3536_v58  ;;  %v3540_v33 = vmul.f32 1.442695, %v3373_v41  ;;  %v3159_v43 = vpop.xlane.xlu1 %3158  ;;  %v3766_v41 = vadd.f32 %v9760_v37, %v9757_v55 }
 0x632   : > { %v9766_v59 = vpop.eup %7040  ;;  %7060 = vpow2.f32 %v3538_v60  ;;  %v3478_v52 = vmul.f32 1.442695, %v3342_v50  ;;  %v3480_v34 = vmul.f32 1.442695, %v3343_v45  ;;  %v3344_v31 = vsub.f32 %v9410_v26, %v3159_v43  ;;  %v2238_v50 = vld [vmem:[#allocation4 + $0xe8] sm:$0xff] }
 0x633   : > { %v9769_v11 = vpop.eup %7042  ;;  %7062 = vpow2.f32 %v3540_v33  ;;  %v3345_v13 = vsub.f32 %v9414_v18, %v3159_v43  ;;  %v3718_v21 = vadd.f32 %v9764_v6, %v9754_v44  ;;  %v3204_v56 = vpop.xlane.xlu0 %3203  ;;  %v2221_v18 = vld [vmem:[#allocation4 + $0x60] sm:$0xff] }
 0x634   : > { %v9774_v1 = vpop.eup %7044  ;;  %7064 = vpow2.f32 %v3478_v52  ;;  %v3482_v63 = vmul.f32 1.442695, %v3344_v31  ;;  %v3374_v8 = vsub.f32 %v9408_v22, %v3204_v56  ;;  %v3375_v39 = vsub.f32 %v9412_v51, %v3204_v56  ;;  %6137 = vmatprep.subr.bf16.mxu0 %v2221_v18  ;;  %v2229_v22 = vld [vmem:[#allocation4 + $0xa0] sm:$0xff]  ;;  %v2222_v51 = vld [vmem:[#allocation4 + $0x68] sm:$0xff] }
 0x635   : > { %v9778_v26 = vpop.eup %7046  ;;  %7066 = vpow2.f32 %v3480_v34  ;;  %v3484_v19 = vmul.f32 1.442695, %v3345_v13  ;;  %3719 = vadd.xlane.f32.xlu0 %v3718_v21  ;;  %v3207_v14 = vpop.xlane.xlu1 %3206  ;;  %6138 = vmatpush3.bf16.msra.mxu0 %v2213_v61 }
 0x636   : > { %v9780_v36 = vpop.eup %7048  ;;  %7068 = vpow2.f32 %v3482_v63  ;;  %v3542_v25 = vmul.f32 1.442695, %v3374_v8  ;;  %v3544_v20 = vmul.f32 1.442695, %v3375_v39  ;;  %v3376_v10 = vsub.f32 %v9416_v38, %v3207_v14  ;;  %6202 = vmatpush3.bf16.msra.mxu1 %v2229_v22  ;;  %6139 = vmatprep.subr.bf16.mxu0 %v2222_v51 }
 0x637   : > { %v9783_v58 = vpop.eup %7050  ;;  %7070 = vpow2.f32 %v3484_v19  ;;  %v3377_v32 = vsub.f32 %v9420_v48, %v3207_v14  ;;  %v3721_v53 = vadd.f32 %v9778_v26, %v9766_v59  ;;  %v3162_v60 = vpop.xlane.xlu0 %3161  ;;  %v2214_v48 = vld [vmem:[#allocation4 + $0x28] sm:$0xff]  ;;  %6203 = vmatprep.subr.bf16.mxu1 %v2238_v50  ;;  %v3769_v63 = vadd.f32 %v9774_v1, %v9769_v11 }
 0x638   : > { %v9790_v38 = vpop.eup %7052  ;;  %7072 = vpow2.f32 %v3542_v25  ;;  %v3546_v45 = vmul.f32 1.442695, %v3376_v10  ;;  %v3346_v33 = vsub.f32 %v9428_v12, %v3162_v60  ;;  %v3347_v43 = vsub.f32 %v9430_v28, %v3162_v60 }
 0x639   : > { %v9794_v30 = vpop.eup %7054  ;;  %7074 = vpow2.f32 %v3544_v20  ;;  %v3548_v62 = vmul.f32 1.442695, %v3377_v32  ;;  %3767 = vadd.xlane.f32.xlu0 %v3766_v41  ;;  %3722 = vadd.xlane.f32.xlu1 %v3721_v53  ;;  %v3165_v52 = vpop.xlane.xlu1 %3164  ;;  %v3724_v34 = vadd.f32 %v9783_v58, %v9780_v36 }
 0x63a   : > { %v9798_v31 = vpop.eup %7056  ;;  %7076 = vpow2.f32 %v3546_v45  ;;  %v3486_v13 = vmul.f32 1.442695, %v3346_v33  ;;  %v3488_v12 = vmul.f32 1.442695, %v3347_v43  ;;  %v3348_v28 = vsub.f32 %v9434_v46, %v3165_v52  ;;  %6140 = vmatpush3.bf16.msra.mxu0 %v2214_v48 }
 0x63b   : > { %v9801_v21 = vpop.eup %7058  ;;  %7078 = vpow2.f32 %v3548_v62  ;;  %v3349_v56 = vsub.f32 %v9438_v5, %v3165_v52  ;;  %v3210_v8 = vpop.xlane.xlu0 %3209  ;;  %v3727_v51 = vadd.f32 %v9794_v30, %v9790_v38 }
 0x63c   : > { %v9806_v39 = vpop.eup %7060  ;;  %7080 = vpow2.f32 %v3486_v13  ;;  %v3490_v19 = vmul.f32 1.442695, %v3348_v28  ;;  %v3378_v14 = vsub.f32 %v9432_v57, %v3210_v8  ;;  %v3379_v18 = vsub.f32 %v9436_v9, %v3210_v8 }
 0x63d   : > { %v9810_v61 = vpop.eup %7062  ;;  %7082 = vpow2.f32 %v3488_v12  ;;  %v3492_v46 = vmul.f32 1.442695, %v3349_v56  ;;  %3725 = vadd.xlane.f32.xlu0 %v3724_v34  ;;  %3770 = vadd.xlane.f32.xlu1 %v3769_v63  ;;  %v3213_v5 = vpop.xlane.xlu1 %3212  ;;  %v3772_v3 = vadd.f32 %v9801_v21, %v9798_v31 }
 0x63e   : > { %v9814_v25 = vpop.eup %7064  ;;  %7084 = vpow2.f32 %v3490_v19  ;;  %v3550_v20 = vmul.f32 1.442695, %v3378_v14  ;;  %v3552_v10 = vmul.f32 1.442695, %v3379_v18  ;;  %v3380_v22 = vsub.f32 %v9440_v16, %v3213_v5 }
 0x63f   : > { %v9817_v57 = vpop.eup %7066  ;;  %7086 = vpow2.f32 %v3492_v46  ;;  %v3381_v9 = vsub.f32 %v9444_v23, %v3213_v5  ;;  %v3168_v32 = vpop.xlane.xlu0 %3167  ;;  %v3775_v34 = vadd.f32 %v9810_v61, %v9806_v39 }
 0x640   : > { %v9822_v41 = vpop.eup %7068  ;;  %7088 = vpow2.f32 %v3550_v20  ;;  %v3554_v53 = vmul.f32 1.442695, %v3380_v22  ;;  %v3350_v60 = vsub.f32 %v9452_v42, %v3168_v32  ;;  %v3351_v50 = vsub.f32 %v9454_v29, %v3168_v32 }
 0x641   : > { %v9826_v45 = vpop.eup %7070  ;;  %7090 = vpow2.f32 %v3552_v10  ;;  %v3556_v16 = vmul.f32 1.442695, %v3381_v9  ;;  %3773 = vadd.xlane.f32.xlu0 %v3772_v3  ;;  %3728 = vadd.xlane.f32.xlu1 %v3727_v51  ;;  %v3171_v33 = vpop.xlane.xlu1 %3170  ;;  %v3730_v23 = vadd.f32 %v9817_v57, %v9814_v25 }
 0x642   : > { %v9830_v43 = vpop.eup %7072  ;;  %7092 = vpow2.f32 %v3554_v53  ;;  %v3494_v48 = vmul.f32 1.442695, %v3350_v60  ;;  %v3496_v62 = vmul.f32 1.442695, %v3351_v50  ;;  %v3352_v52 = vsub.f32 %v9458_v4, %v3171_v33 }
 0x643   : > { %v9833_v42 = vpop.eup %7074  ;;  %7094 = vpow2.f32 %v3556_v16  ;;  %v3353_v29 = vsub.f32 %v9462_v7, %v3171_v33  ;;  %v3216_v13 = vpop.xlane.xlu0 %3215  ;;  %v3733_v3 = vadd.f32 %v9826_v45, %v9822_v41 }
 0x644   : > { %v9838_v12 = vpop.eup %7076  ;;  %7096 = vpow2.f32 %v3494_v48  ;;  %v3498_v28 = vmul.f32 1.442695, %v3352_v52  ;;  %v3382_v56 = vsub.f32 %v9456_v54, %v3216_v13  ;;  %v3383_v63 = vsub.f32 %v9460_v35, %v3216_v13 }
 0x645   : > { %v9842_v8 = vpop.eup %7078  ;;  %7098 = vpow2.f32 %v3496_v62  ;;  %v3500_v4 = vmul.f32 1.442695, %v3353_v29  ;;  %3731 = vadd.xlane.f32.xlu0 %v3730_v23  ;;  %3776 = vadd.xlane.f32.xlu1 %v3775_v34  ;;  %v3219_v19 = vpop.xlane.xlu1 %3218  ;;  %v3778_v7 = vadd.f32 %v9833_v42, %v9830_v43 }
 0x646   : > { %v9846_v14 = vpop.eup %7080  ;;  %7100 = vpow2.f32 %v3498_v28  ;;  %v3558_v18 = vmul.f32 1.442695, %v3382_v56  ;;  %v3560_v46 = vmul.f32 1.442695, %v3383_v63  ;;  %v3384_v5 = vsub.f32 %v9464_v27, %v3219_v19 }
 0x647   : > { %v9849_v54 = vpop.eup %7082  ;;  %7102 = vpow2.f32 %v3500_v4  ;;  %v3385_v35 = vsub.f32 %v9468_v24, %v3219_v19  ;;  %v3174_v20 = vpop.xlane.xlu0 %3173  ;;  %v3781_v23 = vadd.f32 %v9842_v8, %v9838_v12  ;;  %v11232_v19 = vld [vmem:[#allocation23_spill] sm:$0xff] }
 0x648   : > { %v9854_v10 = vpop.eup %7084  ;;  %7104 = vpow2.f32 %v3558_v18  ;;  %v3562_v22 = vmul.f32 1.442695, %v3384_v5  ;;  %v3354_v9 = vsub.f32 %v9476_v17, %v3174_v20  ;;  %v3355_v51 = vsub.f32 %v9478_v0, %v3174_v20  ;;  %v2223_v18 = vld [vmem:[#allocation4 + $0x70] sm:$0xff] }
 0x649   : > { %v9858_v32 = vpop.eup %7086  ;;  %7106 = vpow2.f32 %v3560_v46  ;;  %v3564_v27 = vmul.f32 1.442695, %v3385_v35  ;;  %3779 = vadd.xlane.f32.xlu0 %v3778_v7  ;;  %3734 = vadd.xlane.f32.xlu1 %v3733_v3  ;;  %v3177_v53 = vpop.xlane.xlu1 %3176  ;;  %v3736_v24 = vadd.f32 %v9849_v54, %v9846_v14  ;;  %v11233_v46 = vld [vmem:[#allocation24_spill] sm:$0xff] }
 0x64a   : > { %v9862_v60 = vpop.eup %7088  ;;  %7108 = vpow2.f32 %v3562_v22  ;;  %v3502_v50 = vmul.f32 1.442695, %v3354_v9  ;;  %v3504_v16 = vmul.f32 1.442695, %v3355_v51  ;;  %v3356_v33 = vsub.f32 %v9482_v2, %v3177_v53  ;;  %6141 = vmatprep.subr.bf16.mxu0 %v2223_v18  ;;  %v11234_v9 = vld [vmem:[#allocation25_spill] sm:$0xff] }
 0x64b   : > { %v9865_v17 = vpop.eup %7090  ;;  %7110 = vpow2.f32 %v3564_v27  ;;  %v3357_v0 = vsub.f32 %v9486_v40, %v3177_v53  ;;  %v3222_v48 = vpop.xlane.xlu0 %3221  ;;  %v3739_v35 = vadd.f32 %v9858_v32, %v9854_v10  ;;  %v11235_v27 = vld [vmem:[#allocation26_spill] sm:$0xff] }
 0x64c   : > { %v9870_v62 = vpop.eup %7092  ;;  %7112 = vpow2.f32 %v3502_v50  ;;  %v3506_v52 = vmul.f32 1.442695, %v3356_v33  ;;  %v3386_v29 = vsub.f32 %v9480_v49, %v3222_v48  ;;  %v3387_v34 = vsub.f32 %v9484_v15, %v3222_v48  ;;  %v2230_v49 = vld [vmem:[#allocation4 + $0xa8] sm:$0xff] }
 0x64d   : > { %v9874_v13 = vpop.eup %7094  ;;  %7114 = vpow2.f32 %v3504_v16  ;;  %v3508_v2 = vmul.f32 1.442695, %v3357_v0  ;;  %3737 = vadd.xlane.f32.xlu0 %v3736_v24  ;;  %3782 = vadd.xlane.f32.xlu1 %v3781_v23  ;;  %v3225_v28 = vpop.xlane.xlu1 %3224  ;;  %v3784_v40 = vadd.f32 %v9865_v17, %v9862_v60  ;;  %v2215_v24 = vld [vmem:[#allocation4 + $0x30] sm:$0xff] }
 0x64e   : > { %v9878_v56 = vpop.eup %7096  ;;  %7116 = vpow2.f32 %v3506_v52  ;;  %v3566_v63 = vmul.f32 1.442695, %v3386_v29  ;;  %v3568_v4 = vmul.f32 1.442695, %v3387_v34  ;;  %v3388_v7 = vsub.f32 %v11232_v19, %v3225_v28  ;;  %6204 = vmatpush3.bf16.msra.mxu1 %v2230_v49  ;;  %v11237_v29 = vld [vmem:[#allocation28_spill] sm:$0xff]  ;;  %6142 = vmatpush3.bf16.msra.mxu0 %v2215_v24  ;;  %v2239_v19 = vld [vmem:[#allocation4 + $0xf0] sm:$0xff] }
 0x64f   : > { %v9881_v15 = vpop.eup %7098  ;;  %7118 = vpow2.f32 %v3508_v2  ;;  %v3389_v5 = vsub.f32 %v11233_v46, %v3225_v28  ;;  %v3180_v3 = vpop.xlane.xlu0 %3179  ;;  %v11238_v28 = vld [vmem:[#allocation30_spill] sm:$0xff]  ;;  %v11239_v46 = vld [vmem:[#allocation27_spill] sm:$0xff]  ;;  %6205 = vmatprep.subr.bf16.mxu1 %v2239_v19 }
 0x650   : > { %v9886_v20 = vpop.eup %7100  ;;  %7120 = vpow2.f32 %v3566_v63  ;;  %v3570_v22 = vmul.f32 1.442695, %v3388_v7  ;;  %v3358_v51 = vsub.f32 %v11234_v9, %v3180_v3  ;;  %v3359_v53 = vsub.f32 %v11235_v27, %v3180_v3  ;;  %v2224_v7 = vld [vmem:[#allocation4 + $0x78] sm:$0xff] }
 0x651   : > { %v9890_v50 = vpop.eup %7102  ;;  %7122 = vpow2.f32 %v3568_v4  ;;  %v3572_v16 = vmul.f32 1.442695, %v3389_v5  ;;  %3785 = vadd.xlane.f32.xlu0 %v3784_v40  ;;  %3740 = vadd.xlane.f32.xlu1 %v3739_v35  ;;  %v3183_v33 = vpop.xlane.xlu1 %3182  ;;  %v3742_v0 = vadd.f32 %v9881_v15, %v9878_v56  ;;  %v3787_v40 = vadd.f32 %v9874_v13, %v9870_v62  ;;  %v11240_v35 = vld [vmem:[#allocation29_spill] sm:$0xff]  ;;  %v2216_v9 = vld [vmem:[#allocation4 + $0x38] sm:$0xff] }
 0x652   : > { %v9894_v23 = vpop.eup %7104  ;;  %7124 = vpow2.f32 %v3570_v22  ;;  %v3510_v48 = vmul.f32 1.442695, %v3358_v51  ;;  %v3512_v52 = vmul.f32 1.442695, %v3359_v53  ;;  %v3360_v34 = vsub.f32 %v11237_v29, %v3183_v33  ;;  %v2231_v22 = vld [vmem:[#allocation4 + $0xb0] sm:$0xff]  ;;  %6143 = vmatprep.subr.bf16.mxu0 %v2224_v7  ;;  %v11242_v29 = vld [vmem:[#allocation31_spill] sm:$0xff] }
 0x653   : > { %11236 = vst [vmem:[#allocation23_spill] sm:$0xff] %v9894_v23  ;;  %v9897_v2 = vpop.eup %7106  ;;  %7126 = vpow2.f32 %v3572_v16  ;;  %v3361_v63 = vsub.f32 %v11238_v28, %v3183_v33  ;;  %v3228_v4 = vpop.xlane.xlu0 %3227  ;;  %6206 = vmatpush3.bf16.msra.mxu1 %v2231_v22  ;;  %6144 = vmatpush3.bf16.msra.mxu0 %v2216_v9  ;;  %v2232_v19 = vld [vmem:[#allocation4 + $0xb8] sm:$0xff]  ;;  %v2249_v7 = vld [vmem:[#allocation4 + $0x140] sm:$0xff] }
 0x654   : > { %v9902_v49 = vpop.eup %7108  ;;  %7128 = vpow2.f32 %v3510_v48  ;;  %v3514_v18 = vmul.f32 1.442695, %v3360_v34  ;;  %v3390_v5 = vsub.f32 %v11239_v46, %v3228_v4  ;;  %v3391_v3 = vsub.f32 %v11240_v35, %v3228_v4  ;;  %v2240_v4 = vld [vmem:[#allocation4 + $0xf8] sm:$0xff]  ;;  %6257 = vmatprep.subr.bf16.mxu0 %v2249_v7 }
 0x655   : > { %v9906_v51 = vpop.eup %7110  ;;  %7130 = vpow2.f32 %v3512_v52  ;;  %v3516_v27 = vmul.f32 1.442695, %v3361_v63  ;;  %3743 = vadd.xlane.f32.xlu0 %v3742_v0  ;;  %3788 = vadd.xlane.f32.xlu1 %v3787_v40  ;;  %v3231_v53 = vpop.xlane.xlu1 %3230  ;;  %v3790_v24 = vadd.f32 %v9897_v2, %v9894_v23  ;;  %v11244_v52 = vld [vmem:[#allocation32_spill] sm:$0xff]  ;;  %v3745_v0 = vadd.f32 %v9890_v50, %v9886_v20 }
 0x656   : > { %v9910_v16 = vpop.eup %7112  ;;  %7132 = vpow2.f32 %v3514_v18  ;;  %v3574_v33 = vmul.f32 1.442695, %v3390_v5  ;;  %v3576_v48 = vmul.f32 1.442695, %v3391_v3  ;;  %v3392_v34 = vsub.f32 %v11242_v29, %v3231_v53  ;;  %v11246_v5 = vld [vmem:[#allocation33_spill] sm:$0xff]  ;;  %v11247_v3 = vld [vmem:[#allocation34_spill] sm:$0xff]  ;;  %6207 = vmatprep.subr.bf16.mxu1 %v2240_v4 }
 0x657   : > { %11241 = vst [vmem:[#allocation24_spill] sm:$0xff] %v9910_v16  ;;  %v9913_v28 = vpop.eup %7114  ;;  %7134 = vpow2.f32 %v3516_v27  ;;  %v3393_v63 = vsub.f32 %v11244_v52, %v3231_v53  ;;  %v3186_v40 = vpop.xlane.xlu0 %3185  ;;  %v2265_v52 = vld [vmem:[#allocation4 + $0x1c0] sm:$0xff]  ;;  %6208 = vmatpush3.bf16.msra.mxu1 %v2232_v19 }
 0x658   : > { %11243 = vst [vmem:[#allocation25_spill] sm:$0xff] %v9913_v28  ;;  %v9918_v46 = vpop.eup %7116  ;;  %7136 = vpow2.f32 %v3574_v33  ;;  %v3578_v18 = vmul.f32 1.442695, %v3392_v34  ;;  %v3362_v35 = vsub.f32 %v11246_v5, %v3186_v40  ;;  %v3363_v22 = vsub.f32 %v11247_v3, %v3186_v40  ;;  %v11250_v5 = vld [vmem:[#allocation36_spill] sm:$0xff]  ;;  %6321 = vmatprep.subr.bf16.mxu1 %v2265_v52 }
 0x659   : > { %11245 = vst [vmem:[#allocation26_spill] sm:$0xff] %v9918_v46  ;;  %v9922_v9 = vpop.eup %7118  ;;  %7138 = vpow2.f32 %v3576_v48  ;;  %v3580_v27 = vmul.f32 1.442695, %v3393_v63  ;;  %3791 = vadd.xlane.f32.xlu0 %v3790_v24  ;;  %3746 = vadd.xlane.f32.xlu1 %v3745_v0  ;;  %v3189_v53 = vpop.xlane.xlu1 %3188  ;;  %v3748_v29 = vadd.f32 %v9913_v28, %v9910_v16  ;;  %v11252_v48 = vld [vmem:[#allocation38_spill] sm:$0xff]  ;;  %v3793_v24 = vadd.f32 %v9906_v51, %v9902_v49 }
 0x65a   : > { %11248 = vst [vmem:[#allocation28_spill] sm:$0xff] %v9922_v9  ;;  %v9926_v23 = vpop.eup %7120  ;;  %7140 = vpow2.f32 %v3578_v18  ;;  %v3518_v33 = vmul.f32 1.442695, %v3362_v35  ;;  %v3520_v34 = vmul.f32 1.442695, %v3363_v22  ;;  %v3364_v40 = vsub.f32 %v11250_v5, %v3189_v53  ;;  %v11254_v18 = vld [vmem:[#allocation35_spill] sm:$0xff] }
 0x65b   : > { %11249 = vst [vmem:[#allocation30_spill] sm:$0xff] %v9926_v23  ;;  %v9929_v4 = vpop.eup %7122  ;;  %7142 = vpow2.f32 %v3580_v27  ;;  %v3365_v63 = vsub.f32 %v11252_v48, %v3189_v53  ;;  %v3234_v0 = vpop.xlane.xlu0 %3233  ;;  %v11255_v22 = vld [vmem:[#allocation37_spill] sm:$0xff] }
 0x65c   : > { %11251 = vst [vmem:[#allocation27_spill] sm:$0xff] %v9929_v4  ;;  %v9934_v7 = vpop.eup %7124  ;;  %7144 = vpow2.f32 %v3518_v33  ;;  %v3522_v3 = vmul.f32 1.442695, %v3364_v40  ;;  %v3394_v35 = vsub.f32 %v11254_v18, %v3234_v0  ;;  %v3395_v16 = vsub.f32 %v11255_v22, %v3234_v0  ;;  %v11258_v40 = vld [vmem:[#allocation39_spill] sm:$0xff]  ;;  %v11260_v0 = vld [vmem:[#allocation40_spill] sm:$0xff] }
 0x65d   : > { %11253 = vst [vmem:[#allocation29_spill] sm:$0xff] %v9934_v7  ;;  %v9938_v5 = vpop.eup %7126  ;;  %7146 = vpow2.f32 %v3520_v34  ;;  %v3524_v19 = vmul.f32 1.442695, %v3365_v63  ;;  %3749 = vadd.xlane.f32.xlu0 %v3748_v29  ;;  %3794 = vadd.xlane.f32.xlu1 %v3793_v24  ;;  %v3237_v27 = vpop.xlane.xlu1 %3236  ;;  %v3796_v53 = vadd.f32 %v9929_v4, %v9926_v23  ;;  %v3751_v29 = vadd.f32 %v9922_v9, %v9918_v46  ;;  %v11262_v23 = vld [vmem:[#allocation41_spill] sm:$0xff] }
 0x65e   : > { %11256 = vst [vmem:[#allocation31_spill] sm:$0xff] %v9938_v5  ;;  %v9942_v48 = vpop.eup %7128  ;;  %7148 = vpow2.f32 %v3522_v3  ;;  %v3582_v52 = vmul.f32 1.442695, %v3394_v35  ;;  %v3584_v33 = vmul.f32 1.442695, %v3395_v16  ;;  %v3396_v28 = vsub.f32 %v11258_v40, %v3237_v27  ;;  %v11263_v3 = vld [vmem:[#allocation42_spill] sm:$0xff] }
 0x65f   : > { %11257 = vst [vmem:[#allocation32_spill] sm:$0xff] %v9942_v48  ;;  %v9945_v18 = vpop.eup %7130  ;;  %7150 = vpow2.f32 %v3524_v19  ;;  %v3397_v22 = vsub.f32 %v11260_v0, %v3237_v27  ;;  %v3240_v34 = vpop.xlane.xlu0 %3239 }
 0x660   : > { %11259 = vst [vmem:[#allocation33_spill] sm:$0xff] %v9945_v18  ;;  %v9950_v63 = vpop.eup %7132  ;;  %7152 = vpow2.f32 %v3582_v52  ;;  %v3586_v24 = vmul.f32 1.442695, %v3396_v28  ;;  %v3398_v4 = vsub.f32 %v11262_v23, %v3240_v34  ;;  %v3399_v35 = vsub.f32 %v11263_v3, %v3240_v34  ;;  %v11266_v28 = vld [vmem:[#allocation44_spill] sm:$0xff]  ;;  %v11268_v34 = vld [vmem:[#allocation46_spill] sm:$0xff] }
 0x661   : > { %11261 = vst [vmem:[#allocation34_spill] sm:$0xff] %v9950_v63  ;;  %v9954_v16 = vpop.eup %7134  ;;  %7154 = vpow2.f32 %v3584_v33  ;;  %v3588_v40 = vmul.f32 1.442695, %v3397_v22  ;;  %3797 = vadd.xlane.f32.xlu0 %v3796_v53  ;;  %3752 = vadd.xlane.f32.xlu1 %v3751_v29  ;;  %v3243_v19 = vpop.xlane.xlu1 %3242  ;;  %v3754_v27 = vadd.f32 %v9945_v18, %v9942_v48  ;;  %v3799_v53 = vadd.f32 %v9938_v5, %v9934_v7  ;;  %v11270_v48 = vld [vmem:[#allocation43_spill] sm:$0xff] }
 0x662   : > { %11264 = vst [vmem:[#allocation36_spill] sm:$0xff] %v9954_v16  ;;  %v9958_v0 = vpop.eup %7136  ;;  %7156 = vpow2.f32 %v3586_v24  ;;  %v3590_v46 = vmul.f32 1.442695, %v3398_v4  ;;  %v3592_v52 = vmul.f32 1.442695, %v3399_v35  ;;  %v3400_v9 = vsub.f32 %v11266_v28, %v3243_v19  ;;  %v11271_v24 = vld [vmem:[#allocation45_spill] sm:$0xff] }
 0x663   : > { %11265 = vst [vmem:[#allocation38_spill] sm:$0xff] %v9958_v0  ;;  %v9961_v23 = vpop.eup %7138  ;;  %7158 = vpow2.f32 %v3588_v40  ;;  %v3401_v3 = vsub.f32 %v11268_v34, %v3243_v19  ;;  %v3288_v33 = vpop.xlane.xlu0 %3287 }
 0x664   : > { %11267 = vst [vmem:[#allocation35_spill] sm:$0xff] %v9961_v23  ;;  %v9966_v22 = vpop.eup %7140  ;;  %7160 = vpow2.f32 %v3590_v46  ;;  %v3594_v29 = vmul.f32 1.442695, %v3400_v9  ;;  %v3430_v18 = vsub.f32 %v11270_v48, %v3288_v33  ;;  %v3431_v4 = vsub.f32 %v11271_v24, %v3288_v33  ;;  %v11274_v9 = vld [vmem:[#allocation47_spill] sm:$0xff]  ;;  %v11276_v33 = vld [vmem:[#allocation48_spill] sm:$0xff] }
 0x665   : > { %11269 = vst [vmem:[#allocation37_spill] sm:$0xff] %v9966_v22  ;;  %v9970_v35 = vpop.eup %7142  ;;  %7162 = vpow2.f32 %v3592_v52  ;;  %v3596_v28 = vmul.f32 1.442695, %v3401_v3  ;;  %3755 = vadd.xlane.f32.xlu0 %v3754_v27  ;;  %3800 = vadd.xlane.f32.xlu1 %v3799_v53  ;;  %v3291_v40 = vpop.xlane.xlu1 %3290  ;;  %v3802_v19 = vadd.f32 %v9961_v23, %v9958_v0  ;;  %v3757_v27 = vadd.f32 %v9954_v16, %v9950_v63  ;;  %v11278_v0 = vld [vmem:[#allocation49_spill] sm:$0xff] }
 0x666   : > { %11272 = vst [vmem:[#allocation39_spill] sm:$0xff] %v9970_v35  ;;  %v9974_v34 = vpop.eup %7144  ;;  %7164 = vpow2.f32 %v3594_v29  ;;  %v3654_v7 = vmul.f32 1.442695, %v3430_v18  ;;  %v3656_v46 = vmul.f32 1.442695, %v3431_v4  ;;  %v3432_v5 = vsub.f32 %v11274_v9, %v3291_v40  ;;  %v11279_v29 = vld [vmem:[#allocation50_spill] sm:$0xff] }
 0x667   : > { %11273 = vst [vmem:[#allocation40_spill] sm:$0xff] %v9974_v34  ;;  %v9977_v48 = vpop.eup %7146  ;;  %7166 = vpow2.f32 %v3596_v28  ;;  %v3433_v24 = vsub.f32 %v11276_v33, %v3291_v40  ;;  %v3246_v52 = vpop.xlane.xlu0 %3245 }
 0x668   : > { %11275 = vst [vmem:[#allocation41_spill] sm:$0xff] %v9977_v48  ;;  %v9982_v3 = vpop.eup %7148  ;;  %7168 = vpow2.f32 %v3654_v7  ;;  %v3658_v53 = vmul.f32 1.442695, %v3432_v5  ;;  %v3402_v23 = vsub.f32 %v11278_v0, %v3246_v52  ;;  %v3403_v18 = vsub.f32 %v11279_v29, %v3246_v52  ;;  %v11282_v5 = vld [vmem:[#allocation52_spill] sm:$0xff]  ;;  %v11284_v52 = vld [vmem:[#allocation54_spill] sm:$0xff] }
 0x669   : > { %11277 = vst [vmem:[#allocation42_spill] sm:$0xff] %v9982_v3  ;;  %v9986_v4 = vpop.eup %7150  ;;  %7170 = vpow2.f32 %v3656_v46  ;;  %v3660_v9 = vmul.f32 1.442695, %v3433_v24  ;;  %3803 = vadd.xlane.f32.xlu0 %v3802_v19  ;;  %3758 = vadd.xlane.f32.xlu1 %v3757_v27  ;;  %v3249_v28 = vpop.xlane.xlu1 %3248  ;;  %v3760_v40 = vadd.f32 %v9977_v48, %v9974_v34  ;;  %v3805_v19 = vadd.f32 %v9970_v35, %v9966_v22  ;;  %v11286_v34 = vld [vmem:[#allocation51_spill] sm:$0xff] }
 0x66a   : > { %11280 = vst [vmem:[#allocation44_spill] sm:$0xff] %v9986_v4  ;;  %v9990_v33 = vpop.eup %7152  ;;  %7172 = vpow2.f32 %v3658_v53  ;;  %v3598_v63 = vmul.f32 1.442695, %v3402_v23  ;;  %v3600_v7 = vmul.f32 1.442695, %v3403_v18  ;;  %v3404_v16 = vsub.f32 %v11282_v5, %v3249_v28  ;;  %v11287_v53 = vld [vmem:[#allocation53_spill] sm:$0xff] }
 0x66b   : > { %11281 = vst [vmem:[#allocation46_spill] sm:$0xff] %v9990_v33  ;;  %v9993_v0 = vpop.eup %7154  ;;  %7174 = vpow2.f32 %v3660_v9  ;;  %v3405_v29 = vsub.f32 %v11284_v52, %v3249_v28  ;;  %v3294_v46 = vpop.xlane.xlu0 %3293 }
 0x66c   : > { %11283 = vst [vmem:[#allocation43_spill] sm:$0xff] %v9993_v0  ;;  %v9998_v24 = vpop.eup %7156  ;;  %7176 = vpow2.f32 %v3598_v63  ;;  %v3602_v27 = vmul.f32 1.442695, %v3404_v16  ;;  %v3434_v48 = vsub.f32 %v11286_v34, %v3294_v46  ;;  %v3435_v23 = vsub.f32 %v11287_v53, %v3294_v46  ;;  %v11290_v16 = vld [vmem:[#allocation55_spill] sm:$0xff]  ;;  %v11292_v46 = vld [vmem:[#allocation56_spill] sm:$0xff] }
 0x66d   : > { %11285 = vst [vmem:[#allocation45_spill] sm:$0xff] %v9998_v24  ;;  %v10002_v18 = vpop.eup %7158  ;;  %7178 = vpow2.f32 %v3600_v7  ;;  %v3604_v5 = vmul.f32 1.442695, %v3405_v29  ;;  %3761 = vadd.xlane.f32.xlu0 %v3760_v40  ;;  %3806 = vadd.xlane.f32.xlu1 %v3805_v19  ;;  %v3297_v9 = vpop.xlane.xlu1 %3296  ;;  %v3808_v28 = vadd.f32 %v9993_v0, %v9990_v33  ;;  %v3763_v40 = vadd.f32 %v9986_v4, %v9982_v3  ;;  %v11294_v33 = vld [vmem:[#allocation57_spill] sm:$0xff] }
 0x66e   : > { %11288 = vst [vmem:[#allocation47_spill] sm:$0xff] %v10002_v18  ;;  %v10006_v52 = vpop.eup %7160  ;;  %7180 = vpow2.f32 %v3602_v27  ;;  %v3662_v22 = vmul.f32 1.442695, %v3434_v48  ;;  %v3664_v63 = vmul.f32 1.442695, %v3435_v23  ;;  %v3436_v35 = vsub.f32 %v11290_v16, %v3297_v9  ;;  %v11295_v27 = vld [vmem:[#allocation58_spill] sm:$0xff] }
 0x66f   : > { %11289 = vst [vmem:[#allocation48_spill] sm:$0xff] %v10006_v52  ;;  %v10009_v34 = vpop.eup %7162  ;;  %7182 = vpow2.f32 %v3604_v5  ;;  %v3437_v53 = vsub.f32 %v11292_v46, %v3297_v9  ;;  %v3252_v7 = vpop.xlane.xlu0 %3251 }
 0x670   : > { %11291 = vst [vmem:[#allocation49_spill] sm:$0xff] %v10009_v34  ;;  %v10014_v29 = vpop.eup %7164  ;;  %7184 = vpow2.f32 %v3662_v22  ;;  %v3666_v19 = vmul.f32 1.442695, %v3436_v35  ;;  %v3406_v0 = vsub.f32 %v11294_v33, %v3252_v7  ;;  %v3407_v48 = vsub.f32 %v11295_v27, %v3252_v7  ;;  %v11298_v35 = vld [vmem:[#allocation60_spill] sm:$0xff]  ;;  %v11300_v7 = vld [vmem:[#allocation62_spill] sm:$0xff] }
 0x671   : > { %11293 = vst [vmem:[#allocation50_spill] sm:$0xff] %v10014_v29  ;;  %v10018_v23 = vpop.eup %7166  ;;  %7186 = vpow2.f32 %v3664_v63  ;;  %v3668_v16 = vmul.f32 1.442695, %v3437_v53  ;;  %3809 = vadd.xlane.f32.xlu0 %v3808_v28  ;;  %3764 = vadd.xlane.f32.xlu1 %v3763_v40  ;;  %v3255_v5 = vpop.xlane.xlu1 %3254  ;;  %v3814_v9 = vadd.f32 %v10009_v34, %v10006_v52  ;;  %v3811_v28 = vadd.f32 %v10002_v18, %v9998_v24  ;;  %v11302_v34 = vld [vmem:[#allocation59_spill] sm:$0xff] }
 0x672   : > { %11296 = vst [vmem:[#allocation52_spill] sm:$0xff] %v10018_v23  ;;  %v10022_v46 = vpop.eup %7168  ;;  %7188 = vpow2.f32 %v3666_v19  ;;  %v3606_v3 = vmul.f32 1.442695, %v3406_v0  ;;  %v3608_v22 = vmul.f32 1.442695, %v3407_v48  ;;  %v3408_v4 = vsub.f32 %v11298_v35, %v3255_v5  ;;  %v11303_v19 = vld [vmem:[#allocation61_spill] sm:$0xff] }
 0x673   : > { %11297 = vst [vmem:[#allocation54_spill] sm:$0xff] %v10022_v46  ;;  %v10025_v33 = vpop.eup %7170  ;;  %7190 = vpow2.f32 %v3668_v16  ;;  %v3409_v27 = vsub.f32 %v11300_v7, %v3255_v5  ;;  %v3300_v63 = vpop.xlane.xlu0 %3299 }
 0x674   : > { %11299 = vst [vmem:[#allocation51_spill] sm:$0xff] %v10025_v33  ;;  %v10030_v53 = vpop.eup %7172  ;;  %7192 = vpow2.f32 %v3606_v3  ;;  %v3610_v40 = vmul.f32 1.442695, %v3408_v4  ;;  %v3438_v52 = vsub.f32 %v11302_v34, %v3300_v63  ;;  %v3439_v0 = vsub.f32 %v11303_v19, %v3300_v63  ;;  %v11306_v4 = vld [vmem:[#allocation63_spill] sm:$0xff]  ;;  %v11308_v63 = vld [vmem:[#allocation64_spill] sm:$0xff] }
 0x675   : > { %11301 = vst [vmem:[#allocation53_spill] sm:$0xff] %v10030_v53  ;;  %v10034_v48 = vpop.eup %7174  ;;  %7194 = vpow2.f32 %v3608_v22  ;;  %v3612_v35 = vmul.f32 1.442695, %v3409_v27  ;;  %3815 = vadd.xlane.f32.xlu0 %v3814_v9  ;;  %3812 = vadd.xlane.f32.xlu1 %v3811_v28  ;;  %v3303_v16 = vpop.xlane.xlu1 %3302  ;;  %v3862_v5 = vadd.f32 %v10025_v33, %v10022_v46  ;;  %v3817_v9 = vadd.f32 %v10018_v23, %v10014_v29  ;;  %v11310_v33 = vld [vmem:[#allocation65_spill] sm:$0xff] }
 0x676   : > { %11304 = vst [vmem:[#allocation55_spill] sm:$0xff] %v10034_v48  ;;  %v10038_v7 = vpop.eup %7176  ;;  %7196 = vpow2.f32 %v3610_v40  ;;  %v3670_v24 = vmul.f32 1.442695, %v3438_v52  ;;  %v3672_v3 = vmul.f32 1.442695, %v3439_v0  ;;  %v3440_v18 = vsub.f32 %v11306_v4, %v3303_v16  ;;  %v11311_v40 = vld [vmem:[#allocation66_spill] sm:$0xff] }
 0x677   : > { %11305 = vst [vmem:[#allocation56_spill] sm:$0xff] %v10038_v7  ;;  %v10041_v34 = vpop.eup %7178  ;;  %7198 = vpow2.f32 %v3612_v35  ;;  %v3441_v19 = vsub.f32 %v11308_v63, %v3303_v16  ;;  %v3258_v22 = vpop.xlane.xlu0 %3257 }
 0x678   : > { %11307 = vst [vmem:[#allocation57_spill] sm:$0xff] %v10041_v34  ;;  %v10046_v27 = vpop.eup %7180  ;;  %7200 = vpow2.f32 %v3670_v24  ;;  %v3674_v28 = vmul.f32 1.442695, %v3440_v18  ;;  %v3410_v46 = vsub.f32 %v11310_v33, %v3258_v22  ;;  %v3411_v52 = vsub.f32 %v11311_v40, %v3258_v22  ;;  %v11314_v18 = vld [vmem:[#allocation68_spill] sm:$0xff]  ;;  %v11316_v22 = vld [vmem:[#allocation70_spill] sm:$0xff] }
 0x679   : > { %11309 = vst [vmem:[#allocation58_spill] sm:$0xff] %v10046_v27  ;;  %v10050_v0 = vpop.eup %7182  ;;  %7202 = vpow2.f32 %v3672_v3  ;;  %v3676_v4 = vmul.f32 1.442695, %v3441_v19  ;;  %3863 = vadd.xlane.f32.xlu0 %v3862_v5  ;;  %3818 = vadd.xlane.f32.xlu1 %v3817_v9  ;;  %v3261_v35 = vpop.xlane.xlu1 %3260  ;;  %v3820_v16 = vadd.f32 %v10041_v34, %v10038_v7  ;;  %v3865_v5 = vadd.f32 %v10034_v48, %v10030_v53  ;;  %v11318_v7 = vld [vmem:[#allocation67_spill] sm:$0xff] }
 0x67a   : > { %11312 = vst [vmem:[#allocation60_spill] sm:$0xff] %v10050_v0  ;;  %v10054_v63 = vpop.eup %7184  ;;  %7204 = vpow2.f32 %v3674_v28  ;;  %v3614_v23 = vmul.f32 1.442695, %v3410_v46  ;;  %v3616_v24 = vmul.f32 1.442695, %v3411_v52  ;;  %v3412_v29 = vsub.f32 %v11314_v18, %v3261_v35  ;;  %v11319_v28 = vld [vmem:[#allocation69_spill] sm:$0xff] }
 0x67b   : > { %11313 = vst [vmem:[#allocation62_spill] sm:$0xff] %v10054_v63  ;;  %v10057_v33 = vpop.eup %7186  ;;  %7206 = vpow2.f32 %v3676_v4  ;;  %v3413_v40 = vsub.f32 %v11316_v22, %v3261_v35  ;;  %v3306_v3 = vpop.xlane.xlu0 %3305 }
 0x67c   : > { %11315 = vst [vmem:[#allocation59_spill] sm:$0xff] %v10057_v33  ;;  %v10062_v19 = vpop.eup %7188  ;;  %7208 = vpow2.f32 %v3614_v23  ;;  %v3618_v9 = vmul.f32 1.442695, %v3412_v29  ;;  %v3442_v34 = vsub.f32 %v11318_v7, %v3306_v3  ;;  %v3443_v46 = vsub.f32 %v11319_v28, %v3306_v3  ;;  %v11322_v29 = vld [vmem:[#allocation71_spill] sm:$0xff]  ;;  %v11324_v3 = vld [vmem:[#allocation72_spill] sm:$0xff] }
 0x67d   : > { %11317 = vst [vmem:[#allocation61_spill] sm:$0xff] %v10062_v19  ;;  %v10066_v52 = vpop.eup %7190  ;;  %7210 = vpow2.f32 %v3616_v24  ;;  %v3620_v18 = vmul.f32 1.442695, %v3413_v40  ;;  %3821 = vadd.xlane.f32.xlu0 %v3820_v16  ;;  %3866 = vadd.xlane.f32.xlu1 %v3865_v5  ;;  %v3309_v4 = vpop.xlane.xlu1 %3308  ;;  %v3868_v35 = vadd.f32 %v10057_v33, %v10054_v63  ;;  %v3823_v16 = vadd.f32 %v10050_v0, %v10046_v27  ;;  %v11326_v63 = vld [vmem:[#allocation73_spill] sm:$0xff] }
 0x67e   : > { %11320 = vst [vmem:[#allocation63_spill] sm:$0xff] %v10066_v52  ;;  %v10070_v22 = vpop.eup %7192  ;;  %7212 = vpow2.f32 %v3618_v9  ;;  %v3678_v48 = vmul.f32 1.442695, %v3442_v34  ;;  %v3680_v23 = vmul.f32 1.442695, %v3443_v46  ;;  %v3444_v53 = vsub.f32 %v11322_v29, %v3309_v4  ;;  %v11327_v9 = vld [vmem:[#allocation74_spill] sm:$0xff] }
 0x67f   : > { %11321 = vst [vmem:[#allocation64_spill] sm:$0xff] %v10070_v22  ;;  %v10073_v7 = vpop.eup %7194  ;;  %7214 = vpow2.f32 %v3620_v18  ;;  %v3445_v28 = vsub.f32 %v11324_v3, %v3309_v4  ;;  %v3264_v24 = vpop.xlane.xlu0 %3263 }
 0x680   : > { %11323 = vst [vmem:[#allocation65_spill] sm:$0xff] %v10073_v7  ;;  %v10078_v40 = vpop.eup %7196  ;;  %7216 = vpow2.f32 %v3678_v48  ;;  %v3682_v5 = vmul.f32 1.442695, %v3444_v53  ;;  %v3414_v33 = vsub.f32 %v11326_v63, %v3264_v24  ;;  %v3415_v34 = vsub.f32 %v11327_v9, %v3264_v24  ;;  %v11330_v53 = vld [vmem:[#allocation76_spill] sm:$0xff]  ;;  %v11332_v24 = vld [vmem:[#allocation78_spill] sm:$0xff] }
 0x681   : > { %11325 = vst [vmem:[#allocation66_spill] sm:$0xff] %v10078_v40  ;;  %v10082_v46 = vpop.eup %7198  ;;  %7218 = vpow2.f32 %v3680_v23  ;;  %v3684_v29 = vmul.f32 1.442695, %v3445_v28  ;;  %3869 = vadd.xlane.f32.xlu0 %v3868_v35  ;;  %3824 = vadd.xlane.f32.xlu1 %v3823_v16  ;;  %v3267_v18 = vpop.xlane.xlu1 %3266  ;;  %v3826_v4 = vadd.f32 %v10073_v7, %v10070_v22  ;;  %v3871_v35 = vadd.f32 %v10066_v52, %v10062_v19  ;;  %v11334_v22 = vld [vmem:[#allocation75_spill] sm:$0xff] }
 0x682   : > { %11328 = vst [vmem:[#allocation68_spill] sm:$0xff] %v10082_v46  ;;  %v10086_v3 = vpop.eup %7200  ;;  %7220 = vpow2.f32 %v3682_v5  ;;  %v3622_v27 = vmul.f32 1.442695, %v3414_v33  ;;  %v3624_v48 = vmul.f32 1.442695, %v3415_v34  ;;  %v3416_v0 = vsub.f32 %v11330_v53, %v3267_v18  ;;  %v11335_v5 = vld [vmem:[#allocation77_spill] sm:$0xff] }
 0x683   : > { %11329 = vst [vmem:[#allocation70_spill] sm:$0xff] %v10086_v3  ;;  %v10089_v63 = vpop.eup %7202  ;;  %7222 = vpow2.f32 %v3684_v29  ;;  %v3417_v9 = vsub.f32 %v11332_v24, %v3267_v18  ;;  %v3312_v23 = vpop.xlane.xlu0 %3311 }
 0x684   : > { %11331 = vst [vmem:[#allocation67_spill] sm:$0xff] %v10089_v63  ;;  %v10094_v28 = vpop.eup %7204  ;;  %7224 = vpow2.f32 %v3622_v27  ;;  %v3626_v16 = vmul.f32 1.442695, %v3416_v0  ;;  %v3446_v7 = vsub.f32 %v11334_v22, %v3312_v23  ;;  %v3447_v33 = vsub.f32 %v11335_v5, %v3312_v23  ;;  %v11338_v0 = vld [vmem:[#allocation79_spill] sm:$0xff]  ;;  %v11340_v23 = vld [vmem:[#allocation80_spill] sm:$0xff] }
 0x685   : > { %11333 = vst [vmem:[#allocation69_spill] sm:$0xff] %v10094_v28  ;;  %v10098_v34 = vpop.eup %7206  ;;  %7226 = vpow2.f32 %v3624_v48  ;;  %v3628_v53 = vmul.f32 1.442695, %v3417_v9  ;;  %3827 = vadd.xlane.f32.xlu0 %v3826_v4  ;;  %3872 = vadd.xlane.f32.xlu1 %v3871_v35  ;;  %v3315_v29 = vpop.xlane.xlu1 %3314  ;;  %v3874_v18 = vadd.f32 %v10089_v63, %v10086_v3  ;;  %v3829_v4 = vadd.f32 %v10082_v46, %v10078_v40  ;;  %v11342_v3 = vld [vmem:[#allocation81_spill] sm:$0xff] }
 0x686   : > { %11336 = vst [vmem:[#allocation71_spill] sm:$0xff] %v10098_v34  ;;  %v10102_v24 = vpop.eup %7208  ;;  %7228 = vpow2.f32 %v3626_v16  ;;  %v3686_v19 = vmul.f32 1.442695, %v3446_v7  ;;  %v3688_v27 = vmul.f32 1.442695, %v3447_v33  ;;  %v3448_v52 = vsub.f32 %v11338_v0, %v3315_v29  ;;  %v11343_v16 = vld [vmem:[#allocation82_spill] sm:$0xff] }
 0x687   : > { %11337 = vst [vmem:[#allocation72_spill] sm:$0xff] %v10102_v24  ;;  %v10105_v22 = vpop.eup %7210  ;;  %7230 = vpow2.f32 %v3628_v53  ;;  %v3449_v5 = vsub.f32 %v11340_v23, %v3315_v29  ;;  %v3270_v48 = vpop.xlane.xlu0 %3269 }
 0x688   : > { %11339 = vst [vmem:[#allocation73_spill] sm:$0xff] %v10105_v22  ;;  %v10110_v9 = vpop.eup %7212  ;;  %7232 = vpow2.f32 %v3686_v19  ;;  %v3690_v35 = vmul.f32 1.442695, %v3448_v52  ;;  %v3418_v63 = vsub.f32 %v11342_v3, %v3270_v48  ;;  %v3419_v7 = vsub.f32 %v11343_v16, %v3270_v48  ;;  %v11346_v52 = vld [vmem:[#allocation84_spill] sm:$0xff]  ;;  %v11348_v48 = vld [vmem:[#allocation86_spill] sm:$0xff] }
 0x689   : > { %11341 = vst [vmem:[#allocation74_spill] sm:$0xff] %v10110_v9  ;;  %v10114_v33 = vpop.eup %7214  ;;  %7234 = vpow2.f32 %v3688_v27  ;;  %v3692_v0 = vmul.f32 1.442695, %v3449_v5  ;;  %3875 = vadd.xlane.f32.xlu0 %v3874_v18  ;;  %3830 = vadd.xlane.f32.xlu1 %v3829_v4  ;;  %v3273_v53 = vpop.xlane.xlu1 %3272  ;;  %v3832_v29 = vadd.f32 %v10105_v22, %v10102_v24  ;;  %v3877_v18 = vadd.f32 %v10098_v34, %v10094_v28  ;;  %v11350_v24 = vld [vmem:[#allocation83_spill] sm:$0xff] }
 0x68a   : > { %11344 = vst [vmem:[#allocation76_spill] sm:$0xff] %v10114_v33  ;;  %v10118_v23 = vpop.eup %7216  ;;  %7236 = vpow2.f32 %v3690_v35  ;;  %v3630_v40 = vmul.f32 1.442695, %v3418_v63  ;;  %v3632_v19 = vmul.f32 1.442695, %v3419_v7  ;;  %v3420_v46 = vsub.f32 %v11346_v52, %v3273_v53  ;;  %v11351_v35 = vld [vmem:[#allocation85_spill] sm:$0xff] }
 0x68b   : > { %11345 = vst [vmem:[#allocation78_spill] sm:$0xff] %v10118_v23  ;;  %v10121_v3 = vpop.eup %7218  ;;  %7238 = vpow2.f32 %v3692_v0  ;;  %v3421_v16 = vsub.f32 %v11348_v48, %v3273_v53  ;;  %v3318_v27 = vpop.xlane.xlu0 %3317 }
 0x68c   : > { %11347 = vst [vmem:[#allocation75_spill] sm:$0xff] %v10121_v3  ;;  %v10126_v5 = vpop.eup %7220  ;;  %7240 = vpow2.f32 %v3630_v40  ;;  %v3634_v4 = vmul.f32 1.442695, %v3420_v46  ;;  %v3450_v22 = vsub.f32 %v11350_v24, %v3318_v27  ;;  %v3451_v63 = vsub.f32 %v11351_v35, %v3318_v27  ;;  %v11354_v46 = vld [vmem:[#allocation87_spill] sm:$0xff]  ;;  %v11356_v27 = vld [vmem:[#allocation88_spill] sm:$0xff] }
 0x68d   : > { %11349 = vst [vmem:[#allocation77_spill] sm:$0xff] %v10126_v5  ;;  %v10130_v7 = vpop.eup %7222  ;;  %7242 = vpow2.f32 %v3632_v19  ;;  %v3636_v52 = vmul.f32 1.442695, %v3421_v16  ;;  %3833 = vadd.xlane.f32.xlu0 %v3832_v29  ;;  %3878 = vadd.xlane.f32.xlu1 %v3877_v18  ;;  %v3321_v0 = vpop.xlane.xlu1 %3320  ;;  %v3880_v53 = vadd.f32 %v10121_v3, %v10118_v23  ;;  %v3835_v29 = vadd.f32 %v10114_v33, %v10110_v9 }
 0x68e   : > { %11352 = vst [vmem:[#allocation79_spill] sm:$0xff] %v10130_v7  ;;  %v10134_v48 = vpop.eup %7224  ;;  %7244 = vpow2.f32 %v3634_v4  ;;  %v3694_v28 = vmul.f32 1.442695, %v3450_v22  ;;  %v3696_v40 = vmul.f32 1.442695, %v3451_v63  ;;  %v3452_v34 = vsub.f32 %v11354_v46, %v3321_v0  ;;  %v11358_v4 = vld [vmem:[#allocation89_spill] sm:$0xff] }
 0x68f   : > { %11353 = vst [vmem:[#allocation80_spill] sm:$0xff] %v10134_v48  ;;  %v10137_v24 = vpop.eup %7226  ;;  %7246 = vpow2.f32 %v3636_v52  ;;  %v3453_v35 = vsub.f32 %v11356_v27, %v3321_v0  ;;  %v3276_v19 = vpop.xlane.xlu0 %3275 }
 0x690   : > { %11355 = vst [vmem:[#allocation81_spill] sm:$0xff] %v10137_v24  ;;  %v10142_v16 = vpop.eup %7228  ;;  %7248 = vpow2.f32 %v3694_v28  ;;  %v3698_v18 = vmul.f32 1.442695, %v3452_v34  ;;  %v3422_v23 = vsub.f32 %v9692_v47, %v3276_v19  ;;  %v3423_v22 = vsub.f32 %v11358_v4, %v3276_v19  ;;  %v11361_v34 = vld [vmem:[#allocation91_spill] sm:$0xff]  ;;  %v11363_v19 = vld [vmem:[#allocation93_spill] sm:$0xff] }
 0x691   : > { %11357 = vst [vmem:[#allocation82_spill] sm:$0xff] %v10142_v16  ;;  %v10146_v63 = vpop.eup %7230  ;;  %7250 = vpow2.f32 %v3696_v40  ;;  %v3700_v46 = vmul.f32 1.442695, %v3453_v35  ;;  %3881 = vadd.xlane.f32.xlu0 %v3880_v53  ;;  %3836 = vadd.xlane.f32.xlu1 %v3835_v29  ;;  %v3279_v52 = vpop.xlane.xlu1 %3278  ;;  %v3838_v0 = vadd.f32 %v10137_v24, %v10134_v48  ;;  %v3883_v53 = vadd.f32 %v10130_v7, %v10126_v5  ;;  %v11365_v48 = vld [vmem:[#allocation90_spill] sm:$0xff] }
 0x692   : > { %11359 = vst [vmem:[#allocation84_spill] sm:$0xff] %v10146_v63  ;;  %v10150_v27 = vpop.eup %7232  ;;  %7252 = vpow2.f32 %v3698_v18  ;;  %v3638_v3 = vmul.f32 1.442695, %v3422_v23  ;;  %v3640_v28 = vmul.f32 1.442695, %v3423_v22  ;;  %v3424_v9 = vsub.f32 %v11361_v34, %v3279_v52  ;;  %v11366_v18 = vld [vmem:[#allocation92_spill] sm:$0xff] }
 0x693   : > { %11360 = vst [vmem:[#allocation86_spill] sm:$0xff] %v10150_v27  ;;  %v10153_v47 = vpop.eup %7234  ;;  %7254 = vpow2.f32 %v3700_v46  ;;  %v3425_v4 = vsub.f32 %v11363_v19, %v3279_v52  ;;  %v3324_v40 = vpop.xlane.xlu0 %3323 }
 0x694   : > { %11362 = vst [vmem:[#allocation83_spill] sm:$0xff] %v10153_v47  ;;  %v10158_v35 = vpop.eup %7236  ;;  %7256 = vpow2.f32 %v3638_v3  ;;  %v3642_v29 = vmul.f32 1.442695, %v3424_v9  ;;  %v3454_v24 = vsub.f32 %v11365_v48, %v3324_v40  ;;  %v3455_v23 = vsub.f32 %v11366_v18, %v3324_v40  ;;  %v11369_v9 = vld [vmem:[#allocation94_spill] sm:$0xff]  ;;  %v11371_v40 = vld [vmem:[#allocation95_spill] sm:$0xff] }
 0x695   : > { %11364 = vst [vmem:[#allocation85_spill] sm:$0xff] %v10158_v35  ;;  %v10162_v22 = vpop.eup %7238  ;;  %7258 = vpow2.f32 %v3640_v28  ;;  %v3644_v34 = vmul.f32 1.442695, %v3425_v4  ;;  %3839 = vadd.xlane.f32.xlu0 %v3838_v0  ;;  %3884 = vadd.xlane.f32.xlu1 %v3883_v53  ;;  %v3327_v46 = vpop.xlane.xlu1 %3326  ;;  %v3886_v52 = vadd.f32 %v10153_v47, %v10150_v27  ;;  %v3841_v0 = vadd.f32 %v10146_v63, %v10142_v16  ;;  %v11372_v27 = vld [vmem:[#allocation96_spill] sm:$0xff] }
 0x696   : > { %11367 = vst [vmem:[#allocation87_spill] sm:$0xff] %v10162_v22  ;;  %v10166_v19 = vpop.eup %7240  ;;  %7260 = vpow2.f32 %v3642_v29  ;;  %v3702_v5 = vmul.f32 1.442695, %v3454_v24  ;;  %v3704_v3 = vmul.f32 1.442695, %v3455_v23  ;;  %v3456_v7 = vsub.f32 %v11369_v9, %v3327_v46  ;;  %v11373_v29 = vld [vmem:[#allocation97_spill] sm:$0xff] }
 0x697   : > { %11368 = vst [vmem:[#allocation88_spill] sm:$0xff] %v10166_v19  ;;  %v10169_v48 = vpop.eup %7242  ;;  %7262 = vpow2.f32 %v3644_v34  ;;  %v3457_v18 = vsub.f32 %v11371_v40, %v3327_v46  ;;  %v3282_v28 = vpop.xlane.xlu0 %3281 }
 0x698   : > { %11370 = vst [vmem:[#allocation89_spill] sm:$0xff] %v10169_v48  ;;  %v10174_v4 = vpop.eup %7244  ;;  %7264 = vpow2.f32 %v3702_v5  ;;  %v3706_v53 = vmul.f32 1.442695, %v3456_v7  ;;  %v3426_v47 = vsub.f32 %v11372_v27, %v3282_v28  ;;  %v3427_v24 = vsub.f32 %v11373_v29, %v3282_v28  ;;  %v11374_v7 = vld [vmem:[#allocation99_spill] sm:$0xff] }
 0x699   : > { %v10178_v23 = vpop.eup %7246  ;;  %7266 = vpow2.f32 %v3704_v3  ;;  %v3708_v9 = vmul.f32 1.442695, %v3457_v18  ;;  %3887 = vadd.xlane.f32.xlu0 %v3886_v52  ;;  %3842 = vadd.xlane.f32.xlu1 %v3841_v0  ;;  %v3844_v34 = vadd.f32 %v10169_v48, %v10166_v19  ;;  %v3285_v46 = vpop.xlane.xlu1 %3284  ;;  %v3889_v3 = vadd.f32 %v10162_v22, %v10158_v35  ;;  %v11375_v18 = vld [vmem:[#allocation101_spill] sm:$0xff]  ;;  %v11376_v19 = vld [vmem:[#allocation98_spill] sm:$0xff] }
 0x69a   : > { %v10182_v40 = vpop.eup %7248  ;;  %7268 = vpow2.f32 %v3706_v53  ;;  %v3646_v16 = vmul.f32 1.442695, %v3426_v47  ;;  %v3648_v5 = vmul.f32 1.442695, %v3427_v24  ;;  %v3428_v63 = vsub.f32 %v11374_v7, %v3285_v46  ;;  %v11377_v53 = vld [vmem:[#allocation100_spill] sm:$0xff] }
 0x69b   : > { %v10185_v27 = vpop.eup %7250  ;;  %7270 = vpow2.f32 %v3708_v9  ;;  %v3429_v52 = vsub.f32 %v11375_v18, %v3285_v46  ;;  %v3330_v0 = vpop.xlane.xlu0 %3329 }
 0x69c   : > { %v10190_v28 = vpop.eup %7252  ;;  %7272 = vpow2.f32 %v3646_v16  ;;  %v3650_v29 = vmul.f32 1.442695, %v3428_v63  ;;  %v3458_v48 = vsub.f32 %v11376_v19, %v3330_v0  ;;  %v3459_v47 = vsub.f32 %v11377_v53, %v3330_v0  ;;  %v11379_v16 = vld [vmem:[#allocation102_spill] sm:$0xff] }
 0x69d   : > { %v10194_v24 = vpop.eup %7254  ;;  %7274 = vpow2.f32 %v3648_v5  ;;  %3845 = vadd.xlane.f32.xlu0 %v3844_v34  ;;  %3890 = vadd.xlane.f32.xlu1 %v3889_v3  ;;  %v3892_v9 = vadd.f32 %v10185_v27, %v10182_v40  ;;  %v3333_v7 = vpop.xlane.xlu1 %3332  ;;  %v3652_v46 = vmul.f32 1.442695, %v3429_v52  ;;  %v3847_v19 = vadd.f32 %v10178_v23, %v10174_v4  ;;  %v11380_v5 = vld [vmem:[#allocation103_spill] sm:$0xff] }
 0x69e   : > { %v10198_v35 = vpop.eup %7256  ;;  %v3710_v18 = vmul.f32 1.442695, %v3458_v48  ;;  %v3712_v22 = vmul.f32 1.442695, %v3459_v47  ;;  %v3460_v63 = vsub.f32 %v11379_v16, %v3333_v7  ;;  %7276 = vpow2.f32 %v3650_v29 }
 0x69f   : > { %11378 = vst [vmem:[#allocation91_spill] sm:$0xff] %v10198_v35  ;;  %v10201_v33 = vpop.eup %7258  ;;  %v3461_v34 = vsub.f32 %v11380_v5, %v3333_v7  ;;  %v3895_v7 = vadd.f32 %v10194_v24, %v10190_v28 }
 0x6a0   : > { %v10206_v3 = vpop.eup %7260  ;;  %7278 = vpow2.f32 %v3710_v18  ;;  %v3714_v48 = vmul.f32 1.442695, %v3460_v63  ;;  %v3850_v52 = vadd.f32 %v10201_v33, %v10198_v35 }
 0x6a1   : > { %11381 = vst [vmem:[#allocation93_spill] sm:$0xff] %v10206_v3  ;;  %v10208_v0 = vpop.eup %7262  ;;  %7280 = vpow2.f32 %v3712_v22  ;;  %3893 = vadd.xlane.f32.xlu0 %v3892_v9  ;;  %3848 = vadd.xlane.f32.xlu1 %v3847_v19  ;;  %v3716_v29 = vmul.f32 1.442695, %v3461_v34 }
 0x6a2   : > { %v10212_v53 = vpop.eup %7264  ;;  %7282 = vpow2.f32 %v3652_v46  ;;  %v3853_v63 = vadd.f32 %v10208_v0, %v10206_v3  ;;  %v2241_v3 = vld [vmem:[#allocation4 + $0x100] sm:$0xff] }
 0x6a3   : > { %11382 = vst [vmem:[#allocation90_spill] sm:$0xff] %v10212_v53  ;;  %v10214_v47 = vpop.eup %7266  ;;  %7284 = vpow2.f32 %v3714_v48 }
 0x6a4   : > { %11383 = vst [vmem:[#allocation92_spill] sm:$0xff] %v10214_v47  ;;  %v10218_v16 = vpop.eup %7268  ;;  %v3898_v22 = vadd.f32 %v10214_v47, %v10212_v53  ;;  %7286 = vpow2.f32 %v3716_v29 }
 0x6a5   : > { %11384 = vst [vmem:[#allocation94_spill] sm:$0xff] %v10218_v16  ;;  %v10220_v18 = vpop.eup %7270  ;;  %3851 = vadd.xlane.f32.xlu0 %v3850_v52  ;;  %3896 = vadd.xlane.f32.xlu1 %v3895_v7 }
 0x6a6   : > { %11385 = vst [vmem:[#allocation95_spill] sm:$0xff] %v10220_v18  ;;  %v10224_v9 = vpop.eup %7272  ;;  %v3901_v52 = vadd.f32 %v10220_v18, %v10218_v16 }
 0x6a7   : > { %11386 = vst [vmem:[#allocation96_spill] sm:$0xff] %v10224_v9  ;;  %v10226_v46 = vpop.eup %7274 }
 0x6a8   : > { %11387 = vst [vmem:[#allocation97_spill] sm:$0xff] %v10226_v46  ;;  %v10230_v19 = vpop.eup %7276  ;;  %v3856_v5 = vadd.f32 %v10226_v46, %v10224_v9 }
 0x6a9   : > { %11388 = vst [vmem:[#allocation99_spill] sm:$0xff] %v10230_v19  ;;  %3899 = vadd.xlane.f32.xlu0 %v3898_v22  ;;  %3854 = vadd.xlane.f32.xlu1 %v3853_v63 }
 0x6aa   : > { %v10234_v34 = vpop.eup %7278 }
 0x6ab   : > { %11389 = vst [vmem:[#allocation101_spill] sm:$0xff] %v10234_v34  ;;  %v10236_v48 = vpop.eup %7280 }
 0x6ac   : > { %11390 = vst [vmem:[#allocation98_spill] sm:$0xff] %v10236_v48  ;;  %v10240_v29 = vpop.eup %7282  ;;  %v3904_v7 = vadd.f32 %v10236_v48, %v10234_v34 }
 0x6ad   : > { %11391 = vst [vmem:[#allocation100_spill] sm:$0xff] %v10240_v29  ;;  %3857 = vadd.xlane.f32.xlu0 %v3856_v5  ;;  %3902 = vadd.xlane.f32.xlu1 %v3901_v52  ;;  %v10244_v53 = vpop.eup %7284  ;;  %v3859_v22 = vadd.f32 %v10240_v29, %v10230_v19 }
 0x6ae   : > { %11392 = vst [vmem:[#allocation102_spill] sm:$0xff] %v10244_v53  ;;  %v10248_v63 = vpop.eup %7286 }
 0x6af   : > { %11393 = vst [vmem:[#allocation103_spill] sm:$0xff] %v10248_v63  ;;  %v3907_v9 = vadd.f32 %v10248_v63, %v10244_v53 }
 0x6b1   : > { %3905 = vadd.xlane.f32.xlu0 %v3904_v7  ;;  %3860 = vadd.xlane.f32.xlu1 %v3859_v22 }
 0x6b5   : > { %3908 = vadd.xlane.f32.xlu1 %v3907_v9 }
 0x6c2   : > { %v3720_v46 = vpop.xlane.xlu0 %3719 }
 0x6c3   : > { %7288 = vrcp.f32 %v3720_v46 }
 0x6c6   : > { %v3768_v5 = vpop.xlane.xlu0 %3767  ;;  %v3723_v52 = vpop.xlane.xlu1 %3722 }
 0x6c7   : > { %7290 = vrcp.f32 %v3723_v52 }
 0x6c8   : > { %7292 = vrcp.f32 %v3768_v5 }
 0x6ca   : > { %v3726_v34 = vpop.xlane.xlu0 %3725  ;;  %v3771_v48 = vpop.xlane.xlu1 %3770 }
 0x6cb   : > { %7294 = vrcp.f32 %v3771_v48 }
 0x6cc   : > { %7296 = vrcp.f32 %v3726_v34 }
 0x6cd   : > { %v7289_v29 = vpop.eup %7288 }
 0x6ce   : > { %v3774_v16 = vpop.xlane.xlu0 %3773  ;;  %v3729_v19 = vpop.xlane.xlu1 %3728  ;;  %v3974_v9 = vmul.f32 %v7289_v29, %v9754_v44  ;;  %v3975_v53 = vmul.f32 %v7289_v29, %v9764_v6 }
 0x6cf   : > { %7298 = vrcp.f32 %v3729_v19 }
 0x6d0   : > { %7300 = vrcp.f32 %v3774_v16 }
 0x6d1   : > { %v7291_v7 = vpop.eup %7290 }
 0x6d2   : > { %v3732_v22 = vpop.xlane.xlu0 %3731  ;;  %v3777_v18 = vpop.xlane.xlu1 %3776  ;;  %v3976_v46 = vmul.f32 %v7291_v7, %v9766_v59  ;;  %v3977_v5 = vmul.f32 %v7291_v7, %v9778_v26  ;;  %v2250_v59 = vld [vmem:[#allocation4 + $0x148] sm:$0xff] }
 0x6d3   : > { %v7293_v52 = vpop.eup %7292  ;;  %7302 = vrcp.f32 %v3777_v18 }
 0x6d4   : > { %v4103_v48 = vpack.c.bf16 %v3977_v5, %v3975_v53  ;;  %v4102_v34 = vpack.c.bf16 %v3976_v46, %v3974_v9  ;;  %7304 = vrcp.f32 %v3732_v22  ;;  %v4006_v16 = vmul.f32 %v7293_v52, %v9757_v55  ;;  %v2257_v9 = vld [vmem:[#allocation4 + $0x180] sm:$0xff]  ;;  %v2242_v55 = vld [vmem:[#allocation4 + $0x108] sm:$0xff] }
 0x6d5   : > { %v7295_v63 = vpop.eup %7294  ;;  %v4007_v44 = vmul.f32 %v7293_v52, %v9760_v37  ;;  %v2266_v46 = vld [vmem:[#allocation4 + $0x1c8] sm:$0xff] }
 0x6d6   : > { %v3780_v47 = vpop.xlane.xlu0 %3779  ;;  %v3735_v19 = vpop.xlane.xlu1 %3734  ;;  %v4008_v35 = vmul.f32 %v7295_v63, %v9769_v11  ;;  %4198 = vmatprep.mubr.bf16.mxu0 %v4103_v48  ;;  %v4009_v6 = vmul.f32 %v7295_v63, %v9774_v1 }
 0x6d7   : > { %v7297_v26 = vpop.eup %7296  ;;  %7306 = vrcp.f32 %v3735_v19  ;;  %4199 = vmatmul.mubr.bf16.vlgmr.msra.gmra.mrb[64].mxu0 %v4102_v34 }
 0x6d8   : > { %6258 = vmatpush3.bf16.msra.mxu0 %v2241_v3  ;;  %v4119_v53 = vpack.c.bf16 %v4009_v6, %v4007_v44  ;;  %v4118_v18 = vpack.c.bf16 %v4008_v35, %v4006_v16  ;;  %7308 = vrcp.f32 %v3780_v47  ;;  %v3979_v11 = vmul.f32 %v7297_v26, %v9783_v58  ;;  %v2251_v3 = vld [vmem:[#allocation4 + $0x150] sm:$0xff]  ;;  %v2258_v58 = vld [vmem:[#allocation4 + $0x188] sm:$0xff]  ;;  %v2252_v6 = vld [vmem:[#allocation4 + $0x158] sm:$0xff] }
 0x6d9   : > { %v7299_v29 = vpop.eup %7298  ;;  %6259 = vmatprep.subr.bf16.mxu0 %v2250_v59  ;;  %v3978_v1 = vmul.f32 %v7297_v26, %v9780_v36  ;;  %v2267_v44 = vld [vmem:[#allocation4 + $0x1d0] sm:$0xff] }
 0x6da   : > { %v3738_v7 = vpop.xlane.xlu0 %3737  ;;  %v3783_v22 = vpop.xlane.xlu1 %3782  ;;  %4295 = vmatprep.mubr.bf16.mxu1 %v4119_v53  ;;  %v3981_v37 = vmul.f32 %v7299_v29, %v9794_v30  ;;  %v3980_v63 = vmul.f32 %v7299_v29, %v9790_v38  ;;  %v2243_v30 = vld [vmem:[#allocation4 + $0x110] sm:$0xff] }
 0x6db   : > { %v7301_v5 = vpop.eup %7300  ;;  %7310 = vrcp.f32 %v3783_v22  ;;  %4296 = vmatmul.mubr.bf16.vlgmr.msra.gmra.mrb[64].mxu1 %v4118_v18 }
 0x6dc   : > { %6322 = vmatpush3.bf16.msra.mxu1 %v2257_v9  ;;  %v4105_v35 = vpack.c.bf16 %v3981_v37, %v3979_v11  ;;  %v4104_v47 = vpack.c.bf16 %v3980_v63, %v3978_v1  ;;  %6260 = vmatpush3.bf16.msra.mxu0 %v2242_v55  ;;  %7312 = vrcp.f32 %v3738_v7  ;;  %v4011_v36 = vmul.f32 %v7301_v5, %v9801_v21  ;;  %v2259_v21 = vld [vmem:[#allocation4 + $0x190] sm:$0xff]  ;;  %v2268_v55 = vld [vmem:[#allocation4 + $0x1d8] sm:$0xff]  ;;  %v2253_v11 = vld [vmem:[#allocation4 + $0x160] sm:$0xff] }
 0x6dd   : > { %v7303_v52 = vpop.eup %7302  ;;  %6323 = vmatprep.subr.bf16.mxu1 %v2266_v46  ;;  %6261 = vmatprep.subr.bf16.mxu0 %v2251_v3  ;;  %v4010_v19 = vmul.f32 %v7301_v5, %v9798_v31 }
 0x6de   : > { %v3786_v48 = vpop.xlane.xlu0 %3785  ;;  %v3741_v34 = vpop.xlane.xlu1 %3740  ;;  %4206 = vmatprep.mubr.bf16.mxu0 %v4105_v35  ;;  %v4013_v38 = vmul.f32 %v7303_v52, %v9810_v61  ;;  %v4012_v16 = vmul.f32 %v7303_v52, %v9806_v39  ;;  %v2244_v61 = vld [vmem:[#allocation4 + $0x118] sm:$0xff]  ;;  %v2269_v52 = vld [vmem:[#allocation4 + $0x1e0] sm:$0xff] }
 0x6df   : > { %v7305_v59 = vpop.eup %7304  ;;  %7314 = vrcp.f32 %v3741_v34  ;;  %4207 = vmatmul.mubr.bf16.gmra.mrb[68].mxu0 %v4104_v47 }
 0x6e0   : > { %v4121_v26 = vpack.c.bf16 %v4013_v38, %v4011_v36  ;;  %v4120_v53 = vpack.c.bf16 %v4012_v16, %v4010_v19  ;;  %6324 = vmatpush3.bf16.msra.mxu1 %v2258_v58  ;;  %6262 = vmatpush3.bf16.msra.mxu0 %v2243_v30  ;;  %7316 = vrcp.f32 %v3786_v48  ;;  %v3983_v31 = vmul.f32 %v7305_v59, %v9817_v57  ;;  %v2260_v57 = vld [vmem:[#allocation4 + $0x198] sm:$0xff]  ;;  %v2254_v48 = vld [vmem:[#allocation4 + $0x168] sm:$0xff] }
 0x6e1   : > { %v7307_v18 = vpop.eup %7306  ;;  %6325 = vmatprep.subr.bf16.mxu1 %v2267_v44  ;;  %6263 = vmatprep.subr.bf16.mxu0 %v2252_v6  ;;  %v3982_v22 = vmul.f32 %v7305_v59, %v9814_v25  ;;  %v2270_v6 = vld [vmem:[#allocation4 + $0x1e8] sm:$0xff]  ;;  %v2255_v59 = vld [vmem:[#allocation4 + $0x170] sm:$0xff] }
 0x6e2   : > { %v3744_v29 = vpop.xlane.xlu0 %3743  ;;  %v3789_v7 = vpop.xlane.xlu1 %3788  ;;  %4303 = vmatprep.mubr.bf16.mxu1 %v4121_v26  ;;  %v3985_v39 = vmul.f32 %v7307_v18, %v9826_v45  ;;  %v3984_v9 = vmul.f32 %v7307_v18, %v9822_v41  ;;  %v2245_v45 = vld [vmem:[#allocation4 + $0x120] sm:$0xff] }
 0x6e3   : > { %v7309_v37 = vpop.eup %7308  ;;  %7318 = vrcp.f32 %v3789_v7  ;;  %4304 = vmatmul.mubr.bf16.gmra.mrb[68].mxu1 %v4120_v53 }
 0x6e4   : > { %v4107_v1 = vpack.c.bf16 %v3985_v39, %v3983_v31  ;;  %v4106_v63 = vpack.c.bf16 %v3984_v9, %v3982_v22  ;;  %6326 = vmatpush3.bf16.msra.mxu1 %v2259_v21  ;;  %6264 = vmatpush3.bf16.msra.mxu0 %v2244_v61  ;;  %7320 = vrcp.f32 %v3744_v29  ;;  %v4015_v25 = vmul.f32 %v7309_v37, %v9833_v42  ;;  %v2261_v42 = vld [vmem:[#allocation4 + $0x1a0] sm:$0xff]  ;;  %v2271_v39 = vld [vmem:[#allocation4 + $0x1f0] sm:$0xff]  ;;  %v2256_v22 = vld [vmem:[#allocation4 + $0x178] sm:$0xff] }
 0x6e5   : > { %v7311_v46 = vpop.eup %7310  ;;  %6327 = vmatprep.subr.bf16.mxu1 %v2268_v55  ;;  %6265 = vmatprep.subr.bf16.mxu0 %v2253_v11  ;;  %v4014_v35 = vmul.f32 %v7309_v37, %v9830_v43 }
 0x6e6   : > { %v3792_v3 = vpop.xlane.xlu0 %3791  ;;  %v3747_v5 = vpop.xlane.xlu1 %3746  ;;  %4214 = vmatprep.mubr.bf16.mxu0 %v4107_v1  ;;  %v4017_v41 = vmul.f32 %v7311_v46, %v9842_v8  ;;  %v4016_v47 = vmul.f32 %v7311_v46, %v9838_v12  ;;  %v2246_v8 = vld [vmem:[#allocation4 + $0x128] sm:$0xff] }
 0x6e7   : > { %v7313_v34 = vpop.eup %7312  ;;  %7322 = vrcp.f32 %v3747_v5  ;;  %4215 = vmatmul.mubr.bf16.gmra.mrb[72].mxu0 %v4106_v63  ;;  %v2272_v5 = vld [vmem:[#allocation4 + $0x1f8] sm:$0xff] }
 0x6e8   : > { %v4123_v58 = vpack.c.bf16 %v4017_v41, %v4015_v25  ;;  %v4122_v30 = vpack.c.bf16 %v4016_v47, %v4014_v35  ;;  %6328 = vmatpush3.bf16.msra.mxu1 %v2260_v57  ;;  %6266 = vmatpush3.bf16.msra.mxu0 %v2245_v45  ;;  %7324 = vrcp.f32 %v3792_v3  ;;  %v3987_v43 = vmul.f32 %v7313_v34, %v9849_v54  ;;  %v2262_v54 = vld [vmem:[#allocation4 + $0x1a8] sm:$0xff] }
 0x6e9   : > { %v7315_v36 = vpop.eup %7314  ;;  %6329 = vmatprep.subr.bf16.mxu1 %v2269_v52  ;;  %6267 = vmatprep.subr.bf16.mxu0 %v2254_v48  ;;  %v3986_v16 = vmul.f32 %v7313_v34, %v9846_v14 }
 0x6ea   : > { %v3750_v38 = vpop.xlane.xlu0 %3749  ;;  %v3795_v19 = vpop.xlane.xlu1 %3794  ;;  %4311 = vmatprep.mubr.bf16.mxu1 %v4123_v58  ;;  %v3989_v12 = vmul.f32 %v7315_v36, %v9858_v32  ;;  %v3988_v44 = vmul.f32 %v7315_v36, %v9854_v10  ;;  %v2247_v32 = vld [vmem:[#allocation4 + $0x130] sm:$0xff] }
 0x6eb   : > { %v7317_v26 = vpop.eup %7316  ;;  %7326 = vrcp.f32 %v3795_v19  ;;  %4312 = vmatmul.mubr.bf16.gmra.mrb[72].mxu1 %v4122_v30 }
 0x6ec   : > { %v4109_v53 = vpack.c.bf16 %v3989_v12, %v3987_v43  ;;  %v4108_v18 = vpack.c.bf16 %v3988_v44, %v3986_v16  ;;  %6330 = vmatpush3.bf16.msra.mxu1 %v2261_v42  ;;  %6268 = vmatpush3.bf16.msra.mxu0 %v2246_v8  ;;  %7328 = vrcp.f32 %v3750_v38  ;;  %v4019_v14 = vmul.f32 %v7317_v26, %v9865_v17  ;;  %v2263_v17 = vld [vmem:[#allocation4 + $0x1b0] sm:$0xff]  ;;  %v11398_v16 = vld [vmem:[#allocation26_spill] sm:$0xff] }
 0x6ed   : > { %v7319_v29 = vpop.eup %7318  ;;  %6331 = vmatprep.subr.bf16.mxu1 %v2270_v6  ;;  %6269 = vmatprep.subr.bf16.mxu0 %v2255_v59  ;;  %v4018_v61 = vmul.f32 %v7317_v26, %v9862_v60  ;;  %v11395_v42 = vld [vmem:[#allocation25_spill] sm:$0xff] }
 0x6ee   : > { %v3798_v7 = vpop.xlane.xlu0 %3797  ;;  %v3753_v21 = vpop.xlane.xlu1 %3752  ;;  %4222 = vmatprep.mubr.bf16.mxu0 %v4109_v53  ;;  %v4021_v10 = vmul.f32 %v7319_v29, %v9874_v13  ;;  %v4020_v31 = vmul.f32 %v7319_v29, %v9870_v62  ;;  %v2248_v13 = vld [vmem:[#allocation4 + $0x138] sm:$0xff]  ;;  %v11399_v29 = vld [vmem:[#allocation27_spill] sm:$0xff] }
 0x6ef   : > { %v7321_v9 = vpop.eup %7320  ;;  %7330 = vrcp.f32 %v3753_v21  ;;  %4223 = vmatmul.mubr.bf16.gmra.mrb[76].mxu0 %v4108_v18  ;;  %v11400_v21 = vld [vmem:[#allocation31_spill] sm:$0xff] }
 0x6f0   : > { %v4125_v55 = vpack.c.bf16 %v4021_v10, %v4019_v14  ;;  %v4124_v11 = vpack.c.bf16 %v4020_v31, %v4018_v61  ;;  %6332 = vmatpush3.bf16.msra.mxu1 %v2262_v54  ;;  %6270 = vmatpush3.bf16.msra.mxu0 %v2247_v32  ;;  %7332 = vrcp.f32 %v3798_v7  ;;  %v3991_v60 = vmul.f32 %v7321_v9, %v9881_v15  ;;  %v2264_v15 = vld [vmem:[#allocation4 + $0x1b8] sm:$0xff]  ;;  %v11402_v10 = vld [vmem:[#allocation29_spill] sm:$0xff] }
 0x6f1   : > { %v7323_v37 = vpop.eup %7322  ;;  %6333 = vmatprep.subr.bf16.mxu1 %v2271_v39  ;;  %6271 = vmatprep.subr.bf16.mxu0 %v2256_v22  ;;  %v3990_v46 = vmul.f32 %v7321_v9, %v9878_v56  ;;  %v11401_v32 = vld [vmem:[#allocation30_spill] sm:$0xff] }
 0x6f2   : > { %v3756_v1 = vpop.xlane.xlu0 %3755  ;;  %v3801_v63 = vpop.xlane.xlu1 %3800  ;;  %4319 = vmatprep.mubr.bf16.mxu1 %v4125_v55  ;;  %v3993_v62 = vmul.f32 %v7323_v37, %v9890_v50  ;;  %v3992_v3 = vmul.f32 %v7323_v37, %v9886_v20  ;;  %v11394_v20 = vld [vmem:[#allocation23_spill] sm:$0xff]  ;;  %v11403_v37 = vld [vmem:[#allocation33_spill] sm:$0xff] }
 0x6f3   : > { %v7325_v57 = vpop.eup %7324  ;;  %7334 = vrcp.f32 %v3801_v63  ;;  %4320 = vmatmul.mubr.bf16.gmra.mrb[76].mxu1 %v4124_v11  ;;  %v11404_v63 = vld [vmem:[#allocation36_spill] sm:$0xff] }
 0x6f4   : > { %v4111_v45 = vpack.c.bf16 %v3993_v62, %v3991_v60  ;;  %v4110_v25 = vpack.c.bf16 %v3992_v3, %v3990_v46  ;;  %6334 = vmatpush3.bf16.msra.mxu1 %v2263_v17  ;;  %6272 = vmatpush3.bf16.msra.mxu0 %v2248_v13  ;;  %7336 = vrcp.f32 %v3756_v1  ;;  %v4023_v50 = vmul.f32 %v7325_v57, %v9897_v2  ;;  %v11396_v2 = vld [vmem:[#allocation28_spill] sm:$0xff]  ;;  %v11406_v62 = vld [vmem:[#allocation34_spill] sm:$0xff] }
 0x6f5   : > { %v7327_v41 = vpop.eup %7326  ;;  %6335 = vmatprep.subr.bf16.mxu1 %v2272_v5  ;;  %v4022_v52 = vmul.f32 %v7325_v57, %v11394_v20  ;;  %v11405_v13 = vld [vmem:[#allocation32_spill] sm:$0xff] }
 0x6f6   : > { %v3804_v35 = vpop.xlane.xlu0 %3803  ;;  %v3759_v47 = vpop.xlane.xlu1 %3758  ;;  %4230 = vmatprep.mubr.bf16.mxu0 %v4111_v45  ;;  %v4025_v56 = vmul.f32 %v7327_v41, %v9906_v51  ;;  %v4024_v48 = vmul.f32 %v7327_v41, %v9902_v49  ;;  %v11397_v51 = vld [vmem:[#allocation24_spill] sm:$0xff] }
 0x6f7   : > { %v7329_v34 = vpop.eup %7328  ;;  %7338 = vrcp.f32 %v3759_v47  ;;  %4231 = vmatmul.mubr.bf16.gmra.mrb[80].mxu0 %v4110_v25 }
 0x6f8   : > { %v4127_v58 = vpack.c.bf16 %v4025_v56, %v4023_v50  ;;  %v4126_v30 = vpack.c.bf16 %v4024_v48, %v4022_v52  ;;  %6336 = vmatpush3.bf16.msra.mxu1 %v2264_v15  ;;  %7340 = vrcp.f32 %v3804_v35  ;;  %v3995_v8 = vmul.f32 %v7329_v34, %v11395_v42  ;;  %v11407_v35 = vld [vmem:[#allocation35_spill] sm:$0xff]  ;;  %v11409_v56 = vld [vmem:[#allocation38_spill] sm:$0xff]  ;;  %v11410_v52 = vld [vmem:[#allocation37_spill] sm:$0xff] }
 0x6f9   : > { %v7331_v36 = vpop.eup %7330  ;;  %v3994_v12 = vmul.f32 %v7329_v34, %v11397_v51  ;;  %v11408_v15 = vld [vmem:[#allocation39_spill] sm:$0xff]  ;;  %v11411_v42 = vld [vmem:[#allocation41_spill] sm:$0xff]  ;;  %v11413_v51 = vld [vmem:[#allocation40_spill] sm:$0xff] }
 0x6fa   : > { %v3762_v38 = vpop.xlane.xlu0 %3761  ;;  %v3807_v19 = vpop.xlane.xlu1 %3806  ;;  %4327 = vmatprep.mubr.bf16.mxu1 %v4127_v58  ;;  %v3997_v43 = vmul.f32 %v7331_v36, %v11396_v2  ;;  %v3996_v44 = vmul.f32 %v7331_v36, %v11398_v16  ;;  %v11412_v2 = vld [vmem:[#allocation44_spill] sm:$0xff]  ;;  %v11414_v16 = vld [vmem:[#allocation42_spill] sm:$0xff] }
 0x6fb   : > { %v7333_v49 = vpop.eup %7332  ;;  %7342 = vrcp.f32 %v3807_v19  ;;  %4328 = vmatmul.mubr.bf16.gmra.mrb[80].mxu1 %v4126_v30 }
 0x6fc   : > { %v4113_v6 = vpack.c.bf16 %v3997_v43, %v3995_v8  ;;  %v4112_v59 = vpack.c.bf16 %v3996_v44, %v3994_v12  ;;  %7344 = vrcp.f32 %v3762_v38  ;;  %v4027_v7 = vmul.f32 %v7333_v49, %v11399_v29  ;;  %v11415_v29 = vld [vmem:[#allocation43_spill] sm:$0xff] }
 0x6fd   : > { %v7335_v26 = vpop.eup %7334  ;;  %v4026_v14 = vmul.f32 %v7333_v49, %v11401_v32  ;;  %v11417_v32 = vld [vmem:[#allocation46_spill] sm:$0xff] }
 0x6fe   : > { %v3810_v53 = vpop.xlane.xlu0 %3809  ;;  %v3765_v18 = vpop.xlane.xlu1 %3764  ;;  %4238 = vmatprep.mubr.bf16.mxu0 %v4113_v6  ;;  %v4029_v54 = vmul.f32 %v7335_v26, %v11400_v21  ;;  %v4028_v61 = vmul.f32 %v7335_v26, %v11402_v10  ;;  %v11416_v21 = vld [vmem:[#allocation47_spill] sm:$0xff]  ;;  %v11418_v10 = vld [vmem:[#allocation45_spill] sm:$0xff] }
 0x6ff   : > { %v7337_v31 = vpop.eup %7336  ;;  %7346 = vrcp.f32 %v3765_v18  ;;  %4239 = vmatmul.mubr.bf16.gmra.mrb[84].mxu0 %v4112_v59 }
 0x700   : > { %v4129_v39 = vpack.c.bf16 %v4029_v54, %v4027_v7  ;;  %v4128_v22 = vpack.c.bf16 %v4028_v61, %v4026_v14  ;;  %7348 = vrcp.f32 %v3810_v53  ;;  %v3999_v1 = vmul.f32 %v7337_v31, %v11403_v37  ;;  %v11419_v37 = vld [vmem:[#allocation48_spill] sm:$0xff] }
 0x701   : > { %v7339_v9 = vpop.eup %7338  ;;  %v3998_v60 = vmul.f32 %v7337_v31, %v11405_v13  ;;  %v11421_v13 = vld [vmem:[#allocation49_spill] sm:$0xff] }
 0x702   : > { %v3816_v55 = vpop.xlane.xlu0 %3815  ;;  %v3813_v11 = vpop.xlane.xlu1 %3812  ;;  %4335 = vmatprep.mubr.bf16.mxu1 %v4129_v39  ;;  %v4001_v17 = vmul.f32 %v7339_v9, %v11404_v63  ;;  %v4000_v46 = vmul.f32 %v7339_v9, %v11406_v62  ;;  %v11420_v63 = vld [vmem:[#allocation50_spill] sm:$0xff]  ;;  %v11422_v62 = vld [vmem:[#allocation52_spill] sm:$0xff] }
 0x703   : > { %v7341_v3 = vpop.eup %7340  ;;  %7350 = vrcp.f32 %v3813_v11  ;;  %4336 = vmatmul.mubr.bf16.gmra.mrb[84].mxu1 %v4128_v22 }
 0x704   : > { %v4115_v5 = vpack.c.bf16 %v4001_v17, %v3999_v1  ;;  %v4114_v57 = vpack.c.bf16 %v4000_v46, %v3998_v60  ;;  %7352 = vrcp.f32 %v3816_v55  ;;  %v4031_v47 = vmul.f32 %v7341_v3, %v11407_v35  ;;  %v11423_v35 = vld [vmem:[#allocation54_spill] sm:$0xff] }
 0x705   : > { %v7343_v45 = vpop.eup %7342  ;;  %v4030_v20 = vmul.f32 %v7341_v3, %v11409_v56  ;;  %v11425_v56 = vld [vmem:[#allocation51_spill] sm:$0xff] }
 0x706   : > { %v3864_v25 = vpop.xlane.xlu0 %3863  ;;  %v3819_v41 = vpop.xlane.xlu1 %3818  ;;  %4246 = vmatprep.mubr.bf16.mxu0 %v4115_v5  ;;  %v4033_v50 = vmul.f32 %v7343_v45, %v11408_v15  ;;  %v4032_v48 = vmul.f32 %v7343_v45, %v11410_v52  ;;  %v11424_v15 = vld [vmem:[#allocation53_spill] sm:$0xff]  ;;  %v11426_v52 = vld [vmem:[#allocation55_spill] sm:$0xff] }
 0x707   : > { %v7345_v34 = vpop.eup %7344  ;;  %7354 = vrcp.f32 %v3819_v41  ;;  %4247 = vmatmul.mubr.bf16.gmra.mrb[88].mxu0 %v4114_v57 }
 0x708   : > { %v4131_v58 = vpack.c.bf16 %v4033_v50, %v4031_v47  ;;  %v4130_v30 = vpack.c.bf16 %v4032_v48, %v4030_v20  ;;  %7356 = vrcp.f32 %v3864_v25  ;;  %v4003_v8 = vmul.f32 %v7345_v34, %v11411_v42  ;;  %v11427_v42 = vld [vmem:[#allocation57_spill] sm:$0xff] }
 0x709   : > { %v7347_v36 = vpop.eup %7346  ;;  %v4002_v12 = vmul.f32 %v7345_v34, %v11413_v51  ;;  %v11429_v51 = vld [vmem:[#allocation56_spill] sm:$0xff] }
 0x70a   : > { %v3822_v38 = vpop.xlane.xlu0 %3821  ;;  %v3867_v19 = vpop.xlane.xlu1 %3866  ;;  %4343 = vmatprep.mubr.bf16.mxu1 %v4131_v58  ;;  %v4005_v43 = vmul.f32 %v7347_v36, %v11412_v2  ;;  %v4004_v44 = vmul.f32 %v7347_v36, %v11414_v16  ;;  %v11428_v2 = vld [vmem:[#allocation60_spill] sm:$0xff]  ;;  %v11430_v16 = vld [vmem:[#allocation58_spill] sm:$0xff] }
 0x70b   : > { %v7349_v49 = vpop.eup %7348  ;;  %7358 = vrcp.f32 %v3867_v19  ;;  %4344 = vmatmul.mubr.bf16.gmra.mrb[88].mxu1 %v4130_v30 }
 0x70c   : > { %v4117_v6 = vpack.c.bf16 %v4005_v43, %v4003_v8  ;;  %v4116_v59 = vpack.c.bf16 %v4004_v44, %v4002_v12  ;;  %7360 = vrcp.f32 %v3822_v38  ;;  %v4035_v7 = vmul.f32 %v7349_v49, %v11415_v29  ;;  %v11431_v29 = vld [vmem:[#allocation59_spill] sm:$0xff] }
 0x70d   : > { %v7351_v26 = vpop.eup %7350  ;;  %v4034_v14 = vmul.f32 %v7349_v49, %v11417_v32  ;;  %v11433_v32 = vld [vmem:[#allocation62_spill] sm:$0xff] }
 0x70e   : > { %v3870_v53 = vpop.xlane.xlu0 %3869  ;;  %v3825_v18 = vpop.xlane.xlu1 %3824  ;;  %4254 = vmatprep.mubr.bf16.mxu0 %v4117_v6  ;;  %v4037_v54 = vmul.f32 %v7351_v26, %v11416_v21  ;;  %v4036_v61 = vmul.f32 %v7351_v26, %v11418_v10  ;;  %v11432_v21 = vld [vmem:[#allocation63_spill] sm:$0xff]  ;;  %v11434_v10 = vld [vmem:[#allocation61_spill] sm:$0xff] }
 0x70f   : > { %v7353_v31 = vpop.eup %7352  ;;  %7362 = vrcp.f32 %v3825_v18  ;;  %4255 = vmatmul.mubr.bf16.gmra.mrb[92].mxu0 %v4116_v59 }
 0x710   : > { %v4133_v39 = vpack.c.bf16 %v4037_v54, %v4035_v7  ;;  %v4132_v22 = vpack.c.bf16 %v4036_v61, %v4034_v14  ;;  %7364 = vrcp.f32 %v3870_v53  ;;  %v4038_v1 = vmul.f32 %v7353_v31, %v11419_v37  ;;  %v11435_v37 = vld [vmem:[#allocation65_spill] sm:$0xff] }
 0x711   : > { %v7355_v9 = vpop.eup %7354  ;;  %v4039_v60 = vmul.f32 %v7353_v31, %v11421_v13  ;;  %v11437_v13 = vld [vmem:[#allocation64_spill] sm:$0xff] }
 0x712   : > { %v3828_v55 = vpop.xlane.xlu0 %3827  ;;  %v3873_v11 = vpop.xlane.xlu1 %3872  ;;  %v4040_v17 = vmul.f32 %v7355_v9, %v11420_v63  ;;  %4351 = vmatprep.mubr.bf16.mxu1 %v4133_v39  ;;  %v4041_v46 = vmul.f32 %v7355_v9, %v11422_v62  ;;  %v11436_v63 = vld [vmem:[#allocation68_spill] sm:$0xff]  ;;  %v11438_v62 = vld [vmem:[#allocation66_spill] sm:$0xff] }
 0x713   : > { %v7357_v3 = vpop.eup %7356  ;;  %7366 = vrcp.f32 %v3873_v11  ;;  %4352 = vmatmul.mubr.bf16.gmra.mrb[92].mxu1 %v4132_v22 }
 0x714   : > { %v4135_v5 = vpack.c.bf16 %v4041_v46, %v4039_v60  ;;  %v4134_v57 = vpack.c.bf16 %v4040_v17, %v4038_v1  ;;  %7368 = vrcp.f32 %v3828_v55  ;;  %v4070_v47 = vmul.f32 %v7357_v3, %v11423_v35  ;;  %v11439_v35 = vld [vmem:[#allocation67_spill] sm:$0xff] }
 0x715   : > { %v7359_v45 = vpop.eup %7358  ;;  %v4071_v20 = vmul.f32 %v7357_v3, %v11425_v56  ;;  %v11441_v56 = vld [vmem:[#allocation70_spill] sm:$0xff] }
 0x716   : > { %v3876_v25 = vpop.xlane.xlu0 %3875  ;;  %v3831_v41 = vpop.xlane.xlu1 %3830  ;;  %v4072_v50 = vmul.f32 %v7359_v45, %v11424_v15  ;;  %4392 = vmatprep.mubr.bf16.mxu0 %v4135_v5  ;;  %v4073_v48 = vmul.f32 %v7359_v45, %v11426_v52  ;;  %v11440_v15 = vld [vmem:[#allocation71_spill] sm:$0xff]  ;;  %v11442_v52 = vld [vmem:[#allocation69_spill] sm:$0xff] }
 0x717   : > { %v7361_v34 = vpop.eup %7360  ;;  %7370 = vrcp.f32 %v3831_v41  ;;  %4393 = vmatmul.mubr.bf16.vlgmr.msra.gmra.mrb[96].mxu0 %v4134_v57 }
 0x718   : > { %v4151_v58 = vpack.c.bf16 %v4073_v48, %v4071_v20  ;;  %v4150_v30 = vpack.c.bf16 %v4072_v50, %v4070_v47  ;;  %7372 = vrcp.f32 %v3876_v25  ;;  %v4043_v8 = vmul.f32 %v7361_v34, %v11427_v42  ;;  %v11443_v42 = vld [vmem:[#allocation73_spill] sm:$0xff] }
 0x719   : > { %v7363_v36 = vpop.eup %7362  ;;  %v4042_v12 = vmul.f32 %v7361_v34, %v11429_v51  ;;  %v11445_v51 = vld [vmem:[#allocation72_spill] sm:$0xff] }
 0x71a   : > { %v3834_v38 = vpop.xlane.xlu0 %3833  ;;  %v3879_v19 = vpop.xlane.xlu1 %3878  ;;  %4489 = vmatprep.mubr.bf16.mxu1 %v4151_v58  ;;  %v4045_v43 = vmul.f32 %v7363_v36, %v11428_v2  ;;  %v4044_v44 = vmul.f32 %v7363_v36, %v11430_v16  ;;  %v11444_v2 = vld [vmem:[#allocation76_spill] sm:$0xff]  ;;  %v11446_v16 = vld [vmem:[#allocation74_spill] sm:$0xff] }
 0x71b   : > { %v7365_v49 = vpop.eup %7364  ;;  %7374 = vrcp.f32 %v3879_v19  ;;  %4490 = vmatmul.mubr.bf16.vlgmr.msra.gmra.mrb[96].mxu1 %v4150_v30 }
 0x71c   : > { %v4137_v6 = vpack.c.bf16 %v4045_v43, %v4043_v8  ;;  %v4136_v59 = vpack.c.bf16 %v4044_v44, %v4042_v12  ;;  %7376 = vrcp.f32 %v3834_v38  ;;  %v4075_v7 = vmul.f32 %v7365_v49, %v11431_v29  ;;  %v11447_v29 = vld [vmem:[#allocation75_spill] sm:$0xff] }
 0x71d   : > { %v7367_v26 = vpop.eup %7366  ;;  %v4074_v14 = vmul.f32 %v7365_v49, %v11433_v32  ;;  %v11449_v32 = vld [vmem:[#allocation78_spill] sm:$0xff] }
 0x71e   : > { %v3882_v53 = vpop.xlane.xlu0 %3881  ;;  %v3837_v18 = vpop.xlane.xlu1 %3836  ;;  %4400 = vmatprep.mubr.bf16.mxu0 %v4137_v6  ;;  %v4077_v54 = vmul.f32 %v7367_v26, %v11432_v21  ;;  %v4076_v61 = vmul.f32 %v7367_v26, %v11434_v10  ;;  %v11448_v21 = vld [vmem:[#allocation79_spill] sm:$0xff]  ;;  %v11450_v10 = vld [vmem:[#allocation77_spill] sm:$0xff] }
 0x71f   : > { %v7369_v31 = vpop.eup %7368  ;;  %7378 = vrcp.f32 %v3837_v18  ;;  %4401 = vmatmul.mubr.bf16.gmra.mrb[100].mxu0 %v4136_v59 }
 0x720   : > { %v4153_v39 = vpack.c.bf16 %v4077_v54, %v4075_v7  ;;  %v4152_v22 = vpack.c.bf16 %v4076_v61, %v4074_v14  ;;  %7380 = vrcp.f32 %v3882_v53  ;;  %v4047_v1 = vmul.f32 %v7369_v31, %v11435_v37  ;;  %v11451_v37 = vld [vmem:[#allocation81_spill] sm:$0xff] }
 0x721   : > { %v7371_v9 = vpop.eup %7370  ;;  %v4046_v60 = vmul.f32 %v7369_v31, %v11437_v13  ;;  %v11453_v13 = vld [vmem:[#allocation80_spill] sm:$0xff] }
 0x722   : > { %v3840_v55 = vpop.xlane.xlu0 %3839  ;;  %v3885_v11 = vpop.xlane.xlu1 %3884  ;;  %4497 = vmatprep.mubr.bf16.mxu1 %v4153_v39  ;;  %v4049_v17 = vmul.f32 %v7371_v9, %v11436_v63  ;;  %v4048_v46 = vmul.f32 %v7371_v9, %v11438_v62  ;;  %v11452_v63 = vld [vmem:[#allocation84_spill] sm:$0xff]  ;;  %v11454_v62 = vld [vmem:[#allocation82_spill] sm:$0xff] }
 0x723   : > { %v7373_v3 = vpop.eup %7372  ;;  %7382 = vrcp.f32 %v3885_v11  ;;  %4498 = vmatmul.mubr.bf16.gmra.mrb[100].mxu1 %v4152_v22 }
 0x724   : > { %v4139_v5 = vpack.c.bf16 %v4049_v17, %v4047_v1  ;;  %v4138_v57 = vpack.c.bf16 %v4048_v46, %v4046_v60  ;;  %7384 = vrcp.f32 %v3840_v55  ;;  %v4079_v47 = vmul.f32 %v7373_v3, %v11439_v35  ;;  %v11455_v35 = vld [vmem:[#allocation83_spill] sm:$0xff] }
 0x725   : > { %v7375_v45 = vpop.eup %7374  ;;  %v4078_v20 = vmul.f32 %v7373_v3, %v11441_v56  ;;  %v11457_v56 = vld [vmem:[#allocation86_spill] sm:$0xff] }
 0x726   : > { %v3888_v25 = vpop.xlane.xlu0 %3887  ;;  %v3843_v41 = vpop.xlane.xlu1 %3842  ;;  %4408 = vmatprep.mubr.bf16.mxu0 %v4139_v5  ;;  %v4081_v50 = vmul.f32 %v7375_v45, %v11440_v15  ;;  %v4080_v48 = vmul.f32 %v7375_v45, %v11442_v52  ;;  %v11456_v15 = vld [vmem:[#allocation87_spill] sm:$0xff]  ;;  %v11458_v52 = vld [vmem:[#allocation85_spill] sm:$0xff] }
 0x727   : > { %v7377_v34 = vpop.eup %7376  ;;  %7386 = vrcp.f32 %v3843_v41  ;;  %4409 = vmatmul.mubr.bf16.gmra.mrb[104].mxu0 %v4138_v57 }
 0x728   : > { %v4155_v58 = vpack.c.bf16 %v4081_v50, %v4079_v47  ;;  %v4154_v30 = vpack.c.bf16 %v4080_v48, %v4078_v20  ;;  %7388 = vrcp.f32 %v3888_v25  ;;  %v4051_v8 = vmul.f32 %v7377_v34, %v11443_v42  ;;  %v11459_v42 = vld [vmem:[#allocation89_spill] sm:$0xff] }
 0x729   : > { %v7379_v36 = vpop.eup %7378  ;;  %v4050_v12 = vmul.f32 %v7377_v34, %v11445_v51 }
 0x72a   : > { %v3846_v38 = vpop.xlane.xlu0 %3845  ;;  %v3891_v19 = vpop.xlane.xlu1 %3890  ;;  %4505 = vmatprep.mubr.bf16.mxu1 %v4155_v58  ;;  %v4053_v43 = vmul.f32 %v7379_v36, %v11444_v2  ;;  %v4052_v44 = vmul.f32 %v7379_v36, %v11446_v16 }
 0x72b   : > { %v7381_v49 = vpop.eup %7380  ;;  %7390 = vrcp.f32 %v3891_v19  ;;  %4506 = vmatmul.mubr.bf16.gmra.mrb[104].mxu1 %v4154_v30 }
 0x72c   : > { %v4141_v6 = vpack.c.bf16 %v4053_v43, %v4051_v8  ;;  %v4140_v59 = vpack.c.bf16 %v4052_v44, %v4050_v12  ;;  %7392 = vrcp.f32 %v3846_v38  ;;  %v4083_v7 = vmul.f32 %v7381_v49, %v11447_v29  ;;  %v11460_v43 = vld [vmem:[#allocation88_spill] sm:$0xff] }
 0x72d   : > { %v7383_v26 = vpop.eup %7382  ;;  %v4082_v14 = vmul.f32 %v7381_v49, %v11449_v32 }
 0x72e   : > { %v3894_v53 = vpop.xlane.xlu0 %3893  ;;  %v3849_v18 = vpop.xlane.xlu1 %3848  ;;  %4416 = vmatprep.mubr.bf16.mxu0 %v4141_v6  ;;  %v4085_v54 = vmul.f32 %v7383_v26, %v11448_v21  ;;  %v4084_v61 = vmul.f32 %v7383_v26, %v11450_v10 }
 0x72f   : > { %v7385_v31 = vpop.eup %7384  ;;  %7394 = vrcp.f32 %v3849_v18  ;;  %4417 = vmatmul.mubr.bf16.gmra.mrb[108].mxu0 %v4140_v59 }
 0x730   : > { %v4157_v39 = vpack.c.bf16 %v4085_v54, %v4083_v7  ;;  %v4156_v22 = vpack.c.bf16 %v4084_v61, %v4082_v14  ;;  %7396 = vrcp.f32 %v3894_v53  ;;  %v4055_v1 = vmul.f32 %v7385_v31, %v11451_v37 }
 0x731   : > { %v7387_v9 = vpop.eup %7386  ;;  %v4054_v60 = vmul.f32 %v7385_v31, %v11453_v13 }
 0x732   : > { %v3852_v55 = vpop.xlane.xlu0 %3851  ;;  %v3897_v11 = vpop.xlane.xlu1 %3896  ;;  %4513 = vmatprep.mubr.bf16.mxu1 %v4157_v39  ;;  %v4057_v17 = vmul.f32 %v7387_v9, %v11452_v63  ;;  %v4056_v46 = vmul.f32 %v7387_v9, %v11454_v62  ;;  %v11463_v9 = vld [vmem:[#allocation92_spill] sm:$0xff]  ;;  %v11466_v63 = vld [vmem:[#allocation94_spill] sm:$0xff] }
 0x733   : > { %v7389_v3 = vpop.eup %7388  ;;  %7398 = vrcp.f32 %v3897_v11  ;;  %4514 = vmatmul.mubr.bf16.gmra.mrb[108].mxu1 %v4156_v22  ;;  %v11464_v11 = vld [vmem:[#allocation95_spill] sm:$0xff] }
 0x734   : > { %7400 = vrcp.f32 %v3852_v55  ;;  %v4143_v5 = vpack.c.bf16 %v4057_v17, %v4055_v1  ;;  %v4142_v57 = vpack.c.bf16 %v4056_v46, %v4054_v60  ;;  %v4087_v47 = vmul.f32 %v7389_v3, %v11455_v35  ;;  %v11465_v1 = vld [vmem:[#allocation90_spill] sm:$0xff]  ;;  %v11470_v35 = vld [vmem:[#allocation99_spill] sm:$0xff] }
 0x735   : > { %v7391_v45 = vpop.eup %7390  ;;  %v4086_v20 = vmul.f32 %v7389_v3, %v11457_v56  ;;  %v11467_v3 = vld [vmem:[#allocation97_spill] sm:$0xff] }
 0x736   : > { %v3900_v25 = vpop.xlane.xlu0 %3899  ;;  %v3855_v41 = vpop.xlane.xlu1 %3854  ;;  %4424 = vmatprep.mubr.bf16.mxu0 %v4143_v5  ;;  %v4089_v50 = vmul.f32 %v7391_v45, %v11456_v15  ;;  %v4088_v48 = vmul.f32 %v7391_v45, %v11458_v52 }
 0x737   : > { %v7393_v34 = vpop.eup %7392  ;;  %7402 = vrcp.f32 %v3855_v41  ;;  %4425 = vmatmul.mubr.bf16.gmra.mrb[112].mxu0 %v4142_v57  ;;  %v11468_v57 = vld [vmem:[#allocation100_spill] sm:$0xff] }
 0x738   : > { %v4159_v58 = vpack.c.bf16 %v4089_v50, %v4087_v47  ;;  %v4158_v30 = vpack.c.bf16 %v4088_v48, %v4086_v20  ;;  %7404 = vrcp.f32 %v3900_v25  ;;  %v4059_v8 = vmul.f32 %v7393_v34, %v11459_v42  ;;  %v11469_v25 = vld [vmem:[#allocation96_spill] sm:$0xff]  ;;  %v11471_v20 = vld [vmem:[#allocation98_spill] sm:$0xff]  ;;  %v11472_v48 = vld [vmem:[#allocation103_spill] sm:$0xff] }
 0x739   : > { %v7395_v36 = vpop.eup %7394  ;;  %v4058_v51 = vmul.f32 %v7393_v34, %v11460_v43 }
 0x73a   : > { %v3858_v38 = vpop.xlane.xlu0 %3857  ;;  %v3903_v19 = vpop.xlane.xlu1 %3902  ;;  %4521 = vmatprep.mubr.bf16.mxu1 %v4159_v58  ;;  %v4061_v2 = vmul.f32 %v7395_v36, %v10178_v23  ;;  %v4060_v12 = vmul.f32 %v7395_v36, %v10174_v4  ;;  %v11473_v58 = vld [vmem:[#allocation101_spill] sm:$0xff]  ;;  %v11474_v36 = vld [vmem:[#allocation102_spill] sm:$0xff] }
 0x73b   : > { %v7397_v16 = vpop.eup %7396  ;;  %7406 = vrcp.f32 %v3903_v19  ;;  %4522 = vmatmul.mubr.bf16.gmra.mrb[112].mxu1 %v4158_v30 }
 0x73c   : > { %v4145_v44 = vpack.c.bf16 %v4061_v2, %v4059_v8  ;;  %v4144_v49 = vpack.c.bf16 %v4060_v12, %v4058_v51  ;;  %7408 = vrcp.f32 %v3858_v38  ;;  %v4091_v18 = vmul.f32 %v7397_v16, %v10185_v27  ;;  %v11461_v27 = vld [vmem:[#allocation91_spill] sm:$0xff] }
 0x73d   : > { %v7399_v6 = vpop.eup %7398  ;;  %v4090_v23 = vmul.f32 %v7397_v16, %v10182_v40 }
 0x73e   : > { %v3906_v59 = vpop.xlane.xlu0 %3905  ;;  %v3861_v26 = vpop.xlane.xlu1 %3860  ;;  %4432 = vmatprep.mubr.bf16.mxu0 %v4145_v44  ;;  %v4093_v29 = vmul.f32 %v7399_v6, %v10194_v24  ;;  %v4092_v7 = vmul.f32 %v7399_v6, %v10190_v28  ;;  %v11462_v24 = vld [vmem:[#allocation93_spill] sm:$0xff] }
 0x73f   : > { %v7401_v53 = vpop.eup %7400  ;;  %7410 = vrcp.f32 %v3861_v26  ;;  %4433 = vmatmul.mubr.bf16.gmra.mrb[116].mxu0 %v4144_v49 }
 0x740   : > { %7412 = vrcp.f32 %v3906_v59  ;;  %v4161_v4 = vpack.c.bf16 %v4093_v29, %v4091_v18  ;;  %v4160_v21 = vpack.c.bf16 %v4092_v7, %v4090_v23  ;;  %v4063_v14 = vmul.f32 %v7401_v53, %v10201_v33  ;;  %v6984_v23 = vld [vmem:[#allocation10] sm:$0xff]   ;;  %v6985_v7 = vld [vmem:[#allocation10 + $0x8] sm:$0xff]  }
 0x741   : > { %v7403_v54 = vpop.eup %7402  ;;  %v4062_v61 = vmul.f32 %v7401_v53, %v11461_v27  ;;  %6513 = vmatprep.subr.bf16.mxu0 %v6984_v23 }
 0x742   : > { %v3909_v32 = vpop.xlane.xlu1 %3908  ;;  %4529 = vmatprep.mubr.bf16.mxu1 %v4161_v4  ;;  %v4065_v10 = vmul.f32 %v7403_v54, %v10208_v0  ;;  %v4064_v31 = vmul.f32 %v7403_v54, %v11462_v24  ;;  %v7405_v40 = vpop.eup %7404  ;;  %6514 = vmatpush3.bf16.msra.mxu0 %v6984_v23 }
 0x743   : > { %7414 = vrcp.f32 %v3909_v32  ;;  %4530 = vmatmul.mubr.bf16.gmra.mrb[116].mxu1 %v4160_v21  ;;  %v4095_v55 = vmul.f32 %v7405_v40, %v11463_v9  ;;  %v4094_v33 = vmul.f32 %v7405_v40, %v11465_v1  ;;  %6515 = vmatprep.subr.bf16.mxu0 %v6985_v7  ;;  %v6987_v9 = vld [vmem:[#allocation10 + $0x18] sm:$0xff]  }
 0x744   : > { %v4147_v28 = vpack.c.bf16 %v4065_v10, %v4063_v14  ;;  %v4146_v39 = vpack.c.bf16 %v4064_v31, %v4062_v61  ;;  %v6986_v61 = vld [vmem:[#allocation10 + $0x10] sm:$0xff]  }
 0x745   : > { %v7407_v22 = vpop.eup %7406 }
 0x746   : > { %4440 = vmatprep.mubr.bf16.mxu0 %v4147_v28  ;;  %v4097_v37 = vmul.f32 %v7407_v22, %v11464_v11  ;;  %v4096_v17 = vmul.f32 %v7407_v22, %v11466_v63  ;;  %v7409_v13 = vpop.eup %7408  ;;  %6516 = vmatpush3.bf16.msra.mxu0 %v6985_v7 }
 0x747   : > { %4441 = vmatmul.mubr.bf16.gmra.mrb[120].mxu0 %v4146_v39  ;;  %v4067_v5 = vmul.f32 %v7409_v13, %v11467_v3  ;;  %v4066_v41 = vmul.f32 %v7409_v13, %v11469_v25  ;;  %6517 = vmatprep.subr.bf16.mxu0 %v6986_v61  ;;  %v6988_v13 = vld [vmem:[#allocation10 + $0x20] sm:$0xff]  }
 0x748   : > { %v4163_v0 = vpack.c.bf16 %v4097_v37, %v4095_v55  ;;  %v4162_v60 = vpack.c.bf16 %v4096_v17, %v4094_v33 }
 0x749   : > { %v7411_v62 = vpop.eup %7410 }
 0x74a   : > { %v7413_v46 = vpop.eup %7412  ;;  %4537 = vmatprep.mubr.bf16.mxu1 %v4163_v0  ;;  %v4069_v45 = vmul.f32 %v7411_v62, %v11468_v57  ;;  %v4068_v47 = vmul.f32 %v7411_v62, %v11470_v35  ;;  %6518 = vmatpush3.bf16.msra.mxu0 %v6986_v61  ;;  %v6989_v57 = vld [vmem:[#allocation10 + $0x28] sm:$0xff]  }
 0x74b   : > { %4538 = vmatmul.mubr.bf16.gmra.mrb[120].mxu1 %v4162_v60  ;;  %v4099_v52 = vmul.f32 %v7413_v46, %v11471_v20  ;;  %v4098_v30 = vmul.f32 %v7413_v46, %v11473_v58  ;;  %6519 = vmatprep.subr.bf16.mxu0 %v6987_v9 }
 0x74c   : > { %v4149_v50 = vpack.c.bf16 %v4069_v45, %v4067_v5  ;;  %v4148_v56 = vpack.c.bf16 %v4068_v47, %v4066_v41 }
 0x74d   : > { %v7415_v15 = vpop.eup %7414 }
 0x74e   : > { %v4101_v34 = vmul.f32 %v7415_v15, %v11472_v48  ;;  %v4100_v38 = vmul.f32 %v7415_v15, %v11474_v36  ;;  %4448 = vmatprep.mubr.bf16.mxu0 %v4149_v50  ;;  %6520 = vmatpush3.bf16.msra.mxu0 %v6987_v9 }
 0x74f   : > { %4449 = vmatmul.mubr.bf16.gmra.mrb[124].mxu0 %v4148_v56  ;;  %6521 = vmatprep.subr.bf16.mxu0 %v6988_v13 }
 0x750   : > { %v4165_v19 = vpack.c.bf16 %v4101_v34, %v4099_v52  ;;  %v4164_v42 = vpack.c.bf16 %v4100_v38, %v4098_v30 }
 0x752   : > { %4545 = vmatprep.mubr.bf16.mxu1 %v4165_v19  ;;  %6522 = vmatpush3.bf16.msra.mxu0 %v6988_v13 }
 0x753   : > { %4546 = vmatmul.mubr.bf16.gmra.mrb[124].mxu1 %v4164_v42  ;;  %6523 = vmatprep.subr.bf16.mxu0 %v6989_v57 }
 0x756   : > { %6524 = vmatpush3.bf16.msra.mxu0 %v6989_v57 }
 0x7aa   : > { %v6145_v8 = vpop.f32.mrb[64].mxu0 }
 0x7ab   : > { %v6146_v2 = vpop.f32.mrb[65].mxu0 }
 0x7ac   : > { %v10380_v43 = vadd.f32 %v6146_v2, %v6145_v8  ;;  %v6148_v51 = vpop.f32.mrb[66].mxu0 }
 0x7ad   : > { %v6149_v12 = vpop.f32.mrb[67].mxu0 }
 0x7ae   : > { %v10382_v16 = vadd.f32 %v6149_v12, %v6148_v51  ;;  %v6209_v44 = vpop.f32.mrb[64].mxu1 }
 0x7af   : > { %v6210_v49 = vpop.f32.mrb[65].mxu1 }
 0x7b0   : > { %v6211_v6 = vadd.f32 %v6210_v49, %v6209_v44  ;;  %v6212_v59 = vpop.f32.mrb[66].mxu1 }
 0x7b1   : > { %v6213_v26 = vpop.f32.mrb[67].mxu1 }
 0x7b2   : > { %v6214_v53 = vadd.f32 %v6213_v26, %v6212_v59  ;;  %v6151_v18 = vpop.f32.mrb[68].mxu0 }
 0x7b3   : > { %v6152_v29 = vpop.f32.mrb[69].mxu0 }
 0x7b4   : > { %v6864_v4 = vpack.i.bf16 %v6214_v53, %v6211_v6  ;;  %v10384_v21 = vadd.f32 %v6152_v29, %v6151_v18  ;;  %v6154_v54 = vpop.f32.mrb[70].mxu0 }
 0x7b5   : > { %v6155_v32 = vpop.f32.mrb[71].mxu0 }
 0x7b6   : > { %v10386_v14 = vadd.f32 %v6155_v32, %v6154_v54  ;;  %6865 = vrot.lane.b32.xlu0 %v6864_v4, %s7737_s6  ;;  %v6215_v10 = vpop.f32.mrb[68].mxu1 }
 0x7b7   : > { %v6216_v27 = vpop.f32.mrb[69].mxu1 }
 0x7b8   : > { %v6217_v24 = vadd.f32 %v6216_v27, %v6215_v10  ;;  %v6218_v31 = vpop.f32.mrb[70].mxu1 }
 0x7b9   : > { %v6219_v40 = vpop.f32.mrb[71].mxu1 }
 0x7ba   : > { %v6220_v28 = vadd.f32 %v6219_v40, %v6218_v31  ;;  %v6157_v39 = vpop.f32.mrb[72].mxu0 }
 0x7bb   : > { %v6158_v22 = vpop.f32.mrb[73].mxu0 }
 0x7bc   : > { %v6869_v55 = vpack.i.bf16 %v6220_v28, %v6217_v24  ;;  %v10389_v11 = vadd.f32 %v6158_v22, %v6157_v39  ;;  %v6160_v37 = vpop.f32.mrb[74].mxu0 }
 0x7bd   : > { %v6161_v1 = vpop.f32.mrb[75].mxu0 }
 0x7be   : > { %v10391_v33 = vadd.f32 %v6161_v1, %v6160_v37  ;;  %6870 = vrot.lane.b32.xlu1 %v6869_v55, %s7737_s6  ;;  %v6221_v63 = vpop.f32.mrb[72].mxu1 }
 0x7bf   : > { %v6222_v17 = vpop.f32.mrb[73].mxu1 }
 0x7c0   : > { %v10394_v0 = vadd.f32 %v6222_v17, %v6221_v63  ;;  %v6224_v60 = vpop.f32.mrb[74].mxu1 }
 0x7c1   : > { %v6225_v62 = vpop.f32.mrb[75].mxu1 }
 0x7c2   : > { %v10396_v46 = vadd.f32 %v6225_v62, %v6224_v60  ;;  %v6163_v3 = vpop.f32.mrb[76].mxu0 }
 0x7c3   : > { %v6164_v5 = vpop.f32.mrb[77].mxu0 }
 0x7c4   : > { %v6894_v45 = vpack.i.bf16 %v10396_v46, %v10394_v0  ;;  %v10400_v25 = vadd.f32 %v6164_v5, %v6163_v3  ;;  %v6166_v41 = vpop.f32.mrb[78].mxu0 }
 0x7c5   : > { %v6167_v35 = vpop.f32.mrb[79].mxu0 }
 0x7c6   : > { %v10402_v47 = vadd.f32 %v6167_v35, %v6166_v41  ;;  %v6227_v15 = vpop.f32.mrb[76].mxu1 }
 0x7c7   : > { %v6228_v50 = vpop.f32.mrb[77].mxu1 }
 0x7c8   : > { %v10404_v56 = vadd.f32 %v6228_v50, %v6227_v15  ;;  %v6230_v20 = vpop.f32.mrb[78].mxu1  ;;  %v6990_v50 = vld [vmem:[#allocation10 + $0x30] sm:$0xff]  }
 0x7c9   : > { %v6231_v52 = vpop.f32.mrb[79].mxu1  ;;  %6525 = vmatprep.subr.bf16.mxu0 %v6990_v50 }
 0x7ca   : > { %v10406_v48 = vadd.f32 %v6231_v52, %v6230_v20  ;;  %v6169_v34 = vpop.f32.mrb[80].mxu0  ;;  %6526 = vmatpush3.bf16.msra.mxu0 %v6990_v50 }
 0x7cb   : > { %v6170_v58 = vpop.f32.mrb[81].mxu0 }
 0x7cc   : > { %v6899_v30 = vpack.i.bf16 %v10406_v48, %v10404_v56  ;;  %v10410_v36 = vadd.f32 %v6170_v58, %v6169_v34  ;;  %v6172_v38 = vpop.f32.mrb[82].mxu0 }
 0x7cd   : > { %v6173_v19 = vpop.f32.mrb[83].mxu0 }
 0x7ce   : > { %v10412_v42 = vadd.f32 %v6173_v19, %v6172_v38  ;;  %v6233_v8 = vpop.f32.mrb[80].mxu1 }
 0x7cf   : > { %v6234_v2 = vpop.f32.mrb[81].mxu1 }
 0x7d0   : > { %v10414_v51 = vadd.f32 %v6234_v2, %v6233_v8  ;;  %v6236_v12 = vpop.f32.mrb[82].mxu1 }
 0x7d1   : > { %v6237_v44 = vpop.f32.mrb[83].mxu1 }
 0x7d2   : > { %v10416_v49 = vadd.f32 %v6237_v44, %v6236_v12  ;;  %v6175_v6 = vpop.f32.mrb[84].mxu0 }
 0x7d3   : > { %v6176_v59 = vpop.f32.mrb[85].mxu0 }
 0x7d4   : > { %v6924_v26 = vpack.i.bf16 %v10416_v49, %v10414_v51  ;;  %v10420_v53 = vadd.f32 %v6176_v59, %v6175_v6  ;;  %v6178_v18 = vpop.f32.mrb[86].mxu0 }
 0x7d5   : > { %v6179_v29 = vpop.f32.mrb[87].mxu0 }
 0x7d6   : > { %v10422_v23 = vadd.f32 %v6179_v29, %v6178_v18  ;;  %v6239_v7 = vpop.f32.mrb[84].mxu1  ;;  %v6991_v29 = vld [vmem:[#allocation10 + $0x38] sm:$0xff]  }
 0x7d7   : > { %v6240_v4 = vpop.f32.mrb[85].mxu1  ;;  %6527 = vmatprep.subr.bf16.mxu0 %v6991_v29 }
 0x7d8   : > { %v10424_v54 = vadd.f32 %v6240_v4, %v6239_v7  ;;  %v6242_v32 = vpop.f32.mrb[86].mxu1  ;;  %6528 = vmatpush3.bf16.msra.mxu0 %v6991_v29 }
 0x7d9   : > { %v6243_v10 = vpop.f32.mrb[87].mxu1 }
 0x7da   : > { %v10426_v27 = vadd.f32 %v6243_v10, %v6242_v32  ;;  %v6181_v61 = vpop.f32.mrb[88].mxu0 }
 0x7db   : > { %v6182_v24 = vpop.f32.mrb[89].mxu0 }
 0x7dc   : > { %v6929_v31 = vpack.i.bf16 %v10426_v27, %v10424_v54  ;;  %v10430_v40 = vadd.f32 %v6182_v24, %v6181_v61  ;;  %v6184_v28 = vpop.f32.mrb[90].mxu0 }
 0x7dd   : > { %v6185_v39 = vpop.f32.mrb[91].mxu0 }
 0x7de   : > { %v10432_v22 = vadd.f32 %v6185_v39, %v6184_v28  ;;  %v6245_v9 = vpop.f32.mrb[88].mxu1 }
 0x7df   : > { %v6246_v55 = vpop.f32.mrb[89].mxu1 }
 0x7e0   : > { %v10434_v37 = vadd.f32 %v6246_v55, %v6245_v9  ;;  %v6248_v1 = vpop.f32.mrb[90].mxu1 }
 0x7e1   : > { %v6249_v63 = vpop.f32.mrb[91].mxu1 }
 0x7e2   : > { %v10436_v17 = vadd.f32 %v6249_v63, %v6248_v1  ;;  %v6187_v13 = vpop.f32.mrb[92].mxu0 }
 0x7e3   : > { %v6188_v60 = vpop.f32.mrb[93].mxu0 }
 0x7e4   : > { %v6954_v62 = vpack.i.bf16 %v10436_v17, %v10434_v37  ;;  %v10440_v3 = vadd.f32 %v6188_v60, %v6187_v13  ;;  %v6190_v5 = vpop.f32.mrb[94].mxu0 }
 0x7e5   : > { %v6191_v57 = vpop.f32.mrb[95].mxu0 }
 0x7e6   : > { %v10442_v41 = vadd.f32 %v6191_v57, %v6190_v5  ;;  %v6251_v35 = vpop.f32.mrb[92].mxu1 }
 0x7e7   : > { %v6252_v15 = vpop.f32.mrb[93].mxu1 }
 0x7e8   : > { %v10444_v20 = vadd.f32 %v6252_v15, %v6251_v35  ;;  %v6254_v52 = vpop.f32.mrb[94].mxu1 }
 0x7e9   : > { %v6255_v34 = vpop.f32.mrb[95].mxu1 }
 0x7ea   : > { %v10446_v58 = vadd.f32 %v6255_v34, %v6254_v52  ;;  %v6273_v38 = vpop.f32.mrb[96].mxu0 }
 0x7eb   : > { %v6274_v19 = vpop.f32.mrb[97].mxu0 }
 0x7ec   : > { %v6959_v8 = vpack.i.bf16 %v10446_v58, %v10444_v20  ;;  %v6275_v2 = vadd.f32 %v6274_v19, %v6273_v38  ;;  %v6276_v12 = vpop.f32.mrb[98].mxu0 }
 0x7ed   : > { %v6277_v44 = vpop.f32.mrb[99].mxu0 }
 0x7ee   : > { %v6278_v6 = vadd.f32 %v6277_v44, %v6276_v12  ;;  %v6337_v59 = vpop.f32.mrb[96].mxu1 }
 0x7ef   : > { %v6338_v18 = vpop.f32.mrb[97].mxu1 }
 0x7f0   : > { %v6874_v7 = vpack.i.bf16 %v6278_v6, %v6275_v2  ;;  %v6339_v4 = vadd.f32 %v6338_v18, %v6337_v59  ;;  %v6340_v32 = vpop.f32.mrb[98].mxu1 }
 0x7f1   : > { %v6341_v10 = vpop.f32.mrb[99].mxu1 }
 0x7f2   : > { %v6342_v61 = vadd.f32 %v6341_v10, %v6340_v32  ;;  %6875 = vrot.lane.b32.xlu1 %v6874_v7, %s7738_s30  ;;  %v6279_v24 = vpop.f32.mrb[100].mxu0 }
 0x7f3   : > { %v6280_v28 = vpop.f32.mrb[101].mxu0 }
 0x7f4   : > { %v6879_v39 = vpack.i.bf16 %v6342_v61, %v6339_v4  ;;  %v6281_v9 = vadd.f32 %v6280_v28, %v6279_v24  ;;  %v6282_v55 = vpop.f32.mrb[102].mxu0 }
 0x7f5   : > { %v6283_v1 = vpop.f32.mrb[103].mxu0 }
 0x7f6   : > { %v6284_v63 = vadd.f32 %v6283_v1, %v6282_v55  ;;  %6880 = vrot.lane.b32.xlu0 %v6879_v39, %s7739_s21  ;;  %v6343_v13 = vpop.f32.mrb[100].mxu1 }
 0x7f7   : > { %v6344_v60 = vpop.f32.mrb[101].mxu1 }
 0x7f8   : > { %v6884_v5 = vpack.i.bf16 %v6284_v63, %v6281_v9  ;;  %v6345_v57 = vadd.f32 %v6344_v60, %v6343_v13  ;;  %v6346_v35 = vpop.f32.mrb[102].mxu1 }
 0x7f9   : > { %v6347_v15 = vpop.f32.mrb[103].mxu1 }
 0x7fa   : > { %v6348_v50 = vadd.f32 %v6347_v15, %v6346_v35  ;;  %6895 = vrot.lane.b32.xlu0 %v6894_v45, %s7737_s6  ;;  %6885 = vrot.lane.b32.xlu1 %v6884_v5, %s7738_s30  ;;  %v6285_v52 = vpop.f32.mrb[104].mxu0 }
 0x7fb   : > { %v6286_v34 = vpop.f32.mrb[105].mxu0 }
 0x7fc   : > { %v6889_v38 = vpack.i.bf16 %v6348_v50, %v6345_v57  ;;  %v6287_v19 = vadd.f32 %v6286_v34, %v6285_v52  ;;  %v6288_v2 = vpop.f32.mrb[106].mxu0 }
 0x7fd   : > { %v6289_v12 = vpop.f32.mrb[107].mxu0 }
 0x7fe   : > { %v6290_v44 = vadd.f32 %v6289_v12, %v6288_v2  ;;  %6890 = vrot.lane.b32.xlu1 %v6889_v38, %s7739_s21  ;;  %v6349_v6 = vpop.f32.mrb[104].mxu1 }
 0x7ff   : > { %v6350_v59 = vpop.f32.mrb[105].mxu1 }
 0x800   : > { %v6904_v18 = vpack.i.bf16 %v6290_v44, %v6287_v19  ;;  %v6351_v29 = vadd.f32 %v6350_v59, %v6349_v6  ;;  %v6352_v7 = vpop.f32.mrb[106].mxu1 }
 0x801   : > { %v6353_v4 = vpop.f32.mrb[107].mxu1 }
 0x802   : > { %v6354_v32 = vadd.f32 %v6353_v4, %v6352_v7  ;;  %6900 = vrot.lane.b32.xlu1 %v6899_v30, %s7737_s6  ;;  %6905 = vrot.lane.b32.xlu0 %v6904_v18, %s7738_s30  ;;  %v6291_v0 = vpop.f32.mrb[108].mxu0 }
 0x803   : > { %v6292_v46 = vpop.f32.mrb[109].mxu0 }
 0x804   : > { %v6909_v45 = vpack.i.bf16 %v6354_v32, %v6351_v29  ;;  %v6293_v10 = vadd.f32 %v6292_v46, %v6291_v0  ;;  %v6294_v61 = vpop.f32.mrb[110].mxu0 }
 0x805   : > { %v6295_v24 = vpop.f32.mrb[111].mxu0 }
 0x806   : > { %v6296_v28 = vadd.f32 %v6295_v24, %v6294_v61  ;;  %6910 = vrot.lane.b32.xlu0 %v6909_v45, %s7739_s21  ;;  %v6355_v39 = vpop.f32.mrb[108].mxu1 }
 0x807   : > { %v6356_v9 = vpop.f32.mrb[109].mxu1 }
 0x808   : > { %v6914_v55 = vpack.i.bf16 %v6296_v28, %v6293_v10  ;;  %v6357_v1 = vadd.f32 %v6356_v9, %v6355_v39  ;;  %v6358_v63 = vpop.f32.mrb[110].mxu1 }
 0x809   : > { %v6359_v13 = vpop.f32.mrb[111].mxu1 }
 0x80a   : > { %v6360_v60 = vadd.f32 %v6359_v13, %v6358_v63  ;;  %6925 = vrot.lane.b32.xlu0 %v6924_v26, %s7737_s6  ;;  %6915 = vrot.lane.b32.xlu1 %v6914_v55, %s7738_s30  ;;  %v6297_v56 = vpop.f32.mrb[112].mxu0 }
 0x80b   : > { %v6298_v48 = vpop.f32.mrb[113].mxu0 }
 0x80c   : > { %v6919_v30 = vpack.i.bf16 %v6360_v60, %v6357_v1  ;;  %v6299_v5 = vadd.f32 %v6298_v48, %v6297_v56  ;;  %v6300_v57 = vpop.f32.mrb[114].mxu0 }
 0x80d   : > { %v6301_v35 = vpop.f32.mrb[115].mxu0 }
 0x80e   : > { %v6302_v15 = vadd.f32 %v6301_v35, %v6300_v57  ;;  %6920 = vrot.lane.b32.xlu1 %v6919_v30, %s7739_s21  ;;  %v6361_v50 = vpop.f32.mrb[112].mxu1 }
 0x80f   : > { %v6362_v52 = vpop.f32.mrb[113].mxu1 }
 0x810   : > { %v6934_v34 = vpack.i.bf16 %v6302_v15, %v6299_v5  ;;  %v6363_v38 = vadd.f32 %v6362_v52, %v6361_v50  ;;  %v6364_v19 = vpop.f32.mrb[114].mxu1 }
 0x811   : > { %v6365_v2 = vpop.f32.mrb[115].mxu1 }
 0x812   : > { %v6366_v12 = vadd.f32 %v6365_v2, %v6364_v19  ;;  %6930 = vrot.lane.b32.xlu1 %v6929_v31, %s7737_s6  ;;  %6935 = vrot.lane.b32.xlu0 %v6934_v34, %s7738_s30  ;;  %v6303_v51 = vpop.f32.mrb[116].mxu0 }
 0x813   : > { %v6304_v49 = vpop.f32.mrb[117].mxu0 }
 0x814   : > { %v6939_v26 = vpack.i.bf16 %v6366_v12, %v6363_v38  ;;  %v6305_v44 = vadd.f32 %v6304_v49, %v6303_v51  ;;  %v6306_v6 = vpop.f32.mrb[118].mxu0 }
 0x815   : > { %v6307_v59 = vpop.f32.mrb[119].mxu0 }
 0x816   : > { %v6308_v18 = vadd.f32 %v6307_v59, %v6306_v6  ;;  %6940 = vrot.lane.b32.xlu0 %v6939_v26, %s7739_s21  ;;  %v6367_v29 = vpop.f32.mrb[116].mxu1 }
 0x817   : > { %v6368_v7 = vpop.f32.mrb[117].mxu1 }
 0x818   : > { %v6944_v4 = vpack.i.bf16 %v6308_v18, %v6305_v44  ;;  %v6369_v32 = vadd.f32 %v6368_v7, %v6367_v29  ;;  %v6370_v0 = vpop.f32.mrb[118].mxu1 }
 0x819   : > { %v6371_v46 = vpop.f32.mrb[119].mxu1 }
 0x81a   : > { %v6372_v45 = vadd.f32 %v6371_v46, %v6370_v0  ;;  %6955 = vrot.lane.b32.xlu0 %v6954_v62, %s7737_s6  ;;  %6945 = vrot.lane.b32.xlu1 %v6944_v4, %s7738_s30  ;;  %v6309_v54 = vpop.f32.mrb[120].mxu0 }
 0x81b   : > { %v6310_v27 = vpop.f32.mrb[121].mxu0 }
 0x81c   : > { %v6949_v31 = vpack.i.bf16 %v6372_v45, %v6369_v32  ;;  %v6311_v10 = vadd.f32 %v6310_v27, %v6309_v54  ;;  %v6312_v61 = vpop.f32.mrb[122].mxu0 }
 0x81d   : > { %v6313_v24 = vpop.f32.mrb[123].mxu0 }
 0x81e   : > { %v6314_v28 = vadd.f32 %v6313_v24, %v6312_v61  ;;  %6950 = vrot.lane.b32.xlu1 %v6949_v31, %s7739_s21  ;;  %v6373_v39 = vpop.f32.mrb[120].mxu1 }
 0x81f   : > { %v6374_v9 = vpop.f32.mrb[121].mxu1 }
 0x820   : > { %v6964_v55 = vpack.i.bf16 %v6314_v28, %v6311_v10  ;;  %v6375_v1 = vadd.f32 %v6374_v9, %v6373_v39  ;;  %v6376_v63 = vpop.f32.mrb[122].mxu1 }
 0x821   : > { %v6377_v13 = vpop.f32.mrb[123].mxu1 }
 0x822   : > { %v6378_v60 = vadd.f32 %v6377_v13, %v6376_v63  ;;  %6960 = vrot.lane.b32.xlu1 %v6959_v8, %s7737_s6  ;;  %6965 = vrot.lane.b32.xlu0 %v6964_v55, %s7738_s30  ;;  %v6315_v37 = vpop.f32.mrb[124].mxu0  ;;  %s5972_s6 = sshll.u32 %s11478_s16, 5 }
 0x823   : > { %v6316_v17 = vpop.f32.mrb[125].mxu0 }
 0x824   : > { %v6969_v62 = vpack.i.bf16 %v6378_v60, %v6375_v1  ;;  %v6317_v56 = vadd.f32 %v6316_v17, %v6315_v37  ;;  %v6318_v48 = vpop.f32.mrb[126].mxu0 }
 0x825   : > { %v6319_v30 = vpop.f32.mrb[127].mxu0 }
 0x826   : > { %v6320_v5 = vadd.f32 %v6319_v30, %v6318_v48  ;;  %6970 = vrot.lane.b32.xlu0 %v6969_v62, %s7739_s21  ;;  %v6379_v57 = vpop.f32.mrb[124].mxu1 }
 0x827   : > { %v6380_v35 = vpop.f32.mrb[125].mxu1 }
 0x828   : > { %v6974_v15 = vpack.i.bf16 %v6320_v5, %v6317_v56  ;;  %v6381_v50 = vadd.f32 %v6380_v35, %v6379_v57  ;;  %v6382_v52 = vpop.f32.mrb[126].mxu1  ;;  %v6866_v8 = vpop.permute.xlu0 %6865 }
 0x829   : > { %v6383_v34 = vpop.f32.mrb[127].mxu1  ;;  %v6868_v2 = vunpack.i.h.bf16 %v6866_v8  ;;  %v6867_v12 = vunpack.i.l.bf16 %v6866_v8 }
 0x82a   : > { %v6384_v38 = vadd.f32 %v6383_v34, %v6382_v52  ;;  %6975 = vrot.lane.b32.xlu1 %v6974_v15, %s7738_s30  ;;  %s5719_s30 = sadd.s32 %s5972_s6, %s5971_s3 }
 0x82b   : > { %v4747_v44 = vsel %vm2273_vm1, %v10382_v16, %v6868_v2  ;;  %v4746_v6 = vsel %vm2273_vm1, %v10380_v43, %v6867_v12 }
 0x82c   : > { %v6979_v20 = vpack.i.bf16 %v6384_v38, %v6381_v50 }
 0x82e   : > { %6980 = vrot.lane.b32.xlu1 %v6979_v20, %s7739_s21  ;;  %s11479_s21 = sld [smem:[#allocation21_spill]] }
 0x830   : > { %v6871_v58 = vpop.permute.xlu1 %6870 }
 0x831   : > { %v6873_v45 = vunpack.i.h.bf16 %v6871_v58  ;;  %v6872_v54 = vunpack.i.l.bf16 %v6871_v58 }
 0x833   : > { %v4749_v43 = vsel %vm2273_vm1, %v10386_v14, %v6873_v45  ;;  %v4748_v61 = vsel %vm2273_vm1, %v10384_v21, %v6872_v54 }
 0x834   : > { %p11481_p4 = scmp.ne.s32.totalorder %s11479_s21, 0 }
 0x864   : > { %v6876_v19 = vpop.permute.xlu1 %6875 }
 0x865   : > { %v6878_v51 = vunpack.i.h.bf16 %v6876_v19  ;;  %v6877_v49 = vunpack.i.l.bf16 %v6876_v19 }
 0x867   : > { %v4764_v29 = vsel %vm4762_vm2, %v4747_v44, %v6878_v51  ;;  %v4763_v7 = vsel %vm4762_vm2, %v4746_v6, %v6877_v49 }
 0x868   : > { %v6881_v26 = vpop.permute.xlu0 %6880 }
 0x869   : > { %v6883_v59 = vunpack.i.h.bf16 %v6881_v26  ;;  %v6882_v18 = vunpack.i.l.bf16 %v6881_v26 }
 0x86b   : > { %v4780_v4 = vsel %vm4779_vm3, %v4763_v7, %v6882_v18  ;;  %v4781_v32 = vsel %vm4779_vm3, %v4764_v29, %v6883_v59 }
 0x86c   : > { %v6886_v0 = vpop.permute.xlu1 %6885  ;;  %v4796_v46 = vpack.c.bf16 %v4781_v32, %v4780_v4  ;;  %v6896_v16 = vpop.permute.xlu0 %6895 }
 0x86d   : > { %v6888_v27 = vunpack.i.h.bf16 %v6886_v0  ;;  %v6887_v31 = vunpack.i.l.bf16 %v6886_v0  ;;  %v6898_v60 = vunpack.i.h.bf16 %v6896_v16  ;;  %v6897_v37 = vunpack.i.l.bf16 %v6896_v16 }
 0x86e   : > { %6529 = vmatprep.mubr.bf16.mxu0 %v4796_v46 }
 0x86f   : > { %v4765_v39 = vsel %vm4762_vm2, %v4748_v61, %v6887_v31  ;;  %v4766_v9 = vsel %vm4762_vm2, %v4749_v43, %v6888_v27  ;;  %v4751_v21 = vsel %vm2273_vm1, %v10391_v33, %v6898_v60  ;;  %v4750_v48 = vsel %vm2273_vm1, %v10389_v11, %v6897_v37 }
 0x870   : > { %v6891_v10 = vpop.permute.xlu1 %6890 }
 0x871   : > { %v6893_v24 = vunpack.i.h.bf16 %v6891_v10  ;;  %v6892_v28 = vunpack.i.l.bf16 %v6891_v10 }
 0x873   : > { %v4782_v55 = vsel %vm4779_vm3, %v4765_v39, %v6892_v28  ;;  %v4783_v1 = vsel %vm4779_vm3, %v4766_v9, %v6893_v24 }
 0x874   : > { %v4797_v63 = vpack.c.bf16 %v4783_v1, %v4782_v55  ;;  %v6906_v13 = vpop.permute.xlu0 %6905  ;;  %v6901_v14 = vpop.permute.xlu1 %6900 }
 0x875   : > { %v6908_v17 = vunpack.i.h.bf16 %v6906_v13  ;;  %v6907_v62 = vunpack.i.l.bf16 %v6906_v13  ;;  %v6903_v38 = vunpack.i.h.bf16 %v6901_v14  ;;  %v6902_v20 = vunpack.i.l.bf16 %v6901_v14 }
 0x876   : > { %6530 = vmatmul.mubr.bf16.vlgmr.msra.gmra.mrb[128].mxu0 %v4797_v63 }
 0x877   : > { %v4768_v57 = vsel %vm4762_vm2, %v4751_v21, %v6908_v17  ;;  %v4767_v35 = vsel %vm4762_vm2, %v4750_v48, %v6907_v62  ;;  %v4753_v11 = vsel %vm2273_vm1, %v10402_v47, %v6903_v38  ;;  %v4752_v2 = vsel %vm2273_vm1, %v10400_v25, %v6902_v20 }
 0x878   : > { %v6911_v56 = vpop.permute.xlu0 %6910 }
 0x879   : > { %v6913_v30 = vunpack.i.h.bf16 %v6911_v56  ;;  %v6912_v5 = vunpack.i.l.bf16 %v6911_v56 }
 0x87b   : > { %v4784_v15 = vsel %vm4779_vm3, %v4767_v35, %v6912_v5  ;;  %v4785_v50 = vsel %vm4779_vm3, %v4768_v57, %v6913_v30 }
 0x87c   : > { %v6916_v52 = vpop.permute.xlu1 %6915  ;;  %v4798_v34 = vpack.c.bf16 %v4785_v50, %v4784_v15  ;;  %v6926_v33 = vpop.permute.xlu0 %6925 }
 0x87d   : > { %v6918_v58 = vunpack.i.h.bf16 %v6916_v52  ;;  %v6917_v8 = vunpack.i.l.bf16 %v6916_v52  ;;  %v6928_v29 = vunpack.i.h.bf16 %v6926_v33  ;;  %v6927_v7 = vunpack.i.l.bf16 %v6926_v33 }
 0x87e   : > { %6533 = vmatprep.mubr.bf16.mxu0 %v4798_v34 }
 0x87f   : > { %v4769_v49 = vsel %vm4762_vm2, %v4752_v2, %v6917_v8  ;;  %v4770_v26 = vsel %vm4762_vm2, %v4753_v11, %v6918_v58  ;;  %v4755_v25 = vsel %vm2273_vm1, %v10412_v42, %v6928_v29  ;;  %v4754_v46 = vsel %vm2273_vm1, %v10410_v36, %v6927_v7  ;;  %v2093_v29 = vld [vmem:[%s10557_s26] sm:$0xff] }
 0x880   : > { %v6921_v19 = vpop.permute.xlu1 %6920 }
 0x881   : > { %v6923_v12 = vunpack.i.h.bf16 %v6921_v19  ;;  %v6922_v51 = vunpack.i.l.bf16 %v6921_v19 }
 0x883   : > { %v4786_v44 = vsel %vm4779_vm3, %v4769_v49, %v6922_v51  ;;  %v4787_v6 = vsel %vm4779_vm3, %v4770_v26, %v6923_v12 }
 0x884   : > { %v6936_v59 = vpop.permute.xlu0 %6935  ;;  %v4799_v18 = vpack.c.bf16 %v4787_v6, %v4786_v44  ;;  %v6931_v47 = vpop.permute.xlu1 %6930 }
 0x885   : > { %v6938_v4 = vunpack.i.h.bf16 %v6936_v59  ;;  %v6937_v32 = vunpack.i.l.bf16 %v6936_v59  ;;  %v6933_v24 = vunpack.i.h.bf16 %v6931_v47  ;;  %v6932_v28 = vunpack.i.l.bf16 %v6931_v47  ;;  %v2094_v47 = vld [vmem:[%s10557_s26 + $0x8] sm:$0xff] }
 0x886   : > { %6534 = vmatmul.mubr.bf16.gmra.mrb[132].mxu0 %v4799_v18 }
 0x887   : > { %v4772_v27 = vsel %vm4762_vm2, %v4755_v25, %v6938_v4  ;;  %v4771_v31 = vsel %vm4762_vm2, %v4754_v46, %v6937_v32  ;;  %v4757_v36 = vsel %vm2273_vm1, %v10422_v23, %v6933_v24  ;;  %v4756_v1 = vsel %vm2273_vm1, %v10420_v53, %v6932_v28  ;;  %v2097_v24 = vld [vmem:[%s10557_s26 + $0x20] sm:$0xff] }
 0x888   : > { %v6941_v0 = vpop.permute.xlu0 %6940 }
 0x889   : > { %v6943_v45 = vunpack.i.h.bf16 %v6941_v0  ;;  %v6942_v54 = vunpack.i.l.bf16 %v6941_v0 }
 0x88b   : > { %v4788_v16 = vsel %vm4779_vm3, %v4771_v31, %v6942_v54  ;;  %v4789_v10 = vsel %vm4779_vm3, %v4772_v27, %v6943_v45  ;;  %v2095_v54 = vld [vmem:[%s10557_s26 + $0x10] sm:$0xff] }
 0x88c   : > { %v6946_v43 = vpop.permute.xlu1 %6945  ;;  %v4800_v61 = vpack.c.bf16 %v4789_v10, %v4788_v16  ;;  %v6956_v42 = vpop.permute.xlu0 %6955  ;;  %v2096_v10 = vld [vmem:[%s10557_s26 + $0x18] sm:$0xff] }
 0x88d   : > { %v6948_v39 = vunpack.i.h.bf16 %v6946_v43  ;;  %v6947_v9 = vunpack.i.l.bf16 %v6946_v43  ;;  %v6958_v21 = vunpack.i.h.bf16 %v6956_v42  ;;  %v6957_v48 = vunpack.i.l.bf16 %v6956_v42  ;;  %v2098_v42 = vld [vmem:[%s10557_s26 + $0x28] sm:$0xff] }
 0x88e   : > { %6537 = vmatprep.mubr.bf16.mxu0 %v4800_v61 }
 0x88f   : > { %v4773_v60 = vsel %vm4762_vm2, %v4756_v1, %v6947_v9  ;;  %v4774_v37 = vsel %vm4762_vm2, %v4757_v36, %v6948_v39  ;;  %v4759_v53 = vsel %vm2273_vm1, %v10432_v22, %v6958_v21  ;;  %v4758_v35 = vsel %vm2273_vm1, %v10430_v40, %v6957_v48  ;;  %v2101_v21 = vld [vmem:[%s10557_s26 + $0x40] sm:$0xff] }
 0x890   : > { %v6951_v55 = vpop.permute.xlu1 %6950 }
 0x891   : > { %v6953_v63 = vunpack.i.h.bf16 %v6951_v55  ;;  %v6952_v13 = vunpack.i.l.bf16 %v6951_v55 }
 0x893   : > { %v4790_v17 = vsel %vm4779_vm3, %v4773_v60, %v6952_v13  ;;  %v4791_v62 = vsel %vm4779_vm3, %v4774_v37, %v6953_v63  ;;  %v2099_v13 = vld [vmem:[%s10557_s26 + $0x30] sm:$0xff] }
 0x894   : > { %v6966_v14 = vpop.permute.xlu0 %6965  ;;  %v4801_v56 = vpack.c.bf16 %v4791_v62, %v4790_v17  ;;  %v6961_v23 = vpop.permute.xlu1 %6960  ;;  %v2100_v17 = vld [vmem:[%s10557_s26 + $0x38] sm:$0xff] }
 0x895   : > { %v6968_v30 = vunpack.i.h.bf16 %v6966_v14  ;;  %v6967_v5 = vunpack.i.l.bf16 %v6966_v14  ;;  %v6963_v33 = vunpack.i.h.bf16 %v6961_v23  ;;  %v6962_v19 = vunpack.i.l.bf16 %v6961_v23  ;;  %v2102_v23 = vld [vmem:[%s10557_s26 + $0x48] sm:$0xff] }
 0x896   : > { %6538 = vmatmul.mubr.bf16.gmra.mrb[136].mxu0 %v4801_v56 }
 0x897   : > { %v4776_v52 = vsel %vm4762_vm2, %v4759_v53, %v6968_v30  ;;  %v4775_v34 = vsel %vm4762_vm2, %v4758_v35, %v6967_v5  ;;  %v4761_v2 = vsel %vm2273_vm1, %v10442_v41, %v6963_v33  ;;  %v4760_v12 = vsel %vm2273_vm1, %v10440_v3, %v6962_v19  ;;  %v10562_v3 = vld [vmem:[%s11475_s2] ss:$0 sm:$0xff]  ;;  %s11480_s2 = sld [smem:[#allocation111_spill]] }
 0x898   : > { %v6971_v57 = vpop.permute.xlu0 %6970  ;;  %v2105_v33 = vld [vmem:[%s10557_s26 + $0x60] sm:$0xff] }
 0x899   : > { %v6973_v15 = vunpack.i.h.bf16 %v6971_v57  ;;  %v6972_v50 = vunpack.i.l.bf16 %v6971_v57 }
 0x89b   : > { %v4792_v38 = vsel %vm4779_vm3, %v4775_v34, %v6972_v50  ;;  %v4793_v20 = vsel %vm4779_vm3, %v4776_v52, %v6973_v15  ;;  %v2103_v50 = vld [vmem:[%s10557_s26 + $0x50] sm:$0xff] }
 0x89c   : > { %v6976_v58 = vpop.permute.xlu1 %6975  ;;  %v4802_v8 = vpack.c.bf16 %v4793_v20, %v4792_v38  ;;  %v2104_v38 = vld [vmem:[%s10557_s26 + $0x58] sm:$0xff] }
 0x89d   : > { %v6978_v22 = vunpack.i.h.bf16 %v6976_v58  ;;  %v6977_v11 = vunpack.i.l.bf16 %v6976_v58 }
 0x89e   : > { %6541 = vmatprep.mubr.bf16.mxu0 %v4802_v8 }
 0x89f   : > { %v4777_v26 = vsel %vm4762_vm2, %v4760_v12, %v6977_v11  ;;  %v4778_v44 = vsel %vm4762_vm2, %v4761_v2, %v6978_v22 }
 0x8a0   : > { %v6981_v40 = vpop.permute.xlu1 %6980 }
 0x8a1   : > { %v6983_v51 = vunpack.i.h.bf16 %v6981_v40  ;;  %v6982_v49 = vunpack.i.l.bf16 %v6981_v40  ;;  %v2106_v40 = vld [vmem:[%s10557_s26 + $0x68] sm:$0xff] }
 0x8a3   : > { %v4794_v6 = vsel %vm4779_vm3, %v4777_v26, %v6982_v49  ;;  %v4795_v59 = vsel %vm4779_vm3, %v4778_v44, %v6983_v51  ;;  %v2107_v26 = vld [vmem:[%s10557_s26 + $0x70] sm:$0xff] }
 0x8a4   : > { %v4803_v18 = vpack.c.bf16 %v4795_v59, %v4794_v6  ;;  %v2108_v59 = vld [vmem:[%s10557_s26 + $0x78] sm:$0xff]  ;;  %s5973_s26 = sshll.u32 %s5719_s30, 7 }
 0x8a5   : > { %s10867_s12 = scalar_lea.hbm %s11480_s2, %s5973_s26 }
 0x8a6   : > { %6542 = vmatmul.mubr.bf16.gmra.mrb[140].mxu0 %v4803_v18 }
 0x949   : > { %v6531_v41 = vpop.f32.mrb[128].mxu0 }
 0x94a   : > { %v4909_v7 = vpop.f32.mrb[129].mxu0  ;;  %v4918_v25 = vadd.f32 %v6531_v41, %v10562_v3 }
 0x94b   : > { %v4910_v4 = vadd.f32 %v10562_v3, %v4909_v7  ;;  %v6532_v32 = vpop.f32.mrb[130].mxu0  ;;  %v6994_v7 = vld [vmem:[#allocation11 + $0x4] ss:$8 sps:$4 sm:$0xff]  }
 0x94c   : > { %v4912_v0 = vpop.f32.mrb[131].mxu0  ;;  %v10575_v31 = vadd.f32 %v4918_v25, %v2095_v54  ;;  %v4921_v16 = vadd.f32 %v6532_v32, %v10562_v3  ;;  %5281 = vmatprep.subr.bf16.mxu1 %v6994_v7  ;;  %v7000_v32 = vld [vmem:[#allocation11 + $0x24] ss:$8 sps:$4 sm:$0xff]   ;;  %v7001_v25 = vld [vmem:[#allocation11 + $0x30] ss:$8 sps:$4 sm:$0xff]  }
 0x94d   : > { %v10568_v46 = vadd.f32 %v4910_v4, %v2093_v29  ;;  %v4913_v45 = vadd.f32 %v10562_v3, %v4912_v0  ;;  %v6992_v29 = vld [vmem:[#allocation11] ss:$8 sps:$4 sm:$0xff]   ;;  %v6997_v4 = vld [vmem:[#allocation11 + $0x14] ss:$8 sps:$4 sm:$0xff]  }
 0x94e   : > { %v10581_v43 = vadd.f32 %v4921_v16, %v2096_v10  ;;  %5282 = vmatpush1.bf16.msra.mxu1 %v6992_v29  ;;  %v7003_v0 = vld [vmem:[#allocation11 + $0x34] ss:$8 sps:$4 sm:$0xff]   ;;  %v7004_v54 = vld [vmem:[#allocation11 + $0x40] ss:$8 sps:$4 sm:$0xff]   ;;  %v7007_v10 = vld [vmem:[#allocation11 + $0x50] ss:$8 sps:$4 sm:$0xff]  }
 0x94f   : > { %v10572_v27 = vadd.f32 %v4913_v45, %v2094_v47  ;;  %4988 = vadd.xlane.f32.xlu0 %v10568_v46  ;;  %5283 = vmatprep.subr.bf16.mxu1 %v6997_v4  ;;  %v6998_v47 = vld [vmem:[#allocation11 + $0x20] ss:$8 sps:$4 sm:$0xff]   ;;  %v7006_v45 = vld [vmem:[#allocation11 + $0x44] ss:$8 sps:$4 sm:$0xff]   ;;  %v7009_v16 = vld [vmem:[#allocation11 + $0x54] ss:$8 sps:$4 sm:$0xff]  }
 0x951   : > { %4990 = vadd.xlane.f32.xlu1 %v10572_v27 }
 0x953   : > { %4992 = vadd.xlane.f32.xlu0 %v10575_v31 }
 0x957   : > { %4994 = vadd.xlane.f32.xlu0 %v10581_v43 }
 0x959   : > { %v6535_v61 = vpop.f32.mrb[132].mxu0 }
 0x95a   : > { %v4925_v28 = vpop.f32.mrb[133].mxu0  ;;  %v4934_v36 = vadd.f32 %v6535_v61, %v10562_v3 }
 0x95b   : > { %v4926_v39 = vadd.f32 %v10562_v3, %v4925_v28  ;;  %v6536_v9 = vpop.f32.mrb[134].mxu0 }
 0x95c   : > { %v4928_v55 = vpop.f32.mrb[135].mxu0  ;;  %v4937_v60 = vadd.f32 %v6536_v9, %v10562_v3  ;;  %v10597_v62 = vadd.f32 %v4934_v36, %v2099_v13 }
 0x95d   : > { %v10588_v1 = vadd.f32 %v4926_v39, %v2097_v24  ;;  %v4929_v63 = vadd.f32 %v10562_v3, %v4928_v55 }
 0x95e   : > { %v10600_v14 = vadd.f32 %v4937_v60, %v2100_v17 }
 0x95f   : > { %v10593_v37 = vadd.f32 %v4929_v63, %v2098_v42  ;;  %4996 = vadd.xlane.f32.xlu0 %v10588_v1 }
 0x961   : > { %4998 = vadd.xlane.f32.xlu1 %v10593_v37 }
 0x963   : > { %5000 = vadd.xlane.f32.xlu0 %v10597_v62 }
 0x965   : > { %5002 = vadd.xlane.f32.xlu1 %v10600_v14 }
 0x969   : > { %v6539_v56 = vpop.f32.mrb[136].mxu0 }
 0x96a   : > { %v4941_v48 = vpop.f32.mrb[137].mxu0  ;;  %v4950_v53 = vadd.f32 %v6539_v56, %v10562_v3 }
 0x96b   : > { %v4942_v30 = vadd.f32 %v10562_v3, %v4941_v48  ;;  %v6540_v5 = vpop.f32.mrb[138].mxu0 }
 0x96c   : > { %v4944_v57 = vpop.f32.mrb[139].mxu0  ;;  %v4953_v52 = vadd.f32 %v6540_v5, %v10562_v3  ;;  %v10617_v20 = vadd.f32 %v4950_v53, %v2103_v50 }
 0x96d   : > { %v10608_v35 = vadd.f32 %v4942_v30, %v2101_v21  ;;  %v4945_v15 = vadd.f32 %v10562_v3, %v4944_v57 }
 0x96e   : > { %v10620_v58 = vadd.f32 %v4953_v52, %v2104_v38 }
 0x96f   : > { %v10613_v34 = vadd.f32 %v4945_v15, %v2102_v23  ;;  %5004 = vadd.xlane.f32.xlu0 %v10608_v35 }
 0x971   : > { %5006 = vadd.xlane.f32.xlu1 %v10613_v34 }
 0x973   : > { %5008 = vadd.xlane.f32.xlu0 %v10617_v20 }
 0x975   : > { %5010 = vadd.xlane.f32.xlu1 %v10620_v58 }
 0x979   : > { %v6543_v8 = vpop.f32.mrb[140].mxu0 }
 0x97a   : > { %v4957_v19 = vpop.f32.mrb[141].mxu0  ;;  %v4966_v12 = vadd.f32 %v6543_v8, %v10562_v3 }
 0x97b   : > { %v4958_v22 = vadd.f32 %v10562_v3, %v4957_v19  ;;  %v6544_v11 = vpop.f32.mrb[142].mxu0 }
 0x97c   : > { %v4960_v2 = vpop.f32.mrb[143].mxu0  ;;  %v4969_v44 = vadd.f32 %v6544_v11, %v10562_v3  ;;  %v10637_v18 = vadd.f32 %v4966_v12, %v2107_v26  ;;  %v7012_v26 = vld [vmem:[#allocation11 + $0x64] ss:$8 sps:$4 sm:$0xff]  }
 0x97d   : > { %v10628_v51 = vadd.f32 %v4958_v22, %v2105_v33  ;;  %v4961_v49 = vadd.f32 %v10562_v3, %v4960_v2  ;;  %v6995_v3 = vld [vmem:[#allocation11 + $0x10] ss:$8 sps:$4 sm:$0xff]  }
 0x97e   : > { %v10640_v41 = vadd.f32 %v4969_v44, %v2108_v59  ;;  %5284 = vmatpush1.bf16.msra.mxu1 %v6995_v3  ;;  %v7010_v59 = vld [vmem:[#allocation11 + $0x60] ss:$8 sps:$4 sm:$0xff]  }
 0x97f   : > { %v10633_v6 = vadd.f32 %v4961_v49, %v2106_v40  ;;  %5012 = vadd.xlane.f32.xlu0 %v10628_v51  ;;  %5285 = vmatprep.subr.bf16.mxu1 %v7000_v32  ;;  %v7015_v32 = vld [vmem:[#allocation11 + $0x74] ss:$8 sps:$4 sm:$0xff]  }
 0x981   : > { %5014 = vadd.xlane.f32.xlu1 %v10633_v6 }
 0x982   : > { %5286 = vmatpush1.bf16.msra.mxu1 %v6998_v47 }
 0x983   : > { %5016 = vadd.xlane.f32.xlu0 %v10637_v18  ;;  %5287 = vmatprep.subr.bf16.mxu1 %v7003_v0 }
 0x985   : > { %5018 = vadd.xlane.f32.xlu1 %v10640_v41 }
 0x986   : > { %5288 = vmatpush1.bf16.msra.mxu1 %v7001_v25 }
 0x987   : > { %5289 = vmatprep.subr.bf16.mxu1 %v7006_v45  ;;  %v7013_v45 = vld [vmem:[#allocation11 + $0x70] ss:$8 sps:$4 sm:$0xff]  }
 0x98a   : > { %5290 = vmatpush1.bf16.msra.mxu1 %v7004_v54 }
 0x98b   : > { %5291 = vmatprep.subr.bf16.mxu1 %v7009_v16 }
 0x98e   : > { %5292 = vmatpush1.bf16.msra.mxu1 %v7007_v10 }
 0x98f   : > { %5293 = vmatprep.subr.bf16.mxu1 %v7012_v26  ;;  %v7020_v26 = vld [vmem:[#allocation13 + $0x50] sm:$0xff]  }
 0x992   : > { %5294 = vmatpush1.bf16.msra.mxu1 %v7010_v59  ;;  %v10727_v59 = vld [vmem:[#allocation13 + $0x58] sm:$0xff]  }
 0x993   : > { %5295 = vmatprep.subr.bf16.mxu1 %v7015_v32  ;;  %v10739_v32 = vld [vmem:[#allocation13 + $0x68] sm:$0xff]  }
 0x996   : > { %5296 = vmatpush1.bf16.msra.mxu1 %v7013_v45 }
 0x9dc   : > { %v4989_v61 = vpop.xlane.xlu0 %4988 }
 0x9dd   : > { %v5021_v24 = vmul.f32 0.0078125, %v4989_v61 }
 0x9de   : > { %v4991_v28 = vpop.xlane.xlu1 %4990 }
 0x9df   : > { %v10645_v39 = vsub.f32 %v10568_v46, %v5021_v24  ;;  %v5022_v9 = vmul.f32 0.0078125, %v4991_v28 }
 0x9e0   : > { %v4993_v42 = vpop.xlane.xlu0 %4992 }
 0x9e1   : > { %v10648_v55 = vsub.f32 %v10572_v27, %v5022_v9  ;;  %v5023_v36 = vmul.f32 0.0078125, %v4993_v42  ;;  %v5053_v63 = vmul.f32 %v10645_v39, %v10645_v39  ;;  %v7740_v9 = vmov 0  }
 0x9e2   : > { %5313 = vmatprep.mubr.bf16.mxu1 %v7740_v9 }
 0x9e3   : > { %v10653_v13 = vsub.f32 %v10575_v31, %v5023_v36  ;;  %5069 = vadd.xlane.f32.xlu0 %v5053_v63  ;;  %v5054_v60 = vmul.f32 %v10648_v55, %v10648_v55 }
 0x9e4   : > { %v4995_v17 = vpop.xlane.xlu0 %4994 }
 0x9e5   : > { %v5024_v56 = vmul.f32 0.0078125, %v4995_v17  ;;  %5071 = vadd.xlane.f32.xlu1 %v5054_v60  ;;  %v5055_v21 = vmul.f32 %v10653_v13, %v10653_v13 }
 0x9e7   : > { %v10660_v48 = vsub.f32 %v10581_v43, %v5024_v56  ;;  %5073 = vadd.xlane.f32.xlu0 %v5055_v21 }
 0x9e9   : > { %v5056_v30 = vmul.f32 %v10660_v48, %v10660_v48 }
 0x9eb   : > { %5075 = vadd.xlane.f32.xlu1 %v5056_v30 }
 0x9ec   : > { %v4997_v5 = vpop.xlane.xlu0 %4996 }
 0x9ed   : > { %v5025_v23 = vmul.f32 0.0078125, %v4997_v5 }
 0x9ee   : > { %v4999_v57 = vpop.xlane.xlu1 %4998 }
 0x9ef   : > { %v10665_v53 = vsub.f32 %v10588_v1, %v5025_v23  ;;  %v5026_v15 = vmul.f32 0.0078125, %v4999_v57 }
 0x9f0   : > { %v5001_v50 = vpop.xlane.xlu0 %5000 }
 0x9f1   : > { %v10668_v52 = vsub.f32 %v10593_v37, %v5026_v15  ;;  %v5027_v38 = vmul.f32 0.0078125, %v5001_v50  ;;  %v5057_v8 = vmul.f32 %v10665_v53, %v10665_v53 }
 0x9f2   : > { %v5003_v33 = vpop.xlane.xlu1 %5002 }
 0x9f3   : > { %v10673_v19 = vsub.f32 %v10597_v62, %v5027_v38  ;;  %v5028_v22 = vmul.f32 0.0078125, %v5003_v33  ;;  %5077 = vadd.xlane.f32.xlu0 %v5057_v8  ;;  %v5058_v11 = vmul.f32 %v10668_v52, %v10668_v52 }
 0x9f5   : > { %v10678_v40 = vsub.f32 %v10600_v14, %v5028_v22  ;;  %5079 = vadd.xlane.f32.xlu1 %v5058_v11  ;;  %v5059_v2 = vmul.f32 %v10673_v19, %v10673_v19  ;;  %v7016_v11 = vld [vmem:[#allocation13 + $0x40] sm:$0xff]  }
 0x9f6   : > { %6401 = vmatprep.subr.bf16.mxu0 %v7016_v11  ;;  %6561 = vmatprep.subr.bf16.mxu1 %v7016_v11 }
 0x9f7   : > { %5081 = vadd.xlane.f32.xlu0 %v5059_v2  ;;  %v5060_v12 = vmul.f32 %v10678_v40, %v10678_v40  ;;  %v7017_v2 = vld [vmem:[#allocation13] sm:$0xff]  }
 0x9f8   : > { %6402 = vmatpush3.bf16.msra.mxu0 %v7017_v2 }
 0x9f9   : > { %5083 = vadd.xlane.f32.xlu1 %v5060_v12  ;;  %v7018_v12 = vld [vmem:[#allocation13 + $0x48] sm:$0xff]  }
 0x9fa   : > { %6403 = vmatprep.subr.bf16.mxu0 %v7018_v12 }
 0x9fc   : > { %v5005_v49 = vpop.xlane.xlu0 %5004 }
 0x9fd   : > { %v5029_v44 = vmul.f32 0.0078125, %v5005_v49  ;;  %v7019_v49 = vld [vmem:[#allocation13 + $0x8] sm:$0xff]  }
 0x9fe   : > { %v5007_v29 = vpop.xlane.xlu1 %5006  ;;  %6404 = vmatpush3.bf16.msra.mxu0 %v7019_v49 }
 0x9ff   : > { %v10685_v7 = vsub.f32 %v10608_v35, %v5029_v44  ;;  %v5030_v4 = vmul.f32 0.0078125, %v5007_v29  ;;  %v10725_v44 = vld [vmem:[#allocation13 + $0x10] sm:$0xff]   ;;  %6405 = vmatprep.subr.bf16.mxu0 %v7020_v26  ;;  %v10730_v29 = vld [vmem:[#allocation13 + $0x18] sm:$0xff]  }
 0xa00   : > { %v5009_v3 = vpop.xlane.xlu0 %5008 }
 0xa01   : > { %v10688_v47 = vsub.f32 %v10613_v34, %v5030_v4  ;;  %v5031_v0 = vmul.f32 0.0078125, %v5009_v3  ;;  %v5061_v25 = vmul.f32 %v10685_v7, %v10685_v7  ;;  %v10733_v4 = vld [vmem:[#allocation13 + $0x60] sm:$0xff]  }
 0xa02   : > { %v5011_v54 = vpop.xlane.xlu1 %5010  ;;  %6406 = vmatpush3.bf16.msra.mxu0 %v10725_v44  ;;  %v10736_v3 = vld [vmem:[#allocation13 + $0x20] sm:$0xff]  }
 0xa03   : > { %v10693_v16 = vsub.f32 %v10617_v20, %v5031_v0  ;;  %v5032_v10 = vmul.f32 0.0078125, %v5011_v54  ;;  %5085 = vadd.xlane.f32.xlu0 %v5061_v25  ;;  %v5062_v61 = vmul.f32 %v10688_v47, %v10688_v47  ;;  %6407 = vmatprep.subr.bf16.mxu0 %v10727_v59 }
 0xa05   : > { %v10698_v24 = vsub.f32 %v10620_v58, %v5032_v10  ;;  %5087 = vadd.xlane.f32.xlu1 %v5062_v61  ;;  %v5063_v28 = vmul.f32 %v10693_v16, %v10693_v16 }
 0xa06   : > { %6408 = vmatpush3.bf16.msra.mxu0 %v10730_v29 }
 0xa07   : > { %5089 = vadd.xlane.f32.xlu0 %v5063_v28  ;;  %v5064_v42 = vmul.f32 %v10698_v24, %v10698_v24  ;;  %6409 = vmatprep.subr.bf16.mxu0 %v10733_v4 }
 0xa09   : > { %5091 = vadd.xlane.f32.xlu1 %v5064_v42 }
 0xa0a   : > { %6410 = vmatpush3.bf16.msra.mxu0 %v10736_v3 }
 0xa0b   : > { %6411 = vmatprep.subr.bf16.mxu0 %v10739_v32 }
 0xa0c   : > { %v5013_v36 = vpop.xlane.xlu0 %5012 }
 0xa0d   : > { %v5033_v63 = vmul.f32 0.0078125, %v5013_v36 }
 0xa0e   : > { %v5015_v60 = vpop.xlane.xlu1 %5014 }
 0xa0f   : > { %v10706_v17 = vsub.f32 %v10628_v51, %v5033_v63  ;;  %v5034_v56 = vmul.f32 0.0078125, %v5015_v60 }
 0xa10   : > { %v5017_v21 = vpop.xlane.xlu0 %5016 }
 0xa11   : > { %v10709_v30 = vsub.f32 %v10633_v6, %v5034_v56  ;;  %v5035_v5 = vmul.f32 0.0078125, %v5017_v21  ;;  %v5065_v23 = vmul.f32 %v10706_v17, %v10706_v17 }
 0xa12   : > { %v5019_v57 = vpop.xlane.xlu1 %5018 }
 0xa13   : > { %v10714_v15 = vsub.f32 %v10637_v18, %v5035_v5  ;;  %v5036_v50 = vmul.f32 0.0078125, %v5019_v57  ;;  %5093 = vadd.xlane.f32.xlu0 %v5065_v23  ;;  %v5066_v38 = vmul.f32 %v10709_v30, %v10709_v30 }
 0xa15   : > { %v10719_v8 = vsub.f32 %v10640_v41, %v5036_v50  ;;  %5095 = vadd.xlane.f32.xlu1 %v5066_v38  ;;  %v5067_v33 = vmul.f32 %v10714_v15, %v10714_v15 }
 0xa17   : > { %5097 = vadd.xlane.f32.xlu0 %v5067_v33  ;;  %v5068_v22 = vmul.f32 %v10719_v8, %v10719_v8 }
 0xa19   : > { %5099 = vadd.xlane.f32.xlu1 %v5068_v22 }
 0xa70   : > { %v5070_v0 = vpop.xlane.xlu0 %5069 }
 0xa71   : > { %v5101_v25 = vmul.f32 0.0078125, %v5070_v0 }
 0xa72   : > { %v5072_v45 = vpop.xlane.xlu1 %5071 }
 0xa73   : > { %v5117_v54 = vadd.f32 1e-05, %v5101_v25  ;;  %v5102_v10 = vmul.f32 0.0078125, %v5072_v45 }
 0xa74   : > { %v5074_v61 = vpop.xlane.xlu0 %5073 }
 0xa75   : > { %7416 = vrsqrt.f32 %v5117_v54  ;;  %v5118_v28 = vadd.f32 1e-05, %v5102_v10  ;;  %v5103_v42 = vmul.f32 0.0078125, %v5074_v61 }
 0xa77   : > { %7418 = vrsqrt.f32 %v5118_v28  ;;  %v5119_v36 = vadd.f32 1e-05, %v5103_v42 }
 0xa78   : > { %v5076_v63 = vpop.xlane.xlu1 %5075 }
 0xa79   : > { %v5104_v60 = vmul.f32 0.0078125, %v5076_v63  ;;  %7420 = vrsqrt.f32 %v5119_v36 }
 0xa7b   : > { %v5120_v56 = vadd.f32 1e-05, %v5104_v60 }
 0xa7d   : > { %7422 = vrsqrt.f32 %v5120_v56 }
 0xa7f   : > { %v7417_v21 = vpop.eup %7416 }
 0xa80   : > { %v5078_v5 = vpop.xlane.xlu0 %5077  ;;  %v5149_v50 = vmul.f32 %v7417_v21, %v10645_v39 }
 0xa81   : > { %v7419_v23 = vpop.eup %7418  ;;  %v5105_v57 = vmul.f32 0.0078125, %v5078_v5 }
 0xa82   : > { %v5150_v38 = vmul.f32 %v7419_v23, %v10648_v55  ;;  %v5080_v33 = vpop.xlane.xlu1 %5079 }
 0xa83   : > { %v5121_v22 = vadd.f32 1e-05, %v5105_v57  ;;  %v5106_v11 = vmul.f32 0.0078125, %v5080_v33  ;;  %v7421_v10 = vpop.eup %7420 }
 0xa84   : > { %v5082_v0 = vpop.xlane.xlu0 %5081  ;;  %v5165_v25 = vpack.c.bf16 %v5150_v38, %v5149_v50  ;;  %v5151_v63 = vmul.f32 %v7421_v10, %v10653_v13 }
 0xa85   : > { %7424 = vrsqrt.f32 %v5121_v22  ;;  %v5122_v45 = vadd.f32 1e-05, %v5106_v11  ;;  %v5107_v54 = vmul.f32 0.0078125, %v5082_v0 }
 0xa86   : > { %v5084_v61 = vpop.xlane.xlu1 %5083  ;;  %5314 = vmatmul.mubr.bf16.vlgmr.msra.gmra.mrb[128].mxu1 %v5165_v25 }
 0xa87   : > { %v7423_v28 = vpop.eup %7422  ;;  %7426 = vrsqrt.f32 %v5122_v45  ;;  %v5108_v42 = vmul.f32 0.0078125, %v5084_v61  ;;  %5323 = vmatprep.mubr.bf16.mxu1 %v7740_v9  ;;  %6569 = vmatpush3.bf16.msra.mxu1 %v7017_v2  ;;  %v5123_v55 = vadd.f32 1e-05, %v5107_v54 }
 0xa88   : > { %v5152_v39 = vmul.f32 %v7423_v28, %v10660_v48  ;;  %6562 = vmatprep.subr.bf16.mxu1 %v7018_v12 }
 0xa89   : > { %v5124_v36 = vadd.f32 1e-05, %v5108_v42 }
 0xa8a   : > { %v5166_v60 = vpack.c.bf16 %v5152_v39, %v5151_v63 }
 0xa8b   : > { %7428 = vrsqrt.f32 %v5124_v36  ;;  %6570 = vmatpush3.bf16.msra.mxu1 %v7019_v49 }
 0xa8c   : > { %6563 = vmatprep.subr.bf16.mxu1 %v7020_v26  ;;  %7430 = vrsqrt.f32 %v5123_v55 }
 0xa8e   : > { %5324 = vmatmul.mubr.bf16.gmra.mrb[132].mxu1 %v5166_v60 }
 0xa8f   : > { %v7425_v56 = vpop.eup %7424  ;;  %5333 = vmatprep.mubr.bf16.mxu1 %v7740_v9  ;;  %6571 = vmatpush3.bf16.msra.mxu1 %v10725_v44 }
 0xa90   : > { %v5086_v21 = vpop.xlane.xlu0 %5085  ;;  %6564 = vmatprep.subr.bf16.mxu1 %v10727_v59  ;;  %v5153_v5 = vmul.f32 %v7425_v56, %v10665_v53 }
 0xa91   : > { %v7427_v48 = vpop.eup %7426  ;;  %v5109_v2 = vmul.f32 0.0078125, %v5086_v21 }
 0xa92   : > { %v5088_v12 = vpop.xlane.xlu1 %5087  ;;  %v5154_v13 = vmul.f32 %v7427_v48, %v10668_v52 }
 0xa93   : > { %v5125_v49 = vadd.f32 1e-05, %v5109_v2  ;;  %v5110_v23 = vmul.f32 0.0078125, %v5088_v12  ;;  %6572 = vmatpush3.bf16.msra.mxu1 %v10730_v29 }
 0xa94   : > { %v5090_v26 = vpop.xlane.xlu0 %5089  ;;  %v5167_v57 = vpack.c.bf16 %v5154_v13, %v5153_v5  ;;  %6565 = vmatprep.subr.bf16.mxu1 %v10733_v4 }
 0xa95   : > { %v7429_v50 = vpop.eup %7428  ;;  %7432 = vrsqrt.f32 %v5125_v49  ;;  %v5126_v44 = vadd.f32 1e-05, %v5110_v23  ;;  %v5111_v38 = vmul.f32 0.0078125, %v5090_v26 }
 0xa96   : > { %v5092_v59 = vpop.xlane.xlu1 %5091  ;;  %5334 = vmatmul.mubr.bf16.gmra.mrb[136].mxu1 %v5167_v57  ;;  %v7431_v33 = vpop.eup %7430  ;;  %v5156_v53 = vmul.f32 %v7429_v50, %v10678_v40  ;;  %v7027_v50 = vld [vmem:[#allocation13 + $0x28] sm:$0xff]  }
 0xa97   : > { %7434 = vrsqrt.f32 %v5126_v44  ;;  %v5112_v22 = vmul.f32 0.0078125, %v5092_v59  ;;  %5343 = vmatprep.mubr.bf16.mxu1 %v7740_v9  ;;  %6573 = vmatpush3.bf16.msra.mxu1 %v10736_v3  ;;  %v5127_v52 = vadd.f32 1e-05, %v5111_v38  ;;  %v5155_v4 = vmul.f32 %v7431_v33, %v10673_v19  ;;  %v7028_v44 = vld [vmem:[#allocation13 + $0x70] sm:$0xff]   ;;  %v5189_v59 = vld [vmem:[%s11476_s8] sm:$0x3] }
 0xa98   : > { %6566 = vmatprep.subr.bf16.mxu1 %v10739_v32  ;;  %6412 = vmatpush3.bf16.msra.mxu0 %v7027_v50  ;;  %v7029_v38 = vld [vmem:[#allocation13 + $0x30] sm:$0xff]   ;;  %s7590_s8 = scalar_lea.vmem %s10869_s15, 2048 }
 0xa99   : > { %v5128_v29 = vadd.f32 1e-05, %v5112_v22  ;;  %v5168_v11 = vpack.c.bf16 %v5156_v53, %v5155_v4  ;;  %6413 = vmatprep.subr.bf16.mxu0 %v7028_v44  ;;  %p7591_p1 = scmp.ne.s32.totalorder %s10869_s15, %s7590_s8 }
 0xa9b   : > { %7436 = vrsqrt.f32 %v5128_v29  ;;  %6574 = vmatpush3.bf16.msra.mxu1 %v7027_v50  ;;  %p7592_p6 = pnand %p7591_p1, %p11481_p4 }
 0xa9c   : > { %7438 = vrsqrt.f32 %v5127_v52  ;;  %6567 = vmatprep.subr.bf16.mxu1 %v7028_v44  ;;  %6414 = vmatpush3.bf16.msra.mxu0 %v7029_v38 }
 0xa9d   : > { %p7593_p13 = pneg %p7592_p6 }
 0xa9e   : > { %5344 = vmatmul.mubr.bf16.gmra.mrb[140].mxu1 %v5168_v11 }
 0xa9f   : > { %v7433_v0 = vpop.eup %7432  ;;  %5353 = vmatprep.mubr.bf16.mxu1 %v7740_v9  ;;  %6575 = vmatpush3.bf16.msra.mxu1 %v7029_v38 }
 0xaa0   : > { %v5094_v25 = vpop.xlane.xlu0 %5093  ;;  %v5157_v3 = vmul.f32 %v7433_v0, %v10685_v7 }
 0xaa1   : > { %v7435_v45 = vpop.eup %7434  ;;  %v5113_v54 = vmul.f32 0.0078125, %v5094_v25 }
 0xaa2   : > { %v5096_v10 = vpop.xlane.xlu1 %5095  ;;  %v5158_v40 = vmul.f32 %v7435_v45, %v10688_v47 }
 0xaa3   : > { %v5129_v32 = vadd.f32 1e-05, %v5113_v54  ;;  %v5114_v61 = vmul.f32 0.0078125, %v5096_v10 }
 0xaa4   : > { %v5098_v28 = vpop.xlane.xlu0 %5097  ;;  %v5169_v42 = vpack.c.bf16 %v5158_v40, %v5157_v3 }
 0xaa5   : > { %v7437_v19 = vpop.eup %7436  ;;  %7440 = vrsqrt.f32 %v5129_v32  ;;  %v5130_v39 = vadd.f32 1e-05, %v5114_v61  ;;  %v5115_v55 = vmul.f32 0.0078125, %v5098_v28 }
 0xaa6   : > { %v5100_v36 = vpop.xlane.xlu1 %5099  ;;  %5354 = vmatmul.mubr.bf16.gmra.mrb[144].mxu1 %v5169_v42  ;;  %v7439_v63 = vpop.eup %7438  ;;  %v5160_v56 = vmul.f32 %v7437_v19, %v10698_v24 }
 0xaa7   : > { %7442 = vrsqrt.f32 %v5130_v39  ;;  %v5116_v60 = vmul.f32 0.0078125, %v5100_v36  ;;  %5363 = vmatprep.mubr.bf16.mxu1 %v7740_v9  ;;  %v5131_v7 = vadd.f32 1e-05, %v5115_v55  ;;  %v5159_v47 = vmul.f32 %v7439_v63, %v10693_v16 }
 0xaa9   : > { %v5132_v21 = vadd.f32 1e-05, %v5116_v60  ;;  %v5170_v48 = vpack.c.bf16 %v5160_v56, %v5159_v47 }
 0xaab   : > { %7444 = vrsqrt.f32 %v5132_v21 }
 0xaac   : > { %7446 = vrsqrt.f32 %v5131_v7 }
 0xaae   : > { %5364 = vmatmul.mubr.bf16.gmra.mrb[148].mxu1 %v5170_v48 }
 0xaaf   : > { %v7441_v2 = vpop.eup %7440  ;;  %5373 = vmatprep.mubr.bf16.mxu1 %v7740_v9 }
 0xab0   : > { %v5161_v5 = vmul.f32 %v7441_v2, %v10706_v17  ;;  %v7030_v17 = vld [vmem:[#allocation13 + $0x78] sm:$0xff]  }
 0xab1   : > { %v7443_v12 = vpop.eup %7442  ;;  %6415 = vmatprep.subr.bf16.mxu0 %v7030_v17  ;;  %6568 = vmatprep.subr.bf16.mxu1 %v7030_v17 }
 0xab2   : > { %v5162_v13 = vmul.f32 %v7443_v12, %v10709_v30  ;;  %v7031_v30 = vld [vmem:[#allocation13 + $0x38] sm:$0xff]  }
 0xab3   : > { %6416 = vmatpush3.bf16.msra.mxu0 %v7031_v30  ;;  %6576 = vmatpush3.bf16.msra.mxu1 %v7031_v30 }
 0xab4   : > { %v5171_v49 = vpack.c.bf16 %v5162_v13, %v5161_v5 }
 0xab5   : > { %v7445_v23 = vpop.eup %7444 }
 0xab6   : > { %5374 = vmatmul.mubr.bf16.gmra.mrb[152].mxu1 %v5171_v49  ;;  %v7447_v24 = vpop.eup %7446  ;;  %v5164_v16 = vmul.f32 %v7445_v23, %v10719_v8 }
 0xab7   : > { %5383 = vmatprep.mubr.bf16.mxu1 %v7740_v9  ;;  %v5163_v26 = vmul.f32 %v7447_v24, %v10714_v15  ;;  %v5191_v9 = vlaneseq }
 0xab9   : > { %v5172_v57 = vpack.c.bf16 %v5164_v16, %v5163_v26  ;;  %v5192_v8 = vshrl.u32 %v5191_v9, 7 }
 0xabb   : > { %v5193_v15 = vsub.s32 0, %v5192_v8  ;;  %v5197_v33 = vsub.s32 1, %v5192_v8 }
 0xabd   : > { %v10775_v22 = vrot.slane %v5189_v59, %v5193_v15  ;;  %v10777_v53 = vrot.slane %v5189_v59, %v5197_v33 }
 0xabe   : > { %5384 = vmatmul.mubr.bf16.gmra.mrb[156].mxu1 %v5172_v57 }
 0xb59   : > { %v5315_v52 = vpop.f32.mrb[128].mxu1 }
 0xb5a   : > { %v5316_v29 = vadd.f32 %v5315_v52, %v10775_v22  ;;  %v5317_v4 = vpop.f32.mrb[129].mxu1 }
 0xb5b   : > { %v5318_v11 = vadd.f32 %v5317_v4, %v10777_v53  ;;  %v5319_v0 = vpop.f32.mrb[130].mxu1 }
 0xb5c   : > { %v5320_v25 = vadd.f32 %v5319_v0, %v10775_v22  ;;  %v5321_v45 = vpop.f32.mrb[131].mxu1  ;;  %v5394_v10 = vmax.f32 %v5316_v29, 0.0 }
 0xb5d   : > { %v5322_v54 = vadd.f32 %v5321_v45, %v10777_v53  ;;  %v5395_v40 = vmax.f32 %v5318_v11, 0.0 }
 0xb5e   : > { %v5396_v3 = vmax.f32 %v5320_v25, 0.0 }
 0xb5f   : > { %v5397_v32 = vmax.f32 %v5322_v54, 0.0 }
 0xb60   : > { %v5426_v61 = vpack.c.bf16 %v5396_v3, %v5394_v10 }
 0xb61   : > { %v5427_v28 = vpack.c.bf16 %v5397_v32, %v5395_v40  ;;  %v5325_v42 = vpop.f32.mrb[132].mxu1 }
 0xb62   : > { %v5326_v19 = vadd.f32 %v5325_v42, %v10775_v22  ;;  %v5327_v39 = vpop.f32.mrb[133].mxu1 }
 0xb63   : > { %v5328_v55 = vadd.f32 %v5327_v39, %v10777_v53  ;;  %v5329_v36 = vpop.f32.mrb[134].mxu1  ;;  %5609 = vmatprep.mubr.bf16.mxu0 %v5427_v28 }
 0xb64   : > { %v5330_v63 = vadd.f32 %v5329_v36, %v10775_v22  ;;  %v5331_v60 = vpop.f32.mrb[135].mxu1  ;;  %5610 = vmatmul.mubr.bf16.vlgmr.msra.gmra.mrb[144].mxu0 %v5426_v61  ;;  %v5398_v7 = vmax.f32 %v5326_v19, 0.0 }
 0xb65   : > { %v5332_v56 = vadd.f32 %v5331_v60, %v10777_v53  ;;  %v5399_v47 = vmax.f32 %v5328_v55, 0.0 }
 0xb66   : > { %v5400_v21 = vmax.f32 %v5330_v63, 0.0 }
 0xb67   : > { %v5401_v48 = vmax.f32 %v5332_v56, 0.0 }
 0xb68   : > { %v5428_v2 = vpack.c.bf16 %v5400_v21, %v5398_v7 }
 0xb69   : > { %v5429_v12 = vpack.c.bf16 %v5401_v48, %v5399_v47  ;;  %v5335_v5 = vpop.f32.mrb[136].mxu1 }
 0xb6a   : > { %v5336_v13 = vadd.f32 %v5335_v5, %v10775_v22  ;;  %v5337_v49 = vpop.f32.mrb[137].mxu1 }
 0xb6b   : > { %v5338_v23 = vadd.f32 %v5337_v49, %v10777_v53  ;;  %v5339_v24 = vpop.f32.mrb[138].mxu1  ;;  %5617 = vmatprep.mubr.bf16.mxu0 %v5429_v12 }
 0xb6c   : > { %v5340_v16 = vadd.f32 %v5339_v24, %v10775_v22  ;;  %v5341_v26 = vpop.f32.mrb[139].mxu1  ;;  %5618 = vmatmul.mubr.bf16.gmra.mrb[148].mxu0 %v5428_v2  ;;  %v5402_v50 = vmax.f32 %v5336_v13, 0.0 }
 0xb6d   : > { %v5342_v57 = vadd.f32 %v5341_v26, %v10777_v53  ;;  %v5403_v38 = vmax.f32 %v5338_v23, 0.0 }
 0xb6e   : > { %v5404_v44 = vmax.f32 %v5340_v16, 0.0 }
 0xb6f   : > { %v5405_v17 = vmax.f32 %v5342_v57, 0.0 }
 0xb70   : > { %v5430_v30 = vpack.c.bf16 %v5404_v44, %v5402_v50 }
 0xb71   : > { %v5431_v9 = vpack.c.bf16 %v5405_v17, %v5403_v38  ;;  %v5345_v8 = vpop.f32.mrb[140].mxu1 }
 0xb72   : > { %v5346_v15 = vadd.f32 %v5345_v8, %v10775_v22  ;;  %v5347_v59 = vpop.f32.mrb[141].mxu1 }
 0xb73   : > { %v5348_v33 = vadd.f32 %v5347_v59, %v10777_v53  ;;  %v5349_v52 = vpop.f32.mrb[142].mxu1  ;;  %5625 = vmatprep.mubr.bf16.mxu0 %v5431_v9 }
 0xb74   : > { %v5350_v29 = vadd.f32 %v5349_v52, %v10775_v22  ;;  %v5351_v4 = vpop.f32.mrb[143].mxu1  ;;  %5626 = vmatmul.mubr.bf16.gmra.mrb[152].mxu0 %v5430_v30  ;;  %v5406_v0 = vmax.f32 %v5346_v15, 0.0 }
 0xb75   : > { %v5352_v11 = vadd.f32 %v5351_v4, %v10777_v53  ;;  %v5407_v45 = vmax.f32 %v5348_v33, 0.0 }
 0xb76   : > { %v5408_v25 = vmax.f32 %v5350_v29, 0.0 }
 0xb77   : > { %v5409_v54 = vmax.f32 %v5352_v11, 0.0 }
 0xb78   : > { %v5432_v10 = vpack.c.bf16 %v5408_v25, %v5406_v0 }
 0xb79   : > { %v5433_v3 = vpack.c.bf16 %v5409_v54, %v5407_v45  ;;  %v5355_v40 = vpop.f32.mrb[144].mxu1 }
 0xb7a   : > { %v5356_v32 = vadd.f32 %v5355_v40, %v10775_v22  ;;  %v5357_v61 = vpop.f32.mrb[145].mxu1 }
 0xb7b   : > { %v5358_v28 = vadd.f32 %v5357_v61, %v10777_v53  ;;  %v5359_v42 = vpop.f32.mrb[146].mxu1  ;;  %5633 = vmatprep.mubr.bf16.mxu0 %v5433_v3 }
 0xb7c   : > { %v5360_v19 = vadd.f32 %v5359_v42, %v10775_v22  ;;  %v5361_v39 = vpop.f32.mrb[147].mxu1  ;;  %5634 = vmatmul.mubr.bf16.gmra.mrb[156].mxu0 %v5432_v10  ;;  %v5410_v36 = vmax.f32 %v5356_v32, 0.0 }
 0xb7d   : > { %v5362_v55 = vadd.f32 %v5361_v39, %v10777_v53  ;;  %v5411_v60 = vmax.f32 %v5358_v28, 0.0 }
 0xb7e   : > { %v5412_v63 = vmax.f32 %v5360_v19, 0.0 }
 0xb7f   : > { %v5413_v56 = vmax.f32 %v5362_v55, 0.0 }
 0xb80   : > { %v5434_v7 = vpack.c.bf16 %v5412_v63, %v5410_v36 }
 0xb81   : > { %v5435_v21 = vpack.c.bf16 %v5413_v56, %v5411_v60  ;;  %v5365_v47 = vpop.f32.mrb[148].mxu1  ;;  %v10814_v56 = vld [vmem:[%s11477_s1] ss:$0 sm:$0xff]  ;;  %s7596_s1 = scalar_lea.vmem %s7595_s24, 4096 }
 0xb82   : > { %v5366_v48 = vadd.f32 %v5365_v47, %v10775_v22  ;;  %v5367_v2 = vpop.f32.mrb[149].mxu1  ;;  %p7598_p11 = scmp.lt.s32.totalorder %s7596_s1, %s7590_s8 }
 0xb83   : > { %v5368_v12 = vadd.f32 %v5367_v2, %v10777_v53  ;;  %v5369_v5 = vpop.f32.mrb[150].mxu1  ;;  %5641 = vmatprep.mubr.bf16.mxu0 %v5435_v21 }
 0xb84   : > { %v5370_v13 = vadd.f32 %v5369_v5, %v10775_v22  ;;  %v5371_v49 = vpop.f32.mrb[151].mxu1  ;;  %5642 = vmatmul.mubr.bf16.gmra.mrb[160].mxu0 %v5434_v7  ;;  %v5414_v24 = vmax.f32 %v5366_v48, 0.0  ;;  %p7599_p5 = por %p7598_p11, %p7597_p10 }
 0xb85   : > { %v5372_v23 = vadd.f32 %v5371_v49, %v10777_v53  ;;  %v5415_v26 = vmax.f32 %v5368_v12, 0.0 }
 0xb86   : > { %v5416_v16 = vmax.f32 %v5370_v13, 0.0  ;;  %p7600_p8 = pnand %p7599_p5, %p7593_p13 }
 0xb87   : > { %v5417_v57 = vmax.f32 %v5372_v23, 0.0 }
 0xb88   : > { %v5436_v50 = vpack.c.bf16 %v5416_v16, %v5414_v24 }
 0xb89   : > { %v5437_v44 = vpack.c.bf16 %v5417_v57, %v5415_v26  ;;  %v5375_v38 = vpop.f32.mrb[152].mxu1 }
 0xb8a   : > { %v5376_v17 = vadd.f32 %v5375_v38, %v10775_v22  ;;  %v5377_v30 = vpop.f32.mrb[153].mxu1 }
 0xb8b   : > { %v5378_v9 = vadd.f32 %v5377_v30, %v10777_v53  ;;  %v5379_v8 = vpop.f32.mrb[154].mxu1  ;;  %5649 = vmatprep.mubr.bf16.mxu0 %v5437_v44 }
 0xb8c   : > { %v5380_v15 = vadd.f32 %v5379_v8, %v10775_v22  ;;  %v5381_v59 = vpop.f32.mrb[155].mxu1  ;;  %5650 = vmatmul.mubr.bf16.gmra.mrb[164].mxu0 %v5436_v50  ;;  %v5418_v52 = vmax.f32 %v5376_v17, 0.0 }
 0xb8d   : > { %v5382_v33 = vadd.f32 %v5381_v59, %v10777_v53  ;;  %v5419_v4 = vmax.f32 %v5378_v9, 0.0 }
 0xb8e   : > { %v5420_v29 = vmax.f32 %v5380_v15, 0.0 }
 0xb8f   : > { %v5421_v11 = vmax.f32 %v5382_v33, 0.0 }
 0xb90   : > { %v5438_v0 = vpack.c.bf16 %v5420_v29, %v5418_v52 }
 0xb91   : > { %v5439_v25 = vpack.c.bf16 %v5421_v11, %v5419_v4  ;;  %v5385_v45 = vpop.f32.mrb[156].mxu1 }
 0xb92   : > { %v5386_v54 = vadd.f32 %v5385_v45, %v10775_v22  ;;  %v5387_v10 = vpop.f32.mrb[157].mxu1 }
 0xb93   : > { %v5388_v3 = vadd.f32 %v5387_v10, %v10777_v53  ;;  %v5389_v40 = vpop.f32.mrb[158].mxu1  ;;  %5657 = vmatprep.mubr.bf16.mxu1 %v5439_v25 }
 0xb94   : > { %v5390_v32 = vadd.f32 %v5389_v40, %v10775_v22  ;;  %v5391_v61 = vpop.f32.mrb[159].mxu1  ;;  %5658 = vmatmul.mubr.bf16.vlgmr.msra.gmra.mrb[160].mxu1 %v5438_v0  ;;  %v5422_v42 = vmax.f32 %v5386_v54, 0.0 }
 0xb95   : > { %v5392_v28 = vadd.f32 %v5391_v61, %v10777_v53  ;;  %v5423_v39 = vmax.f32 %v5388_v3, 0.0 }
 0xb96   : > { %v5424_v19 = vmax.f32 %v5390_v32, 0.0 }
 0xb97   : > { %v5425_v55 = vmax.f32 %v5392_v28, 0.0 }
 0xb98   : > { %v5440_v36 = vpack.c.bf16 %v5424_v19, %v5422_v42 }
 0xb99   : > { %v5441_v63 = vpack.c.bf16 %v5425_v55, %v5423_v39 }
 0xb9b   : > { %5665 = vmatprep.mubr.bf16.mxu1 %v5441_v63 }
 0xb9c   : > { %5666 = vmatmul.mubr.bf16.gmra.mrb[164].mxu1 %v5440_v36 }
 0xc37   : > { %v6417_v60 = vpop.f32.mrb[144].mxu0 }
 0xc38   : > { %v6418_v22 = vpop.f32.mrb[145].mxu0 }
 0xc39   : > { %v6419_v7 = vadd.f32 %v6418_v22, %v6417_v60  ;;  %v6420_v21 = vpop.f32.mrb[146].mxu0 }
 0xc3a   : > { %v6421_v53 = vpop.f32.mrb[147].mxu0 }
 0xc3b   : > { %v5612_v47 = vadd.f32 %v6419_v7, %v10814_v56  ;;  %v6422_v48 = vadd.f32 %v6421_v53, %v6420_v21 }
 0xc3d   : > { %v5674_v2 = vadd.f32 %v5612_v47, %v10568_v46  ;;  %v5615_v12 = vadd.f32 %v6422_v48, %v10814_v56 }
 0xc3f   : > { %5690 = vst [vmem:[%s8069_s9] sm:$0xff] %v5674_v2  ;;  %v5675_v5 = vadd.f32 %v5615_v12, %v10572_v27  ;;  %v6423_v13 = vpop.f32.mrb[148].mxu0 }
 0xc40   : > { %v6424_v49 = vpop.f32.mrb[149].mxu0 }
 0xc41   : > { %5691 = vst [vmem:[%s8069_s9 + $0x8] sm:$0xff] %v5675_v5  ;;  %v6425_v23 = vadd.f32 %v6424_v49, %v6423_v13  ;;  %v6426_v24 = vpop.f32.mrb[150].mxu0 }
 0xc42   : > { %v6427_v16 = vpop.f32.mrb[151].mxu0 }
 0xc43   : > { %v5620_v26 = vadd.f32 %v6425_v23, %v10814_v56  ;;  %v6428_v57 = vadd.f32 %v6427_v16, %v6426_v24 }
 0xc45   : > { %v5676_v50 = vadd.f32 %v5620_v26, %v10575_v31  ;;  %v5623_v46 = vadd.f32 %v6428_v57, %v10814_v56 }
 0xc47   : > { %5692 = vst [vmem:[%s8069_s9 + $0x10] sm:$0xff] %v5676_v50  ;;  %v5677_v44 = vadd.f32 %v5623_v46, %v10581_v43  ;;  %v6429_v38 = vpop.f32.mrb[152].mxu0 }
 0xc48   : > { %v6430_v27 = vpop.f32.mrb[153].mxu0 }
 0xc49   : > { %5693 = vst [vmem:[%s8069_s9 + $0x18] sm:$0xff] %v5677_v44  ;;  %v6431_v17 = vadd.f32 %v6430_v27, %v6429_v38  ;;  %v6432_v30 = vpop.f32.mrb[154].mxu0 }
 0xc4a   : > { %v6433_v9 = vpop.f32.mrb[155].mxu0 }
 0xc4b   : > { %v5628_v8 = vadd.f32 %v6431_v17, %v10814_v56  ;;  %v6434_v15 = vadd.f32 %v6433_v9, %v6432_v30 }
 0xc4d   : > { %v5678_v59 = vadd.f32 %v5628_v8, %v10588_v1  ;;  %v5631_v31 = vadd.f32 %v6434_v15, %v10814_v56 }
 0xc4f   : > { %5694 = vst [vmem:[%s8069_s9 + $0x20] sm:$0xff] %v5678_v59  ;;  %v5679_v33 = vadd.f32 %v5631_v31, %v10593_v37  ;;  %v6435_v52 = vpop.f32.mrb[156].mxu0 }
 0xc50   : > { %v6436_v43 = vpop.f32.mrb[157].mxu0 }
 0xc51   : > { %5695 = vst [vmem:[%s8069_s9 + $0x28] sm:$0xff] %v5679_v33  ;;  %v6437_v29 = vadd.f32 %v6436_v43, %v6435_v52  ;;  %v6438_v4 = vpop.f32.mrb[158].mxu0 }
 0xc52   : > { %v6439_v11 = vpop.f32.mrb[159].mxu0 }
 0xc53   : > { %v5636_v0 = vadd.f32 %v6437_v29, %v10814_v56  ;;  %v6440_v25 = vadd.f32 %v6439_v11, %v6438_v4 }
 0xc55   : > { %v5680_v45 = vadd.f32 %v5636_v0, %v10597_v62  ;;  %v5639_v1 = vadd.f32 %v6440_v25, %v10814_v56 }
 0xc57   : > { %5696 = vst [vmem:[%s8069_s9 + $0x30] sm:$0xff] %v5680_v45  ;;  %v5681_v54 = vadd.f32 %v5639_v1, %v10600_v14  ;;  %v6441_v10 = vpop.f32.mrb[160].mxu0 }
 0xc58   : > { %v6442_v37 = vpop.f32.mrb[161].mxu0 }
 0xc59   : > { %5697 = vst [vmem:[%s8069_s9 + $0x38] sm:$0xff] %v5681_v54  ;;  %v6443_v3 = vadd.f32 %v6442_v37, %v6441_v10  ;;  %v6444_v40 = vpop.f32.mrb[162].mxu0 }
 0xc5a   : > { %v6445_v32 = vpop.f32.mrb[163].mxu0 }
 0xc5b   : > { %v5644_v61 = vadd.f32 %v6443_v3, %v10814_v56  ;;  %v6446_v28 = vadd.f32 %v6445_v32, %v6444_v40 }
 0xc5d   : > { %v5682_v42 = vadd.f32 %v5644_v61, %v10608_v35  ;;  %v5647_v62 = vadd.f32 %v6446_v28, %v10814_v56 }
 0xc5f   : > { %5698 = vst [vmem:[%s8069_s9 + $0x40] sm:$0xff] %v5682_v42  ;;  %v5683_v19 = vadd.f32 %v5647_v62, %v10613_v34  ;;  %v6447_v39 = vpop.f32.mrb[164].mxu0 }
 0xc60   : > { %v6448_v14 = vpop.f32.mrb[165].mxu0 }
 0xc61   : > { %5699 = vst [vmem:[%s8069_s9 + $0x48] sm:$0xff] %v5683_v19  ;;  %v6449_v55 = vadd.f32 %v6448_v14, %v6447_v39  ;;  %v6450_v36 = vpop.f32.mrb[166].mxu0 }
 0xc62   : > { %v6451_v63 = vpop.f32.mrb[167].mxu0 }
 0xc63   : > { %v5652_v60 = vadd.f32 %v6449_v55, %v10814_v56  ;;  %v6452_v22 = vadd.f32 %v6451_v63, %v6450_v36 }
 0xc65   : > { %v5684_v7 = vadd.f32 %v5652_v60, %v10617_v20  ;;  %v5655_v35 = vadd.f32 %v6452_v22, %v10814_v56 }
 0xc67   : > { %5700 = vst [vmem:[%s8069_s9 + $0x50] sm:$0xff] %v5684_v7  ;;  %v5685_v21 = vadd.f32 %v5655_v35, %v10620_v58  ;;  %v6453_v34 = vpop.f32.mrb[160].mxu1 }
 0xc68   : > { %v6454_v53 = vpop.f32.mrb[161].mxu1 }
 0xc69   : > { %5701 = vst [vmem:[%s8069_s9 + $0x58] sm:$0xff] %v5685_v21  ;;  %v6455_v47 = vadd.f32 %v6454_v53, %v6453_v34  ;;  %v6456_v48 = vpop.f32.mrb[162].mxu1 }
 0xc6a   : > { %v6457_v2 = vpop.f32.mrb[163].mxu1 }
 0xc6b   : > { %v5660_v12 = vadd.f32 %v6455_v47, %v10814_v56  ;;  %v6458_v5 = vadd.f32 %v6457_v2, %v6456_v48 }
 0xc6d   : > { %v5686_v13 = vadd.f32 %v5660_v12, %v10628_v51  ;;  %v5663_v20 = vadd.f32 %v6458_v5, %v10814_v56 }
 0xc6f   : > { %5702 = vst [vmem:[%s8069_s9 + $0x60] sm:$0xff] %v5686_v13  ;;  %v5687_v58 = vadd.f32 %v5663_v20, %v10633_v6  ;;  %v6459_v49 = vpop.f32.mrb[164].mxu1 }
 0xc70   : > { %v6460_v23 = vpop.f32.mrb[165].mxu1 }
 0xc71   : > { %5703 = vst [vmem:[%s8069_s9 + $0x68] sm:$0xff] %v5687_v58  ;;  %v6461_v24 = vadd.f32 %v6460_v23, %v6459_v49  ;;  %v6462_v16 = vpop.f32.mrb[166].mxu1 }
 0xc72   : > { %v6463_v26 = vpop.f32.mrb[167].mxu1 }
 0xc73   : > { %v5668_v51 = vadd.f32 %v6461_v24, %v10814_v56  ;;  %v6464_v57 = vadd.f32 %v6463_v26, %v6462_v16 }
 0xc75   : > { %v5688_v50 = vadd.f32 %v5668_v51, %v10637_v18  ;;  %v5671_v6 = vadd.f32 %v6464_v57, %v10814_v56 }
 0xc77   : > { %5704 = vst [vmem:[%s8069_s9 + $0x70] sm:$0xff] %v5688_v50  ;;  %v5689_v46 = vadd.f32 %v5671_v6, %v10640_v41 }
 0xc79   : > { %5705 = vst [vmem:[%s8069_s9 + $0x78] sm:$0xff] %v5689_v46 }
 0xc7a   : > { %7603 = shalt.err (!%p7600_p8)
}
 0xc7b   : > { %s7604_s5 = scalar_lea.hbm %s10867_s12, 2048  ;;  %s7608_s3 = scalar_lea.hbm %s11480_s2, 8192 }
 0xc7c   : > { %p7605_p12 = scmp.ne.s32.totalorder %s10867_s12, %s7604_s5  ;;  %p7609_p9 = scmp.lt.u32.totalorder %s10867_s12, %s11480_s2 }
 0xc7d   : > { %p7610_p0 = scmp.lt.u32.totalorder %s7608_s3, %s7604_s5  ;;  %p7612_p1 = scmp.lt.u32.totalorder %s7604_s5, %s10867_s12 }
 0xc7e   : > { %p7606_p2 = pnand %p7605_p12, %p11481_p4 }
 0xc7f   : > { %p7611_p3 = por %p7610_p0, %p7609_p9 }
 0xc80   : > { %p7607_p7 = pneg %p7606_p2 }
 0xc81   : > { %p7613_p6 = por %p7612_p1, %p7611_p3 }
 0xc83   : > { %p7614_p13 = pnand %p7613_p6, %p7607_p7 }
 0xc85   : > { %7617 = shalt.err (!%p7614_p13)
}
 0xc86   : > { %s7742_s26 = smov 128   ;;  %s7743_s22 = smov 8  }
 0xc87   : > { %6627 = dma.vmem_to_hbm [thread:$0]  (%p11481_p4), %s10869_s15, 2048, %s10867_s12, %s10876_s4, %s7742_s26, %s7742_s26, %s7743_s22  }
 0xc88 PF: > { %s11482_s23 = sld [smem:[#allocation19_spill]]  ;;  %s11483_s8 = sld [smem:[#allocation22_spill]] }
 0xc89   : > { %p6659_p10 = scmp.ge.s32.totalorder %s7720_s19, 2 }
 0xc8e   : > { %s5737_s25 = sand.u32 1, %s11482_s23   ;;  %p11484_p11 = scmp.ne.s32.totalorder %s11483_s8, 0 }
 0xc8f   : > { %s5738_s24 = scalar_lea.sflag [#allocation7], %s5737_s25 }
 0xc90   : > { %p6647_p5 = pnand %p6659_p10, %p11484_p11 }
 0xc92   : > { %7675 = dma.done.wait (!%p6647_p5), %s5738_s24, 2048  }
 0xc93   : > { %7677 = vsyncadd (!%p6647_p5), %s5738_s24, 4294965248  ;;  %s27_s19 = sadd.s32 1, %s7720_s19   ;;  %s11485_s30 = smov %s7684_s10 }
 0xc94   : > { %p24_p8 = scmp.ge.s32.totalorder %s27_s19, 6   ;;  %s11486_s10 = smov %s7688_s11 }
 0xc95   : > { %s11487_s11 = smov %s8001_s20  ;;  %s11488_s12 = smov %s7696_s13 }
 0xc96   : > { %s11489_s13 = smov %s7700_s14  ;;  %s11490_s14 = smov %s7998_s28 }
 0xc97   : > { %s11491_s15 = smov %s7712_s17  ;;  %s11492_s16 = smov %s7716_s18 }
 0xc98   : > { %s11493_s17 = smov %s11496_s27  ;;  %s11494_s18 = smov %s11500_s29 }
 0xc99   :  { %26 = sbr.rel (!%p24_p8) target bundleno = 20 (0x14), region = 132 }
 0xca0   :  { %5743 = vsyncpa [#allocation6], 1 }
 0xca1   :  { %5745 = vsyncpa [#allocation6 + $0x1], 1 }
 0xca2   :  { %5746 = vsyncpa [#allocation9], 1 }
 0xca3   :  { %5747 = vsyncpa [#allocation12], 1 }
 0xca4   :  { %5748 = vsyncpa [#allocation7], 1 }
 0xca5   :  { %5750 = vsyncpa [#allocation7 + $0x1], 1 }

</bundles_post_ra>
